<compile_context>
chip_gen: v5e
topology: v5e:2x2
jax: 0.10.0
libtpu: 0.0.40
codegen_flags: <defaults>
</compile_context>

<pallas_src>
import functools

import jax
import jax.numpy as jnp
from jax.experimental import pallas as pl
from jax.experimental.pallas import tpu as pltpu


# ----------------------------------------------------------------------------------
# Tiling helpers
# ----------------------------------------------------------------------------------

TM_PREF, TN_PREF, TK_PREF = 512, 256, 512   # GEMM tile preferences (~4.5 MiB working set)
TE_PREF = 1024                              # elementwise row-tile preference


def _round_up(x, m):
    return ((x + m - 1) // m) * m


def _choose_tile(dim, pref, align):
    """Largest reasonable tile <= pref, aligned; full (padded) extent if it fits."""
    padded = _round_up(max(dim, 1), align)
    if padded <= pref:
        return padded
    nb = -(-padded // pref)
    return _round_up(-(-padded // nb), align)


def _apply_act(y, act):
    if act == "relu":
        return jnp.maximum(y, 0.0)
    if act == "tanh":
        return jnp.tanh(y)
    return y


# ----------------------------------------------------------------------------------
# Pallas kernels
# ----------------------------------------------------------------------------------

def _gemm_act_kernel(a_ref, b_ref, bias_ref, o_ref, acc_ref, *, act):
    """Tiled matmul with fused bias (+ optional activation) epilogue."""
    k = pl.program_id(2)

    @pl.when(k == 0)
    def _():
        acc_ref[...] = jnp.zeros_like(acc_ref)

    acc_ref[...] += jnp.dot(a_ref[...], b_ref[...],
                            preferred_element_type=jnp.float32)

    @pl.when(k == pl.num_programs(2) - 1)
    def _():
        y = acc_ref[...] + bias_ref[...]
        o_ref[...] = _apply_act(y, act).astype(o_ref.dtype)


def _gemm_stats_kernel(a_ref, b_ref, bias_ref, o_ref, sum_ref, sq_ref, acc_ref):
    """Tiled matmul with fused bias + per-tile BatchNorm partial statistics."""
    k = pl.program_id(2)

    @pl.when(k == 0)
    def _():
        acc_ref[...] = jnp.zeros_like(acc_ref)

    acc_ref[...] += jnp.dot(a_ref[...], b_ref[...],
                            preferred_element_type=jnp.float32)

    @pl.when(k == pl.num_programs(2) - 1)
    def _():
        y = acc_ref[...] + bias_ref[...]
        o_ref[...] = y.astype(o_ref.dtype)
        cs = jnp.sum(y, axis=0, keepdims=True)        # (1, tn)
        cq = jnp.sum(y * y, axis=0, keepdims=True)
        sum_ref[...] = jnp.broadcast_to(cs, sum_ref.shape)
        sq_ref[...] = jnp.broadcast_to(cq, sq_ref.shape)


def _affine_kernel(x_ref, s_ref, t_ref, o_ref, *, act):
    y = x_ref[...].astype(jnp.float32) * s_ref[...] + t_ref[...]
    o_ref[...] = _apply_act(y, act).astype(o_ref.dtype)


def _affine_res_kernel(x_ref, s_ref, t_ref, r_ref, o_ref, *, act):
    y = x_ref[...].astype(jnp.float32) * s_ref[...] + t_ref[...]
    y = _apply_act(y, act) + r_ref[...].astype(jnp.float32)
    o_ref[...] = y.astype(o_ref.dtype)


# ----------------------------------------------------------------------------------
# GEMM wrapper (bf16 operands, f32 accumulation, fused bias / stats / act)
# ----------------------------------------------------------------------------------

def gemm_bias(a, b, bias, *, act=None, with_stats=False, out_dtype=jnp.float32):
    """(M,K) @ (K,N) + bias[N].
    with_stats=False: returns act(out) as (M,N).
    with_stats=True : returns (out (M,N), col_sum (N,), col_sumsq (N,)) of out."""
    M, K = a.shape
    K2, N = b.shape
    assert K == K2
    tm = _choose_tile(M, TM_PREF, 128)
    tn = _choose_tile(N, TN_PREF, 128)
    tk = _choose_tile(K, TK_PREF, 128)
    Mp, Kp, Np = _round_up(M, tm), _round_up(K, tk), _round_up(N, tn)

    a_p = jnp.pad(a, ((0, Mp - M), (0, Kp - K))).astype(jnp.bfloat16)
    b_p = jnp.pad(b, ((0, Kp - K), (0, Np - N))).astype(jnp.bfloat16)
    bias32 = bias.astype(jnp.float32)
    bias_p = jnp.pad(bias32, (0, Np - N)).reshape(1, Np)

    grid = (Mp // tm, Np // tn, Kp // tk)
    in_specs = [
        pl.BlockSpec((tm, tk), lambda i, j, k: (i, k)),
        pl.BlockSpec((tk, tn), lambda i, j, k: (k, j)),
        pl.BlockSpec((1, tn), lambda i, j, k: (0, j)),
    ]
    cparams = pltpu.CompilerParams(
        dimension_semantics=("parallel", "parallel", "arbitrary"),
        vmem_limit_bytes=64 * 1024 * 1024)

    if with_stats:
        gm = Mp // tm
        out, ps, pq = pl.pallas_call(
            _gemm_stats_kernel,
            out_shape=(jax.ShapeDtypeStruct((Mp, Np), out_dtype),
                       jax.ShapeDtypeStruct((8 * gm, Np), jnp.float32),
                       jax.ShapeDtypeStruct((8 * gm, Np), jnp.float32)),
            grid_spec=pltpu.PrefetchScalarGridSpec(
                num_scalar_prefetch=0,
                grid=grid,
                in_specs=in_specs,
                out_specs=(pl.BlockSpec((tm, tn), lambda i, j, k: (i, j)),
                           pl.BlockSpec((8, tn), lambda i, j, k: (i, j)),
                           pl.BlockSpec((8, tn), lambda i, j, k: (i, j))),
                scratch_shapes=[pltpu.VMEM((tm, tn), jnp.float32)]),
            compiler_params=cparams,
        )(a_p, b_p, bias_p)
        # Padded M rows contribute exactly `bias` per row (acc == 0 there): correct it.
        npad = Mp - M
        s = ps[::8, :N].sum(axis=0) - npad * bias32
        q = pq[::8, :N].sum(axis=0) - npad * (bias32 * bias32)
        return out[:M, :N], s, q

    out = pl.pallas_call(
        functools.partial(_gemm_act_kernel, act=act),
        out_shape=jax.ShapeDtypeStruct((Mp, Np), out_dtype),
        grid_spec=pltpu.PrefetchScalarGridSpec(
            num_scalar_prefetch=0,
            grid=grid,
            in_specs=in_specs,
            out_specs=pl.BlockSpec((tm, tn), lambda i, j, k: (i, j)),
            scratch_shapes=[pltpu.VMEM((tm, tn), jnp.float32)]),
        compiler_params=cparams,
    )(a_p, b_p, bias_p)
    return out[:M, :N]


# ----------------------------------------------------------------------------------
# Fused BN-affine + activation + residual (single elementwise pass, lane-packed)
# ----------------------------------------------------------------------------------

def affine_act(x, scale, shift, act=None, residual=None, out_dtype=jnp.bfloat16):
    """y = act(x * scale[c] + shift[c]) (+ residual).  x: (..., C)."""
    shp = x.shape
    C = shp[-1]
    x2 = x.reshape(-1, C)
    M = x2.shape[0]

    # Lane packing: fold g rows into the lane dim when C is small (avoids >90% lane waste).
    g = 1
    if C < 128 and 128 % C == 0 and M % (128 // C) == 0:
        g = 128 // C
    Mg, Cg = M // g, C * g
    x2 = x2.reshape(Mg, Cg)
    s = jnp.tile(scale.astype(jnp.float32), g)
    t = jnp.tile(shift.astype(jnp.float32), g)

    Cp = _round_up(Cg, 128)
    te = _choose_tile(Mg, TE_PREF, 16)
    Mp = _round_up(Mg, te)

    xp = jnp.pad(x2, ((0, Mp - Mg), (0, Cp - Cg)))
    sp = jnp.pad(s, (0, Cp - Cg)).reshape(1, Cp)
    tp = jnp.pad(t, (0, Cp - Cg)).reshape(1, Cp)

    in_specs = [pl.BlockSpec((te, Cp), lambda i: (i, 0)),
                pl.BlockSpec((1, Cp), lambda i: (0, 0)),
                pl.BlockSpec((1, Cp), lambda i: (0, 0))]
    args = [xp, sp, tp]
    if residual is not None:
        r2 = residual.reshape(-1, C).reshape(Mg, Cg)
        rp = jnp.pad(r2, ((0, Mp - Mg), (0, Cp - Cg)))
        in_specs.append(pl.BlockSpec((te, Cp), lambda i: (i, 0)))
        args.append(rp)
        kern = functools.partial(_affine_res_kernel, act=act)
    else:
        kern = functools.partial(_affine_kernel, act=act)

    out = pl.pallas_call(
        kern,
        out_shape=jax.ShapeDtypeStruct((Mp, Cp), out_dtype),
        grid=(Mp // te,),
        in_specs=in_specs,
        out_specs=pl.BlockSpec((te, Cp), lambda i: (i, 0)),
        compiler_params=pltpu.CompilerParams(dimension_semantics=("parallel",)),
    )(*args)
    return out[:Mg, :Cg].reshape(M, C).reshape(shp)


# ----------------------------------------------------------------------------------
# Conv / norm / pool building blocks (im2col glue in JAX, GEMM in Pallas)
# ----------------------------------------------------------------------------------

def extract_patches(x, kh, kw, stride):
    """x: (N, H, W, C) (already padded).  Returns (N, Ho, Wo, kh*kw*C), Ho, Wo.
    Patch channel order is (ki, kj, c).
    # TODO(synk): patches are materialized by XLA (k^2 HBM amplification); a
    # halo-tiled Pallas conv with overlapping-window DMA would avoid this."""
    N, H, W, C = x.shape
    Ho = (H - kh) // stride + 1
    Wo = (W - kw) // stride + 1
    cols = []
    for i in range(kh):
        for j in range(kw):
            cols.append(x[:, i:i + (Ho - 1) * stride + 1:stride,
                          j:j + (Wo - 1) * stride + 1:stride, :])
    return jnp.concatenate(cols, axis=-1), Ho, Wo


def conv2d(x, w, b, stride=1, pad=0, pad_mode="zero", act=None,
           with_stats=False, out_dtype=jnp.float32):
    """x: NHWC.  w: torch Conv2d layout (Cout, Cin, kh, kw).  b: (Cout,).
    with_stats=True -> returns (y_bf16, col_sum, col_sumsq, count) for fused BN."""
    cout, cin, kh, kw = w.shape
    x = x.astype(jnp.bfloat16)      # build patches directly in bf16 (halves glue traffic)
    if pad > 0:
        mode = "reflect" if pad_mode == "reflect" else "constant"
        x = jnp.pad(x, ((0, 0), (pad, pad), (pad, pad), (0, 0)), mode=mode)
    patches, Ho, Wo = extract_patches(x, kh, kw, stride)
    Nb = x.shape[0]
    A = patches.reshape(Nb * Ho * Wo, kh * kw * cin)
    W2 = jnp.transpose(w, (2, 3, 1, 0)).reshape(kh * kw * cin, cout)
    if with_stats:
        y, s, q = gemm_bias(A, W2, b, with_stats=True, out_dtype=jnp.bfloat16)
        return y.reshape(Nb, Ho, Wo, cout), s, q, A.shape[0]
    y = gemm_bias(A, W2, b, act=act, out_dtype=out_dtype)
    return y.reshape(Nb, Ho, Wo, cout)


def bn_affine_from_sums(s, q, count, gamma, beta, eps=1e-5):
    """Training-mode BatchNorm2d (batch statistics, biased variance) -> scale/shift."""
    mean = s / count
    var = jnp.maximum(q / count - mean * mean, 0.0)
    scale = gamma * jax.lax.rsqrt(var + eps)
    shift = beta - mean * scale
    return scale, shift


def conv_bn_act(x, cp, bnp, *, stride=1, pad=0, pad_mode="zero", act="relu",
                residual=None, eps=1e-5):
    """Conv -> BatchNorm (batch stats, fused into GEMM epilogue) -> act (+ residual)."""
    y, s, q, cnt = conv2d(x, cp["w"], cp["b"], stride=stride, pad=pad,
                          pad_mode=pad_mode, with_stats=True)
    sc, sh = bn_affine_from_sums(s, q, cnt, bnp["g"], bnp["be"], eps)
    return affine_act(y, sc, sh, act=act, residual=residual)


def conv_transpose2d(x, w, b):
    """ConvTranspose2d(kernel=5, stride=2, padding=2, output_padding=1) via sub-pixel
    decomposition (4 dense sub-convs on the undilated input, then interleave).
    x: NHWC.  w: torch ConvTranspose2d layout (Cin, Cout, kh, kw).
    Returns (y (N,2H,2W,Cout) bf16, col_sum, col_sumsq, count) for fused BN."""
    cin, cout, kh, kw = w.shape
    assert kh == 5 and kw == 5, "sub-pixel decomposition assumes k=5, s=2, p=2, op=1"
    N, H, W, _ = x.shape
    xp = jnp.pad(x, ((0, 0), (1, 1), (1, 1), (0, 0)))
    tap_idx = {0: (4, 2, 0), 1: (3, 1)}

    ys = {}
    s_tot = jnp.zeros((cout,), jnp.float32)
    q_tot = jnp.zeros((cout,), jnp.float32)
    cnt = 0
    for a in (0, 1):
        for bb in (0, 1):
            ri = jnp.array(tap_idx[a], dtype=jnp.int32)
            ci = jnp.array(tap_idx[bb], dtype=jnp.int32)
            sub = jnp.take(w, ri, axis=2)
            sub = jnp.take(sub, ci, axis=3)                  # (Cin, Cout, ka, kb)
            sub = jnp.transpose(sub, (1, 0, 2, 3))           # (Cout, Cin, ka, kb)
            xin = xp[:, a:, bb:, :]
            y, s, q, c = conv2d(xin, sub, b, with_stats=True)
            ys[(a, bb)] = y
            s_tot = s_tot + s
            q_tot = q_tot + q
            cnt += c
    # Interleave: out[:, 2h+a, 2w+b, :] = ys[(a, b)][:, h, w, :]
    top = jnp.stack([ys[(0, 0)], ys[(0, 1)]], axis=3)        # (N,H,W,2,Cout)
    bot = jnp.stack([ys[(1, 0)], ys[(1, 1)]], axis=3)
    yy = jnp.stack([top, bot], axis=2)                        # (N,H,2,W,2,Cout)
    out = yy.reshape(N, 2 * H, 2 * W, cout)
    return out, s_tot, q_tot, cnt


def convT_bn_relu(x, w, b, bnp, eps=1e-5):
    y, s, q, cnt = conv_transpose2d(x, w, b)
    sc, sh = bn_affine_from_sums(s, q, cnt, bnp["g"], bnp["be"], eps)
    return affine_act(y, sc, sh, act="relu")


def avgpool3_s2(x):
    """AvgPool2d(3, stride=2, padding=1, count_include_pad=False).  Tiny op: JAX glue."""
    N, H, W, C = x.shape
    xp = jnp.pad(x, ((0, 0), (1, 1), (1, 1), (0, 0)))
    ones = jnp.pad(jnp.ones((1, H, W, 1), x.dtype), ((0, 0), (1, 1), (1, 1), (0, 0)))
    patches, Ho, Wo = extract_patches(xp, 3, 3, 2)
    cnts, _, _ = extract_patches(ones, 3, 3, 2)
    s = patches.reshape(N, Ho, Wo, 9, C).sum(axis=3)
    c = cnts.reshape(1, Ho, Wo, 9, 1).sum(axis=3)
    return s / c


def resnet_block(x, p):
    y = conv_bn_act(x, p["conv1"], p["bn1"], pad=1, pad_mode="reflect", act="relu")
    # second conv: BN (no act), residual add fused into the affine epilogue
    y = conv_bn_act(y, p["conv2"], p["bn2"], pad=1, pad_mode="reflect",
                    act=None, residual=x)
    return y


# ----------------------------------------------------------------------------------
# Deterministic parameter construction (mirrors LocalEnhancer.__init__)
# ----------------------------------------------------------------------------------

class Init:
    def __init__(self, key):
        self.key = key
        self.i = 0

    def _next(self):
        self.i += 1
        return jax.random.fold_in(self.key, self.i)

    def conv(self, cout, cin, k):
        return {"w": 0.02 * jax.random.normal(self._next(), (cout, cin, k, k), jnp.float32),
                "b": 0.02 * jax.random.normal(self._next(), (cout,), jnp.float32)}

    def convT(self, cin, cout, k):
        return {"w": 0.02 * jax.random.normal(self._next(), (cin, cout, k, k), jnp.float32),
                "b": 0.02 * jax.random.normal(self._next(), (cout,), jnp.float32)}

    def bn(self, c):
        return {"g": 1.0 + 0.02 * jax.random.normal(self._next(), (c,), jnp.float32),
                "be": 0.02 * jax.random.normal(self._next(), (c,), jnp.float32)}

    def resblock(self, dim):
        return {"conv1": self.conv(dim, dim, 3), "bn1": self.bn(dim),
                "conv2": self.conv(dim, dim, 3), "bn2": self.bn(dim)}


def build_params(key, input_nc, output_nc, ngf, n_down_g, n_blocks_g,
                 n_local, n_blocks_local):
    init = Init(key)
    ngf_g = ngf * 2 ** n_local

    g = {"conv0": init.conv(ngf_g, input_nc, 7), "bn0": init.bn(ngf_g),
         "down": [], "blocks": [], "up": []}
    for i in range(n_down_g):
        mult = 2 ** i
        g["down"].append({"conv": init.conv(ngf_g * mult * 2, ngf_g * mult, 5),
                          "bn": init.bn(ngf_g * mult * 2)})
    mult = 2 ** n_down_g
    for _ in range(n_blocks_g):
        g["blocks"].append(init.resblock(ngf_g * mult))
    for i in range(n_down_g):
        mult = 2 ** (n_down_g - i)
        g["up"].append({"convT": init.convT(ngf_g * mult, ngf_g * mult // 2, 5),
                        "bn": init.bn(ngf_g * mult // 2)})
    # (GlobalGenerator's trailing [ReflPad, Conv7, Tanh] are dropped by LocalEnhancer.)

    local = []
    for n in range(1, n_local + 1):
        ngf_l = ngf * 2 ** (n_local - n)
        down = {"conv0": init.conv(ngf_l, input_nc, 7), "bn0": init.bn(ngf_l),
                "conv1": init.conv(ngf_l * 2, ngf_l, 5), "bn1": init.bn(ngf_l * 2)}
        up = {"blocks": [init.resblock(ngf_l * 2) for _ in range(n_blocks_local)],
              "convT": init.convT(ngf_l * 2, ngf_l, 5), "bnT": init.bn(ngf_l),
              "final": init.conv(output_nc, ngf, 7) if n == n_local else None}
        local.append({"down": down, "up": up})

    return {"global": g, "local": local}


# ----------------------------------------------------------------------------------
# LocalEnhancer forward
# ----------------------------------------------------------------------------------

def local_enhancer_forward(x_nchw, P, n_local):
    # Note: BatchNorm uses batch statistics (training-mode nn.BatchNorm2d default).
    x = jnp.transpose(x_nchw, (0, 2, 3, 1)).astype(jnp.float32)  # NCHW -> NHWC

    inputs = [x]
    for _ in range(n_local):
        inputs.append(avgpool3_s2(inputs[-1]))

    # ---- global generator (minus its last 3 layers) on coarsest input ----
    g = P["global"]
    y = conv_bn_act(inputs[-1], g["conv0"], g["bn0"], pad=3, pad_mode="reflect", act="relu")
    for d in g["down"]:
        y = conv_bn_act(y, d["conv"], d["bn"], stride=2, pad=2, act="relu")
    for blk in g["blocks"]:
        y = resnet_block(y, blk)
    for u in g["up"]:
        y = convT_bn_relu(y, u["convT"]["w"], u["convT"]["b"], u["bn"])
    output_prev = y

    # ---- local enhancer branches ----
    for n in range(1, n_local + 1):
        lp = P["local"][n - 1]
        xin = inputs[n_local - n]
        d = lp["down"]
        z = conv_bn_act(xin, d["conv0"], d["bn0"], pad=3, pad_mode="reflect", act="relu")
        # "downsample(x) + output_prev" add fused into the BN/ReLU epilogue of conv1
        z = conv_bn_act(z, d["conv1"], d["bn1"], stride=2, pad=2, act="relu",
                        residual=output_prev)

        u = lp["up"]
        for blk in u["blocks"]:
            z = resnet_block(z, blk)
        z = convT_bn_relu(z, u["convT"]["w"], u["convT"]["b"], u["bnT"])
        if u["final"] is not None:
            # ReflectionPad(3) + Conv7 + Tanh, tanh fused into the GEMM epilogue
            z = conv2d(z, u["final"]["w"], u["final"]["b"], pad=3, pad_mode="reflect",
                       act="tanh", out_dtype=jnp.float32)
        output_prev = z

    return jnp.transpose(output_prev.astype(jnp.float32), (0, 3, 1, 2))  # back to NCHW


# ----------------------------------------------------------------------------------

if __name__ == "__main__":
    # Small but structurally faithful configuration.
    INPUT_NC, OUTPUT_NC = 3, 3
    NGF = 8
    N_DOWN_G, N_BLOCKS_G = 2, 2
    N_LOCAL, N_BLOCKS_LOCAL = 1, 2
    B, H, W = 2, 32, 32

    key = jax.random.PRNGKey(0)
    params = build_params(jax.random.fold_in(key, 1), INPUT_NC, OUTPUT_NC, NGF,
                          N_DOWN_G, N_BLOCKS_G, N_LOCAL, N_BLOCKS_LOCAL)
    x = jax.random.normal(jax.random.fold_in(key, 2), (B, INPUT_NC, H, W), jnp.float32)

    fwd = jax.jit(functools.partial(local_enhancer_forward, n_local=N_LOCAL))
    out = fwd(x, params)
    out = jax.block_until_ready(out)
    assert out.shape == (B, OUTPUT_NC, H, W), out.shape
    assert bool(jnp.all(jnp.isfinite(out)))
    print("KERNEL_OK")
</pallas_src>

<mosaic_0001>
module attributes {stable_mosaic.version = 11 : i64} {
  func.func @_gemm_stats_kernel(%arg0: i32, %arg1: i32, %arg2: i32, %arg3: memref<512x256xbf16, #tpu.memory_space<vmem>>, %arg4: memref<256x128xbf16, #tpu.memory_space<vmem>>, %arg5: memref<1x128xf32, #tpu.memory_space<vmem>>, %arg6: memref<512x128xbf16, #tpu.memory_space<vmem>>, %arg7: memref<8x128xf32, #tpu.memory_space<vmem>>, %arg8: memref<8x128xf32, #tpu.memory_space<vmem>>, %arg9: memref<512x128xf32, #tpu.memory_space<vmem>>) attributes {dimension_semantics = [#tpu.dimension_semantics<parallel>, #tpu.dimension_semantics<parallel>, #tpu.dimension_semantics<arbitrary>], iteration_bounds = array<i64: 1, 1, 1>, scalar_prefetch = 0 : i64, scratch_operands = 1 : i64, tpu.core_type = #tpu.core_type<tc>, window_params = [{transform_indices = @transform_0, window_bounds = array<i64: 512, 256>}, {transform_indices = @transform_1, window_bounds = array<i64: 256, 128>}, {transform_indices = @transform_2, window_bounds = array<i64: 1, 128>}, {transform_indices = @transform_3, window_bounds = array<i64: 512, 128>}, {transform_indices = @transform_4, window_bounds = array<i64: 8, 128>}, {transform_indices = @transform_5, window_bounds = array<i64: 8, 128>}]} {
    %c0_i32 = arith.constant 0 : i32
    %0 = arith.cmpi eq, %arg2, %c0_i32 : i32
    %1 = arith.extui %0 : i1 to i32
    %c0_i32_0 = arith.constant 0 : i32
    %2 = arith.cmpi ne, %1, %c0_i32_0 : i32
    scf.if %2 {
      %cst_10 = arith.constant 0.000000e+00 : f32
      %12 = vector.broadcast %cst_10 : f32 to vector<512x128xf32>
      %c0_11 = arith.constant 0 : index
      %c0_12 = arith.constant 0 : index
      %13 = vector.load %arg9[%c0_11, %c0_12] : memref<512x128xf32, #tpu.memory_space<vmem>>, vector<512x128xf32>
      tpu.vector_store %arg9[%c0_11, %c0_12], %12 {strides = array<i32>} : memref<512x128xf32, #tpu.memory_space<vmem>>, vector<512x128xf32>,
    } else {
    }
    %c0 = arith.constant 0 : index
    %c0_1 = arith.constant 0 : index
    %3 = vector.load %arg9[%c0, %c0_1] : memref<512x128xf32, #tpu.memory_space<vmem>>, vector<512x128xf32>
    %c0_2 = arith.constant 0 : index
    %c0_3 = arith.constant 0 : index
    %4 = vector.load %arg3[%c0_2, %c0_3] : memref<512x256xbf16, #tpu.memory_space<vmem>>, vector<512x256xbf16>
    %c0_4 = arith.constant 0 : index
    %c0_5 = arith.constant 0 : index
    %5 = vector.load %arg4[%c0_4, %c0_5] : memref<256x128xbf16, #tpu.memory_space<vmem>>, vector<256x128xbf16>
    %cst = arith.constant dense<0.000000e+00> : vector<512x128xf32>
    %6 = tpu.matmul %4, %5, %cst {dimension_numbers = #tpu.dot_dimension_numbers<[1], [0], [0], [1], [0, 0, 1, 1], [], []>} : vector<512x256xbf16>, vector<256x128xbf16>, vector<512x128xf32> -> vector<512x128xf32>
    %7 = arith.addf %3, %6 : vector<512x128xf32>
    %c0_6 = arith.constant 0 : index
    %c0_7 = arith.constant 0 : index
    %8 = vector.load %arg9[%c0_6, %c0_7] : memref<512x128xf32, #tpu.memory_space<vmem>>, vector<512x128xf32>
    tpu.vector_store %arg9[%c0_6, %c0_7], %7 {strides = array<i32>} : memref<512x128xf32, #tpu.memory_space<vmem>>, vector<512x128xf32>,
    %c0_i32_8 = arith.constant 0 : i32
    %9 = arith.cmpi eq, %arg2, %c0_i32_8 : i32
    %10 = arith.extui %9 : i1 to i32
    %c0_i32_9 = arith.constant 0 : i32
    %11 = arith.cmpi ne, %10, %c0_i32_9 : i32
    scf.if %11 {
      %c0_10 = arith.constant 0 : index
      %c0_11 = arith.constant 0 : index
      %12 = vector.load %arg9[%c0_10, %c0_11] : memref<512x128xf32, #tpu.memory_space<vmem>>, vector<512x128xf32>
      %c0_12 = arith.constant 0 : index
      %c0_13 = arith.constant 0 : index
      %13 = vector.load %arg5[%c0_12, %c0_13] : memref<1x128xf32, #tpu.memory_space<vmem>>, vector<1x128xf32>
      %14 = vector.broadcast %13 : vector<1x128xf32> to vector<512x128xf32>
      %15 = arith.addf %12, %14 : vector<512x128xf32>
      %16 = arith.truncf %15 : vector<512x128xf32> to vector<512x128xbf16>
      %c0_14 = arith.constant 0 : index
      %c0_15 = arith.constant 0 : index
      %17 = vector.load %arg6[%c0_14, %c0_15] : memref<512x128xbf16, #tpu.memory_space<vmem>>, vector<512x128xbf16>
      tpu.vector_store %arg6[%c0_14, %c0_15], %16 {strides = array<i32>} : memref<512x128xbf16, #tpu.memory_space<vmem>>, vector<512x128xbf16>,
      %cst_16 = arith.constant dense<0.000000e+00> : vector<128xf32>
      %18 = vector.multi_reduction <add>, %15, %cst_16 [0] : vector<512x128xf32> to vector<128xf32>
      %19 = vector.shape_cast %18 : vector<128xf32> to vector<1x128xf32>
      %20 = arith.mulf %15, %15 : vector<512x128xf32>
      %cst_17 = arith.constant dense<0.000000e+00> : vector<128xf32>
      %21 = vector.multi_reduction <add>, %20, %cst_17 [0] : vector<512x128xf32> to vector<128xf32>
      %22 = vector.shape_cast %21 : vector<128xf32> to vector<1x128xf32>
      %23 = vector.shape_cast %19 : vector<1x128xf32> to vector<1x128xf32>
      %24 = vector.broadcast %23 : vector<1x128xf32> to vector<8x128xf32>
      %c0_18 = arith.constant 0 : index
      %c0_19 = arith.constant 0 : index
      %25 = vector.load %arg7[%c0_18, %c0_19] : memref<8x128xf32, #tpu.memory_space<vmem>>, vector<8x128xf32>
      tpu.vector_store %arg7[%c0_18, %c0_19], %24 {strides = array<i32>} : memref<8x128xf32, #tpu.memory_space<vmem>>, vector<8x128xf32>,
      %26 = vector.shape_cast %22 : vector<1x128xf32> to vector<1x128xf32>
      %27 = vector.broadcast %26 : vector<1x128xf32> to vector<8x128xf32>
      %c0_20 = arith.constant 0 : index
      %c0_21 = arith.constant 0 : index
      %28 = vector.load %arg8[%c0_20, %c0_21] : memref<8x128xf32, #tpu.memory_space<vmem>>, vector<8x128xf32>
      tpu.vector_store %arg8[%c0_20, %c0_21], %27 {strides = array<i32>} : memref<8x128xf32, #tpu.memory_space<vmem>>, vector<8x128xf32>,
    } else {
    }
    return
  }
  func.func @transform_0(%arg0: i32, %arg1: i32, %arg2: i32) -> (i32, i32) {
    %c0_i32 = arith.constant 0 : i32
    return %arg0, %arg2 : i32, i32
  }
  func.func @transform_1(%arg0: i32, %arg1: i32, %arg2: i32) -> (i32, i32) {
    %c0_i32 = arith.constant 0 : i32
    return %arg2, %arg1 : i32, i32
  }
  func.func @transform_2(%arg0: i32, %arg1: i32, %arg2: i32) -> (i32, i32) {
    %c0_i32 = arith.constant 0 : i32
    %c0_i32_0 = arith.constant 0 : i32
    return %c0_i32, %arg1 : i32, i32
  }
  func.func @transform_3(%arg0: i32, %arg1: i32, %arg2: i32) -> (i32, i32) {
    %c0_i32 = arith.constant 0 : i32
    return %arg0, %arg1 : i32, i32
  }
  func.func @transform_4(%arg0: i32, %arg1: i32, %arg2: i32) -> (i32, i32) {
    %c0_i32 = arith.constant 0 : i32
    return %arg0, %arg1 : i32, i32
  }
  func.func @transform_5(%arg0: i32, %arg1: i32, %arg2: i32) -> (i32, i32) {
    %c0_i32 = arith.constant 0 : i32
    return %arg0, %arg1 : i32, i32
  }
}

module attributes {stable_mosaic.version = 11 : i64} {
  func.func @_affine_kernel(%arg0: i32, %arg1: memref<64x128xbf16, #tpu.memory_space<vmem>>, %arg2: memref<1x128xf32, #tpu.memory_space<vmem>>, %arg3: memref<1x128xf32, #tpu.memory_space<vmem>>, %arg4: memref<64x128xbf16, #tpu.memory_space<vmem>>) attributes {dimension_semantics = [#tpu.dimension_semantics<parallel>], iteration_bounds = array<i64: 1>, scalar_prefetch = 0 : i64, scratch_operands = 0 : i64, tpu.core_type = #tpu.core_type<tc>, window_params = [{transform_indices = @transform_0, window_bounds = array<i64: 64, 128>}, {pipeline_mode = #tpu.pipeline_mode<synchronous>, transform_indices = @transform_1, window_bounds = array<i64: 1, 128>}, {pipeline_mode = #tpu.pipeline_mode<synchronous>, transform_indices = @transform_2, window_bounds = array<i64: 1, 128>}, {transform_indices = @transform_3, window_bounds = array<i64: 64, 128>}]} {
    %c0 = arith.constant 0 : index
    %c0_0 = arith.constant 0 : index
    %0 = vector.load %arg1[%c0, %c0_0] : memref<64x128xbf16, #tpu.memory_space<vmem>>, vector<64x128xbf16>
    %1 = arith.extf %0 : vector<64x128xbf16> to vector<64x128xf32>
    %c0_1 = arith.constant 0 : index
    %c0_2 = arith.constant 0 : index
    %2 = vector.load %arg2[%c0_1, %c0_2] : memref<1x128xf32, #tpu.memory_space<vmem>>, vector<1x128xf32>
    %3 = vector.broadcast %2 : vector<1x128xf32> to vector<64x128xf32>
    %4 = arith.mulf %1, %3 : vector<64x128xf32>
    %c0_3 = arith.constant 0 : index
    %c0_4 = arith.constant 0 : index
    %5 = vector.load %arg3[%c0_3, %c0_4] : memref<1x128xf32, #tpu.memory_space<vmem>>, vector<1x128xf32>
    %6 = vector.broadcast %5 : vector<1x128xf32> to vector<64x128xf32>
    %7 = arith.addf %4, %6 : vector<64x128xf32>
    %cst = arith.constant 0.000000e+00 : f32
    %8 = vector.broadcast %cst : f32 to vector<64x128xf32>
    %9 = arith.maximumf %7, %8 : vector<64x128xf32>
    %10 = arith.truncf %9 : vector<64x128xf32> to vector<64x128xbf16>
    %c0_5 = arith.constant 0 : index
    %c0_6 = arith.constant 0 : index
    %11 = vector.load %arg4[%c0_5, %c0_6] : memref<64x128xbf16, #tpu.memory_space<vmem>>, vector<64x128xbf16>
    tpu.vector_store %arg4[%c0_5, %c0_6], %10 {strides = array<i32>} : memref<64x128xbf16, #tpu.memory_space<vmem>>, vector<64x128xbf16>,
    return
  }
  func.func @transform_0(%arg0: i32) -> (i32, i32) {
    %c0_i32 = arith.constant 0 : i32
    %c0_i32_0 = arith.constant 0 : i32
    return %arg0, %c0_i32 : i32, i32
  }
  func.func @transform_1(%arg0: i32) -> (i32, i32) {
    %c0_i32 = arith.constant 0 : i32
    %c0_i32_0 = arith.constant 0 : i32
    %c0_i32_1 = arith.constant 0 : i32
    return %c0_i32, %c0_i32_0 : i32, i32
  }
  func.func @transform_2(%arg0: i32) -> (i32, i32) {
    %c0_i32 = arith.constant 0 : i32
    %c0_i32_0 = arith.constant 0 : i32
    %c0_i32_1 = arith.constant 0 : i32
    return %c0_i32, %c0_i32_0 : i32, i32
  }
  func.func @transform_3(%arg0: i32) -> (i32, i32) {
    %c0_i32 = arith.constant 0 : i32
    %c0_i32_0 = arith.constant 0 : i32
    return %arg0, %c0_i32 : i32, i32
  }
}

module attributes {stable_mosaic.version = 11 : i64} {
  func.func @_gemm_stats_kernel(%arg0: i32, %arg1: i32, %arg2: i32, %arg3: memref<128x512xbf16, #tpu.memory_space<vmem>>, %arg4: memref<512x128xbf16, #tpu.memory_space<vmem>>, %arg5: memref<1x128xf32, #tpu.memory_space<vmem>>, %arg6: memref<128x128xbf16, #tpu.memory_space<vmem>>, %arg7: memref<8x128xf32, #tpu.memory_space<vmem>>, %arg8: memref<8x128xf32, #tpu.memory_space<vmem>>, %arg9: memref<128x128xf32, #tpu.memory_space<vmem>>) attributes {dimension_semantics = [#tpu.dimension_semantics<parallel>, #tpu.dimension_semantics<parallel>, #tpu.dimension_semantics<arbitrary>], iteration_bounds = array<i64: 1, 1, 1>, scalar_prefetch = 0 : i64, scratch_operands = 1 : i64, tpu.core_type = #tpu.core_type<tc>, window_params = [{transform_indices = @transform_0, window_bounds = array<i64: 128, 512>}, {transform_indices = @transform_1, window_bounds = array<i64: 512, 128>}, {transform_indices = @transform_2, window_bounds = array<i64: 1, 128>}, {transform_indices = @transform_3, window_bounds = array<i64: 128, 128>}, {transform_indices = @transform_4, window_bounds = array<i64: 8, 128>}, {transform_indices = @transform_5, window_bounds = array<i64: 8, 128>}]} {
    %c0_i32 = arith.constant 0 : i32
    %0 = arith.cmpi eq, %arg2, %c0_i32 : i32
    %1 = arith.extui %0 : i1 to i32
    %c0_i32_0 = arith.constant 0 : i32
    %2 = arith.cmpi ne, %1, %c0_i32_0 : i32
    scf.if %2 {
      %cst_10 = arith.constant 0.000000e+00 : f32
      %12 = vector.broadcast %cst_10 : f32 to vector<128x128xf32>
      %c0_11 = arith.constant 0 : index
      %c0_12 = arith.constant 0 : index
      %13 = vector.load %arg9[%c0_11, %c0_12] : memref<128x128xf32, #tpu.memory_space<vmem>>, vector<128x128xf32>
      tpu.vector_store %arg9[%c0_11, %c0_12], %12 {strides = array<i32>} : memref<128x128xf32, #tpu.memory_space<vmem>>, vector<128x128xf32>,
    } else {
    }
    %c0 = arith.constant 0 : index
    %c0_1 = arith.constant 0 : index
    %3 = vector.load %arg9[%c0, %c0_1] : memref<128x128xf32, #tpu.memory_space<vmem>>, vector<128x128xf32>
    %c0_2 = arith.constant 0 : index
    %c0_3 = arith.constant 0 : index
    %4 = vector.load %arg3[%c0_2, %c0_3] : memref<128x512xbf16, #tpu.memory_space<vmem>>, vector<128x512xbf16>
    %c0_4 = arith.constant 0 : index
    %c0_5 = arith.constant 0 : index
    %5 = vector.load %arg4[%c0_4, %c0_5] : memref<512x128xbf16, #tpu.memory_space<vmem>>, vector<512x128xbf16>
    %cst = arith.constant dense<0.000000e+00> : vector<128x128xf32>
    %6 = tpu.matmul %4, %5, %cst {dimension_numbers = #tpu.dot_dimension_numbers<[1], [0], [0], [1], [0, 0, 1, 1], [], []>} : vector<128x512xbf16>, vector<512x128xbf16>, vector<128x128xf32> -> vector<128x128xf32>
    %7 = arith.addf %3, %6 : vector<128x128xf32>
    %c0_6 = arith.constant 0 : index
    %c0_7 = arith.constant 0 : index
    %8 = vector.load %arg9[%c0_6, %c0_7] : memref<128x128xf32, #tpu.memory_space<vmem>>, vector<128x128xf32>
    tpu.vector_store %arg9[%c0_6, %c0_7], %7 {strides = array<i32>} : memref<128x128xf32, #tpu.memory_space<vmem>>, vector<128x128xf32>,
    %c0_i32_8 = arith.constant 0 : i32
    %9 = arith.cmpi eq, %arg2, %c0_i32_8 : i32
    %10 = arith.extui %9 : i1 to i32
    %c0_i32_9 = arith.constant 0 : i32
    %11 = arith.cmpi ne, %10, %c0_i32_9 : i32
    scf.if %11 {
      %c0_10 = arith.constant 0 : index
      %c0_11 = arith.constant 0 : index
      %12 = vector.load %arg9[%c0_10, %c0_11] : memref<128x128xf32, #tpu.memory_space<vmem>>, vector<128x128xf32>
      %c0_12 = arith.constant 0 : index
      %c0_13 = arith.constant 0 : index
      %13 = vector.load %arg5[%c0_12, %c0_13] : memref<1x128xf32, #tpu.memory_space<vmem>>, vector<1x128xf32>
      %14 = vector.broadcast %13 : vector<1x128xf32> to vector<128x128xf32>
      %15 = arith.addf %12, %14 : vector<128x128xf32>
      %16 = arith.truncf %15 : vector<128x128xf32> to vector<128x128xbf16>
      %c0_14 = arith.constant 0 : index
      %c0_15 = arith.constant 0 : index
      %17 = vector.load %arg6[%c0_14, %c0_15] : memref<128x128xbf16, #tpu.memory_space<vmem>>, vector<128x128xbf16>
      tpu.vector_store %arg6[%c0_14, %c0_15], %16 {strides = array<i32>} : memref<128x128xbf16, #tpu.memory_space<vmem>>, vector<128x128xbf16>,
      %cst_16 = arith.constant dense<0.000000e+00> : vector<128xf32>
      %18 = vector.multi_reduction <add>, %15, %cst_16 [0] : vector<128x128xf32> to vector<128xf32>
      %19 = vector.shape_cast %18 : vector<128xf32> to vector<1x128xf32>
      %20 = arith.mulf %15, %15 : vector<128x128xf32>
      %cst_17 = arith.constant dense<0.000000e+00> : vector<128xf32>
      %21 = vector.multi_reduction <add>, %20, %cst_17 [0] : vector<128x128xf32> to vector<128xf32>
      %22 = vector.shape_cast %21 : vector<128xf32> to vector<1x128xf32>
      %23 = vector.shape_cast %19 : vector<1x128xf32> to vector<1x128xf32>
      %24 = vector.broadcast %23 : vector<1x128xf32> to vector<8x128xf32>
      %c0_18 = arith.constant 0 : index
      %c0_19 = arith.constant 0 : index
      %25 = vector.load %arg7[%c0_18, %c0_19] : memref<8x128xf32, #tpu.memory_space<vmem>>, vector<8x128xf32>
      tpu.vector_store %arg7[%c0_18, %c0_19], %24 {strides = array<i32>} : memref<8x128xf32, #tpu.memory_space<vmem>>, vector<8x128xf32>,
      %26 = vector.shape_cast %22 : vector<1x128xf32> to vector<1x128xf32>
      %27 = vector.broadcast %26 : vector<1x128xf32> to vector<8x128xf32>
      %c0_20 = arith.constant 0 : index
      %c0_21 = arith.constant 0 : index
      %28 = vector.load %arg8[%c0_20, %c0_21] : memref<8x128xf32, #tpu.memory_space<vmem>>, vector<8x128xf32>
      tpu.vector_store %arg8[%c0_20, %c0_21], %27 {strides = array<i32>} : memref<8x128xf32, #tpu.memory_space<vmem>>, vector<8x128xf32>,
    } else {
    }
    return
  }
  func.func @transform_0(%arg0: i32, %arg1: i32, %arg2: i32) -> (i32, i32) {
    %c0_i32 = arith.constant 0 : i32
    return %arg0, %arg2 : i32, i32
  }
  func.func @transform_1(%arg0: i32, %arg1: i32, %arg2: i32) -> (i32, i32) {
    %c0_i32 = arith.constant 0 : i32
    return %arg2, %arg1 : i32, i32
  }
  func.func @transform_2(%arg0: i32, %arg1: i32, %arg2: i32) -> (i32, i32) {
    %c0_i32 = arith.constant 0 : i32
    %c0_i32_0 = arith.constant 0 : i32
    return %c0_i32, %arg1 : i32, i32
  }
  func.func @transform_3(%arg0: i32, %arg1: i32, %arg2: i32) -> (i32, i32) {
    %c0_i32 = arith.constant 0 : i32
    return %arg0, %arg1 : i32, i32
  }
  func.func @transform_4(%arg0: i32, %arg1: i32, %arg2: i32) -> (i32, i32) {
    %c0_i32 = arith.constant 0 : i32
    return %arg0, %arg1 : i32, i32
  }
  func.func @transform_5(%arg0: i32, %arg1: i32, %arg2: i32) -> (i32, i32) {
    %c0_i32 = arith.constant 0 : i32
    return %arg0, %arg1 : i32, i32
  }
}

module attributes {stable_mosaic.version = 11 : i64} {
  func.func @_affine_kernel(%arg0: i32, %arg1: memref<32x128xbf16, #tpu.memory_space<vmem>>, %arg2: memref<1x128xf32, #tpu.memory_space<vmem>>, %arg3: memref<1x128xf32, #tpu.memory_space<vmem>>, %arg4: memref<32x128xbf16, #tpu.memory_space<vmem>>) attributes {dimension_semantics = [#tpu.dimension_semantics<parallel>], iteration_bounds = array<i64: 1>, scalar_prefetch = 0 : i64, scratch_operands = 0 : i64, tpu.core_type = #tpu.core_type<tc>, window_params = [{transform_indices = @transform_0, window_bounds = array<i64: 32, 128>}, {pipeline_mode = #tpu.pipeline_mode<synchronous>, transform_indices = @transform_1, window_bounds = array<i64: 1, 128>}, {pipeline_mode = #tpu.pipeline_mode<synchronous>, transform_indices = @transform_2, window_bounds = array<i64: 1, 128>}, {transform_indices = @transform_3, window_bounds = array<i64: 32, 128>}]} {
    %c0 = arith.constant 0 : index
    %c0_0 = arith.constant 0 : index
    %0 = vector.load %arg1[%c0, %c0_0] : memref<32x128xbf16, #tpu.memory_space<vmem>>, vector<32x128xbf16>
    %1 = arith.extf %0 : vector<32x128xbf16> to vector<32x128xf32>
    %c0_1 = arith.constant 0 : index
    %c0_2 = arith.constant 0 : index
    %2 = vector.load %arg2[%c0_1, %c0_2] : memref<1x128xf32, #tpu.memory_space<vmem>>, vector<1x128xf32>
    %3 = vector.broadcast %2 : vector<1x128xf32> to vector<32x128xf32>
    %4 = arith.mulf %1, %3 : vector<32x128xf32>
    %c0_3 = arith.constant 0 : index
    %c0_4 = arith.constant 0 : index
    %5 = vector.load %arg3[%c0_3, %c0_4] : memref<1x128xf32, #tpu.memory_space<vmem>>, vector<1x128xf32>
    %6 = vector.broadcast %5 : vector<1x128xf32> to vector<32x128xf32>
    %7 = arith.addf %4, %6 : vector<32x128xf32>
    %cst = arith.constant 0.000000e+00 : f32
    %8 = vector.broadcast %cst : f32 to vector<32x128xf32>
    %9 = arith.maximumf %7, %8 : vector<32x128xf32>
    %10 = arith.truncf %9 : vector<32x128xf32> to vector<32x128xbf16>
    %c0_5 = arith.constant 0 : index
    %c0_6 = arith.constant 0 : index
    %11 = vector.load %arg4[%c0_5, %c0_6] : memref<32x128xbf16, #tpu.memory_space<vmem>>, vector<32x128xbf16>
    tpu.vector_store %arg4[%c0_5, %c0_6], %10 {strides = array<i32>} : memref<32x128xbf16, #tpu.memory_space<vmem>>, vector<32x128xbf16>,
    return
  }
  func.func @transform_0(%arg0: i32) -> (i32, i32) {
    %c0_i32 = arith.constant 0 : i32
    %c0_i32_0 = arith.constant 0 : i32
    return %arg0, %c0_i32 : i32, i32
  }
  func.func @transform_1(%arg0: i32) -> (i32, i32) {
    %c0_i32 = arith.constant 0 : i32
    %c0_i32_0 = arith.constant 0 : i32
    %c0_i32_1 = arith.constant 0 : i32
    return %c0_i32, %c0_i32_0 : i32, i32
  }
  func.func @transform_2(%arg0: i32) -> (i32, i32) {
    %c0_i32 = arith.constant 0 : i32
    %c0_i32_0 = arith.constant 0 : i32
    %c0_i32_1 = arith.constant 0 : i32
    return %c0_i32, %c0_i32_0 : i32, i32
  }
  func.func @transform_3(%arg0: i32) -> (i32, i32) {
    %c0_i32 = arith.constant 0 : i32
    %c0_i32_0 = arith.constant 0 : i32
    return %arg0, %c0_i32 : i32, i32
  }
}

module attributes {stable_mosaic.version = 11 : i64} {
  func.func @_gemm_stats_kernel(%arg0: i32, %arg1: i32, %arg2: i32, %arg3: memref<128x512xbf16, #tpu.memory_space<vmem>>, %arg4: memref<512x128xbf16, #tpu.memory_space<vmem>>, %arg5: memref<1x128xf32, #tpu.memory_space<vmem>>, %arg6: memref<128x128xbf16, #tpu.memory_space<vmem>>, %arg7: memref<8x128xf32, #tpu.memory_space<vmem>>, %arg8: memref<8x128xf32, #tpu.memory_space<vmem>>, %arg9: memref<128x128xf32, #tpu.memory_space<vmem>>) attributes {dimension_semantics = [#tpu.dimension_semantics<parallel>, #tpu.dimension_semantics<parallel>, #tpu.dimension_semantics<arbitrary>], iteration_bounds = array<i64: 1, 1, 2>, scalar_prefetch = 0 : i64, scratch_operands = 1 : i64, tpu.core_type = #tpu.core_type<tc>, window_params = [{transform_indices = @transform_0, window_bounds = array<i64: 128, 512>}, {transform_indices = @transform_1, window_bounds = array<i64: 512, 128>}, {transform_indices = @transform_2, window_bounds = array<i64: 1, 128>}, {transform_indices = @transform_3, window_bounds = array<i64: 128, 128>}, {transform_indices = @transform_4, window_bounds = array<i64: 8, 128>}, {transform_indices = @transform_5, window_bounds = array<i64: 8, 128>}]} {
    %c0_i32 = arith.constant 0 : i32
    %0 = arith.cmpi eq, %arg2, %c0_i32 : i32
    %1 = arith.extui %0 : i1 to i32
    %c0_i32_0 = arith.constant 0 : i32
    %2 = arith.cmpi ne, %1, %c0_i32_0 : i32
    scf.if %2 {
      %cst_9 = arith.constant 0.000000e+00 : f32
      %12 = vector.broadcast %cst_9 : f32 to vector<128x128xf32>
      %c0_10 = arith.constant 0 : index
      %c0_11 = arith.constant 0 : index
      %13 = vector.load %arg9[%c0_10, %c0_11] : memref<128x128xf32, #tpu.memory_space<vmem>>, vector<128x128xf32>
      tpu.vector_store %arg9[%c0_10, %c0_11], %12 {strides = array<i32>} : memref<128x128xf32, #tpu.memory_space<vmem>>, vector<128x128xf32>,
    } else {
    }
    %c0 = arith.constant 0 : index
    %c0_1 = arith.constant 0 : index
    %3 = vector.load %arg9[%c0, %c0_1] : memref<128x128xf32, #tpu.memory_space<vmem>>, vector<128x128xf32>
    %c0_2 = arith.constant 0 : index
    %c0_3 = arith.constant 0 : index
    %4 = vector.load %arg3[%c0_2, %c0_3] : memref<128x512xbf16, #tpu.memory_space<vmem>>, vector<128x512xbf16>
    %c0_4 = arith.constant 0 : index
    %c0_5 = arith.constant 0 : index
    %5 = vector.load %arg4[%c0_4, %c0_5] : memref<512x128xbf16, #tpu.memory_space<vmem>>, vector<512x128xbf16>
    %cst = arith.constant dense<0.000000e+00> : vector<128x128xf32>
    %6 = tpu.matmul %4, %5, %cst {dimension_numbers = #tpu.dot_dimension_numbers<[1], [0], [0], [1], [0, 0, 1, 1], [], []>} : vector<128x512xbf16>, vector<512x128xbf16>, vector<128x128xf32> -> vector<128x128xf32>
    %7 = arith.addf %3, %6 : vector<128x128xf32>
    %c0_6 = arith.constant 0 : index
    %c0_7 = arith.constant 0 : index
    %8 = vector.load %arg9[%c0_6, %c0_7] : memref<128x128xf32, #tpu.memory_space<vmem>>, vector<128x128xf32>
    tpu.vector_store %arg9[%c0_6, %c0_7], %7 {strides = array<i32>} : memref<128x128xf32, #tpu.memory_space<vmem>>, vector<128x128xf32>,
    %c1_i32 = arith.constant 1 : i32
    %9 = arith.cmpi eq, %arg2, %c1_i32 : i32
    %10 = arith.extui %9 : i1 to i32
    %c0_i32_8 = arith.constant 0 : i32
    %11 = arith.cmpi ne, %10, %c0_i32_8 : i32
    scf.if %11 {
      %c0_9 = arith.constant 0 : index
      %c0_10 = arith.constant 0 : index
      %12 = vector.load %arg9[%c0_9, %c0_10] : memref<128x128xf32, #tpu.memory_space<vmem>>, vector<128x128xf32>
      %c0_11 = arith.constant 0 : index
      %c0_12 = arith.constant 0 : index
      %13 = vector.load %arg5[%c0_11, %c0_12] : memref<1x128xf32, #tpu.memory_space<vmem>>, vector<1x128xf32>
      %14 = vector.broadcast %13 : vector<1x128xf32> to vector<128x128xf32>
      %15 = arith.addf %12, %14 : vector<128x128xf32>
      %16 = arith.truncf %15 : vector<128x128xf32> to vector<128x128xbf16>
      %c0_13 = arith.constant 0 : index
      %c0_14 = arith.constant 0 : index
      %17 = vector.load %arg6[%c0_13, %c0_14] : memref<128x128xbf16, #tpu.memory_space<vmem>>, vector<128x128xbf16>
      tpu.vector_store %arg6[%c0_13, %c0_14], %16 {strides = array<i32>} : memref<128x128xbf16, #tpu.memory_space<vmem>>, vector<128x128xbf16>,
      %cst_15 = arith.constant dense<0.000000e+00> : vector<128xf32>
      %18 = vector.multi_reduction <add>, %15, %cst_15 [0] : vector<128x128xf32> to vector<128xf32>
      %19 = vector.shape_cast %18 : vector<128xf32> to vector<1x128xf32>
      %20 = arith.mulf %15, %15 : vector<128x128xf32>
      %cst_16 = arith.constant dense<0.000000e+00> : vector<128xf32>
      %21 = vector.multi_reduction <add>, %20, %cst_16 [0] : vector<128x128xf32> to vector<128xf32>
      %22 = vector.shape_cast %21 : vector<128xf32> to vector<1x128xf32>
      %23 = vector.shape_cast %19 : vector<1x128xf32> to vector<1x128xf32>
      %24 = vector.broadcast %23 : vector<1x128xf32> to vector<8x128xf32>
      %c0_17 = arith.constant 0 : index
      %c0_18 = arith.constant 0 : index
      %25 = vector.load %arg7[%c0_17, %c0_18] : memref<8x128xf32, #tpu.memory_space<vmem>>, vector<8x128xf32>
      tpu.vector_store %arg7[%c0_17, %c0_18], %24 {strides = array<i32>} : memref<8x128xf32, #tpu.memory_space<vmem>>, vector<8x128xf32>,
      %26 = vector.shape_cast %22 : vector<1x128xf32> to vector<1x128xf32>
      %27 = vector.broadcast %26 : vector<1x128xf32> to vector<8x128xf32>
      %c0_19 = arith.constant 0 : index
      %c0_20 = arith.constant 0 : index
      %28 = vector.load %arg8[%c0_19, %c0_20] : memref<8x128xf32, #tpu.memory_space<vmem>>, vector<8x128xf32>
      tpu.vector_store %arg8[%c0_19, %c0_20], %27 {strides = array<i32>} : memref<8x128xf32, #tpu.memory_space<vmem>>, vector<8x128xf32>,
    } else {
    }
    return
  }
  func.func @transform_0(%arg0: i32, %arg1: i32, %arg2: i32) -> (i32, i32) {
    %c0_i32 = arith.constant 0 : i32
    return %arg0, %arg2 : i32, i32
  }
  func.func @transform_1(%arg0: i32, %arg1: i32, %arg2: i32) -> (i32, i32) {
    %c0_i32 = arith.constant 0 : i32
    return %arg2, %arg1 : i32, i32
  }
  func.func @transform_2(%arg0: i32, %arg1: i32, %arg2: i32) -> (i32, i32) {
    %c0_i32 = arith.constant 0 : i32
    %c0_i32_0 = arith.constant 0 : i32
    return %c0_i32, %arg1 : i32, i32
  }
  func.func @transform_3(%arg0: i32, %arg1: i32, %arg2: i32) -> (i32, i32) {
    %c0_i32 = arith.constant 0 : i32
    return %arg0, %arg1 : i32, i32
  }
  func.func @transform_4(%arg0: i32, %arg1: i32, %arg2: i32) -> (i32, i32) {
    %c0_i32 = arith.constant 0 : i32
    return %arg0, %arg1 : i32, i32
  }
  func.func @transform_5(%arg0: i32, %arg1: i32, %arg2: i32) -> (i32, i32) {
    %c0_i32 = arith.constant 0 : i32
    return %arg0, %arg1 : i32, i32
  }
}

module attributes {stable_mosaic.version = 11 : i64} {
  func.func @_affine_kernel(%arg0: i32, %arg1: memref<16x128xbf16, #tpu.memory_space<vmem>>, %arg2: memref<1x128xf32, #tpu.memory_space<vmem>>, %arg3: memref<1x128xf32, #tpu.memory_space<vmem>>, %arg4: memref<16x128xbf16, #tpu.memory_space<vmem>>) attributes {dimension_semantics = [#tpu.dimension_semantics<parallel>], iteration_bounds = array<i64: 1>, scalar_prefetch = 0 : i64, scratch_operands = 0 : i64, tpu.core_type = #tpu.core_type<tc>, window_params = [{transform_indices = @transform_0, window_bounds = array<i64: 16, 128>}, {pipeline_mode = #tpu.pipeline_mode<synchronous>, transform_indices = @transform_1, window_bounds = array<i64: 1, 128>}, {pipeline_mode = #tpu.pipeline_mode<synchronous>, transform_indices = @transform_2, window_bounds = array<i64: 1, 128>}, {transform_indices = @transform_3, window_bounds = array<i64: 16, 128>}]} {
    %c0 = arith.constant 0 : index
    %c0_0 = arith.constant 0 : index
    %0 = vector.load %arg1[%c0, %c0_0] : memref<16x128xbf16, #tpu.memory_space<vmem>>, vector<16x128xbf16>
    %1 = arith.extf %0 : vector<16x128xbf16> to vector<16x128xf32>
    %c0_1 = arith.constant 0 : index
    %c0_2 = arith.constant 0 : index
    %2 = vector.load %arg2[%c0_1, %c0_2] : memref<1x128xf32, #tpu.memory_space<vmem>>, vector<1x128xf32>
    %3 = vector.broadcast %2 : vector<1x128xf32> to vector<16x128xf32>
    %4 = arith.mulf %1, %3 : vector<16x128xf32>
    %c0_3 = arith.constant 0 : index
    %c0_4 = arith.constant 0 : index
    %5 = vector.load %arg3[%c0_3, %c0_4] : memref<1x128xf32, #tpu.memory_space<vmem>>, vector<1x128xf32>
    %6 = vector.broadcast %5 : vector<1x128xf32> to vector<16x128xf32>
    %7 = arith.addf %4, %6 : vector<16x128xf32>
    %cst = arith.constant 0.000000e+00 : f32
    %8 = vector.broadcast %cst : f32 to vector<16x128xf32>
    %9 = arith.maximumf %7, %8 : vector<16x128xf32>
    %10 = arith.truncf %9 : vector<16x128xf32> to vector<16x128xbf16>
    %c0_5 = arith.constant 0 : index
    %c0_6 = arith.constant 0 : index
    %11 = vector.load %arg4[%c0_5, %c0_6] : memref<16x128xbf16, #tpu.memory_space<vmem>>, vector<16x128xbf16>
    tpu.vector_store %arg4[%c0_5, %c0_6], %10 {strides = array<i32>} : memref<16x128xbf16, #tpu.memory_space<vmem>>, vector<16x128xbf16>,
    return
  }
  func.func @transform_0(%arg0: i32) -> (i32, i32) {
    %c0_i32 = arith.constant 0 : i32
    %c0_i32_0 = arith.constant 0 : i32
    return %arg0, %c0_i32 : i32, i32
  }
  func.func @transform_1(%arg0: i32) -> (i32, i32) {
    %c0_i32 = arith.constant 0 : i32
    %c0_i32_0 = arith.constant 0 : i32
    %c0_i32_1 = arith.constant 0 : i32
    return %c0_i32, %c0_i32_0 : i32, i32
  }
  func.func @transform_2(%arg0: i32) -> (i32, i32) {
    %c0_i32 = arith.constant 0 : i32
    %c0_i32_0 = arith.constant 0 : i32
    %c0_i32_1 = arith.constant 0 : i32
    return %c0_i32, %c0_i32_0 : i32, i32
  }
  func.func @transform_3(%arg0: i32) -> (i32, i32) {
    %c0_i32 = arith.constant 0 : i32
    %c0_i32_0 = arith.constant 0 : i32
    return %arg0, %c0_i32 : i32, i32
  }
}

module attributes {stable_mosaic.version = 11 : i64} {
  func.func @_affine_res_kernel(%arg0: i32, %arg1: memref<16x128xbf16, #tpu.memory_space<vmem>>, %arg2: memref<1x128xf32, #tpu.memory_space<vmem>>, %arg3: memref<1x128xf32, #tpu.memory_space<vmem>>, %arg4: memref<16x128xbf16, #tpu.memory_space<vmem>>, %arg5: memref<16x128xbf16, #tpu.memory_space<vmem>>) attributes {dimension_semantics = [#tpu.dimension_semantics<parallel>], iteration_bounds = array<i64: 1>, scalar_prefetch = 0 : i64, scratch_operands = 0 : i64, tpu.core_type = #tpu.core_type<tc>, window_params = [{transform_indices = @transform_0, window_bounds = array<i64: 16, 128>}, {pipeline_mode = #tpu.pipeline_mode<synchronous>, transform_indices = @transform_1, window_bounds = array<i64: 1, 128>}, {pipeline_mode = #tpu.pipeline_mode<synchronous>, transform_indices = @transform_2, window_bounds = array<i64: 1, 128>}, {transform_indices = @transform_3, window_bounds = array<i64: 16, 128>}, {transform_indices = @transform_4, window_bounds = array<i64: 16, 128>}]} {
    %c0 = arith.constant 0 : index
    %c0_0 = arith.constant 0 : index
    %0 = vector.load %arg1[%c0, %c0_0] : memref<16x128xbf16, #tpu.memory_space<vmem>>, vector<16x128xbf16>
    %1 = arith.extf %0 : vector<16x128xbf16> to vector<16x128xf32>
    %c0_1 = arith.constant 0 : index
    %c0_2 = arith.constant 0 : index
    %2 = vector.load %arg2[%c0_1, %c0_2] : memref<1x128xf32, #tpu.memory_space<vmem>>, vector<1x128xf32>
    %3 = vector.broadcast %2 : vector<1x128xf32> to vector<16x128xf32>
    %4 = arith.mulf %1, %3 : vector<16x128xf32>
    %c0_3 = arith.constant 0 : index
    %c0_4 = arith.constant 0 : index
    %5 = vector.load %arg3[%c0_3, %c0_4] : memref<1x128xf32, #tpu.memory_space<vmem>>, vector<1x128xf32>
    %6 = vector.broadcast %5 : vector<1x128xf32> to vector<16x128xf32>
    %7 = arith.addf %4, %6 : vector<16x128xf32>
    %c0_5 = arith.constant 0 : index
    %c0_6 = arith.constant 0 : index
    %8 = vector.load %arg4[%c0_5, %c0_6] : memref<16x128xbf16, #tpu.memory_space<vmem>>, vector<16x128xbf16>
    %9 = arith.extf %8 : vector<16x128xbf16> to vector<16x128xf32>
    %10 = arith.addf %7, %9 : vector<16x128xf32>
    %11 = arith.truncf %10 : vector<16x128xf32> to vector<16x128xbf16>
    %c0_7 = arith.constant 0 : index
    %c0_8 = arith.constant 0 : index
    %12 = vector.load %arg5[%c0_7, %c0_8] : memref<16x128xbf16, #tpu.memory_space<vmem>>, vector<16x128xbf16>
    tpu.vector_store %arg5[%c0_7, %c0_8], %11 {strides = array<i32>} : memref<16x128xbf16, #tpu.memory_space<vmem>>, vector<16x128xbf16>,
    return
  }
  func.func @transform_0(%arg0: i32) -> (i32, i32) {
    %c0_i32 = arith.constant 0 : i32
    %c0_i32_0 = arith.constant 0 : i32
    return %arg0, %c0_i32 : i32, i32
  }
  func.func @transform_1(%arg0: i32) -> (i32, i32) {
    %c0_i32 = arith.constant 0 : i32
    %c0_i32_0 = arith.constant 0 : i32
    %c0_i32_1 = arith.constant 0 : i32
    return %c0_i32, %c0_i32_0 : i32, i32
  }
  func.func @transform_2(%arg0: i32) -> (i32, i32) {
    %c0_i32 = arith.constant 0 : i32
    %c0_i32_0 = arith.constant 0 : i32
    %c0_i32_1 = arith.constant 0 : i32
    return %c0_i32, %c0_i32_0 : i32, i32
  }
  func.func @transform_3(%arg0: i32) -> (i32, i32) {
    %c0_i32 = arith.constant 0 : i32
    %c0_i32_0 = arith.constant 0 : i32
    return %arg0, %c0_i32 : i32, i32
  }
  func.func @transform_4(%arg0: i32) -> (i32, i32) {
    %c0_i32 = arith.constant 0 : i32
    %c0_i32_0 = arith.constant 0 : i32
    return %arg0, %c0_i32 : i32, i32
  }
}

module attributes {stable_mosaic.version = 11 : i64} {
  func.func @_gemm_stats_kernel(%arg0: i32, %arg1: i32, %arg2: i32, %arg3: memref<128x384xbf16, #tpu.memory_space<vmem>>, %arg4: memref<384x128xbf16, #tpu.memory_space<vmem>>, %arg5: memref<1x128xf32, #tpu.memory_space<vmem>>, %arg6: memref<128x128xbf16, #tpu.memory_space<vmem>>, %arg7: memref<8x128xf32, #tpu.memory_space<vmem>>, %arg8: memref<8x128xf32, #tpu.memory_space<vmem>>, %arg9: memref<128x128xf32, #tpu.memory_space<vmem>>) attributes {dimension_semantics = [#tpu.dimension_semantics<parallel>, #tpu.dimension_semantics<parallel>, #tpu.dimension_semantics<arbitrary>], iteration_bounds = array<i64: 1, 1, 2>, scalar_prefetch = 0 : i64, scratch_operands = 1 : i64, tpu.core_type = #tpu.core_type<tc>, window_params = [{transform_indices = @transform_0, window_bounds = array<i64: 128, 384>}, {transform_indices = @transform_1, window_bounds = array<i64: 384, 128>}, {transform_indices = @transform_2, window_bounds = array<i64: 1, 128>}, {transform_indices = @transform_3, window_bounds = array<i64: 128, 128>}, {transform_indices = @transform_4, window_bounds = array<i64: 8, 128>}, {transform_indices = @transform_5, window_bounds = array<i64: 8, 128>}]} {
    %c0_i32 = arith.constant 0 : i32
    %0 = arith.cmpi eq, %arg2, %c0_i32 : i32
    %1 = arith.extui %0 : i1 to i32
    %c0_i32_0 = arith.constant 0 : i32
    %2 = arith.cmpi ne, %1, %c0_i32_0 : i32
    scf.if %2 {
      %cst_9 = arith.constant 0.000000e+00 : f32
      %12 = vector.broadcast %cst_9 : f32 to vector<128x128xf32>
      %c0_10 = arith.constant 0 : index
      %c0_11 = arith.constant 0 : index
      %13 = vector.load %arg9[%c0_10, %c0_11] : memref<128x128xf32, #tpu.memory_space<vmem>>, vector<128x128xf32>
      tpu.vector_store %arg9[%c0_10, %c0_11], %12 {strides = array<i32>} : memref<128x128xf32, #tpu.memory_space<vmem>>, vector<128x128xf32>,
    } else {
    }
    %c0 = arith.constant 0 : index
    %c0_1 = arith.constant 0 : index
    %3 = vector.load %arg9[%c0, %c0_1] : memref<128x128xf32, #tpu.memory_space<vmem>>, vector<128x128xf32>
    %c0_2 = arith.constant 0 : index
    %c0_3 = arith.constant 0 : index
    %4 = vector.load %arg3[%c0_2, %c0_3] : memref<128x384xbf16, #tpu.memory_space<vmem>>, vector<128x384xbf16>
    %c0_4 = arith.constant 0 : index
    %c0_5 = arith.constant 0 : index
    %5 = vector.load %arg4[%c0_4, %c0_5] : memref<384x128xbf16, #tpu.memory_space<vmem>>, vector<384x128xbf16>
    %cst = arith.constant dense<0.000000e+00> : vector<128x128xf32>
    %6 = tpu.matmul %4, %5, %cst {dimension_numbers = #tpu.dot_dimension_numbers<[1], [0], [0], [1], [0, 0, 1, 1], [], []>} : vector<128x384xbf16>, vector<384x128xbf16>, vector<128x128xf32> -> vector<128x128xf32>
    %7 = arith.addf %3, %6 : vector<128x128xf32>
    %c0_6 = arith.constant 0 : index
    %c0_7 = arith.constant 0 : index
    %8 = vector.load %arg9[%c0_6, %c0_7] : memref<128x128xf32, #tpu.memory_space<vmem>>, vector<128x128xf32>
    tpu.vector_store %arg9[%c0_6, %c0_7], %7 {strides = array<i32>} : memref<128x128xf32, #tpu.memory_space<vmem>>, vector<128x128xf32>,
    %c1_i32 = arith.constant 1 : i32
    %9 = arith.cmpi eq, %arg2, %c1_i32 : i32
    %10 = arith.extui %9 : i1 to i32
    %c0_i32_8 = arith.constant 0 : i32
    %11 = arith.cmpi ne, %10, %c0_i32_8 : i32
    scf.if %11 {
      %c0_9 = arith.constant 0 : index
      %c0_10 = arith.constant 0 : index
      %12 = vector.load %arg9[%c0_9, %c0_10] : memref<128x128xf32, #tpu.memory_space<vmem>>, vector<128x128xf32>
      %c0_11 = arith.constant 0 : index
      %c0_12 = arith.constant 0 : index
      %13 = vector.load %arg5[%c0_11, %c0_12] : memref<1x128xf32, #tpu.memory_space<vmem>>, vector<1x128xf32>
      %14 = vector.broadcast %13 : vector<1x128xf32> to vector<128x128xf32>
      %15 = arith.addf %12, %14 : vector<128x128xf32>
      %16 = arith.truncf %15 : vector<128x128xf32> to vector<128x128xbf16>
      %c0_13 = arith.constant 0 : index
      %c0_14 = arith.constant 0 : index
      %17 = vector.load %arg6[%c0_13, %c0_14] : memref<128x128xbf16, #tpu.memory_space<vmem>>, vector<128x128xbf16>
      tpu.vector_store %arg6[%c0_13, %c0_14], %16 {strides = array<i32>} : memref<128x128xbf16, #tpu.memory_space<vmem>>, vector<128x128xbf16>,
      %cst_15 = arith.constant dense<0.000000e+00> : vector<128xf32>
      %18 = vector.multi_reduction <add>, %15, %cst_15 [0] : vector<128x128xf32> to vector<128xf32>
      %19 = vector.shape_cast %18 : vector<128xf32> to vector<1x128xf32>
      %20 = arith.mulf %15, %15 : vector<128x128xf32>
      %cst_16 = arith.constant dense<0.000000e+00> : vector<128xf32>
      %21 = vector.multi_reduction <add>, %20, %cst_16 [0] : vector<128x128xf32> to vector<128xf32>
      %22 = vector.shape_cast %21 : vector<128xf32> to vector<1x128xf32>
      %23 = vector.shape_cast %19 : vector<1x128xf32> to vector<1x128xf32>
      %24 = vector.broadcast %23 : vector<1x128xf32> to vector<8x128xf32>
      %c0_17 = arith.constant 0 : index
      %c0_18 = arith.constant 0 : index
      %25 = vector.load %arg7[%c0_17, %c0_18] : memref<8x128xf32, #tpu.memory_space<vmem>>, vector<8x128xf32>
      tpu.vector_store %arg7[%c0_17, %c0_18], %24 {strides = array<i32>} : memref<8x128xf32, #tpu.memory_space<vmem>>, vector<8x128xf32>,
      %26 = vector.shape_cast %22 : vector<1x128xf32> to vector<1x128xf32>
      %27 = vector.broadcast %26 : vector<1x128xf32> to vector<8x128xf32>
      %c0_19 = arith.constant 0 : index
      %c0_20 = arith.constant 0 : index
      %28 = vector.load %arg8[%c0_19, %c0_20] : memref<8x128xf32, #tpu.memory_space<vmem>>, vector<8x128xf32>
      tpu.vector_store %arg8[%c0_19, %c0_20], %27 {strides = array<i32>} : memref<8x128xf32, #tpu.memory_space<vmem>>, vector<8x128xf32>,
    } else {
    }
    return
  }
  func.func @transform_0(%arg0: i32, %arg1: i32, %arg2: i32) -> (i32, i32) {
    %c0_i32 = arith.constant 0 : i32
    return %arg0, %arg2 : i32, i32
  }
  func.func @transform_1(%arg0: i32, %arg1: i32, %arg2: i32) -> (i32, i32) {
    %c0_i32 = arith.constant 0 : i32
    return %arg2, %arg1 : i32, i32
  }
  func.func @transform_2(%arg0: i32, %arg1: i32, %arg2: i32) -> (i32, i32) {
    %c0_i32 = arith.constant 0 : i32
    %c0_i32_0 = arith.constant 0 : i32
    return %c0_i32, %arg1 : i32, i32
  }
  func.func @transform_3(%arg0: i32, %arg1: i32, %arg2: i32) -> (i32, i32) {
    %c0_i32 = arith.constant 0 : i32
    return %arg0, %arg1 : i32, i32
  }
  func.func @transform_4(%arg0: i32, %arg1: i32, %arg2: i32) -> (i32, i32) {
    %c0_i32 = arith.constant 0 : i32
    return %arg0, %arg1 : i32, i32
  }
  func.func @transform_5(%arg0: i32, %arg1: i32, %arg2: i32) -> (i32, i32) {
    %c0_i32 = arith.constant 0 : i32
    return %arg0, %arg1 : i32, i32
  }
}

module attributes {stable_mosaic.version = 11 : i64} {
  func.func @_gemm_stats_kernel(%arg0: i32, %arg1: i32, %arg2: i32, %arg3: memref<128x384xbf16, #tpu.memory_space<vmem>>, %arg4: memref<384x128xbf16, #tpu.memory_space<vmem>>, %arg5: memref<1x128xf32, #tpu.memory_space<vmem>>, %arg6: memref<128x128xbf16, #tpu.memory_space<vmem>>, %arg7: memref<8x128xf32, #tpu.memory_space<vmem>>, %arg8: memref<8x128xf32, #tpu.memory_space<vmem>>, %arg9: memref<128x128xf32, #tpu.memory_space<vmem>>) attributes {dimension_semantics = [#tpu.dimension_semantics<parallel>, #tpu.dimension_semantics<parallel>, #tpu.dimension_semantics<arbitrary>], iteration_bounds = array<i64: 1, 1, 1>, scalar_prefetch = 0 : i64, scratch_operands = 1 : i64, tpu.core_type = #tpu.core_type<tc>, window_params = [{transform_indices = @transform_0, window_bounds = array<i64: 128, 384>}, {transform_indices = @transform_1, window_bounds = array<i64: 384, 128>}, {transform_indices = @transform_2, window_bounds = array<i64: 1, 128>}, {transform_indices = @transform_3, window_bounds = array<i64: 128, 128>}, {transform_indices = @transform_4, window_bounds = array<i64: 8, 128>}, {transform_indices = @transform_5, window_bounds = array<i64: 8, 128>}]} {
    %c0_i32 = arith.constant 0 : i32
    %0 = arith.cmpi eq, %arg2, %c0_i32 : i32
    %1 = arith.extui %0 : i1 to i32
    %c0_i32_0 = arith.constant 0 : i32
    %2 = arith.cmpi ne, %1, %c0_i32_0 : i32
    scf.if %2 {
      %cst_10 = arith.constant 0.000000e+00 : f32
      %12 = vector.broadcast %cst_10 : f32 to vector<128x128xf32>
      %c0_11 = arith.constant 0 : index
      %c0_12 = arith.constant 0 : index
      %13 = vector.load %arg9[%c0_11, %c0_12] : memref<128x128xf32, #tpu.memory_space<vmem>>, vector<128x128xf32>
      tpu.vector_store %arg9[%c0_11, %c0_12], %12 {strides = array<i32>} : memref<128x128xf32, #tpu.memory_space<vmem>>, vector<128x128xf32>,
    } else {
    }
    %c0 = arith.constant 0 : index
    %c0_1 = arith.constant 0 : index
    %3 = vector.load %arg9[%c0, %c0_1] : memref<128x128xf32, #tpu.memory_space<vmem>>, vector<128x128xf32>
    %c0_2 = arith.constant 0 : index
    %c0_3 = arith.constant 0 : index
    %4 = vector.load %arg3[%c0_2, %c0_3] : memref<128x384xbf16, #tpu.memory_space<vmem>>, vector<128x384xbf16>
    %c0_4 = arith.constant 0 : index
    %c0_5 = arith.constant 0 : index
    %5 = vector.load %arg4[%c0_4, %c0_5] : memref<384x128xbf16, #tpu.memory_space<vmem>>, vector<384x128xbf16>
    %cst = arith.constant dense<0.000000e+00> : vector<128x128xf32>
    %6 = tpu.matmul %4, %5, %cst {dimension_numbers = #tpu.dot_dimension_numbers<[1], [0], [0], [1], [0, 0, 1, 1], [], []>} : vector<128x384xbf16>, vector<384x128xbf16>, vector<128x128xf32> -> vector<128x128xf32>
    %7 = arith.addf %3, %6 : vector<128x128xf32>
    %c0_6 = arith.constant 0 : index
    %c0_7 = arith.constant 0 : index
    %8 = vector.load %arg9[%c0_6, %c0_7] : memref<128x128xf32, #tpu.memory_space<vmem>>, vector<128x128xf32>
    tpu.vector_store %arg9[%c0_6, %c0_7], %7 {strides = array<i32>} : memref<128x128xf32, #tpu.memory_space<vmem>>, vector<128x128xf32>,
    %c0_i32_8 = arith.constant 0 : i32
    %9 = arith.cmpi eq, %arg2, %c0_i32_8 : i32
    %10 = arith.extui %9 : i1 to i32
    %c0_i32_9 = arith.constant 0 : i32
    %11 = arith.cmpi ne, %10, %c0_i32_9 : i32
    scf.if %11 {
      %c0_10 = arith.constant 0 : index
      %c0_11 = arith.constant 0 : index
      %12 = vector.load %arg9[%c0_10, %c0_11] : memref<128x128xf32, #tpu.memory_space<vmem>>, vector<128x128xf32>
      %c0_12 = arith.constant 0 : index
      %c0_13 = arith.constant 0 : index
      %13 = vector.load %arg5[%c0_12, %c0_13] : memref<1x128xf32, #tpu.memory_space<vmem>>, vector<1x128xf32>
      %14 = vector.broadcast %13 : vector<1x128xf32> to vector<128x128xf32>
      %15 = arith.addf %12, %14 : vector<128x128xf32>
      %16 = arith.truncf %15 : vector<128x128xf32> to vector<128x128xbf16>
      %c0_14 = arith.constant 0 : index
      %c0_15 = arith.constant 0 : index
      %17 = vector.load %arg6[%c0_14, %c0_15] : memref<128x128xbf16, #tpu.memory_space<vmem>>, vector<128x128xbf16>
      tpu.vector_store %arg6[%c0_14, %c0_15], %16 {strides = array<i32>} : memref<128x128xbf16, #tpu.memory_space<vmem>>, vector<128x128xbf16>,
      %cst_16 = arith.constant dense<0.000000e+00> : vector<128xf32>
      %18 = vector.multi_reduction <add>, %15, %cst_16 [0] : vector<128x128xf32> to vector<128xf32>
      %19 = vector.shape_cast %18 : vector<128xf32> to vector<1x128xf32>
      %20 = arith.mulf %15, %15 : vector<128x128xf32>
      %cst_17 = arith.constant dense<0.000000e+00> : vector<128xf32>
      %21 = vector.multi_reduction <add>, %20, %cst_17 [0] : vector<128x128xf32> to vector<128xf32>
      %22 = vector.shape_cast %21 : vector<128xf32> to vector<1x128xf32>
      %23 = vector.shape_cast %19 : vector<1x128xf32> to vector<1x128xf32>
      %24 = vector.broadcast %23 : vector<1x128xf32> to vector<8x128xf32>
      %c0_18 = arith.constant 0 : index
      %c0_19 = arith.constant 0 : index
      %25 = vector.load %arg7[%c0_18, %c0_19] : memref<8x128xf32, #tpu.memory_space<vmem>>, vector<8x128xf32>
      tpu.vector_store %arg7[%c0_18, %c0_19], %24 {strides = array<i32>} : memref<8x128xf32, #tpu.memory_space<vmem>>, vector<8x128xf32>,
      %26 = vector.shape_cast %22 : vector<1x128xf32> to vector<1x128xf32>
      %27 = vector.broadcast %26 : vector<1x128xf32> to vector<8x128xf32>
      %c0_20 = arith.constant 0 : index
      %c0_21 = arith.constant 0 : index
      %28 = vector.load %arg8[%c0_20, %c0_21] : memref<8x128xf32, #tpu.memory_space<vmem>>, vector<8x128xf32>
      tpu.vector_store %arg8[%c0_20, %c0_21], %27 {strides = array<i32>} : memref<8x128xf32, #tpu.memory_space<vmem>>, vector<8x128xf32>,
    } else {
    }
    return
  }
  func.func @transform_0(%arg0: i32, %arg1: i32, %arg2: i32) -> (i32, i32) {
    %c0_i32 = arith.constant 0 : i32
    return %arg0, %arg2 : i32, i32
  }
  func.func @transform_1(%arg0: i32, %arg1: i32, %arg2: i32) -> (i32, i32) {
    %c0_i32 = arith.constant 0 : i32
    return %arg2, %arg1 : i32, i32
  }
  func.func @transform_2(%arg0: i32, %arg1: i32, %arg2: i32) -> (i32, i32) {
    %c0_i32 = arith.constant 0 : i32
    %c0_i32_0 = arith.constant 0 : i32
    return %c0_i32, %arg1 : i32, i32
  }
  func.func @transform_3(%arg0: i32, %arg1: i32, %arg2: i32) -> (i32, i32) {
    %c0_i32 = arith.constant 0 : i32
    return %arg0, %arg1 : i32, i32
  }
  func.func @transform_4(%arg0: i32, %arg1: i32, %arg2: i32) -> (i32, i32) {
    %c0_i32 = arith.constant 0 : i32
    return %arg0, %arg1 : i32, i32
  }
  func.func @transform_5(%arg0: i32, %arg1: i32, %arg2: i32) -> (i32, i32) {
    %c0_i32 = arith.constant 0 : i32
    return %arg0, %arg1 : i32, i32
  }
}

module attributes {stable_mosaic.version = 11 : i64} {
  func.func @_gemm_stats_kernel(%arg0: i32, %arg1: i32, %arg2: i32, %arg3: memref<128x256xbf16, #tpu.memory_space<vmem>>, %arg4: memref<256x128xbf16, #tpu.memory_space<vmem>>, %arg5: memref<1x128xf32, #tpu.memory_space<vmem>>, %arg6: memref<128x128xbf16, #tpu.memory_space<vmem>>, %arg7: memref<8x128xf32, #tpu.memory_space<vmem>>, %arg8: memref<8x128xf32, #tpu.memory_space<vmem>>, %arg9: memref<128x128xf32, #tpu.memory_space<vmem>>) attributes {dimension_semantics = [#tpu.dimension_semantics<parallel>, #tpu.dimension_semantics<parallel>, #tpu.dimension_semantics<arbitrary>], iteration_bounds = array<i64: 1, 1, 1>, scalar_prefetch = 0 : i64, scratch_operands = 1 : i64, tpu.core_type = #tpu.core_type<tc>, window_params = [{transform_indices = @transform_0, window_bounds = array<i64: 128, 256>}, {transform_indices = @transform_1, window_bounds = array<i64: 256, 128>}, {transform_indices = @transform_2, window_bounds = array<i64: 1, 128>}, {transform_indices = @transform_3, window_bounds = array<i64: 128, 128>}, {transform_indices = @transform_4, window_bounds = array<i64: 8, 128>}, {transform_indices = @transform_5, window_bounds = array<i64: 8, 128>}]} {
    %c0_i32 = arith.constant 0 : i32
    %0 = arith.cmpi eq, %arg2, %c0_i32 : i32
    %1 = arith.extui %0 : i1 to i32
    %c0_i32_0 = arith.constant 0 : i32
    %2 = arith.cmpi ne, %1, %c0_i32_0 : i32
    scf.if %2 {
      %cst_10 = arith.constant 0.000000e+00 : f32
      %12 = vector.broadcast %cst_10 : f32 to vector<128x128xf32>
      %c0_11 = arith.constant 0 : index
      %c0_12 = arith.constant 0 : index
      %13 = vector.load %arg9[%c0_11, %c0_12] : memref<128x128xf32, #tpu.memory_space<vmem>>, vector<128x128xf32>
      tpu.vector_store %arg9[%c0_11, %c0_12], %12 {strides = array<i32>} : memref<128x128xf32, #tpu.memory_space<vmem>>, vector<128x128xf32>,
    } else {
    }
    %c0 = arith.constant 0 : index
    %c0_1 = arith.constant 0 : index
    %3 = vector.load %arg9[%c0, %c0_1] : memref<128x128xf32, #tpu.memory_space<vmem>>, vector<128x128xf32>
    %c0_2 = arith.constant 0 : index
    %c0_3 = arith.constant 0 : index
    %4 = vector.load %arg3[%c0_2, %c0_3] : memref<128x256xbf16, #tpu.memory_space<vmem>>, vector<128x256xbf16>
    %c0_4 = arith.constant 0 : index
    %c0_5 = arith.constant 0 : index
    %5 = vector.load %arg4[%c0_4, %c0_5] : memref<256x128xbf16, #tpu.memory_space<vmem>>, vector<256x128xbf16>
    %cst = arith.constant dense<0.000000e+00> : vector<128x128xf32>
    %6 = tpu.matmul %4, %5, %cst {dimension_numbers = #tpu.dot_dimension_numbers<[1], [0], [0], [1], [0, 0, 1, 1], [], []>} : vector<128x256xbf16>, vector<256x128xbf16>, vector<128x128xf32> -> vector<128x128xf32>
    %7 = arith.addf %3, %6 : vector<128x128xf32>
    %c0_6 = arith.constant 0 : index
    %c0_7 = arith.constant 0 : index
    %8 = vector.load %arg9[%c0_6, %c0_7] : memref<128x128xf32, #tpu.memory_space<vmem>>, vector<128x128xf32>
    tpu.vector_store %arg9[%c0_6, %c0_7], %7 {strides = array<i32>} : memref<128x128xf32, #tpu.memory_space<vmem>>, vector<128x128xf32>,
    %c0_i32_8 = arith.constant 0 : i32
    %9 = arith.cmpi eq, %arg2, %c0_i32_8 : i32
    %10 = arith.extui %9 : i1 to i32
    %c0_i32_9 = arith.constant 0 : i32
    %11 = arith.cmpi ne, %10, %c0_i32_9 : i32
    scf.if %11 {
      %c0_10 = arith.constant 0 : index
      %c0_11 = arith.constant 0 : index
      %12 = vector.load %arg9[%c0_10, %c0_11] : memref<128x128xf32, #tpu.memory_space<vmem>>, vector<128x128xf32>
      %c0_12 = arith.constant 0 : index
      %c0_13 = arith.constant 0 : index
      %13 = vector.load %arg5[%c0_12, %c0_13] : memref<1x128xf32, #tpu.memory_space<vmem>>, vector<1x128xf32>
      %14 = vector.broadcast %13 : vector<1x128xf32> to vector<128x128xf32>
      %15 = arith.addf %12, %14 : vector<128x128xf32>
      %16 = arith.truncf %15 : vector<128x128xf32> to vector<128x128xbf16>
      %c0_14 = arith.constant 0 : index
      %c0_15 = arith.constant 0 : index
      %17 = vector.load %arg6[%c0_14, %c0_15] : memref<128x128xbf16, #tpu.memory_space<vmem>>, vector<128x128xbf16>
      tpu.vector_store %arg6[%c0_14, %c0_15], %16 {strides = array<i32>} : memref<128x128xbf16, #tpu.memory_space<vmem>>, vector<128x128xbf16>,
      %cst_16 = arith.constant dense<0.000000e+00> : vector<128xf32>
      %18 = vector.multi_reduction <add>, %15, %cst_16 [0] : vector<128x128xf32> to vector<128xf32>
      %19 = vector.shape_cast %18 : vector<128xf32> to vector<1x128xf32>
      %20 = arith.mulf %15, %15 : vector<128x128xf32>
      %cst_17 = arith.constant dense<0.000000e+00> : vector<128xf32>
      %21 = vector.multi_reduction <add>, %20, %cst_17 [0] : vector<128x128xf32> to vector<128xf32>
      %22 = vector.shape_cast %21 : vector<128xf32> to vector<1x128xf32>
      %23 = vector.shape_cast %19 : vector<1x128xf32> to vector<1x128xf32>
      %24 = vector.broadcast %23 : vector<1x128xf32> to vector<8x128xf32>
      %c0_18 = arith.constant 0 : index
      %c0_19 = arith.constant 0 : index
      %25 = vector.load %arg7[%c0_18, %c0_19] : memref<8x128xf32, #tpu.memory_space<vmem>>, vector<8x128xf32>
      tpu.vector_store %arg7[%c0_18, %c0_19], %24 {strides = array<i32>} : memref<8x128xf32, #tpu.memory_space<vmem>>, vector<8x128xf32>,
      %26 = vector.shape_cast %22 : vector<1x128xf32> to vector<1x128xf32>
      %27 = vector.broadcast %26 : vector<1x128xf32> to vector<8x128xf32>
      %c0_20 = arith.constant 0 : index
      %c0_21 = arith.constant 0 : index
      %28 = vector.load %arg8[%c0_20, %c0_21] : memref<8x128xf32, #tpu.memory_space<vmem>>, vector<8x128xf32>
      tpu.vector_store %arg8[%c0_20, %c0_21], %27 {strides = array<i32>} : memref<8x128xf32, #tpu.memory_space<vmem>>, vector<8x128xf32>,
    } else {
    }
    return
  }
  func.func @transform_0(%arg0: i32, %arg1: i32, %arg2: i32) -> (i32, i32) {
    %c0_i32 = arith.constant 0 : i32
    return %arg0, %arg2 : i32, i32
  }
  func.func @transform_1(%arg0: i32, %arg1: i32, %arg2: i32) -> (i32, i32) {
    %c0_i32 = arith.constant 0 : i32
    return %arg2, %arg1 : i32, i32
  }
  func.func @transform_2(%arg0: i32, %arg1: i32, %arg2: i32) -> (i32, i32) {
    %c0_i32 = arith.constant 0 : i32
    %c0_i32_0 = arith.constant 0 : i32
    return %c0_i32, %arg1 : i32, i32
  }
  func.func @transform_3(%arg0: i32, %arg1: i32, %arg2: i32) -> (i32, i32) {
    %c0_i32 = arith.constant 0 : i32
    return %arg0, %arg1 : i32, i32
  }
  func.func @transform_4(%arg0: i32, %arg1: i32, %arg2: i32) -> (i32, i32) {
    %c0_i32 = arith.constant 0 : i32
    return %arg0, %arg1 : i32, i32
  }
  func.func @transform_5(%arg0: i32, %arg1: i32, %arg2: i32) -> (i32, i32) {
    %c0_i32 = arith.constant 0 : i32
    return %arg0, %arg1 : i32, i32
  }
}

module attributes {stable_mosaic.version = 11 : i64} {
  func.func @_gemm_stats_kernel(%arg0: i32, %arg1: i32, %arg2: i32, %arg3: memref<128x128xbf16, #tpu.memory_space<vmem>>, %arg4: memref<128x128xbf16, #tpu.memory_space<vmem>>, %arg5: memref<1x128xf32, #tpu.memory_space<vmem>>, %arg6: memref<128x128xbf16, #tpu.memory_space<vmem>>, %arg7: memref<8x128xf32, #tpu.memory_space<vmem>>, %arg8: memref<8x128xf32, #tpu.memory_space<vmem>>, %arg9: memref<128x128xf32, #tpu.memory_space<vmem>>) attributes {dimension_semantics = [#tpu.dimension_semantics<parallel>, #tpu.dimension_semantics<parallel>, #tpu.dimension_semantics<arbitrary>], iteration_bounds = array<i64: 1, 1, 1>, scalar_prefetch = 0 : i64, scratch_operands = 1 : i64, tpu.core_type = #tpu.core_type<tc>, window_params = [{transform_indices = @transform_0, window_bounds = array<i64: 128, 128>}, {transform_indices = @transform_1, window_bounds = array<i64: 128, 128>}, {transform_indices = @transform_2, window_bounds = array<i64: 1, 128>}, {transform_indices = @transform_3, window_bounds = array<i64: 128, 128>}, {transform_indices = @transform_4, window_bounds = array<i64: 8, 128>}, {transform_indices = @transform_5, window_bounds = array<i64: 8, 128>}]} {
    %c0_i32 = arith.constant 0 : i32
    %0 = arith.cmpi eq, %arg2, %c0_i32 : i32
    %1 = arith.extui %0 : i1 to i32
    %c0_i32_0 = arith.constant 0 : i32
    %2 = arith.cmpi ne, %1, %c0_i32_0 : i32
    scf.if %2 {
      %cst_10 = arith.constant 0.000000e+00 : f32
      %12 = vector.broadcast %cst_10 : f32 to vector<128x128xf32>
      %c0_11 = arith.constant 0 : index
      %c0_12 = arith.constant 0 : index
      %13 = vector.load %arg9[%c0_11, %c0_12] : memref<128x128xf32, #tpu.memory_space<vmem>>, vector<128x128xf32>
      tpu.vector_store %arg9[%c0_11, %c0_12], %12 {strides = array<i32>} : memref<128x128xf32, #tpu.memory_space<vmem>>, vector<128x128xf32>,
    } else {
    }
    %c0 = arith.constant 0 : index
    %c0_1 = arith.constant 0 : index
    %3 = vector.load %arg9[%c0, %c0_1] : memref<128x128xf32, #tpu.memory_space<vmem>>, vector<128x128xf32>
    %c0_2 = arith.constant 0 : index
    %c0_3 = arith.constant 0 : index
    %4 = vector.load %arg3[%c0_2, %c0_3] : memref<128x128xbf16, #tpu.memory_space<vmem>>, vector<128x128xbf16>
    %c0_4 = arith.constant 0 : index
    %c0_5 = arith.constant 0 : index
    %5 = vector.load %arg4[%c0_4, %c0_5] : memref<128x128xbf16, #tpu.memory_space<vmem>>, vector<128x128xbf16>
    %cst = arith.constant dense<0.000000e+00> : vector<128x128xf32>
    %6 = tpu.matmul %4, %5, %cst {dimension_numbers = #tpu.dot_dimension_numbers<[1], [0], [0], [1], [0, 0, 1, 1], [], []>} : vector<128x128xbf16>, vector<128x128xbf16>, vector<128x128xf32> -> vector<128x128xf32>
    %7 = arith.addf %3, %6 : vector<128x128xf32>
    %c0_6 = arith.constant 0 : index
    %c0_7 = arith.constant 0 : index
    %8 = vector.load %arg9[%c0_6, %c0_7] : memref<128x128xf32, #tpu.memory_space<vmem>>, vector<128x128xf32>
    tpu.vector_store %arg9[%c0_6, %c0_7], %7 {strides = array<i32>} : memref<128x128xf32, #tpu.memory_space<vmem>>, vector<128x128xf32>,
    %c0_i32_8 = arith.constant 0 : i32
    %9 = arith.cmpi eq, %arg2, %c0_i32_8 : i32
    %10 = arith.extui %9 : i1 to i32
    %c0_i32_9 = arith.constant 0 : i32
    %11 = arith.cmpi ne, %10, %c0_i32_9 : i32
    scf.if %11 {
      %c0_10 = arith.constant 0 : index
      %c0_11 = arith.constant 0 : index
      %12 = vector.load %arg9[%c0_10, %c0_11] : memref<128x128xf32, #tpu.memory_space<vmem>>, vector<128x128xf32>
      %c0_12 = arith.constant 0 : index
      %c0_13 = arith.constant 0 : index
      %13 = vector.load %arg5[%c0_12, %c0_13] : memref<1x128xf32, #tpu.memory_space<vmem>>, vector<1x128xf32>
      %14 = vector.broadcast %13 : vector<1x128xf32> to vector<128x128xf32>
      %15 = arith.addf %12, %14 : vector<128x128xf32>
      %16 = arith.truncf %15 : vector<128x128xf32> to vector<128x128xbf16>
      %c0_14 = arith.constant 0 : index
      %c0_15 = arith.constant 0 : index
      %17 = vector.load %arg6[%c0_14, %c0_15] : memref<128x128xbf16, #tpu.memory_space<vmem>>, vector<128x128xbf16>
      tpu.vector_store %arg6[%c0_14, %c0_15], %16 {strides = array<i32>} : memref<128x128xbf16, #tpu.memory_space<vmem>>, vector<128x128xbf16>,
      %cst_16 = arith.constant dense<0.000000e+00> : vector<128xf32>
      %18 = vector.multi_reduction <add>, %15, %cst_16 [0] : vector<128x128xf32> to vector<128xf32>
      %19 = vector.shape_cast %18 : vector<128xf32> to vector<1x128xf32>
      %20 = arith.mulf %15, %15 : vector<128x128xf32>
      %cst_17 = arith.constant dense<0.000000e+00> : vector<128xf32>
      %21 = vector.multi_reduction <add>, %20, %cst_17 [0] : vector<128x128xf32> to vector<128xf32>
      %22 = vector.shape_cast %21 : vector<128xf32> to vector<1x128xf32>
      %23 = vector.shape_cast %19 : vector<1x128xf32> to vector<1x128xf32>
      %24 = vector.broadcast %23 : vector<1x128xf32> to vector<8x128xf32>
      %c0_18 = arith.constant 0 : index
      %c0_19 = arith.constant 0 : index
      %25 = vector.load %arg7[%c0_18, %c0_19] : memref<8x128xf32, #tpu.memory_space<vmem>>, vector<8x128xf32>
      tpu.vector_store %arg7[%c0_18, %c0_19], %24 {strides = array<i32>} : memref<8x128xf32, #tpu.memory_space<vmem>>, vector<8x128xf32>,
      %26 = vector.shape_cast %22 : vector<1x128xf32> to vector<1x128xf32>
      %27 = vector.broadcast %26 : vector<1x128xf32> to vector<8x128xf32>
      %c0_20 = arith.constant 0 : index
      %c0_21 = arith.constant 0 : index
      %28 = vector.load %arg8[%c0_20, %c0_21] : memref<8x128xf32, #tpu.memory_space<vmem>>, vector<8x128xf32>
      tpu.vector_store %arg8[%c0_20, %c0_21], %27 {strides = array<i32>} : memref<8x128xf32, #tpu.memory_space<vmem>>, vector<8x128xf32>,
    } else {
    }
    return
  }
  func.func @transform_0(%arg0: i32, %arg1: i32, %arg2: i32) -> (i32, i32) {
    %c0_i32 = arith.constant 0 : i32
    return %arg0, %arg2 : i32, i32
  }
  func.func @transform_1(%arg0: i32, %arg1: i32, %arg2: i32) -> (i32, i32) {
    %c0_i32 = arith.constant 0 : i32
    return %arg2, %arg1 : i32, i32
  }
  func.func @transform_2(%arg0: i32, %arg1: i32, %arg2: i32) -> (i32, i32) {
    %c0_i32 = arith.constant 0 : i32
    %c0_i32_0 = arith.constant 0 : i32
    return %c0_i32, %arg1 : i32, i32
  }
  func.func @transform_3(%arg0: i32, %arg1: i32, %arg2: i32) -> (i32, i32) {
    %c0_i32 = arith.constant 0 : i32
    return %arg0, %arg1 : i32, i32
  }
  func.func @transform_4(%arg0: i32, %arg1: i32, %arg2: i32) -> (i32, i32) {
    %c0_i32 = arith.constant 0 : i32
    return %arg0, %arg1 : i32, i32
  }
  func.func @transform_5(%arg0: i32, %arg1: i32, %arg2: i32) -> (i32, i32) {
    %c0_i32 = arith.constant 0 : i32
    return %arg0, %arg1 : i32, i32
  }
}

module attributes {stable_mosaic.version = 11 : i64} {
  func.func @_gemm_stats_kernel(%arg0: i32, %arg1: i32, %arg2: i32, %arg3: memref<512x256xbf16, #tpu.memory_space<vmem>>, %arg4: memref<256x128xbf16, #tpu.memory_space<vmem>>, %arg5: memref<1x128xf32, #tpu.memory_space<vmem>>, %arg6: memref<512x128xbf16, #tpu.memory_space<vmem>>, %arg7: memref<8x128xf32, #tpu.memory_space<vmem>>, %arg8: memref<8x128xf32, #tpu.memory_space<vmem>>, %arg9: memref<512x128xf32, #tpu.memory_space<vmem>>) attributes {dimension_semantics = [#tpu.dimension_semantics<parallel>, #tpu.dimension_semantics<parallel>, #tpu.dimension_semantics<arbitrary>], iteration_bounds = array<i64: 4, 1, 1>, scalar_prefetch = 0 : i64, scratch_operands = 1 : i64, tpu.core_type = #tpu.core_type<tc>, window_params = [{transform_indices = @transform_0, window_bounds = array<i64: 512, 256>}, {transform_indices = @transform_1, window_bounds = array<i64: 256, 128>}, {transform_indices = @transform_2, window_bounds = array<i64: 1, 128>}, {transform_indices = @transform_3, window_bounds = array<i64: 512, 128>}, {transform_indices = @transform_4, window_bounds = array<i64: 8, 128>}, {transform_indices = @transform_5, window_bounds = array<i64: 8, 128>}]} {
    %c0_i32 = arith.constant 0 : i32
    %0 = arith.cmpi eq, %arg2, %c0_i32 : i32
    %1 = arith.extui %0 : i1 to i32
    %c0_i32_0 = arith.constant 0 : i32
    %2 = arith.cmpi ne, %1, %c0_i32_0 : i32
    scf.if %2 {
      %cst_10 = arith.constant 0.000000e+00 : f32
      %12 = vector.broadcast %cst_10 : f32 to vector<512x128xf32>
      %c0_11 = arith.constant 0 : index
      %c0_12 = arith.constant 0 : index
      %13 = vector.load %arg9[%c0_11, %c0_12] : memref<512x128xf32, #tpu.memory_space<vmem>>, vector<512x128xf32>
      tpu.vector_store %arg9[%c0_11, %c0_12], %12 {strides = array<i32>} : memref<512x128xf32, #tpu.memory_space<vmem>>, vector<512x128xf32>,
    } else {
    }
    %c0 = arith.constant 0 : index
    %c0_1 = arith.constant 0 : index
    %3 = vector.load %arg9[%c0, %c0_1] : memref<512x128xf32, #tpu.memory_space<vmem>>, vector<512x128xf32>
    %c0_2 = arith.constant 0 : index
    %c0_3 = arith.constant 0 : index
    %4 = vector.load %arg3[%c0_2, %c0_3] : memref<512x256xbf16, #tpu.memory_space<vmem>>, vector<512x256xbf16>
    %c0_4 = arith.constant 0 : index
    %c0_5 = arith.constant 0 : index
    %5 = vector.load %arg4[%c0_4, %c0_5] : memref<256x128xbf16, #tpu.memory_space<vmem>>, vector<256x128xbf16>
    %cst = arith.constant dense<0.000000e+00> : vector<512x128xf32>
    %6 = tpu.matmul %4, %5, %cst {dimension_numbers = #tpu.dot_dimension_numbers<[1], [0], [0], [1], [0, 0, 1, 1], [], []>} : vector<512x256xbf16>, vector<256x128xbf16>, vector<512x128xf32> -> vector<512x128xf32>
    %7 = arith.addf %3, %6 : vector<512x128xf32>
    %c0_6 = arith.constant 0 : index
    %c0_7 = arith.constant 0 : index
    %8 = vector.load %arg9[%c0_6, %c0_7] : memref<512x128xf32, #tpu.memory_space<vmem>>, vector<512x128xf32>
    tpu.vector_store %arg9[%c0_6, %c0_7], %7 {strides = array<i32>} : memref<512x128xf32, #tpu.memory_space<vmem>>, vector<512x128xf32>,
    %c0_i32_8 = arith.constant 0 : i32
    %9 = arith.cmpi eq, %arg2, %c0_i32_8 : i32
    %10 = arith.extui %9 : i1 to i32
    %c0_i32_9 = arith.constant 0 : i32
    %11 = arith.cmpi ne, %10, %c0_i32_9 : i32
    scf.if %11 {
      %c0_10 = arith.constant 0 : index
      %c0_11 = arith.constant 0 : index
      %12 = vector.load %arg9[%c0_10, %c0_11] : memref<512x128xf32, #tpu.memory_space<vmem>>, vector<512x128xf32>
      %c0_12 = arith.constant 0 : index
      %c0_13 = arith.constant 0 : index
      %13 = vector.load %arg5[%c0_12, %c0_13] : memref<1x128xf32, #tpu.memory_space<vmem>>, vector<1x128xf32>
      %14 = vector.broadcast %13 : vector<1x128xf32> to vector<512x128xf32>
      %15 = arith.addf %12, %14 : vector<512x128xf32>
      %16 = arith.truncf %15 : vector<512x128xf32> to vector<512x128xbf16>
      %c0_14 = arith.constant 0 : index
      %c0_15 = arith.constant 0 : index
      %17 = vector.load %arg6[%c0_14, %c0_15] : memref<512x128xbf16, #tpu.memory_space<vmem>>, vector<512x128xbf16>
      tpu.vector_store %arg6[%c0_14, %c0_15], %16 {strides = array<i32>} : memref<512x128xbf16, #tpu.memory_space<vmem>>, vector<512x128xbf16>,
      %cst_16 = arith.constant dense<0.000000e+00> : vector<128xf32>
      %18 = vector.multi_reduction <add>, %15, %cst_16 [0] : vector<512x128xf32> to vector<128xf32>
      %19 = vector.shape_cast %18 : vector<128xf32> to vector<1x128xf32>
      %20 = arith.mulf %15, %15 : vector<512x128xf32>
      %cst_17 = arith.constant dense<0.000000e+00> : vector<128xf32>
      %21 = vector.multi_reduction <add>, %20, %cst_17 [0] : vector<512x128xf32> to vector<128xf32>
      %22 = vector.shape_cast %21 : vector<128xf32> to vector<1x128xf32>
      %23 = vector.shape_cast %19 : vector<1x128xf32> to vector<1x128xf32>
      %24 = vector.broadcast %23 : vector<1x128xf32> to vector<8x128xf32>
      %c0_18 = arith.constant 0 : index
      %c0_19 = arith.constant 0 : index
      %25 = vector.load %arg7[%c0_18, %c0_19] : memref<8x128xf32, #tpu.memory_space<vmem>>, vector<8x128xf32>
      tpu.vector_store %arg7[%c0_18, %c0_19], %24 {strides = array<i32>} : memref<8x128xf32, #tpu.memory_space<vmem>>, vector<8x128xf32>,
      %26 = vector.shape_cast %22 : vector<1x128xf32> to vector<1x128xf32>
      %27 = vector.broadcast %26 : vector<1x128xf32> to vector<8x128xf32>
      %c0_20 = arith.constant 0 : index
      %c0_21 = arith.constant 0 : index
      %28 = vector.load %arg8[%c0_20, %c0_21] : memref<8x128xf32, #tpu.memory_space<vmem>>, vector<8x128xf32>
      tpu.vector_store %arg8[%c0_20, %c0_21], %27 {strides = array<i32>} : memref<8x128xf32, #tpu.memory_space<vmem>>, vector<8x128xf32>,
    } else {
    }
    return
  }
  func.func @transform_0(%arg0: i32, %arg1: i32, %arg2: i32) -> (i32, i32) {
    %c0_i32 = arith.constant 0 : i32
    return %arg0, %arg2 : i32, i32
  }
  func.func @transform_1(%arg0: i32, %arg1: i32, %arg2: i32) -> (i32, i32) {
    %c0_i32 = arith.constant 0 : i32
    return %arg2, %arg1 : i32, i32
  }
  func.func @transform_2(%arg0: i32, %arg1: i32, %arg2: i32) -> (i32, i32) {
    %c0_i32 = arith.constant 0 : i32
    %c0_i32_0 = arith.constant 0 : i32
    return %c0_i32, %arg1 : i32, i32
  }
  func.func @transform_3(%arg0: i32, %arg1: i32, %arg2: i32) -> (i32, i32) {
    %c0_i32 = arith.constant 0 : i32
    return %arg0, %arg1 : i32, i32
  }
  func.func @transform_4(%arg0: i32, %arg1: i32, %arg2: i32) -> (i32, i32) {
    %c0_i32 = arith.constant 0 : i32
    return %arg0, %arg1 : i32, i32
  }
  func.func @transform_5(%arg0: i32, %arg1: i32, %arg2: i32) -> (i32, i32) {
    %c0_i32 = arith.constant 0 : i32
    return %arg0, %arg1 : i32, i32
  }
}

module attributes {stable_mosaic.version = 11 : i64} {
  func.func @_affine_kernel(%arg0: i32, %arg1: memref<128x128xbf16, #tpu.memory_space<vmem>>, %arg2: memref<1x128xf32, #tpu.memory_space<vmem>>, %arg3: memref<1x128xf32, #tpu.memory_space<vmem>>, %arg4: memref<128x128xbf16, #tpu.memory_space<vmem>>) attributes {dimension_semantics = [#tpu.dimension_semantics<parallel>], iteration_bounds = array<i64: 1>, scalar_prefetch = 0 : i64, scratch_operands = 0 : i64, tpu.core_type = #tpu.core_type<tc>, window_params = [{transform_indices = @transform_0, window_bounds = array<i64: 128, 128>}, {pipeline_mode = #tpu.pipeline_mode<synchronous>, transform_indices = @transform_1, window_bounds = array<i64: 1, 128>}, {pipeline_mode = #tpu.pipeline_mode<synchronous>, transform_indices = @transform_2, window_bounds = array<i64: 1, 128>}, {transform_indices = @transform_3, window_bounds = array<i64: 128, 128>}]} {
    %c0 = arith.constant 0 : index
    %c0_0 = arith.constant 0 : index
    %0 = vector.load %arg1[%c0, %c0_0] : memref<128x128xbf16, #tpu.memory_space<vmem>>, vector<128x128xbf16>
    %1 = arith.extf %0 : vector<128x128xbf16> to vector<128x128xf32>
    %c0_1 = arith.constant 0 : index
    %c0_2 = arith.constant 0 : index
    %2 = vector.load %arg2[%c0_1, %c0_2] : memref<1x128xf32, #tpu.memory_space<vmem>>, vector<1x128xf32>
    %3 = vector.broadcast %2 : vector<1x128xf32> to vector<128x128xf32>
    %4 = arith.mulf %1, %3 : vector<128x128xf32>
    %c0_3 = arith.constant 0 : index
    %c0_4 = arith.constant 0 : index
    %5 = vector.load %arg3[%c0_3, %c0_4] : memref<1x128xf32, #tpu.memory_space<vmem>>, vector<1x128xf32>
    %6 = vector.broadcast %5 : vector<1x128xf32> to vector<128x128xf32>
    %7 = arith.addf %4, %6 : vector<128x128xf32>
    %cst = arith.constant 0.000000e+00 : f32
    %8 = vector.broadcast %cst : f32 to vector<128x128xf32>
    %9 = arith.maximumf %7, %8 : vector<128x128xf32>
    %10 = arith.truncf %9 : vector<128x128xf32> to vector<128x128xbf16>
    %c0_5 = arith.constant 0 : index
    %c0_6 = arith.constant 0 : index
    %11 = vector.load %arg4[%c0_5, %c0_6] : memref<128x128xbf16, #tpu.memory_space<vmem>>, vector<128x128xbf16>
    tpu.vector_store %arg4[%c0_5, %c0_6], %10 {strides = array<i32>} : memref<128x128xbf16, #tpu.memory_space<vmem>>, vector<128x128xbf16>,
    return
  }
  func.func @transform_0(%arg0: i32) -> (i32, i32) {
    %c0_i32 = arith.constant 0 : i32
    %c0_i32_0 = arith.constant 0 : i32
    return %arg0, %c0_i32 : i32, i32
  }
  func.func @transform_1(%arg0: i32) -> (i32, i32) {
    %c0_i32 = arith.constant 0 : i32
    %c0_i32_0 = arith.constant 0 : i32
    %c0_i32_1 = arith.constant 0 : i32
    return %c0_i32, %c0_i32_0 : i32, i32
  }
  func.func @transform_2(%arg0: i32) -> (i32, i32) {
    %c0_i32 = arith.constant 0 : i32
    %c0_i32_0 = arith.constant 0 : i32
    %c0_i32_1 = arith.constant 0 : i32
    return %c0_i32, %c0_i32_0 : i32, i32
  }
  func.func @transform_3(%arg0: i32) -> (i32, i32) {
    %c0_i32 = arith.constant 0 : i32
    %c0_i32_0 = arith.constant 0 : i32
    return %arg0, %c0_i32 : i32, i32
  }
}

module attributes {stable_mosaic.version = 11 : i64} {
  func.func @_affine_res_kernel(%arg0: i32, %arg1: memref<64x128xbf16, #tpu.memory_space<vmem>>, %arg2: memref<1x128xf32, #tpu.memory_space<vmem>>, %arg3: memref<1x128xf32, #tpu.memory_space<vmem>>, %arg4: memref<64x128xbf16, #tpu.memory_space<vmem>>, %arg5: memref<64x128xbf16, #tpu.memory_space<vmem>>) attributes {dimension_semantics = [#tpu.dimension_semantics<parallel>], iteration_bounds = array<i64: 1>, scalar_prefetch = 0 : i64, scratch_operands = 0 : i64, tpu.core_type = #tpu.core_type<tc>, window_params = [{transform_indices = @transform_0, window_bounds = array<i64: 64, 128>}, {pipeline_mode = #tpu.pipeline_mode<synchronous>, transform_indices = @transform_1, window_bounds = array<i64: 1, 128>}, {pipeline_mode = #tpu.pipeline_mode<synchronous>, transform_indices = @transform_2, window_bounds = array<i64: 1, 128>}, {transform_indices = @transform_3, window_bounds = array<i64: 64, 128>}, {transform_indices = @transform_4, window_bounds = array<i64: 64, 128>}]} {
    %c0 = arith.constant 0 : index
    %c0_0 = arith.constant 0 : index
    %0 = vector.load %arg1[%c0, %c0_0] : memref<64x128xbf16, #tpu.memory_space<vmem>>, vector<64x128xbf16>
    %1 = arith.extf %0 : vector<64x128xbf16> to vector<64x128xf32>
    %c0_1 = arith.constant 0 : index
    %c0_2 = arith.constant 0 : index
    %2 = vector.load %arg2[%c0_1, %c0_2] : memref<1x128xf32, #tpu.memory_space<vmem>>, vector<1x128xf32>
    %3 = vector.broadcast %2 : vector<1x128xf32> to vector<64x128xf32>
    %4 = arith.mulf %1, %3 : vector<64x128xf32>
    %c0_3 = arith.constant 0 : index
    %c0_4 = arith.constant 0 : index
    %5 = vector.load %arg3[%c0_3, %c0_4] : memref<1x128xf32, #tpu.memory_space<vmem>>, vector<1x128xf32>
    %6 = vector.broadcast %5 : vector<1x128xf32> to vector<64x128xf32>
    %7 = arith.addf %4, %6 : vector<64x128xf32>
    %cst = arith.constant 0.000000e+00 : f32
    %8 = vector.broadcast %cst : f32 to vector<64x128xf32>
    %9 = arith.maximumf %7, %8 : vector<64x128xf32>
    %c0_5 = arith.constant 0 : index
    %c0_6 = arith.constant 0 : index
    %10 = vector.load %arg4[%c0_5, %c0_6] : memref<64x128xbf16, #tpu.memory_space<vmem>>, vector<64x128xbf16>
    %11 = arith.extf %10 : vector<64x128xbf16> to vector<64x128xf32>
    %12 = arith.addf %9, %11 : vector<64x128xf32>
    %13 = arith.truncf %12 : vector<64x128xf32> to vector<64x128xbf16>
    %c0_7 = arith.constant 0 : index
    %c0_8 = arith.constant 0 : index
    %14 = vector.load %arg5[%c0_7, %c0_8] : memref<64x128xbf16, #tpu.memory_space<vmem>>, vector<64x128xbf16>
    tpu.vector_store %arg5[%c0_7, %c0_8], %13 {strides = array<i32>} : memref<64x128xbf16, #tpu.memory_space<vmem>>, vector<64x128xbf16>,
    return
  }
  func.func @transform_0(%arg0: i32) -> (i32, i32) {
    %c0_i32 = arith.constant 0 : i32
    %c0_i32_0 = arith.constant 0 : i32
    return %arg0, %c0_i32 : i32, i32
  }
  func.func @transform_1(%arg0: i32) -> (i32, i32) {
    %c0_i32 = arith.constant 0 : i32
    %c0_i32_0 = arith.constant 0 : i32
    %c0_i32_1 = arith.constant 0 : i32
    return %c0_i32, %c0_i32_0 : i32, i32
  }
  func.func @transform_2(%arg0: i32) -> (i32, i32) {
    %c0_i32 = arith.constant 0 : i32
    %c0_i32_0 = arith.constant 0 : i32
    %c0_i32_1 = arith.constant 0 : i32
    return %c0_i32, %c0_i32_0 : i32, i32
  }
  func.func @transform_3(%arg0: i32) -> (i32, i32) {
    %c0_i32 = arith.constant 0 : i32
    %c0_i32_0 = arith.constant 0 : i32
    return %arg0, %c0_i32 : i32, i32
  }
  func.func @transform_4(%arg0: i32) -> (i32, i32) {
    %c0_i32 = arith.constant 0 : i32
    %c0_i32_0 = arith.constant 0 : i32
    return %arg0, %c0_i32 : i32, i32
  }
}

module attributes {stable_mosaic.version = 11 : i64} {
  func.func @_affine_res_kernel(%arg0: i32, %arg1: memref<64x128xbf16, #tpu.memory_space<vmem>>, %arg2: memref<1x128xf32, #tpu.memory_space<vmem>>, %arg3: memref<1x128xf32, #tpu.memory_space<vmem>>, %arg4: memref<64x128xbf16, #tpu.memory_space<vmem>>, %arg5: memref<64x128xbf16, #tpu.memory_space<vmem>>) attributes {dimension_semantics = [#tpu.dimension_semantics<parallel>], iteration_bounds = array<i64: 1>, scalar_prefetch = 0 : i64, scratch_operands = 0 : i64, tpu.core_type = #tpu.core_type<tc>, window_params = [{transform_indices = @transform_0, window_bounds = array<i64: 64, 128>}, {pipeline_mode = #tpu.pipeline_mode<synchronous>, transform_indices = @transform_1, window_bounds = array<i64: 1, 128>}, {pipeline_mode = #tpu.pipeline_mode<synchronous>, transform_indices = @transform_2, window_bounds = array<i64: 1, 128>}, {transform_indices = @transform_3, window_bounds = array<i64: 64, 128>}, {transform_indices = @transform_4, window_bounds = array<i64: 64, 128>}]} {
    %c0 = arith.constant 0 : index
    %c0_0 = arith.constant 0 : index
    %0 = vector.load %arg1[%c0, %c0_0] : memref<64x128xbf16, #tpu.memory_space<vmem>>, vector<64x128xbf16>
    %1 = arith.extf %0 : vector<64x128xbf16> to vector<64x128xf32>
    %c0_1 = arith.constant 0 : index
    %c0_2 = arith.constant 0 : index
    %2 = vector.load %arg2[%c0_1, %c0_2] : memref<1x128xf32, #tpu.memory_space<vmem>>, vector<1x128xf32>
    %3 = vector.broadcast %2 : vector<1x128xf32> to vector<64x128xf32>
    %4 = arith.mulf %1, %3 : vector<64x128xf32>
    %c0_3 = arith.constant 0 : index
    %c0_4 = arith.constant 0 : index
    %5 = vector.load %arg3[%c0_3, %c0_4] : memref<1x128xf32, #tpu.memory_space<vmem>>, vector<1x128xf32>
    %6 = vector.broadcast %5 : vector<1x128xf32> to vector<64x128xf32>
    %7 = arith.addf %4, %6 : vector<64x128xf32>
    %c0_5 = arith.constant 0 : index
    %c0_6 = arith.constant 0 : index
    %8 = vector.load %arg4[%c0_5, %c0_6] : memref<64x128xbf16, #tpu.memory_space<vmem>>, vector<64x128xbf16>
    %9 = arith.extf %8 : vector<64x128xbf16> to vector<64x128xf32>
    %10 = arith.addf %7, %9 : vector<64x128xf32>
    %11 = arith.truncf %10 : vector<64x128xf32> to vector<64x128xbf16>
    %c0_7 = arith.constant 0 : index
    %c0_8 = arith.constant 0 : index
    %12 = vector.load %arg5[%c0_7, %c0_8] : memref<64x128xbf16, #tpu.memory_space<vmem>>, vector<64x128xbf16>
    tpu.vector_store %arg5[%c0_7, %c0_8], %11 {strides = array<i32>} : memref<64x128xbf16, #tpu.memory_space<vmem>>, vector<64x128xbf16>,
    return
  }
  func.func @transform_0(%arg0: i32) -> (i32, i32) {
    %c0_i32 = arith.constant 0 : i32
    %c0_i32_0 = arith.constant 0 : i32
    return %arg0, %c0_i32 : i32, i32
  }
  func.func @transform_1(%arg0: i32) -> (i32, i32) {
    %c0_i32 = arith.constant 0 : i32
    %c0_i32_0 = arith.constant 0 : i32
    %c0_i32_1 = arith.constant 0 : i32
    return %c0_i32, %c0_i32_0 : i32, i32
  }
  func.func @transform_2(%arg0: i32) -> (i32, i32) {
    %c0_i32 = arith.constant 0 : i32
    %c0_i32_0 = arith.constant 0 : i32
    %c0_i32_1 = arith.constant 0 : i32
    return %c0_i32, %c0_i32_0 : i32, i32
  }
  func.func @transform_3(%arg0: i32) -> (i32, i32) {
    %c0_i32 = arith.constant 0 : i32
    %c0_i32_0 = arith.constant 0 : i32
    return %arg0, %c0_i32 : i32, i32
  }
  func.func @transform_4(%arg0: i32) -> (i32, i32) {
    %c0_i32 = arith.constant 0 : i32
    %c0_i32_0 = arith.constant 0 : i32
    return %arg0, %c0_i32 : i32, i32
  }
}

module attributes {stable_mosaic.version = 11 : i64} {
  func.func @_gemm_stats_kernel(%arg0: i32, %arg1: i32, %arg2: i32, %arg3: memref<512x128xbf16, #tpu.memory_space<vmem>>, %arg4: memref<128x128xbf16, #tpu.memory_space<vmem>>, %arg5: memref<1x128xf32, #tpu.memory_space<vmem>>, %arg6: memref<512x128xbf16, #tpu.memory_space<vmem>>, %arg7: memref<8x128xf32, #tpu.memory_space<vmem>>, %arg8: memref<8x128xf32, #tpu.memory_space<vmem>>, %arg9: memref<512x128xf32, #tpu.memory_space<vmem>>) attributes {dimension_semantics = [#tpu.dimension_semantics<parallel>, #tpu.dimension_semantics<parallel>, #tpu.dimension_semantics<arbitrary>], iteration_bounds = array<i64: 1, 1, 1>, scalar_prefetch = 0 : i64, scratch_operands = 1 : i64, tpu.core_type = #tpu.core_type<tc>, window_params = [{transform_indices = @transform_0, window_bounds = array<i64: 512, 128>}, {transform_indices = @transform_1, window_bounds = array<i64: 128, 128>}, {transform_indices = @transform_2, window_bounds = array<i64: 1, 128>}, {transform_indices = @transform_3, window_bounds = array<i64: 512, 128>}, {transform_indices = @transform_4, window_bounds = array<i64: 8, 128>}, {transform_indices = @transform_5, window_bounds = array<i64: 8, 128>}]} {
    %c0_i32 = arith.constant 0 : i32
    %0 = arith.cmpi eq, %arg2, %c0_i32 : i32
    %1 = arith.extui %0 : i1 to i32
    %c0_i32_0 = arith.constant 0 : i32
    %2 = arith.cmpi ne, %1, %c0_i32_0 : i32
    scf.if %2 {
      %cst_10 = arith.constant 0.000000e+00 : f32
      %12 = vector.broadcast %cst_10 : f32 to vector<512x128xf32>
      %c0_11 = arith.constant 0 : index
      %c0_12 = arith.constant 0 : index
      %13 = vector.load %arg9[%c0_11, %c0_12] : memref<512x128xf32, #tpu.memory_space<vmem>>, vector<512x128xf32>
      tpu.vector_store %arg9[%c0_11, %c0_12], %12 {strides = array<i32>} : memref<512x128xf32, #tpu.memory_space<vmem>>, vector<512x128xf32>,
    } else {
    }
    %c0 = arith.constant 0 : index
    %c0_1 = arith.constant 0 : index
    %3 = vector.load %arg9[%c0, %c0_1] : memref<512x128xf32, #tpu.memory_space<vmem>>, vector<512x128xf32>
    %c0_2 = arith.constant 0 : index
    %c0_3 = arith.constant 0 : index
    %4 = vector.load %arg3[%c0_2, %c0_3] : memref<512x128xbf16, #tpu.memory_space<vmem>>, vector<512x128xbf16>
    %c0_4 = arith.constant 0 : index
    %c0_5 = arith.constant 0 : index
    %5 = vector.load %arg4[%c0_4, %c0_5] : memref<128x128xbf16, #tpu.memory_space<vmem>>, vector<128x128xbf16>
    %cst = arith.constant dense<0.000000e+00> : vector<512x128xf32>
    %6 = tpu.matmul %4, %5, %cst {dimension_numbers = #tpu.dot_dimension_numbers<[1], [0], [0], [1], [0, 0, 1, 1], [], []>} : vector<512x128xbf16>, vector<128x128xbf16>, vector<512x128xf32> -> vector<512x128xf32>
    %7 = arith.addf %3, %6 : vector<512x128xf32>
    %c0_6 = arith.constant 0 : index
    %c0_7 = arith.constant 0 : index
    %8 = vector.load %arg9[%c0_6, %c0_7] : memref<512x128xf32, #tpu.memory_space<vmem>>, vector<512x128xf32>
    tpu.vector_store %arg9[%c0_6, %c0_7], %7 {strides = array<i32>} : memref<512x128xf32, #tpu.memory_space<vmem>>, vector<512x128xf32>,
    %c0_i32_8 = arith.constant 0 : i32
    %9 = arith.cmpi eq, %arg2, %c0_i32_8 : i32
    %10 = arith.extui %9 : i1 to i32
    %c0_i32_9 = arith.constant 0 : i32
    %11 = arith.cmpi ne, %10, %c0_i32_9 : i32
    scf.if %11 {
      %c0_10 = arith.constant 0 : index
      %c0_11 = arith.constant 0 : index
      %12 = vector.load %arg9[%c0_10, %c0_11] : memref<512x128xf32, #tpu.memory_space<vmem>>, vector<512x128xf32>
      %c0_12 = arith.constant 0 : index
      %c0_13 = arith.constant 0 : index
      %13 = vector.load %arg5[%c0_12, %c0_13] : memref<1x128xf32, #tpu.memory_space<vmem>>, vector<1x128xf32>
      %14 = vector.broadcast %13 : vector<1x128xf32> to vector<512x128xf32>
      %15 = arith.addf %12, %14 : vector<512x128xf32>
      %16 = arith.truncf %15 : vector<512x128xf32> to vector<512x128xbf16>
      %c0_14 = arith.constant 0 : index
      %c0_15 = arith.constant 0 : index
      %17 = vector.load %arg6[%c0_14, %c0_15] : memref<512x128xbf16, #tpu.memory_space<vmem>>, vector<512x128xbf16>
      tpu.vector_store %arg6[%c0_14, %c0_15], %16 {strides = array<i32>} : memref<512x128xbf16, #tpu.memory_space<vmem>>, vector<512x128xbf16>,
      %cst_16 = arith.constant dense<0.000000e+00> : vector<128xf32>
      %18 = vector.multi_reduction <add>, %15, %cst_16 [0] : vector<512x128xf32> to vector<128xf32>
      %19 = vector.shape_cast %18 : vector<128xf32> to vector<1x128xf32>
      %20 = arith.mulf %15, %15 : vector<512x128xf32>
      %cst_17 = arith.constant dense<0.000000e+00> : vector<128xf32>
      %21 = vector.multi_reduction <add>, %20, %cst_17 [0] : vector<512x128xf32> to vector<128xf32>
      %22 = vector.shape_cast %21 : vector<128xf32> to vector<1x128xf32>
      %23 = vector.shape_cast %19 : vector<1x128xf32> to vector<1x128xf32>
      %24 = vector.broadcast %23 : vector<1x128xf32> to vector<8x128xf32>
      %c0_18 = arith.constant 0 : index
      %c0_19 = arith.constant 0 : index
      %25 = vector.load %arg7[%c0_18, %c0_19] : memref<8x128xf32, #tpu.memory_space<vmem>>, vector<8x128xf32>
      tpu.vector_store %arg7[%c0_18, %c0_19], %24 {strides = array<i32>} : memref<8x128xf32, #tpu.memory_space<vmem>>, vector<8x128xf32>,
      %26 = vector.shape_cast %22 : vector<1x128xf32> to vector<1x128xf32>
      %27 = vector.broadcast %26 : vector<1x128xf32> to vector<8x128xf32>
      %c0_20 = arith.constant 0 : index
      %c0_21 = arith.constant 0 : index
      %28 = vector.load %arg8[%c0_20, %c0_21] : memref<8x128xf32, #tpu.memory_space<vmem>>, vector<8x128xf32>
      tpu.vector_store %arg8[%c0_20, %c0_21], %27 {strides = array<i32>} : memref<8x128xf32, #tpu.memory_space<vmem>>, vector<8x128xf32>,
    } else {
    }
    return
  }
  func.func @transform_0(%arg0: i32, %arg1: i32, %arg2: i32) -> (i32, i32) {
    %c0_i32 = arith.constant 0 : i32
    return %arg0, %arg2 : i32, i32
  }
  func.func @transform_1(%arg0: i32, %arg1: i32, %arg2: i32) -> (i32, i32) {
    %c0_i32 = arith.constant 0 : i32
    return %arg2, %arg1 : i32, i32
  }
  func.func @transform_2(%arg0: i32, %arg1: i32, %arg2: i32) -> (i32, i32) {
    %c0_i32 = arith.constant 0 : i32
    %c0_i32_0 = arith.constant 0 : i32
    return %c0_i32, %arg1 : i32, i32
  }
  func.func @transform_3(%arg0: i32, %arg1: i32, %arg2: i32) -> (i32, i32) {
    %c0_i32 = arith.constant 0 : i32
    return %arg0, %arg1 : i32, i32
  }
  func.func @transform_4(%arg0: i32, %arg1: i32, %arg2: i32) -> (i32, i32) {
    %c0_i32 = arith.constant 0 : i32
    return %arg0, %arg1 : i32, i32
  }
  func.func @transform_5(%arg0: i32, %arg1: i32, %arg2: i32) -> (i32, i32) {
    %c0_i32 = arith.constant 0 : i32
    return %arg0, %arg1 : i32, i32
  }
}

module attributes {stable_mosaic.version = 11 : i64} {
  func.func @_gemm_act_kernel(%arg0: i32, %arg1: i32, %arg2: i32, %arg3: memref<512x512xbf16, #tpu.memory_space<vmem>>, %arg4: memref<512x128xbf16, #tpu.memory_space<vmem>>, %arg5: memref<1x128xf32, #tpu.memory_space<vmem>>, %arg6: memref<512x128xf32, #tpu.memory_space<vmem>>, %arg7: memref<512x128xf32, #tpu.memory_space<vmem>>) attributes {dimension_semantics = [#tpu.dimension_semantics<parallel>, #tpu.dimension_semantics<parallel>, #tpu.dimension_semantics<arbitrary>], iteration_bounds = array<i64: 4, 1, 1>, scalar_prefetch = 0 : i64, scratch_operands = 1 : i64, tpu.core_type = #tpu.core_type<tc>, window_params = [{transform_indices = @transform_0, window_bounds = array<i64: 512, 512>}, {transform_indices = @transform_1, window_bounds = array<i64: 512, 128>}, {transform_indices = @transform_2, window_bounds = array<i64: 1, 128>}, {transform_indices = @transform_3, window_bounds = array<i64: 512, 128>}]} {
    %c0_i32 = arith.constant 0 : i32
    %0 = arith.cmpi eq, %arg2, %c0_i32 : i32
    %1 = arith.extui %0 : i1 to i32
    %c0_i32_0 = arith.constant 0 : i32
    %2 = arith.cmpi ne, %1, %c0_i32_0 : i32
    scf.if %2 {
      %cst_10 = arith.constant 0.000000e+00 : f32
      %12 = vector.broadcast %cst_10 : f32 to vector<512x128xf32>
      %c0_11 = arith.constant 0 : index
      %c0_12 = arith.constant 0 : index
      %13 = vector.load %arg7[%c0_11, %c0_12] : memref<512x128xf32, #tpu.memory_space<vmem>>, vector<512x128xf32>
      tpu.vector_store %arg7[%c0_11, %c0_12], %12 {strides = array<i32>} : memref<512x128xf32, #tpu.memory_space<vmem>>, vector<512x128xf32>,
    } else {
    }
    %c0 = arith.constant 0 : index
    %c0_1 = arith.constant 0 : index
    %3 = vector.load %arg7[%c0, %c0_1] : memref<512x128xf32, #tpu.memory_space<vmem>>, vector<512x128xf32>
    %c0_2 = arith.constant 0 : index
    %c0_3 = arith.constant 0 : index
    %4 = vector.load %arg3[%c0_2, %c0_3] : memref<512x512xbf16, #tpu.memory_space<vmem>>, vector<512x512xbf16>
    %c0_4 = arith.constant 0 : index
    %c0_5 = arith.constant 0 : index
    %5 = vector.load %arg4[%c0_4, %c0_5] : memref<512x128xbf16, #tpu.memory_space<vmem>>, vector<512x128xbf16>
    %cst = arith.constant dense<0.000000e+00> : vector<512x128xf32>
    %6 = tpu.matmul %4, %5, %cst {dimension_numbers = #tpu.dot_dimension_numbers<[1], [0], [0], [1], [0, 0, 1, 1], [], []>} : vector<512x512xbf16>, vector<512x128xbf16>, vector<512x128xf32> -> vector<512x128xf32>
    %7 = arith.addf %3, %6 : vector<512x128xf32>
    %c0_6 = arith.constant 0 : index
    %c0_7 = arith.constant 0 : index
    %8 = vector.load %arg7[%c0_6, %c0_7] : memref<512x128xf32, #tpu.memory_space<vmem>>, vector<512x128xf32>
    tpu.vector_store %arg7[%c0_6, %c0_7], %7 {strides = array<i32>} : memref<512x128xf32, #tpu.memory_space<vmem>>, vector<512x128xf32>,
    %c0_i32_8 = arith.constant 0 : i32
    %9 = arith.cmpi eq, %arg2, %c0_i32_8 : i32
    %10 = arith.extui %9 : i1 to i32
    %c0_i32_9 = arith.constant 0 : i32
    %11 = arith.cmpi ne, %10, %c0_i32_9 : i32
    scf.if %11 {
      %c0_10 = arith.constant 0 : index
      %c0_11 = arith.constant 0 : index
      %12 = vector.load %arg7[%c0_10, %c0_11] : memref<512x128xf32, #tpu.memory_space<vmem>>, vector<512x128xf32>
      %c0_12 = arith.constant 0 : index
      %c0_13 = arith.constant 0 : index
      %13 = vector.load %arg5[%c0_12, %c0_13] : memref<1x128xf32, #tpu.memory_space<vmem>>, vector<1x128xf32>
      %14 = vector.broadcast %13 : vector<1x128xf32> to vector<512x128xf32>
      %15 = arith.addf %12, %14 : vector<512x128xf32>
      %16 = math.tanh %15 : vector<512x128xf32>
      %c0_14 = arith.constant 0 : index
      %c0_15 = arith.constant 0 : index
      %17 = vector.load %arg6[%c0_14, %c0_15] : memref<512x128xf32, #tpu.memory_space<vmem>>, vector<512x128xf32>
      tpu.vector_store %arg6[%c0_14, %c0_15], %16 {strides = array<i32>} : memref<512x128xf32, #tpu.memory_space<vmem>>, vector<512x128xf32>,
    } else {
    }
    return
  }
  func.func @transform_0(%arg0: i32, %arg1: i32, %arg2: i32) -> (i32, i32) {
    %c0_i32 = arith.constant 0 : i32
    return %arg0, %arg2 : i32, i32
  }
  func.func @transform_1(%arg0: i32, %arg1: i32, %arg2: i32) -> (i32, i32) {
    %c0_i32 = arith.constant 0 : i32
    return %arg2, %arg1 : i32, i32
  }
  func.func @transform_2(%arg0: i32, %arg1: i32, %arg2: i32) -> (i32, i32) {
    %c0_i32 = arith.constant 0 : i32
    %c0_i32_0 = arith.constant 0 : i32
    return %c0_i32, %arg1 : i32, i32
  }
  func.func @transform_3(%arg0: i32, %arg1: i32, %arg2: i32) -> (i32, i32) {
    %c0_i32 = arith.constant 0 : i32
    return %arg0, %arg1 : i32, i32
  }
}

</mosaic_0001>

<bundles_post_ra>
// kernel: tile.163
= control target key start
LH: loop header
LB: loop body
LE: loop exit
PB: predicated region body
PF: predicated region fallthrough
CT: control target
= control target key end

     0   :  { %s22_s0 = inlined_call_operand.vmem [shape: f32[16], index: 0, kind: input, shape index: {}]   ;;  %s23_s1 = inlined_call_operand.vmem [shape: f32[8,16], index: 1, kind: output, shape index: {}]  }
   0x1   :  { %v4_v0 = vld [vmem:[%s22_s0] ss:$0 sm:$0xff] }
   0x2   :  { %5 = vst [vmem:[%s23_s1] sm:$0xff] %v4_v0 }

// kernel: local_enhancer_forward.43
= control target key start
LH: loop header
LB: loop body
LE: loop exit
PB: predicated region body
PF: predicated region fallthrough
CT: control target
= control target key end

     0   :  { %s176_s0 = inlined_call_operand.vmem [shape: bf16[64,128], index: 0, kind: input, shape index: {}]   ;;  %s177_s1 = inlined_call_operand.vmem [shape: f32[1,128], index: 1, kind: input, shape index: {}]   ;;  %s178_s2 = inlined_call_operand.vmem [shape: f32[1,128], index: 2, kind: input, shape index: {}]   ;;  %s179_s3 = inlined_call_operand.vmem [shape: bf16[64,128], index: 3, kind: output, shape index: {}]  }
   0x1   :  { %v83_v0 = vld [vmem:[%s176_s0] sm:$0xff]   ;;  %v118_v5 = vld [vmem:[%s176_s0 + $0x8] sm:$0xff]   ;;  %v119_v8 = vld [vmem:[%s176_s0 + $0x10] sm:$0xff]  }
   0x2   :  { %v124_v1 = vld [vmem:[%s177_s1] ss:$0 sm:$0xff]  ;;  %v84_v2 = vunpack.c.l.bf16 %v83_v0  ;;  %v85_v3 = vunpack.c.h.bf16 %v83_v0  ;;  %v88_v6 = vunpack.c.l.bf16 %v118_v5  ;;  %v89_v7 = vunpack.c.h.bf16 %v118_v5  ;;  %v120_v9 = vld [vmem:[%s176_s0 + $0x18] sm:$0xff]  }
   0x3   :  { %v125_v4 = vld [vmem:[%s178_s2] ss:$0 sm:$0xff]  ;;  %v92_v12 = vunpack.c.l.bf16 %v119_v8  ;;  %v93_v13 = vunpack.c.h.bf16 %v119_v8  ;;  %v96_v16 = vunpack.c.l.bf16 %v120_v9  ;;  %v97_v17 = vunpack.c.h.bf16 %v120_v9 }
   0x4   :  { %v34_v10 = vmul.f32 %v124_v1, %v84_v2  ;;  %v35_v11 = vmul.f32 %v124_v1, %v85_v3  ;;  %v36_v14 = vmul.f32 %v124_v1, %v88_v6  ;;  %v37_v15 = vmul.f32 %v124_v1, %v89_v7 }
   0x5   :  { %v38_v20 = vmul.f32 %v124_v1, %v92_v12  ;;  %v39_v21 = vmul.f32 %v124_v1, %v93_v13  ;;  %v40_v24 = vmul.f32 %v124_v1, %v96_v16  ;;  %v41_v25 = vmul.f32 %v124_v1, %v97_v17 }
   0x6   :  { %v46_v18 = vadd.f32 %v125_v4, %v34_v10  ;;  %v47_v19 = vadd.f32 %v125_v4, %v35_v11  ;;  %v48_v22 = vadd.f32 %v125_v4, %v36_v14  ;;  %v49_v23 = vadd.f32 %v125_v4, %v37_v15 }
   0x7   :  { %v50_v28 = vadd.f32 %v125_v4, %v38_v20  ;;  %v51_v29 = vadd.f32 %v125_v4, %v39_v21  ;;  %v52_v32 = vadd.f32 %v125_v4, %v40_v24  ;;  %v53_v33 = vadd.f32 %v125_v4, %v41_v25 }
   0x8   :  { %v54_v26 = vmax.f32 %v46_v18, 0.0  ;;  %v55_v27 = vmax.f32 %v47_v19, 0.0  ;;  %v56_v30 = vmax.f32 %v48_v22, 0.0  ;;  %v57_v31 = vmax.f32 %v49_v23, 0.0 }
   0x9   :  { %v58_v35 = vmax.f32 %v50_v28, 0.0  ;;  %v59_v36 = vmax.f32 %v51_v29, 0.0  ;;  %v60_v38 = vmax.f32 %v52_v32, 0.0  ;;  %v61_v39 = vmax.f32 %v53_v33, 0.0 }
   0xa   :  { %v101_v34 = vpack.c.bf16 %v55_v27, %v54_v26  ;;  %v106_v37 = vpack.c.bf16 %v57_v31, %v56_v30 }
   0xb   :  { %v111_v40 = vpack.c.bf16 %v59_v36, %v58_v35  ;;  %v116_v41 = vpack.c.bf16 %v61_v39, %v60_v38 }
   0xc   :  { %102 = vst [vmem:[%s179_s3] sm:$0xff] %v101_v34  }
   0xd   :  { %121 = vst [vmem:[%s179_s3 + $0x8] sm:$0xff] %v106_v37  }
   0xe   :  { %122 = vst [vmem:[%s179_s3 + $0x10] sm:$0xff] %v111_v40  }
   0xf   :  { %123 = vst [vmem:[%s179_s3 + $0x18] sm:$0xff] %v116_v41  }

// kernel: local_enhancer_forward.42
= control target key start
LH: loop header
LB: loop body
LE: loop exit
PB: predicated region body
PF: predicated region fallthrough
CT: control target
= control target key end

     0   :  { %s3063_s1 = inlined_call_operand.vmem [shape: bf16[256,128], index: 1, kind: input, shape index: {}]   ;;  %s3064_s0 = inlined_call_operand.vmem [shape: bf16[512,256], index: 0, kind: input, shape index: {}]   ;;  %s3065_s2 = inlined_call_operand.vmem [shape: f32[1,128], index: 2, kind: input, shape index: {}]   ;;  %s3066_s3 = inlined_call_operand.vmem [shape: bf16[512,128], index: 3, kind: output, shape index: {0}]   ;;  %s3067_s4 = inlined_call_operand.vmem [shape: f32[8,128], index: 4, kind: output, shape index: {1}]   ;;  %s3068_s5 = inlined_call_operand.vmem [shape: f32[8,128], index: 5, kind: output, shape index: {2}]  }
   0x1   :  { %v1997_v0 = vld [vmem:[%s3063_s1 + $0x38] sm:$0xff]  ;;  %v1996_v2 = vld [vmem:[%s3063_s1 + $0x30] sm:$0xff]  ;;  %v1995_v4 = vld [vmem:[%s3063_s1 + $0x28] sm:$0xff] }
   0x2   :  { %v2005_v1 = vld [vmem:[%s3063_s1 + $0x78] sm:$0xff]  ;;  %661 = vmatpush.bf16.msra.mxu0 %v1997_v0  ;;  %v2004_v3 = vld [vmem:[%s3063_s1 + $0x70] sm:$0xff]  ;;  %2197 = vmatpush.bf16.msra.mxu2 %v1997_v0  ;;  %v2003_v5 = vld [vmem:[%s3063_s1 + $0x68] sm:$0xff] }
   0x3   :  { %830 = vmatpush.bf16.msra.mxu1 %v2005_v1  ;;  %2205 = vmatpush.bf16.msra.mxu3 %v2005_v1  ;;  %v1994_v6 = vld [vmem:[%s3063_s1 + $0x20] sm:$0xff]  ;;  %v1993_v8 = vld [vmem:[%s3063_s1 + $0x18] sm:$0xff]  ;;  %v1992_v10 = vld [vmem:[%s3063_s1 + $0x10] sm:$0xff] }
   0x4   :  { %v2002_v7 = vld [vmem:[%s3063_s1 + $0x60] sm:$0xff]  ;;  %v2001_v9 = vld [vmem:[%s3063_s1 + $0x58] sm:$0xff]  ;;  %v2000_v11 = vld [vmem:[%s3063_s1 + $0x50] sm:$0xff] }
   0x5   :  { %v1991_v12 = vld [vmem:[%s3063_s1 + $0x8] sm:$0xff]  ;;  %v1990_v14 = vld [vmem:[%s3063_s1] sm:$0xff]  ;;  %v1616_v22 = vld [vmem:[%s3064_s0 + $0x10] sm:$0xf] }
   0x6   :  { %662 = vmatpush.bf16.msra.mxu0 %v1996_v2  ;;  %2198 = vmatpush.bf16.msra.mxu2 %v1996_v2  ;;  %v1999_v13 = vld [vmem:[%s3063_s1 + $0x48] sm:$0xff]  ;;  %v1998_v15 = vld [vmem:[%s3063_s1 + $0x40] sm:$0xff]  ;;  %v1929_v23 = vld [vmem:[%s3064_s0 + $0x14] sm:$0xf0] }
   0x7   :  { %831 = vmatpush.bf16.msra.mxu1 %v2004_v3  ;;  %2206 = vmatpush.bf16.msra.mxu3 %v2004_v3  ;;  %v1608_v16 = vld [vmem:[%s3064_s0] sm:$0xf]  ;;  %v1927_v17 = vld [vmem:[%s3064_s0 + $0x4] sm:$0xf0]  ;;  %v1926_v18 = vld [vmem:[%s3064_s0 + $0x4] sm:$0xf]  ;;  %v1617_v26 = vor.u32 %v1929_v23, %v1616_v22 }
   0x8   :  { %v1610_v19 = vld [vmem:[%s3064_s0 + $0x8] sm:$0xf0]  ;;  %v1609_v20 = vor.u32 %v1927_v17, %v1608_v16  ;;  %v1928_v24 = vld [vmem:[%s3064_s0 + $0x14] sm:$0xf]  ;;  %v1618_v25 = vld [vmem:[%s3064_s0 + $0x18] sm:$0xf0] }
   0x9   :  { %v1613_v21 = vor.u32 %v1926_v18, %v1610_v19  ;;  %v1621_v27 = vor.u32 %v1928_v24, %v1618_v25  ;;  %v1736_v28 = vld [vmem:[%s3064_s0 + $0x100] sm:$0xf]  ;;  %v1959_v29 = vld [vmem:[%s3064_s0 + $0x104] sm:$0xf0]  ;;  %v1958_v30 = vld [vmem:[%s3064_s0 + $0x104] sm:$0xf] }
   0xa   :  { %663 = vmatpush.bf16.msra.mxu0 %v1995_v4  ;;  %2199 = vmatpush.bf16.msra.mxu2 %v1995_v4  ;;  %v1737_v31 = vor.u32 %v1959_v29, %v1736_v28  ;;  %v1738_v32 = vld [vmem:[%s3064_s0 + $0x108] sm:$0xf0]  ;;  %v1624_v34 = vld [vmem:[%s3064_s0 + $0x20] sm:$0xf]  ;;  %v1931_v35 = vld [vmem:[%s3064_s0 + $0x24] sm:$0xf0] }
   0xb   :  { %832 = vmatpush.bf16.msra.mxu1 %v2003_v5  ;;  %2207 = vmatpush.bf16.msra.mxu3 %v2003_v5  ;;  %v1741_v33 = vor.u32 %v1958_v30, %v1738_v32  ;;  %v1930_v36 = vld [vmem:[%s3064_s0 + $0x24] sm:$0xf]  ;;  %v1626_v37 = vld [vmem:[%s3064_s0 + $0x28] sm:$0xf0]  ;;  %v1625_v38 = vor.u32 %v1931_v35, %v1624_v34  ;;  %v1744_v40 = vld [vmem:[%s3064_s0 + $0x110] sm:$0xf] }
   0xc   :  { %v1629_v39 = vor.u32 %v1930_v36, %v1626_v37  ;;  %v1961_v41 = vld [vmem:[%s3064_s0 + $0x114] sm:$0xf0]  ;;  %v1960_v42 = vld [vmem:[%s3064_s0 + $0x114] sm:$0xf]  ;;  %v1746_v44 = vld [vmem:[%s3064_s0 + $0x118] sm:$0xf0] }
   0xd   :  { %v1745_v43 = vor.u32 %v1961_v41, %v1744_v40  ;;  %v1749_v45 = vor.u32 %v1960_v42, %v1746_v44  ;;  %v1632_v46 = vld [vmem:[%s3064_s0 + $0x30] sm:$0xf]  ;;  %v1933_v47 = vld [vmem:[%s3064_s0 + $0x34] sm:$0xf0]  ;;  %v1932_v48 = vld [vmem:[%s3064_s0 + $0x34] sm:$0xf] }
   0xe   :  { %664 = vmatpush.bf16.msra.mxu0 %v1994_v6  ;;  %2200 = vmatpush.bf16.msra.mxu2 %v1994_v6  ;;  %v1634_v49 = vld [vmem:[%s3064_s0 + $0x38] sm:$0xf0]  ;;  %v1633_v50 = vor.u32 %v1933_v47, %v1632_v46  ;;  %v1752_v52 = vld [vmem:[%s3064_s0 + $0x120] sm:$0xf]  ;;  %v1963_v53 = vld [vmem:[%s3064_s0 + $0x124] sm:$0xf0] }
   0xf   :  { %833 = vmatpush.bf16.msra.mxu1 %v2002_v7  ;;  %2208 = vmatpush.bf16.msra.mxu3 %v2002_v7  ;;  %v1637_v51 = vor.u32 %v1932_v48, %v1634_v49  ;;  %v1962_v54 = vld [vmem:[%s3064_s0 + $0x124] sm:$0xf]  ;;  %v1753_v55 = vor.u32 %v1963_v53, %v1752_v52  ;;  %v1754_v56 = vld [vmem:[%s3064_s0 + $0x128] sm:$0xf0]  ;;  %v1640_v58 = vld [vmem:[%s3064_s0 + $0x40] sm:$0xf] }
  0x10   :  { %v1757_v57 = vor.u32 %v1962_v54, %v1754_v56  ;;  %v1935_v59 = vld [vmem:[%s3064_s0 + $0x44] sm:$0xf0]  ;;  %v1934_v60 = vld [vmem:[%s3064_s0 + $0x44] sm:$0xf]  ;;  %v1642_v61 = vld [vmem:[%s3064_s0 + $0x48] sm:$0xf0] }
  0x11   :  { %v1641_v62 = vor.u32 %v1935_v59, %v1640_v58  ;;  %v1645_v63 = vor.u32 %v1934_v60, %v1642_v61  ;;  %v1760_v0 = vld [vmem:[%s3064_s0 + $0x130] sm:$0xf]  ;;  %v1965_v1 = vld [vmem:[%s3064_s0 + $0x134] sm:$0xf0]  ;;  %v1964_v2 = vld [vmem:[%s3064_s0 + $0x134] sm:$0xf] }
  0x12   :  { %665 = vmatpush.bf16.msra.mxu0 %v1993_v8  ;;  %2201 = vmatpush.bf16.msra.mxu2 %v1993_v8  ;;  %v1761_v3 = vor.u32 %v1965_v1, %v1760_v0  ;;  %v1762_v4 = vld [vmem:[%s3064_s0 + $0x138] sm:$0xf0]  ;;  %v1648_v6 = vld [vmem:[%s3064_s0 + $0x50] sm:$0xf]  ;;  %v1937_v7 = vld [vmem:[%s3064_s0 + $0x54] sm:$0xf0] }
  0x13   :  { %834 = vmatpush.bf16.msra.mxu1 %v2001_v9  ;;  %2209 = vmatpush.bf16.msra.mxu3 %v2001_v9  ;;  %v1765_v5 = vor.u32 %v1964_v2, %v1762_v4  ;;  %v1936_v8 = vld [vmem:[%s3064_s0 + $0x54] sm:$0xf]  ;;  %v1650_v9 = vld [vmem:[%s3064_s0 + $0x58] sm:$0xf0]  ;;  %v1770_v16 = vld [vmem:[%s3064_s0 + $0x148] sm:$0xf0] }
  0x14   :  { %v1656_v18 = vld [vmem:[%s3064_s0 + $0x60] sm:$0xf]  ;;  %v1939_v19 = vld [vmem:[%s3064_s0 + $0x64] sm:$0xf0]  ;;  %v1776_v24 = vld [vmem:[%s3064_s0 + $0x150] sm:$0xf] }
  0x15   :  { %v1657_v22 = vor.u32 %v1939_v19, %v1656_v18  ;;  %v1969_v25 = vld [vmem:[%s3064_s0 + $0x154] sm:$0xf0]  ;;  %v1778_v28 = vld [vmem:[%s3064_s0 + $0x158] sm:$0xf0]  ;;  %v1664_v30 = vld [vmem:[%s3064_s0 + $0x70] sm:$0xf] }
  0x16   :  { %666 = vmatpush.bf16.msra.mxu0 %v1992_v10  ;;  %2202 = vmatpush.bf16.msra.mxu2 %v1992_v10  ;;  %v1649_v10 = vor.u32 %v1937_v7, %v1648_v6  ;;  %v1940_v32 = vld [vmem:[%s3064_s0 + $0x74] sm:$0xf]  ;;  %v1784_v36 = vld [vmem:[%s3064_s0 + $0x160] sm:$0xf]  ;;  %v1971_v37 = vld [vmem:[%s3064_s0 + $0x164] sm:$0xf0] }
  0x17   :  { %835 = vmatpush.bf16.msra.mxu1 %v2000_v11  ;;  %2210 = vmatpush.bf16.msra.mxu3 %v2000_v11  ;;  %v1653_v11 = vor.u32 %v1936_v8, %v1650_v9  ;;  %v1786_v40 = vld [vmem:[%s3064_s0 + $0x168] sm:$0xf0]  ;;  %v1672_v42 = vld [vmem:[%s3064_s0 + $0x80] sm:$0xf]  ;;  %v1942_v44 = vld [vmem:[%s3064_s0 + $0x84] sm:$0xf] }
  0x18   :  { %v1972_v52 = vld [vmem:[%s3064_s0 + $0x174] sm:$0xf]  ;;  %v1794_v54 = vld [vmem:[%s3064_s0 + $0x178] sm:$0xf0]  ;;  %v1945_v0 = vld [vmem:[%s3064_s0 + $0x94] sm:$0xf0] }
  0x19   :  { %v1944_v1 = vld [vmem:[%s3064_s0 + $0x94] sm:$0xf]  ;;  %v1682_v2 = vld [vmem:[%s3064_s0 + $0x98] sm:$0xf0]  ;;  %v1802_v18 = vld [vmem:[%s3064_s0 + $0x188] sm:$0xf0] }
  0x1a   :  { %667 = vmatpush.bf16.msra.mxu0 %v1991_v12  ;;  %2203 = vmatpush.bf16.msra.mxu2 %v1991_v12  ;;  %v1768_v12 = vld [vmem:[%s3064_s0 + $0x140] sm:$0xf]  ;;  %v1685_v9 = vor.u32 %v1944_v1, %v1682_v2  ;;  %v1696_v2 = vld [vmem:[%s3064_s0 + $0xb0] sm:$0xf] }
  0x1b   :  { %836 = vmatpush.bf16.msra.mxu1 %v1999_v13  ;;  %2211 = vmatpush.bf16.msra.mxu3 %v1999_v13  ;;  %v1967_v13 = vld [vmem:[%s3064_s0 + $0x144] sm:$0xf0] }
  0x1e   :  { %668 = vmatpush.bf16.msra.mxu0 %v1990_v14  ;;  %2204 = vmatpush.bf16.msra.mxu2 %v1990_v14  ;;  %v1966_v14 = vld [vmem:[%s3064_s0 + $0x144] sm:$0xf] }
  0x1f   :  { %837 = vmatpush.bf16.msra.mxu1 %v1998_v15  ;;  %2212 = vmatpush.bf16.msra.mxu3 %v1998_v15  ;;  %v1769_v15 = vor.u32 %v1967_v13, %v1768_v12  ;;  %v1773_v17 = vor.u32 %v1966_v14, %v1770_v16  ;;  %v1800_v13 = vld [vmem:[%s3064_s0 + $0x180] sm:$0xf]  ;;  %v1975_v14 = vld [vmem:[%s3064_s0 + $0x184] sm:$0xf0] }
  0x21   :  { %669 = vmatmul.bf16.vlgmr.msra.gmra.mxu0 %v1609_v20  ;;  %749 = vmatmul.bf16.vlgmr.msra.gmra.mxu2 %v1737_v31  ;;  %v1938_v20 = vld [vmem:[%s3064_s0 + $0x64] sm:$0xf]  ;;  %v1941_v31 = vld [vmem:[%s3064_s0 + $0x74] sm:$0xf0] }
  0x22   :  { %838 = vmatmul.bf16.vlgmr.msra.gmra.mxu1 %v1613_v21  ;;  %918 = vmatmul.bf16.vlgmr.msra.gmra.mxu3 %v1741_v33  ;;  %v1658_v21 = vld [vmem:[%s3064_s0 + $0x68] sm:$0xf0]  ;;  %v1666_v33 = vld [vmem:[%s3064_s0 + $0x78] sm:$0xf0]  ;;  %v1665_v34 = vor.u32 %v1941_v31, %v1664_v30  ;;  %v1947_v30 = vld [vmem:[%s3064_s0 + $0xa4] sm:$0xf0] }
  0x23   :  { %v1661_v23 = vor.u32 %v1938_v20, %v1658_v21  ;;  %v1669_v35 = vor.u32 %v1940_v32, %v1666_v33  ;;  %v1946_v31 = vld [vmem:[%s3064_s0 + $0xa4] sm:$0xf]  ;;  %v1690_v32 = vld [vmem:[%s3064_s0 + $0xa8] sm:$0xf0] }
  0x31   :  { %674 = vmatmul.bf16.gmra.mxu0 %v1617_v26  ;;  %754 = vmatmul.bf16.gmra.mxu2 %v1745_v43  ;;  %v1968_v26 = vld [vmem:[%s3064_s0 + $0x154] sm:$0xf]  ;;  %v1943_v43 = vld [vmem:[%s3064_s0 + $0x84] sm:$0xf0] }
  0x32   :  { %843 = vmatmul.bf16.gmra.mxu1 %v1621_v27  ;;  %923 = vmatmul.bf16.gmra.mxu3 %v1749_v45  ;;  %v1777_v27 = vor.u32 %v1969_v25, %v1776_v24  ;;  %v1781_v29 = vor.u32 %v1968_v26, %v1778_v28  ;;  %v1674_v45 = vld [vmem:[%s3064_s0 + $0x88] sm:$0xf0]  ;;  %v1673_v46 = vor.u32 %v1943_v43, %v1672_v42 }
  0x33   :  { %v1677_v47 = vor.u32 %v1942_v44, %v1674_v45 }
  0x41   :  { %679 = vmatmul.bf16.gmra.mxu0 %v1625_v38  ;;  %759 = vmatmul.bf16.gmra.mxu2 %v1753_v55  ;;  %v1970_v38 = vld [vmem:[%s3064_s0 + $0x164] sm:$0xf]  ;;  %v1797_v55 = vor.u32 %v1972_v52, %v1794_v54  ;;  %v1810_v52 = vld [vmem:[%s3064_s0 + $0x198] sm:$0xf0] }
  0x42   :  { %848 = vmatmul.bf16.gmra.mxu1 %v1629_v39  ;;  %928 = vmatmul.bf16.gmra.mxu3 %v1757_v57  ;;  %v1785_v39 = vor.u32 %v1971_v37, %v1784_v36  ;;  %v1789_v41 = vor.u32 %v1970_v38, %v1786_v40  ;;  %v2500_v57 = vld [vmem:[%s3065_s2] ss:$0 sm:$0xff]  ;;  %v1693_v38 = vor.u32 %v1946_v31, %v1690_v32 }
  0x51   :  { %684 = vmatmul.bf16.gmra.mxu0 %v1633_v50  ;;  %764 = vmatmul.bf16.gmra.mxu2 %v1761_v3  ;;  %v1792_v50 = vld [vmem:[%s3064_s0 + $0x170] sm:$0xf] }
  0x52   :  { %853 = vmatmul.bf16.gmra.mxu1 %v1637_v51  ;;  %933 = vmatmul.bf16.gmra.mxu3 %v1765_v5  ;;  %v1973_v51 = vld [vmem:[%s3064_s0 + $0x174] sm:$0xf0] }
  0x53   :  { %v1793_v53 = vor.u32 %v1973_v51, %v1792_v50 }
  0x61   :  { %689 = vmatmul.bf16.gmra.mxu0 %v1641_v62  ;;  %769 = vmatmul.bf16.gmra.mxu2 %v1769_v15  ;;  %v1974_v15 = vld [vmem:[%s3064_s0 + $0x184] sm:$0xf] }
  0x62   :  { %858 = vmatmul.bf16.gmra.mxu1 %v1645_v63  ;;  %938 = vmatmul.bf16.gmra.mxu3 %v1773_v17  ;;  %v1680_v63 = vld [vmem:[%s3064_s0 + $0x90] sm:$0xf]  ;;  %v1801_v17 = vor.u32 %v1975_v14, %v1800_v13  ;;  %v1805_v19 = vor.u32 %v1974_v15, %v1802_v18 }
  0x63   :  { %v1681_v8 = vor.u32 %v1945_v0, %v1680_v63 }
  0x71   :  { %694 = vmatmul.bf16.gmra.mxu0 %v1649_v10  ;;  %774 = vmatmul.bf16.gmra.mxu2 %v1777_v27 }
  0x72   :  { %863 = vmatmul.bf16.gmra.mxu1 %v1653_v11  ;;  %943 = vmatmul.bf16.gmra.mxu3 %v1781_v29  ;;  %v1688_v29 = vld [vmem:[%s3064_s0 + $0xa0] sm:$0xf] }
  0x73   :  { %v1689_v37 = vor.u32 %v1947_v30, %v1688_v29 }
  0x81   :  { %699 = vmatmul.bf16.gmra.mxu0 %v1657_v22  ;;  %779 = vmatmul.bf16.gmra.mxu2 %v1785_v39 }
  0x82   :  { %868 = vmatmul.bf16.gmra.mxu1 %v1661_v23  ;;  %948 = vmatmul.bf16.gmra.mxu3 %v1789_v41 }
  0x91   :  { %704 = vmatmul.bf16.gmra.mxu0 %v1665_v34  ;;  %784 = vmatmul.bf16.gmra.mxu2 %v1793_v53 }
  0x92   :  { %873 = vmatmul.bf16.gmra.mxu1 %v1669_v35  ;;  %953 = vmatmul.bf16.gmra.mxu3 %v1797_v55 }
  0x9e   :  { %v670_v48 = vpop.f32.mrf.mxu0 }
  0x9f   :  { %v839_v49 = vpop.f32.mrf.mxu1 }
  0xa0   :  { %v840_v56 = vadd.f32 %v839_v49, %v670_v48  ;;  %v1977_v48 = vld [vmem:[%s3064_s0 + $0x194] sm:$0xf0]  ;;  %v1976_v49 = vld [vmem:[%s3064_s0 + $0x194] sm:$0xf] }
  0xa1   :  { %709 = vmatmul.bf16.gmra.mxu0 %v1673_v46  ;;  %789 = vmatmul.bf16.gmra.mxu2 %v1801_v17  ;;  %v1813_v54 = vor.u32 %v1976_v49, %v1810_v52 }
  0xa2   :  { %878 = vmatmul.bf16.gmra.mxu1 %v1677_v47  ;;  %v1198_v60 = vadd.f32 %v2500_v57, %v840_v56  ;;  %958 = vmatmul.bf16.gmra.mxu3 %v1805_v19  ;;  %v1808_v47 = vld [vmem:[%s3064_s0 + $0x190] sm:$0xf] }
  0xa3   :  { %v1809_v51 = vor.u32 %v1977_v48, %v1808_v47 }
  0xa4   :  { %v1459_v3 = vmul.f32 %v1198_v60, %v1198_v60  ;;  %v750_v26 = vpop.f32.mrf.mxu2 }
  0xa5   :  { %v919_v27 = vpop.f32.mrf.mxu3 }
  0xa6   :  { %v672_v58 = vpop.f32.mrf.mxu0  ;;  %v920_v39 = vadd.f32 %v919_v27, %v750_v26 }
  0xa7   :  { %v841_v59 = vpop.f32.mrf.mxu1 }
  0xa8   :  { %v842_v61 = vadd.f32 %v841_v59, %v672_v58  ;;  %v2549_v45 = vadd.f32 %v2500_v57, %v920_v39  ;;  %v1951_v39 = vld [vmem:[%s3064_s0 + $0xc4] sm:$0xf0] }
  0xaa   :  { %v1199_v62 = vadd.f32 %v2500_v57, %v842_v61 }
  0xac   :  { %v2009_v4 = vpack.c.bf16 %v1199_v62, %v1198_v60  ;;  %v1390_v5 = vadd.f32 %v1199_v62, %v1198_v60  ;;  %v1460_v6 = vmul.f32 %v1199_v62, %v1199_v62  ;;  %v752_v43 = vpop.f32.mrf.mxu2 }
  0xad   :  { %v921_v44 = vpop.f32.mrf.mxu3 }
  0xae   :  { %2010 = vst [vmem:[%s3066_s3] sm:$0xff] %v2009_v4   ;;  %v1523_v7 = vadd.f32 %v1460_v6, %v1459_v3  ;;  %v675_v10 = vpop.f32.mrf.mxu0  ;;  %v922_v46 = vadd.f32 %v921_v44, %v752_v43  ;;  %v1949_v3 = vld [vmem:[%s3064_s0 + $0xb4] sm:$0xf0]  ;;  %v1948_v4 = vld [vmem:[%s3064_s0 + $0xb4] sm:$0xf] }
  0xaf   :  { %v844_v11 = vpop.f32.mrf.mxu1 }
  0xb0   :  { %v845_v12 = vadd.f32 %v844_v11, %v675_v10  ;;  %v2565_v53 = vadd.f32 %v2500_v57, %v922_v46  ;;  %v1697_v10 = vor.u32 %v1949_v3, %v1696_v2 }
  0xb1   :  { %714 = vmatmul.bf16.gmra.mxu0 %v1681_v8  ;;  %794 = vmatmul.bf16.gmra.mxu2 %v1809_v51 }
  0xb2   :  { %v1200_v16 = vadd.f32 %v2500_v57, %v845_v12  ;;  %883 = vmatmul.bf16.gmra.mxu1 %v1685_v9  ;;  %v2089_v58 = vpack.c.bf16 %v2565_v53, %v2549_v45  ;;  %963 = vmatmul.bf16.gmra.mxu3 %v1813_v54 }
  0xb4   :  { %v1391_v20 = vadd.f32 %v1390_v5, %v1200_v16  ;;  %v1461_v21 = vmul.f32 %v1200_v16, %v1200_v16  ;;  %2181 = vst [vmem:[%s3066_s3 + $0x80] sm:$0xff] %v2089_v58   ;;  %v755_v63 = vpop.f32.mrf.mxu2  ;;  %v1698_v5 = vld [vmem:[%s3064_s0 + $0xb8] sm:$0xf0] }
  0xb5   :  { %v924_v0 = vpop.f32.mrf.mxu3  ;;  %v1701_v11 = vor.u32 %v1948_v4, %v1698_v5 }
  0xb6   :  { %v1524_v22 = vadd.f32 %v1523_v7, %v1461_v21  ;;  %v677_v23 = vpop.f32.mrf.mxu0  ;;  %v925_v12 = vadd.f32 %v924_v0, %v755_v63  ;;  %v1979_v21 = vld [vmem:[%s3064_s0 + $0x1a4] sm:$0xf0]  ;;  %v1826_v0 = vld [vmem:[%s3064_s0 + $0x1b8] sm:$0xf0] }
  0xb7   :  { %v846_v24 = vpop.f32.mrf.mxu1 }
  0xb8   :  { %v847_v25 = vadd.f32 %v846_v24, %v677_v23  ;;  %v2589_v18 = vadd.f32 %v2500_v57, %v925_v12 }
  0xba   :  { %v1201_v28 = vadd.f32 %v2500_v57, %v847_v25  ;;  %v1818_v25 = vld [vmem:[%s3064_s0 + $0x1a8] sm:$0xf0] }
  0xbc   :  { %v2014_v33 = vpack.c.bf16 %v1201_v28, %v1200_v16  ;;  %v1392_v34 = vadd.f32 %v1391_v20, %v1201_v28  ;;  %v1462_v35 = vmul.f32 %v1201_v28, %v1201_v28  ;;  %v757_v16 = vpop.f32.mrf.mxu2  ;;  %v1816_v20 = vld [vmem:[%s3064_s0 + $0x1a0] sm:$0xf] }
  0xbd   :  { %v926_v17 = vpop.f32.mrf.mxu3  ;;  %v1817_v24 = vor.u32 %v1979_v21, %v1816_v20 }
  0xbe   :  { %2166 = vst [vmem:[%s3066_s3 + $0x8] sm:$0xff] %v2014_v33   ;;  %v1525_v36 = vadd.f32 %v1524_v22, %v1462_v35  ;;  %v680_v40 = vpop.f32.mrf.mxu0  ;;  %v927_v19 = vadd.f32 %v926_v17, %v757_v16  ;;  %v1978_v22 = vld [vmem:[%s3064_s0 + $0x1a4] sm:$0xf]  ;;  %v1714_v16 = vld [vmem:[%s3064_s0 + $0xd8] sm:$0xf0] }
  0xbf   :  { %v849_v41 = vpop.f32.mrf.mxu1  ;;  %v1821_v27 = vor.u32 %v1978_v22, %v1818_v25 }
  0xc0   :  { %v850_v42 = vadd.f32 %v849_v41, %v680_v40  ;;  %v2605_v26 = vadd.f32 %v2500_v57, %v927_v19  ;;  %v1950_v40 = vld [vmem:[%s3064_s0 + $0xc4] sm:$0xf]  ;;  %v1706_v41 = vld [vmem:[%s3064_s0 + $0xc8] sm:$0xf0] }
  0xc1   :  { %719 = vmatmul.bf16.gmra.mxu0 %v1689_v37  ;;  %799 = vmatmul.bf16.gmra.mxu2 %v1817_v24  ;;  %v1709_v48 = vor.u32 %v1950_v40, %v1706_v41 }
  0xc2   :  { %v1202_v50 = vadd.f32 %v2500_v57, %v850_v42  ;;  %888 = vmatmul.bf16.gmra.mxu1 %v1693_v38  ;;  %v2094_v30 = vpack.c.bf16 %v2605_v26, %v2589_v18  ;;  %968 = vmatmul.bf16.gmra.mxu3 %v1821_v27  ;;  %v1704_v38 = vld [vmem:[%s3064_s0 + $0xc0] sm:$0xf] }
  0xc3   :  { %v1705_v47 = vor.u32 %v1951_v39, %v1704_v38  ;;  %v1834_v38 = vld [vmem:[%s3064_s0 + $0x1c8] sm:$0xf0] }
  0xc4   :  { %v1393_v55 = vadd.f32 %v1392_v34, %v1202_v50  ;;  %v1463_v56 = vmul.f32 %v1202_v50, %v1202_v50  ;;  %2182 = vst [vmem:[%s3066_s3 + $0x88] sm:$0xff] %v2094_v30   ;;  %v760_v35 = vpop.f32.mrf.mxu2 }
  0xc6   :  { %v1526_v59 = vadd.f32 %v1525_v36, %v1463_v56  ;;  %v682_v60 = vpop.f32.mrf.mxu0  ;;  %v929_v36 = vpop.f32.mrf.mxu3 }
  0xc7   :  { %v851_v61 = vpop.f32.mrf.mxu1  ;;  %v930_v49 = vadd.f32 %v929_v36, %v760_v35  ;;  %v1982_v35 = vld [vmem:[%s3064_s0 + $0x1c4] sm:$0xf] }
  0xc8   :  { %v852_v62 = vadd.f32 %v851_v61, %v682_v60  ;;  %v1981_v60 = vld [vmem:[%s3064_s0 + $0x1b4] sm:$0xf0]  ;;  %v1980_v61 = vld [vmem:[%s3064_s0 + $0x1b4] sm:$0xf]  ;;  %v1837_v40 = vor.u32 %v1982_v35, %v1834_v38 }
  0xc9   :  { %v2629_v56 = vadd.f32 %v2500_v57, %v930_v49  ;;  %v1829_v2 = vor.u32 %v1980_v61, %v1826_v0 }
  0xca   :  { %v1203_v1 = vadd.f32 %v2500_v57, %v852_v62 }
  0xcc   :  { %v2019_v6 = vpack.c.bf16 %v1203_v1, %v1202_v50  ;;  %v1394_v7 = vadd.f32 %v1393_v55, %v1203_v1  ;;  %v1464_v8 = vmul.f32 %v1203_v1, %v1203_v1  ;;  %v762_v54 = vpop.f32.mrf.mxu2 }
  0xce   :  { %2167 = vst [vmem:[%s3066_s3 + $0x10] sm:$0xff] %v2019_v6   ;;  %v1527_v9 = vadd.f32 %v1526_v59, %v1464_v8  ;;  %v685_v13 = vpop.f32.mrf.mxu0  ;;  %v931_v55 = vpop.f32.mrf.mxu3  ;;  %v1824_v59 = vld [vmem:[%s3064_s0 + $0x1b0] sm:$0xf] }
  0xcf   :  { %v854_v14 = vpop.f32.mrf.mxu1  ;;  %v932_v58 = vadd.f32 %v931_v55, %v762_v54  ;;  %v1825_v63 = vor.u32 %v1981_v60, %v1824_v59  ;;  %v1955_v54 = vld [vmem:[%s3064_s0 + $0xe4] sm:$0xf0]  ;;  %v1954_v55 = vld [vmem:[%s3064_s0 + $0xe4] sm:$0xf] }
  0xd0   :  { %v855_v15 = vadd.f32 %v854_v14, %v685_v13  ;;  %v1712_v13 = vld [vmem:[%s3064_s0 + $0xd0] sm:$0xf]  ;;  %v1953_v14 = vld [vmem:[%s3064_s0 + $0xd4] sm:$0xf0] }
  0xd1   :  { %724 = vmatmul.bf16.gmra.mxu0 %v1697_v10  ;;  %v2645_v1 = vadd.f32 %v2500_v57, %v932_v58  ;;  %804 = vmatmul.bf16.gmra.mxu2 %v1825_v63  ;;  %v1713_v22 = vor.u32 %v1953_v14, %v1712_v13  ;;  %v1722_v58 = vld [vmem:[%s3064_s0 + $0xe8] sm:$0xf0] }
  0xd2   :  { %v1204_v23 = vadd.f32 %v2500_v57, %v855_v15  ;;  %893 = vmatmul.bf16.gmra.mxu1 %v1701_v11  ;;  %973 = vmatmul.bf16.gmra.mxu3 %v1829_v2  ;;  %v1952_v15 = vld [vmem:[%s3064_s0 + $0xd4] sm:$0xf]  ;;  %v1725_v0 = vor.u32 %v1954_v55, %v1722_v58 }
  0xd3   :  { %v2099_v5 = vpack.c.bf16 %v2645_v1, %v2629_v56 }
  0xd4   :  { %v1395_v28 = vadd.f32 %v1394_v7, %v1204_v23  ;;  %v1465_v29 = vmul.f32 %v1204_v23, %v1204_v23  ;;  %v765_v10 = vpop.f32.mrf.mxu2 }
  0xd5   :  { %2183 = vst [vmem:[%s3066_s3 + $0x90] sm:$0xff] %v2099_v5  }
  0xd6   :  { %v1528_v31 = vadd.f32 %v1527_v9, %v1465_v29  ;;  %v687_v32 = vpop.f32.mrf.mxu0  ;;  %v934_v11 = vpop.f32.mrf.mxu3 }
  0xd7   :  { %v856_v33 = vpop.f32.mrf.mxu1  ;;  %v935_v24 = vadd.f32 %v934_v11, %v765_v10  ;;  %v1840_v10 = vld [vmem:[%s3064_s0 + $0x1d0] sm:$0xf]  ;;  %v1985_v11 = vld [vmem:[%s3064_s0 + $0x1d4] sm:$0xf0] }
  0xd8   :  { %v857_v34 = vadd.f32 %v856_v33, %v687_v32  ;;  %v1832_v33 = vld [vmem:[%s3064_s0 + $0x1c0] sm:$0xf]  ;;  %v1841_v14 = vor.u32 %v1985_v11, %v1840_v10 }
  0xda   :  { %v1205_v37 = vadd.f32 %v2500_v57, %v857_v34  ;;  %v1983_v34 = vld [vmem:[%s3064_s0 + $0x1c4] sm:$0xf0] }
  0xdc   :  { %v2024_v42 = vpack.c.bf16 %v1205_v37, %v1204_v23  ;;  %v1396_v43 = vadd.f32 %v1395_v28, %v1205_v37  ;;  %v1466_v44 = vmul.f32 %v1205_v37, %v1205_v37  ;;  %v1717_v23 = vor.u32 %v1952_v15, %v1714_v16  ;;  %v767_v29 = vpop.f32.mrf.mxu2  ;;  %v1842_v15 = vld [vmem:[%s3064_s0 + $0x1d8] sm:$0xf0] }
  0xdd   :  { %v1833_v37 = vor.u32 %v1983_v34, %v1832_v33  ;;  %v1956_v33 = vld [vmem:[%s3064_s0 + $0xf4] sm:$0xf]  ;;  %v1730_v34 = vld [vmem:[%s3064_s0 + $0xf8] sm:$0xf0] }
  0xde   :  { %2168 = vst [vmem:[%s3066_s3 + $0x18] sm:$0xff] %v2024_v42   ;;  %v1529_v46 = vadd.f32 %v1528_v31, %v1466_v44  ;;  %v690_v50 = vpop.f32.mrf.mxu0  ;;  %v936_v30 = vpop.f32.mrf.mxu3  ;;  %v2669_v31 = vadd.f32 %v2500_v57, %v935_v24 }
  0xdf   :  { %v859_v51 = vpop.f32.mrf.mxu1  ;;  %v937_v32 = vadd.f32 %v936_v30, %v767_v29  ;;  %v1728_v30 = vld [vmem:[%s3064_s0 + $0xf0] sm:$0xf] }
  0xe0   :  { %v860_v52 = vadd.f32 %v859_v51, %v690_v50 }
  0xe1   :  { %729 = vmatmul.bf16.gmra.mxu0 %v1705_v47  ;;  %v2685_v39 = vadd.f32 %v2500_v57, %v937_v32  ;;  %809 = vmatmul.bf16.gmra.mxu2 %v1833_v37  ;;  %v1957_v32 = vld [vmem:[%s3064_s0 + $0xf4] sm:$0xf0] }
  0xe2   :  { %v1206_v62 = vadd.f32 %v2500_v57, %v860_v52  ;;  %898 = vmatmul.bf16.gmra.mxu1 %v1709_v48  ;;  %978 = vmatmul.bf16.gmra.mxu3 %v1837_v40  ;;  %v1720_v52 = vld [vmem:[%s3064_s0 + $0xe0] sm:$0xf]  ;;  %v1729_v40 = vor.u32 %v1957_v32, %v1728_v30  ;;  %v1858_v30 = vld [vmem:[%s3064_s0 + $0x1f8] sm:$0xf0] }
  0xe3   :  { %v1721_v63 = vor.u32 %v1955_v54, %v1720_v52  ;;  %v1987_v52 = vld [vmem:[%s3064_s0 + $0x1e4] sm:$0xf0]  ;;  %v1986_v54 = vld [vmem:[%s3064_s0 + $0x1e4] sm:$0xf] }
  0xe4   :  { %v1397_v3 = vadd.f32 %v1396_v43, %v1206_v62  ;;  %v1467_v4 = vmul.f32 %v1206_v62, %v1206_v62  ;;  %v2104_v43 = vpack.c.bf16 %v2685_v39, %v2669_v31  ;;  %v770_v49 = vpop.f32.mrf.mxu2 }
  0xe6   :  { %v1530_v6 = vadd.f32 %v1529_v46, %v1467_v4  ;;  %v692_v7 = vpop.f32.mrf.mxu0  ;;  %2184 = vst [vmem:[%s3066_s3 + $0x98] sm:$0xff] %v2104_v43   ;;  %v939_v50 = vpop.f32.mrf.mxu3 }
  0xe7   :  { %v861_v8 = vpop.f32.mrf.mxu1  ;;  %v940_v2 = vadd.f32 %v939_v50, %v770_v49 }
  0xe8   :  { %v862_v9 = vadd.f32 %v861_v8, %v692_v7 }
  0xe9   :  { %v2709_v8 = vadd.f32 %v2500_v57, %v940_v2 }
  0xea   :  { %v1207_v12 = vadd.f32 %v2500_v57, %v862_v9 }
  0xec   :  { %v2029_v17 = vpack.c.bf16 %v1207_v12, %v1206_v62  ;;  %v1398_v19 = vadd.f32 %v1397_v3, %v1207_v12  ;;  %v1468_v20 = vmul.f32 %v1207_v12, %v1207_v12  ;;  %v1984_v12 = vld [vmem:[%s3064_s0 + $0x1d4] sm:$0xf] }
  0xee   :  { %2169 = vst [vmem:[%s3066_s3 + $0x20] sm:$0xff] %v2029_v17   ;;  %v1531_v21 = vadd.f32 %v1530_v6, %v1468_v20  ;;  %v695_v25 = vpop.f32.mrf.mxu0  ;;  %v772_v6 = vpop.f32.mrf.mxu2  ;;  %v1845_v17 = vor.u32 %v1984_v12, %v1842_v15 }
  0xef   :  { %v864_v27 = vpop.f32.mrf.mxu1  ;;  %v941_v7 = vpop.f32.mrf.mxu3 }
  0xf0   :  { %v865_v28 = vadd.f32 %v864_v27, %v695_v25  ;;  %v942_v9 = vadd.f32 %v941_v7, %v772_v6 }
  0xf1   :  { %734 = vmatmul.bf16.gmra.mxu0 %v1713_v22  ;;  %814 = vmatmul.bf16.gmra.mxu2 %v1841_v14 }
  0xf2   :  { %v1208_v36 = vadd.f32 %v2500_v57, %v865_v28  ;;  %903 = vmatmul.bf16.gmra.mxu1 %v1717_v23  ;;  %v2725_v16 = vadd.f32 %v2500_v57, %v942_v9  ;;  %983 = vmatmul.bf16.gmra.mxu3 %v1845_v17 }
  0xf4   :  { %v1399_v41 = vadd.f32 %v1398_v19, %v1208_v36  ;;  %v1469_v42 = vmul.f32 %v1208_v36, %v1208_v36 }
  0xf6   :  { %v1532_v44 = vadd.f32 %v1531_v21, %v1469_v42  ;;  %v697_v46 = vpop.f32.mrf.mxu0  ;;  %v2109_v21 = vpack.c.bf16 %v2725_v16, %v2709_v8  ;;  %v775_v27 = vpop.f32.mrf.mxu2 }
  0xf7   :  { %v866_v47 = vpop.f32.mrf.mxu1  ;;  %v944_v28 = vpop.f32.mrf.mxu3 }
  0xf8   :  { %v867_v48 = vadd.f32 %v866_v47, %v697_v46  ;;  %2185 = vst [vmem:[%s3066_s3 + $0xa0] sm:$0xff] %v2109_v21   ;;  %v945_v42 = vadd.f32 %v944_v28, %v775_v27  ;;  %v1988_v27 = vld [vmem:[%s3064_s0 + $0x1f4] sm:$0xf] }
  0xfa   :  { %v1209_v51 = vadd.f32 %v2500_v57, %v867_v48  ;;  %v2749_v49 = vadd.f32 %v2500_v57, %v945_v42 }
  0xfc   :  { %v2034_v59 = vpack.c.bf16 %v1209_v51, %v1208_v36  ;;  %v1400_v60 = vadd.f32 %v1399_v41, %v1209_v51  ;;  %v1470_v61 = vmul.f32 %v1209_v51, %v1209_v51  ;;  %v1733_v41 = vor.u32 %v1956_v33, %v1730_v34  ;;  %v1848_v51 = vld [vmem:[%s3064_s0 + $0x1e0] sm:$0xf] }
  0xfd   :  { %v1849_v58 = vor.u32 %v1987_v52, %v1848_v51  ;;  %v1861_v33 = vor.u32 %v1988_v27, %v1858_v30 }
  0xfe   :  { %2170 = vst [vmem:[%s3066_s3 + $0x28] sm:$0xff] %v2034_v59   ;;  %v1533_v62 = vadd.f32 %v1532_v44, %v1470_v61  ;;  %v700_v3 = vpop.f32.mrf.mxu0  ;;  %v777_v47 = vpop.f32.mrf.mxu2  ;;  %v1850_v59 = vld [vmem:[%s3064_s0 + $0x1e8] sm:$0xf0] }
  0xff   :  { %v869_v4 = vpop.f32.mrf.mxu1  ;;  %v946_v48 = vpop.f32.mrf.mxu3  ;;  %v1853_v61 = vor.u32 %v1986_v54, %v1850_v59 }
 0x100   :  { %v870_v5 = vadd.f32 %v869_v4, %v700_v3  ;;  %v947_v50 = vadd.f32 %v946_v48, %v777_v47 }
 0x101   :  { %739 = vmatmul.bf16.gmra.mxu0 %v1721_v63  ;;  %819 = vmatmul.bf16.gmra.mxu2 %v1849_v58 }
 0x102   :  { %v1210_v13 = vadd.f32 %v2500_v57, %v870_v5  ;;  %908 = vmatmul.bf16.gmra.mxu1 %v1725_v0  ;;  %988 = vmatmul.bf16.gmra.mxu3 %v1853_v61 }
 0x104   :  { %v1401_v19 = vadd.f32 %v1400_v60, %v1210_v13  ;;  %v1471_v20 = vmul.f32 %v1210_v13, %v1210_v13  ;;  %v2765_v60 = vadd.f32 %v2500_v57, %v947_v50 }
 0x106   :  { %v1534_v22 = vadd.f32 %v1533_v62, %v1471_v20  ;;  %v702_v23 = vpop.f32.mrf.mxu0  ;;  %v2114_v0 = vpack.c.bf16 %v2765_v60, %v2749_v49  ;;  %v780_v6 = vpop.f32.mrf.mxu2 }
 0x107   :  { %v871_v24 = vpop.f32.mrf.mxu1  ;;  %v949_v7 = vpop.f32.mrf.mxu3 }
 0x108   :  { %v872_v25 = vadd.f32 %v871_v24, %v702_v23  ;;  %2186 = vst [vmem:[%s3066_s3 + $0xa8] sm:$0xff] %v2114_v0   ;;  %v950_v14 = vadd.f32 %v949_v7, %v780_v6  ;;  %v1856_v24 = vld [vmem:[%s3064_s0 + $0x1f0] sm:$0xf] }
 0x10a   :  { %v1211_v29 = vadd.f32 %v2500_v57, %v872_v25  ;;  %v1989_v25 = vld [vmem:[%s3064_s0 + $0x1f4] sm:$0xf0] }
 0x10c   :  { %v2039_v35 = vpack.c.bf16 %v1211_v29, %v1210_v13  ;;  %v1402_v36 = vadd.f32 %v1401_v19, %v1211_v29  ;;  %v1472_v37 = vmul.f32 %v1211_v29, %v1211_v29  ;;  %v1857_v29 = vor.u32 %v1989_v25, %v1856_v24 }
 0x10e   :  { %2171 = vst [vmem:[%s3066_s3 + $0x30] sm:$0xff] %v2039_v35   ;;  %v1535_v38 = vadd.f32 %v1534_v22, %v1472_v37  ;;  %v705_v43 = vpop.f32.mrf.mxu0  ;;  %v782_v20 = vpop.f32.mrf.mxu2  ;;  %v2777_v22 = vadd.f32 %v2500_v57, %v950_v14 }
 0x10f   :  { %v874_v44 = vpop.f32.mrf.mxu1  ;;  %v951_v21 = vpop.f32.mrf.mxu3 }
 0x110   :  { %v875_v46 = vadd.f32 %v874_v44, %v705_v43  ;;  %v952_v23 = vadd.f32 %v951_v21, %v782_v20 }
 0x111   :  { %744 = vmatmul.bf16.gmra.mxu0 %v1729_v40  ;;  %824 = vmatmul.bf16.gmra.mxu2 %v1857_v29 }
 0x112   :  { %v1212_v55 = vadd.f32 %v2500_v57, %v875_v46  ;;  %913 = vmatmul.bf16.gmra.mxu1 %v1733_v41  ;;  %v2793_v32 = vadd.f32 %v2500_v57, %v952_v23  ;;  %993 = vmatmul.bf16.gmra.mxu3 %v1861_v33 }
 0x114   :  { %v1403_v62 = vadd.f32 %v1402_v36, %v1212_v55  ;;  %v1473_v63 = vmul.f32 %v1212_v55, %v1212_v55  ;;  %v2119_v36 = vpack.c.bf16 %v2793_v32, %v2777_v22 }
 0x116   :  { %v1536_v2 = vadd.f32 %v1535_v38, %v1473_v63  ;;  %v707_v3 = vpop.f32.mrf.mxu0  ;;  %2187 = vst [vmem:[%s3066_s3 + $0xb0] sm:$0xff] %v2119_v36   ;;  %v785_v42 = vpop.f32.mrf.mxu2 }
 0x117   :  { %v876_v4 = vpop.f32.mrf.mxu1  ;;  %v954_v43 = vpop.f32.mrf.mxu3 }
 0x118   :  { %v877_v5 = vadd.f32 %v876_v4, %v707_v3  ;;  %v955_v51 = vadd.f32 %v954_v43, %v785_v42 }
 0x11a   :  { %v1213_v9 = vadd.f32 %v2500_v57, %v877_v5  ;;  %v2805_v61 = vadd.f32 %v2500_v57, %v955_v51 }
 0x11c   :  { %v2044_v10 = vpack.c.bf16 %v1213_v9, %v1212_v55  ;;  %v1404_v11 = vadd.f32 %v1403_v62, %v1213_v9  ;;  %v1474_v12 = vmul.f32 %v1213_v9, %v1213_v9 }
 0x11e   :  { %2172 = vst [vmem:[%s3066_s3 + $0x38] sm:$0xff] %v2044_v10   ;;  %v1537_v13 = vadd.f32 %v1536_v2, %v1474_v12  ;;  %v710_v15 = vpop.f32.mrf.mxu0  ;;  %v787_v58 = vpop.f32.mrf.mxu2 }
 0x11f   :  { %v879_v17 = vpop.f32.mrf.mxu1  ;;  %v956_v59 = vpop.f32.mrf.mxu3 }
 0x120   :  { %v880_v19 = vadd.f32 %v879_v17, %v710_v15  ;;  %v957_v62 = vadd.f32 %v956_v59, %v787_v58 }
 0x122   :  { %v1214_v28 = vadd.f32 %v2500_v57, %v880_v19  ;;  %v2809_v0 = vadd.f32 %v2500_v57, %v957_v62 }
 0x124   :  { %v1405_v34 = vadd.f32 %v1404_v11, %v1214_v28  ;;  %v1475_v35 = vmul.f32 %v1214_v28, %v1214_v28  ;;  %v2124_v4 = vpack.c.bf16 %v2809_v0, %v2805_v61 }
 0x126   :  { %v1538_v37 = vadd.f32 %v1537_v13, %v1475_v35  ;;  %v712_v38 = vpop.f32.mrf.mxu0  ;;  %2188 = vst [vmem:[%s3066_s3 + $0xb8] sm:$0xff] %v2124_v4   ;;  %v790_v10 = vpop.f32.mrf.mxu2 }
 0x127   :  { %v881_v40 = vpop.f32.mrf.mxu1  ;;  %v959_v11 = vpop.f32.mrf.mxu3 }
 0x128   :  { %v882_v41 = vadd.f32 %v881_v40, %v712_v38  ;;  %v960_v19 = vadd.f32 %v959_v11, %v790_v10 }
 0x12a   :  { %v1215_v44 = vadd.f32 %v2500_v57, %v882_v41  ;;  %v2825_v25 = vadd.f32 %v2500_v57, %v960_v19 }
 0x12c   :  { %v2049_v46 = vpack.c.bf16 %v1215_v44, %v1214_v28  ;;  %v1406_v47 = vadd.f32 %v1405_v34, %v1215_v44  ;;  %v1476_v48 = vmul.f32 %v1215_v44, %v1215_v44 }
 0x12e   :  { %2173 = vst [vmem:[%s3066_s3 + $0x40] sm:$0xff] %v2049_v46   ;;  %v1539_v50 = vadd.f32 %v1538_v37, %v1476_v48  ;;  %v715_v52 = vpop.f32.mrf.mxu0  ;;  %v792_v23 = vpop.f32.mrf.mxu2 }
 0x12f   :  { %v884_v54 = vpop.f32.mrf.mxu1  ;;  %v961_v24 = vpop.f32.mrf.mxu3 }
 0x130   :  { %v885_v55 = vadd.f32 %v884_v54, %v715_v52  ;;  %v962_v27 = vadd.f32 %v961_v24, %v792_v23 }
 0x132   :  { %v1216_v63 = vadd.f32 %v2500_v57, %v885_v55  ;;  %v2828_v28 = vadd.f32 %v2500_v57, %v962_v27 }
 0x134   :  { %v1407_v2 = vadd.f32 %v1406_v47, %v1216_v63  ;;  %v1477_v3 = vmul.f32 %v1216_v63, %v1216_v63  ;;  %v2129_v29 = vpack.c.bf16 %v2828_v28, %v2825_v25 }
 0x136   :  { %v1540_v5 = vadd.f32 %v1539_v50, %v1477_v3  ;;  %v717_v6 = vpop.f32.mrf.mxu0  ;;  %2189 = vst [vmem:[%s3066_s3 + $0xc0] sm:$0xff] %v2129_v29   ;;  %v795_v36 = vpop.f32.mrf.mxu2 }
 0x137   :  { %v886_v7 = vpop.f32.mrf.mxu1  ;;  %v964_v37 = vpop.f32.mrf.mxu3 }
 0x138   :  { %v887_v9 = vadd.f32 %v886_v7, %v717_v6  ;;  %v965_v42 = vadd.f32 %v964_v37, %v795_v36 }
 0x13a   :  { %v1217_v12 = vadd.f32 %v2500_v57, %v887_v9  ;;  %v2847_v48 = vadd.f32 %v2500_v57, %v965_v42 }
 0x13c   :  { %v2054_v13 = vpack.c.bf16 %v1217_v12, %v1216_v63  ;;  %v2817_v14 = vadd.f32 %v1407_v2, %v1217_v12  ;;  %v1478_v15 = vmul.f32 %v1217_v12, %v1217_v12 }
 0x13e   :  { %2174 = vst [vmem:[%s3066_s3 + $0x48] sm:$0xff] %v2054_v13   ;;  %v2822_v17 = vadd.f32 %v1540_v5, %v1478_v15  ;;  %v720_v20 = vpop.f32.mrf.mxu0  ;;  %v797_v46 = vpop.f32.mrf.mxu2 }
 0x13f   :  { %v889_v21 = vpop.f32.mrf.mxu1  ;;  %v966_v47 = vpop.f32.mrf.mxu3 }
 0x140   :  { %v890_v30 = vadd.f32 %v889_v21, %v720_v20  ;;  %v967_v50 = vadd.f32 %v966_v47, %v797_v46 }
 0x142   :  { %v2836_v38 = vadd.f32 %v2500_v57, %v890_v30  ;;  %v2850_v51 = vadd.f32 %v2500_v57, %v967_v50 }
 0x144   :  { %v2134_v52 = vpack.c.bf16 %v2850_v51, %v2847_v48 }
 0x146   :  { %v722_v33 = vpop.f32.mrf.mxu0  ;;  %2190 = vst [vmem:[%s3066_s3 + $0xc8] sm:$0xff] %v2134_v52   ;;  %v800_v62 = vpop.f32.mrf.mxu2 }
 0x147   :  { %v891_v34 = vpop.f32.mrf.mxu1  ;;  %v969_v63 = vpop.f32.mrf.mxu3 }
 0x148   :  { %v892_v35 = vadd.f32 %v891_v34, %v722_v33  ;;  %v970_v5 = vadd.f32 %v969_v63, %v800_v62 }
 0x14a   :  { %v2839_v40 = vadd.f32 %v2500_v57, %v892_v35  ;;  %v2869_v11 = vadd.f32 %v2500_v57, %v970_v5 }
 0x14c   :  { %v2059_v41 = vpack.c.bf16 %v2839_v40, %v2836_v38 }
 0x14e   :  { %2175 = vst [vmem:[%s3066_s3 + $0x50] sm:$0xff] %v2059_v41   ;;  %v725_v43 = vpop.f32.mrf.mxu0  ;;  %v802_v9 = vpop.f32.mrf.mxu2 }
 0x14f   :  { %v894_v44 = vpop.f32.mrf.mxu1  ;;  %v971_v10 = vpop.f32.mrf.mxu3 }
 0x150   :  { %v895_v54 = vadd.f32 %v894_v44, %v725_v43  ;;  %v972_v12 = vadd.f32 %v971_v10, %v802_v9 }
 0x152   :  { %v2858_v2 = vadd.f32 %v2500_v57, %v895_v54  ;;  %v2872_v13 = vadd.f32 %v2500_v57, %v972_v12 }
 0x154   :  { %v2139_v15 = vpack.c.bf16 %v2872_v13, %v2869_v11 }
 0x156   :  { %v727_v55 = vpop.f32.mrf.mxu0  ;;  %2191 = vst [vmem:[%s3066_s3 + $0xd0] sm:$0xff] %v2139_v15   ;;  %v805_v24 = vpop.f32.mrf.mxu2  ;;  %v1479_v15 = vmul.f32 %v2836_v38, %v2836_v38 }
 0x157   :  { %v896_v58 = vpop.f32.mrf.mxu1  ;;  %v974_v27 = vpop.f32.mrf.mxu3 }
 0x158   :  { %v897_v59 = vadd.f32 %v896_v58, %v727_v55  ;;  %v975_v34 = vadd.f32 %v974_v27, %v805_v24  ;;  %v1542_v27 = vadd.f32 %v2822_v17, %v1479_v15 }
 0x15a   :  { %v2861_v3 = vadd.f32 %v2500_v57, %v897_v59  ;;  %v2885_v42 = vadd.f32 %v2500_v57, %v975_v34 }
 0x15c   :  { %v2064_v4 = vpack.c.bf16 %v2861_v3, %v2858_v2 }
 0x15e   :  { %2176 = vst [vmem:[%s3066_s3 + $0x58] sm:$0xff] %v2064_v4   ;;  %v730_v6 = vpop.f32.mrf.mxu0  ;;  %v807_v37 = vpop.f32.mrf.mxu2 }
 0x15f   :  { %v899_v7 = vpop.f32.mrf.mxu1  ;;  %v976_v41 = vpop.f32.mrf.mxu3 }
 0x160   :  { %v900_v19 = vadd.f32 %v899_v7, %v730_v6  ;;  %v977_v43 = vadd.f32 %v976_v41, %v807_v37 }
 0x162   :  { %v1222_v29 = vadd.f32 %v2500_v57, %v900_v19  ;;  %v2888_v44 = vadd.f32 %v2500_v57, %v977_v43 }
 0x164   :  { %v2144_v46 = vpack.c.bf16 %v2888_v44, %v2885_v42 }
 0x166   :  { %v732_v20 = vpop.f32.mrf.mxu0  ;;  %2192 = vst [vmem:[%s3066_s3 + $0xd8] sm:$0xff] %v2144_v46   ;;  %v810_v55 = vpop.f32.mrf.mxu2 }
 0x167   :  { %v901_v21 = vpop.f32.mrf.mxu1  ;;  %v979_v58 = vpop.f32.mrf.mxu3 }
 0x168   :  { %v902_v23 = vadd.f32 %v901_v21, %v732_v20  ;;  %v980_v6 = vadd.f32 %v979_v58, %v810_v55  ;;  %v1480_v20 = vmul.f32 %v2839_v40, %v2839_v40 }
 0x16a   :  { %v1223_v30 = vadd.f32 %v2500_v57, %v902_v23  ;;  %v2901_v12 = vadd.f32 %v2500_v57, %v980_v6  ;;  %v1409_v23 = vadd.f32 %v2817_v14, %v2836_v38  ;;  %v1543_v46 = vadd.f32 %v1542_v27, %v1480_v20 }
 0x16b   :  { %v1482_v14 = vmul.f32 %v2861_v3, %v2861_v3 }
 0x16c   :  { %v2069_v33 = vpack.c.bf16 %v1223_v30, %v1222_v29 }
 0x16e   :  { %2177 = vst [vmem:[%s3066_s3 + $0x60] sm:$0xff] %v2069_v33   ;;  %v735_v35 = vpop.f32.mrf.mxu0  ;;  %v812_v7 = vpop.f32.mrf.mxu2  ;;  %v1481_v33 = vmul.f32 %v2858_v2, %v2858_v2 }
 0x16f   :  { %v904_v36 = vpop.f32.mrf.mxu1  ;;  %v981_v9 = vpop.f32.mrf.mxu3 }
 0x170   :  { %v905_v47 = vadd.f32 %v904_v36, %v735_v35  ;;  %v982_v10 = vadd.f32 %v981_v9, %v812_v7  ;;  %v1410_v36 = vadd.f32 %v1409_v23, %v2839_v40 }
 0x172   :  { %v1224_v59 = vadd.f32 %v2500_v57, %v905_v47  ;;  %v2906_v19 = vadd.f32 %v2500_v57, %v982_v10  ;;  %v1411_v17 = vadd.f32 %v1410_v36, %v2858_v2 }
 0x174   :  { %v2149_v21 = vpack.c.bf16 %v2906_v19, %v2901_v12  ;;  %v1485_v7 = vmul.f32 %v1224_v59, %v1224_v59 }
 0x176   :  { %v737_v50 = vpop.f32.mrf.mxu0  ;;  %2193 = vst [vmem:[%s3066_s3 + $0xe0] sm:$0xff] %v2149_v21   ;;  %v815_v41 = vpop.f32.mrf.mxu2 }
 0x177   :  { %v906_v52 = vpop.f32.mrf.mxu1  ;;  %v984_v43 = vpop.f32.mrf.mxu3 }
 0x178   :  { %v907_v54 = vadd.f32 %v906_v52, %v737_v50  ;;  %v1544_v50 = vadd.f32 %v1543_v46, %v1481_v33  ;;  %v1483_v52 = vmul.f32 %v1222_v29, %v1222_v29  ;;  %v985_v10 = vadd.f32 %v984_v43, %v815_v41 }
 0x17a   :  { %v1225_v62 = vadd.f32 %v2500_v57, %v907_v54  ;;  %v1412_v54 = vadd.f32 %v1411_v17, %v2861_v3  ;;  %v1545_v58 = vadd.f32 %v1544_v50, %v1482_v14 }
 0x17c   :  { %v2074_v63 = vpack.c.bf16 %v1225_v62, %v1224_v59  ;;  %v1413_v40 = vadd.f32 %v1412_v54, %v1222_v29  ;;  %v2931_v29 = vadd.f32 %v2500_v57, %v985_v10 }
 0x17e   :  { %2178 = vst [vmem:[%s3066_s3 + $0x68] sm:$0xff] %v2074_v63   ;;  %v740_v4 = vpop.f32.mrf.mxu0  ;;  %v1484_v63 = vmul.f32 %v1223_v30, %v1223_v30  ;;  %v1414_v2 = vadd.f32 %v1413_v40, %v1223_v30  ;;  %v817_v15 = vpop.f32.mrf.mxu2 }
 0x17f   :  { %v909_v5 = vpop.f32.mrf.mxu1  ;;  %v986_v20 = vpop.f32.mrf.mxu3 }
 0x180   :  { %v910_v24 = vadd.f32 %v909_v5, %v740_v4  ;;  %v1546_v4 = vadd.f32 %v1545_v58, %v1483_v52  ;;  %v987_v21 = vadd.f32 %v986_v20, %v817_v15  ;;  %v1415_v3 = vadd.f32 %v1414_v2, %v1224_v59 }
 0x182   :  { %v1226_v38 = vadd.f32 %v2500_v57, %v910_v24  ;;  %v1547_v23 = vadd.f32 %v1546_v4, %v1484_v63  ;;  %v1486_v24 = vmul.f32 %v1225_v62, %v1225_v62  ;;  %v2934_v27 = vadd.f32 %v2500_v57, %v987_v21 }
 0x184   :  { %v1548_v33 = vadd.f32 %v1547_v23, %v1485_v7  ;;  %v2154_v36 = vpack.c.bf16 %v2934_v27, %v2931_v29  ;;  %v1492_v7 = vmul.f32 %v2565_v53, %v2565_v53  ;;  %v1493_v23 = vmul.f32 %v2589_v18, %v2589_v18 }
 0x186   :  { %v742_v34 = vpop.f32.mrf.mxu0  ;;  %2194 = vst [vmem:[%s3066_s3 + $0xe8] sm:$0xff] %v2154_v36  }
 0x187   :  { %v911_v35 = vpop.f32.mrf.mxu1  ;;  %v989_v54 = vpop.f32.mrf.mxu3 }
 0x188   :  { %v912_v37 = vadd.f32 %v911_v35, %v742_v34  ;;  %v1416_v34 = vadd.f32 %v1415_v3, %v1225_v62  ;;  %v1487_v35 = vmul.f32 %v1226_v38, %v1226_v38  ;;  %v820_v62 = vpop.f32.mrf.mxu2 }
 0x189   :  { %v990_v10 = vadd.f32 %v989_v54, %v820_v62 }
 0x18a   :  { %v1227_v47 = vadd.f32 %v2500_v57, %v912_v37  ;;  %v1549_v37 = vadd.f32 %v1548_v33, %v1486_v24  ;;  %v1417_v41 = vadd.f32 %v1416_v34, %v1226_v38 }
 0x18c   :  { %v2079_v55 = vpack.c.bf16 %v1227_v47, %v1226_v38  ;;  %v1488_v43 = vmul.f32 %v1227_v47, %v1227_v47  ;;  %v1550_v14 = vadd.f32 %v1549_v37, %v1487_v35  ;;  %v1418_v17 = vadd.f32 %v1417_v41, %v1227_v47 }
 0x18e   :  { %2179 = vst [vmem:[%s3066_s3 + $0x70] sm:$0xff] %v2079_v55   ;;  %v745_v5 = vpop.f32.mrf.mxu0  ;;  %v1551_v55 = vadd.f32 %v1550_v14, %v1488_v43  ;;  %v1496_v43 = vmul.f32 %v2645_v1, %v2645_v1 }
 0x18f   :  { %v914_v6 = vpop.f32.mrf.mxu1  ;;  %v991_v20 = vpop.f32.mrf.mxu3 }
 0x190   :  { %v915_v9 = vadd.f32 %v914_v6, %v745_v5  ;;  %v1491_v6 = vmul.f32 %v2549_v45, %v2549_v45  ;;  %v822_v15 = vpop.f32.mrf.mxu2 }
 0x191   :  { %v992_v21 = vadd.f32 %v991_v20, %v822_v15  ;;  %v1503_v15 = vmul.f32 %v2777_v22, %v2777_v22 }
 0x192   :  { %v1228_v30 = vadd.f32 %v2500_v57, %v915_v9 }
 0x194   :  { %v1489_v50 = vmul.f32 %v1228_v30, %v1228_v30  ;;  %v1419_v58 = vadd.f32 %v1418_v17, %v1228_v30  ;;  %v1497_v17 = vmul.f32 %v2669_v31, %v2669_v31 }
 0x196   :  { %v747_v46 = vpop.f32.mrf.mxu0  ;;  %v1552_v63 = vadd.f32 %v1551_v55, %v1489_v50  ;;  %v1499_v55 = vmul.f32 %v2709_v8, %v2709_v8 }
 0x197   :  { %v916_v59 = vpop.f32.mrf.mxu1  ;;  %v994_v14 = vpop.f32.mrf.mxu3 }
 0x198   :  { %v917_v52 = vadd.f32 %v916_v59, %v747_v46  ;;  %v825_v59 = vpop.f32.mrf.mxu2 }
 0x19a   :  { %v1229_v40 = vadd.f32 %v2500_v57, %v917_v52 }
 0x19c   :  { %v2084_v4 = vpack.c.bf16 %v1229_v40, %v1228_v30  ;;  %v1420_v38 = vadd.f32 %v1419_v58, %v1229_v40  ;;  %v1490_v5 = vmul.f32 %v1229_v40, %v1229_v40  ;;  %v1500_v40 = vmul.f32 %v2725_v16, %v2725_v16 }
 0x19e   :  { %2180 = vst [vmem:[%s3066_s3 + $0x78] sm:$0xff] %v2084_v4   ;;  %v1421_v47 = vadd.f32 %v1420_v38, %v2549_v45  ;;  %v1553_v2 = vadd.f32 %v1552_v63, %v1490_v5  ;;  %v2214_v45 = vld [vmem:[%s3065_s2] ss:$0 sm:$0xff] }
 0x19f   :  { %v2958_v33 = vadd.f32 %v2214_v45, %v990_v10  ;;  %v2960_v34 = vadd.f32 %v2214_v45, %v992_v21  ;;  %v996_v5 = vpop.f32.mrf.mxu3 }
 0x1a0   :  { %v1422_v9 = vadd.f32 %v1421_v47, %v2565_v53  ;;  %v1554_v57 = vadd.f32 %v1553_v2, %v1491_v6  ;;  %v1494_v53 = vmul.f32 %v2605_v26, %v2605_v26  ;;  %v827_v38 = vpop.f32.mrf.mxu2 }
 0x1a1   :  { %v2159_v36 = vpack.c.bf16 %v2960_v34, %v2958_v33  ;;  %v997_v6 = vadd.f32 %v996_v5, %v827_v38  ;;  %v1518_v5 = vmul.f32 %v2934_v27, %v2934_v27 }
 0x1a2   :  { %v1423_v3 = vadd.f32 %v1422_v9, %v2589_v18  ;;  %v1555_v24 = vadd.f32 %v1554_v57, %v1492_v7  ;;  %v1495_v18 = vmul.f32 %v2629_v56, %v2629_v56 }
 0x1a3   :  { %2195 = vst [vmem:[%s3066_s3 + $0xf0] sm:$0xff] %v2159_v36   ;;  %v2991_v9 = vadd.f32 %v2214_v45, %v997_v6 }
 0x1a4   :  { %v1424_v35 = vadd.f32 %v1423_v3, %v2605_v26  ;;  %v1556_v30 = vadd.f32 %v1555_v24, %v1493_v23 }
 0x1a6   :  { %v1425_v37 = vadd.f32 %v1424_v35, %v2629_v56  ;;  %v1557_v41 = vadd.f32 %v1556_v30, %v1494_v53  ;;  %v1498_v56 = vmul.f32 %v2685_v39, %v2685_v39  ;;  %v1506_v53 = vmul.f32 %v2809_v0, %v2809_v0 }
 0x1a7   :  { %v1507_v30 = vmul.f32 %v2825_v25, %v2825_v25 }
 0x1a8   :  { %v1426_v46 = vadd.f32 %v1425_v37, %v2645_v1  ;;  %v1558_v26 = vadd.f32 %v1557_v41, %v1495_v18 }
 0x1aa   :  { %v1427_v50 = vadd.f32 %v1426_v46, %v2669_v31  ;;  %v1559_v52 = vadd.f32 %v1558_v26, %v1496_v43  ;;  %v995_v31 = vadd.f32 %v994_v14, %v825_v59 }
 0x1ac   :  { %v1428_v62 = vadd.f32 %v1427_v50, %v2685_v39  ;;  %v1560_v54 = vadd.f32 %v1559_v52, %v1497_v17  ;;  %v1501_v39 = vmul.f32 %v2749_v49, %v2749_v49  ;;  %v1260_v7 = vadd.f32 %v2214_v45, %v995_v31 }
 0x1ad   :  { %v1517_v31 = vmul.f32 %v2931_v29, %v2931_v29 }
 0x1ae   :  { %v1429_v1 = vadd.f32 %v1428_v62, %v2709_v8  ;;  %v1561_v58 = vadd.f32 %v1560_v54, %v1498_v56  ;;  %v1502_v8 = vmul.f32 %v2765_v60, %v2765_v60  ;;  %v2164_v10 = vpack.c.bf16 %v2991_v9, %v1260_v7 }
 0x1b0   :  { %v1430_v63 = vadd.f32 %v1429_v1, %v2725_v16  ;;  %v1562_v4 = vadd.f32 %v1561_v58, %v1499_v55  ;;  %2196 = vst [vmem:[%s3066_s3 + $0xf8] sm:$0xff] %v2164_v10   ;;  %v1515_v1 = vmul.f32 %v2901_v12, %v2901_v12 }
 0x1b2   :  { %v1431_v47 = vadd.f32 %v1430_v63, %v2749_v49  ;;  %v1563_v2 = vadd.f32 %v1562_v4, %v1500_v40  ;;  %v1504_v49 = vmul.f32 %v2793_v32, %v2793_v32  ;;  %v1516_v63 = vmul.f32 %v2906_v19, %v2906_v19 }
 0x1b4   :  { %v1432_v57 = vadd.f32 %v1431_v47, %v2765_v60  ;;  %v1564_v16 = vadd.f32 %v1563_v2, %v1501_v39  ;;  %v1505_v60 = vmul.f32 %v2805_v61, %v2805_v61  ;;  %v1519_v39 = vmul.f32 %v2958_v33, %v2958_v33 }
 0x1b5   :  { %v1520_v2 = vmul.f32 %v2960_v34, %v2960_v34 }
 0x1b6   :  { %v1565_v20 = vadd.f32 %v1564_v16, %v1502_v8  ;;  %v1433_v21 = vadd.f32 %v1432_v57, %v2777_v22  ;;  %v1521_v57 = vmul.f32 %v1260_v7, %v1260_v7 }
 0x1b8   :  { %v1434_v23 = vadd.f32 %v1433_v21, %v2793_v32  ;;  %v1566_v3 = vadd.f32 %v1565_v20, %v1503_v15  ;;  %v1508_v32 = vmul.f32 %v2828_v28, %v2828_v28 }
 0x1ba   :  { %v1435_v24 = vadd.f32 %v1434_v23, %v2805_v61  ;;  %v1567_v45 = vadd.f32 %v1566_v3, %v1504_v49  ;;  %v1509_v61 = vmul.f32 %v2847_v48, %v2847_v48 }
 0x1bc   :  { %v1436_v22 = vadd.f32 %v1435_v24, %v2809_v0  ;;  %v1568_v35 = vadd.f32 %v1567_v45, %v1505_v60  ;;  %v1510_v0 = vmul.f32 %v2850_v51, %v2850_v51 }
 0x1be   :  { %v1437_v36 = vadd.f32 %v1436_v22, %v2825_v25  ;;  %v1569_v18 = vadd.f32 %v1568_v35, %v1506_v53  ;;  %v1511_v25 = vmul.f32 %v2869_v11, %v2869_v11 }
 0x1c0   :  { %v1438_v37 = vadd.f32 %v1437_v36, %v2828_v28  ;;  %v1570_v41 = vadd.f32 %v1569_v18, %v1507_v30  ;;  %v1512_v28 = vmul.f32 %v2872_v13, %v2872_v13 }
 0x1c2   :  { %v1439_v43 = vadd.f32 %v1438_v37, %v2847_v48  ;;  %v1571_v46 = vadd.f32 %v1570_v41, %v1508_v32  ;;  %v1513_v48 = vmul.f32 %v2885_v42, %v2885_v42 }
 0x1c4   :  { %v1440_v26 = vadd.f32 %v1439_v43, %v2850_v51  ;;  %v1572_v59 = vadd.f32 %v1571_v46, %v1509_v61  ;;  %v1514_v51 = vmul.f32 %v2888_v44, %v2888_v44 }
 0x1c6   :  { %v1441_v14 = vadd.f32 %v1440_v26, %v2869_v11  ;;  %v1573_v17 = vadd.f32 %v1572_v59, %v1510_v0 }
 0x1c8   :  { %v1442_v50 = vadd.f32 %v1441_v14, %v2872_v13  ;;  %v1574_v52 = vadd.f32 %v1573_v17, %v1511_v25 }
 0x1ca   :  { %v1443_v56 = vadd.f32 %v1442_v50, %v2885_v42  ;;  %v1575_v62 = vadd.f32 %v1574_v52, %v1512_v28 }
 0x1cc   :  { %v1444_v54 = vadd.f32 %v1443_v56, %v2888_v44  ;;  %v1576_v55 = vadd.f32 %v1575_v62, %v1513_v48 }
 0x1ce   :  { %v1445_v11 = vadd.f32 %v1444_v54, %v2901_v12  ;;  %v1577_v58 = vadd.f32 %v1576_v55, %v1514_v51 }
 0x1d0   :  { %v1578_v13 = vadd.f32 %v1577_v58, %v1515_v1  ;;  %v1446_v40 = vadd.f32 %v1445_v11, %v2906_v19 }
 0x1d2   :  { %v1579_v42 = vadd.f32 %v1578_v13, %v1516_v63  ;;  %v1447_v4 = vadd.f32 %v1446_v40, %v2931_v29 }
 0x1d4   :  { %v1580_v44 = vadd.f32 %v1579_v42, %v1517_v31  ;;  %v1448_v38 = vadd.f32 %v1447_v4, %v2934_v27  ;;  %v1522_v27 = vmul.f32 %v2991_v9, %v2991_v9 }
 0x1d6   :  { %v1581_v12 = vadd.f32 %v1580_v44, %v1518_v5  ;;  %v1449_v6 = vadd.f32 %v1448_v38, %v2958_v33 }
 0x1d8   :  { %v1582_v47 = vadd.f32 %v1581_v12, %v1519_v39  ;;  %v1450_v19 = vadd.f32 %v1449_v6, %v2960_v34 }
 0x1da   :  { %v1583_v8 = vadd.f32 %v1582_v47, %v1520_v2  ;;  %v1451_v29 = vadd.f32 %v1450_v19, %v1260_v7 }
 0x1dc   :  { %v1584_v16 = vadd.f32 %v1583_v8, %v1521_v57  ;;  %v1452_v10 = vadd.f32 %v1451_v29, %v2991_v9 }
 0x1de   :  { %v1453_v15 = vrot.slane %v1452_v10, 4  ;;  %v1585_v20 = vadd.f32 %v1584_v16, %v1522_v27 }
 0x1e0   :  { %v1454_v21 = vadd.f32 %v1453_v15, %v1452_v10  ;;  %v1586_v49 = vrot.slane %v1585_v20, 4 }
 0x1e2   :  { %v1455_v33 = vrot.slane %v1454_v21, 2  ;;  %v1587_v23 = vadd.f32 %v1586_v49, %v1585_v20 }
 0x1e4   :  { %v1456_v3 = vadd.f32 %v1455_v33, %v1454_v21  ;;  %v1588_v60 = vrot.slane %v1587_v23, 2 }
 0x1e6   :  { %v1457_v24 = vrot.slane %v1456_v3, 1  ;;  %v1589_v45 = vadd.f32 %v1588_v60, %v1587_v23 }
 0x1e8   :  { %v1458_v34 = vadd.f32 %v1457_v24, %v1456_v3  ;;  %v1590_v53 = vrot.slane %v1589_v45, 1 }
 0x1ea   :  { %v1591_v22 = vadd.f32 %v1590_v53, %v1589_v45  ;;  %1592 = vst [vmem:[%s3067_s4] sm:$0xff] %v1458_v34 }
 0x1ec   :  { %1593 = vst [vmem:[%s3068_s5] sm:$0xff] %v1591_v22 }

// kernel: tile.173
= control target key start
LH: loop header
LB: loop body
LE: loop exit
PB: predicated region body
PF: predicated region fallthrough
CT: control target
= control target key end

     0   :  { %s22_s0 = inlined_call_operand.vmem [shape: f32[32], index: 0, kind: input, shape index: {}]   ;;  %s23_s1 = inlined_call_operand.vmem [shape: f32[4,32], index: 1, kind: output, shape index: {}]  }
   0x1   :  { %v4_v0 = vld [vmem:[%s22_s0] ss:$0 sm:$0xff] }
   0x2   :  { %5 = vst [vmem:[%s23_s1] sm:$0xf] %v4_v0 }

// kernel: local_enhancer_forward.45
= control target key start
LH: loop header
LB: loop body
LE: loop exit
PB: predicated region body
PF: predicated region fallthrough
CT: control target
= control target key end

     0   :  { %s114_s0 = inlined_call_operand.vmem [shape: bf16[32,128], index: 0, kind: input, shape index: {}]   ;;  %s115_s1 = inlined_call_operand.vmem [shape: f32[1,128], index: 1, kind: input, shape index: {}]   ;;  %s116_s2 = inlined_call_operand.vmem [shape: f32[1,128], index: 2, kind: input, shape index: {}]   ;;  %s117_s3 = inlined_call_operand.vmem [shape: bf16[32,128], index: 3, kind: output, shape index: {}]  }
   0x1   :  { %v55_v0 = vld [vmem:[%s114_s0] sm:$0xff]   ;;  %v72_v5 = vld [vmem:[%s114_s0 + $0x8] sm:$0xff]  }
   0x2   :  { %v74_v1 = vld [vmem:[%s115_s1] ss:$0 sm:$0xff]  ;;  %v56_v2 = vunpack.c.l.bf16 %v55_v0  ;;  %v57_v3 = vunpack.c.h.bf16 %v55_v0  ;;  %v60_v6 = vunpack.c.l.bf16 %v72_v5  ;;  %v61_v7 = vunpack.c.h.bf16 %v72_v5 }
   0x3   :  { %v75_v4 = vld [vmem:[%s116_s2] ss:$0 sm:$0xff] }
   0x4   :  { %v26_v8 = vmul.f32 %v74_v1, %v56_v2  ;;  %v27_v9 = vmul.f32 %v74_v1, %v57_v3  ;;  %v28_v10 = vmul.f32 %v74_v1, %v60_v6  ;;  %v29_v11 = vmul.f32 %v74_v1, %v61_v7 }
   0x6   :  { %v34_v12 = vadd.f32 %v75_v4, %v26_v8  ;;  %v35_v13 = vadd.f32 %v75_v4, %v27_v9  ;;  %v36_v14 = vadd.f32 %v75_v4, %v28_v10  ;;  %v37_v15 = vadd.f32 %v75_v4, %v29_v11 }
   0x8   :  { %v38_v16 = vmax.f32 %v34_v12, 0.0  ;;  %v39_v17 = vmax.f32 %v35_v13, 0.0  ;;  %v40_v18 = vmax.f32 %v36_v14, 0.0  ;;  %v41_v19 = vmax.f32 %v37_v15, 0.0 }
   0xa   :  { %v65_v20 = vpack.c.bf16 %v39_v17, %v38_v16  ;;  %v70_v21 = vpack.c.bf16 %v41_v19, %v40_v18 }
   0xc   :  { %66 = vst [vmem:[%s117_s3] sm:$0xff] %v65_v20  }
   0xd   :  { %73 = vst [vmem:[%s117_s3 + $0x8] sm:$0xff] %v70_v21  }

// kernel: local_enhancer_forward.44
= control target key start
LH: loop header
LB: loop body
LE: loop exit
PB: predicated region body
PF: predicated region fallthrough
CT: control target
= control target key end

     0   :  { %s1633_s1 = inlined_call_operand.vmem [shape: bf16[512,128], index: 1, kind: input, shape index: {}]   ;;  %s1634_s0 = inlined_call_operand.vmem [shape: bf16[128,512], index: 0, kind: input, shape index: {}]   ;;  %s1635_s2 = inlined_call_operand.vmem [shape: f32[1,128], index: 2, kind: input, shape index: {}]   ;;  %s1636_s3 = inlined_call_operand.vmem [shape: bf16[128,128], index: 3, kind: output, shape index: {0}]   ;;  %s1637_s4 = inlined_call_operand.vmem [shape: f32[8,128], index: 4, kind: output, shape index: {1}]   ;;  %s1638_s5 = inlined_call_operand.vmem [shape: f32[8,128], index: 5, kind: output, shape index: {2}]  }
   0x1   :  { %v1167_v0 = vld [vmem:[%s1633_s1 + $0x38] sm:$0xff]  ;;  %v1166_v4 = vld [vmem:[%s1633_s1 + $0x30] sm:$0xff]  ;;  %v1165_v8 = vld [vmem:[%s1633_s1 + $0x28] sm:$0xff] }
   0x2   :  { %v1175_v1 = vld [vmem:[%s1633_s1 + $0x78] sm:$0xff]  ;;  %501 = vmatpush.bf16.msra.mxu0 %v1167_v0  ;;  %v1174_v5 = vld [vmem:[%s1633_s1 + $0x70] sm:$0xff]  ;;  %v1173_v9 = vld [vmem:[%s1633_s1 + $0x68] sm:$0xff] }
   0x3   :  { %v1183_v2 = vld [vmem:[%s1633_s1 + $0xb8] sm:$0xff]  ;;  %550 = vmatpush.bf16.msra.mxu1 %v1175_v1  ;;  %v1182_v6 = vld [vmem:[%s1633_s1 + $0xb0] sm:$0xff]  ;;  %v1181_v10 = vld [vmem:[%s1633_s1 + $0xa8] sm:$0xff] }
   0x4   :  { %v1191_v3 = vld [vmem:[%s1633_s1 + $0xf8] sm:$0xff]  ;;  %599 = vmatpush.bf16.msra.mxu2 %v1183_v2  ;;  %v1190_v7 = vld [vmem:[%s1633_s1 + $0xf0] sm:$0xff]  ;;  %v1189_v11 = vld [vmem:[%s1633_s1 + $0xe8] sm:$0xff] }
   0x5   :  { %648 = vmatpush.bf16.msra.mxu3 %v1191_v3  ;;  %v1164_v12 = vld [vmem:[%s1633_s1 + $0x20] sm:$0xff]  ;;  %v1163_v16 = vld [vmem:[%s1633_s1 + $0x18] sm:$0xff]  ;;  %v1162_v20 = vld [vmem:[%s1633_s1 + $0x10] sm:$0xff] }
   0x6   :  { %502 = vmatpush.bf16.msra.mxu0 %v1166_v4  ;;  %v1172_v13 = vld [vmem:[%s1633_s1 + $0x60] sm:$0xff]  ;;  %v1171_v17 = vld [vmem:[%s1633_s1 + $0x58] sm:$0xff]  ;;  %v1170_v21 = vld [vmem:[%s1633_s1 + $0x50] sm:$0xff] }
   0x7   :  { %551 = vmatpush.bf16.msra.mxu1 %v1174_v5  ;;  %v1180_v14 = vld [vmem:[%s1633_s1 + $0xa0] sm:$0xff]  ;;  %v1179_v18 = vld [vmem:[%s1633_s1 + $0x98] sm:$0xff]  ;;  %v1178_v22 = vld [vmem:[%s1633_s1 + $0x90] sm:$0xff] }
   0x8   :  { %600 = vmatpush.bf16.msra.mxu2 %v1182_v6  ;;  %v1188_v15 = vld [vmem:[%s1633_s1 + $0xe0] sm:$0xff]  ;;  %v1187_v19 = vld [vmem:[%s1633_s1 + $0xd8] sm:$0xff]  ;;  %v1186_v23 = vld [vmem:[%s1633_s1 + $0xd0] sm:$0xff] }
   0x9   :  { %649 = vmatpush.bf16.msra.mxu3 %v1190_v7  ;;  %v1161_v24 = vld [vmem:[%s1633_s1 + $0x8] sm:$0xff]  ;;  %v1160_v28 = vld [vmem:[%s1633_s1] sm:$0xff]  ;;  %v1130_v33 = vld [vmem:[%s1634_s0 + $0xc] sm:$0xf0] }
   0xa   :  { %503 = vmatpush.bf16.msra.mxu0 %v1165_v8  ;;  %v1169_v25 = vld [vmem:[%s1633_s1 + $0x48] sm:$0xff]  ;;  %v1168_v29 = vld [vmem:[%s1633_s1 + $0x40] sm:$0xff]  ;;  %v876_v35 = vld [vmem:[%s1634_s0 + $0x10] sm:$0xf0] }
   0xb   :  { %552 = vmatpush.bf16.msra.mxu1 %v1173_v9  ;;  %v1177_v26 = vld [vmem:[%s1633_s1 + $0x88] sm:$0xff]  ;;  %v1176_v30 = vld [vmem:[%s1633_s1 + $0x80] sm:$0xff]  ;;  %v1131_v37 = vld [vmem:[%s1634_s0 + $0x14] sm:$0xf0] }
   0xc   :  { %601 = vmatpush.bf16.msra.mxu2 %v1181_v10  ;;  %v1185_v27 = vld [vmem:[%s1633_s1 + $0xc8] sm:$0xff]  ;;  %v1184_v31 = vld [vmem:[%s1633_s1 + $0xc0] sm:$0xff]  ;;  %v884_v39 = vld [vmem:[%s1634_s0 + $0x18] sm:$0xf0] }
   0xd   :  { %650 = vmatpush.bf16.msra.mxu3 %v1189_v11  ;;  %v874_v32 = vld [vmem:[%s1634_s0] sm:$0xf]  ;;  %v1128_v34 = vld [vmem:[%s1634_s0 + $0x4] sm:$0xf]  ;;  %v882_v36 = vld [vmem:[%s1634_s0 + $0x8] sm:$0xf] }
   0xe   :  { %504 = vmatpush.bf16.msra.mxu0 %v1164_v12  ;;  %v1129_v38 = vld [vmem:[%s1634_s0 + $0xc] sm:$0xf]  ;;  %v875_v40 = vor.u32 %v1130_v33, %v874_v32  ;;  %v879_v41 = vor.u32 %v1128_v34, %v876_v35  ;;  %v883_v42 = vor.u32 %v1131_v37, %v882_v36  ;;  %v890_v44 = vld [vmem:[%s1634_s0 + $0x20] sm:$0xf]  ;;  %v1134_v45 = vld [vmem:[%s1634_s0 + $0x2c] sm:$0xf0] }
   0xf   :  { %553 = vmatpush.bf16.msra.mxu1 %v1172_v13  ;;  %v887_v43 = vor.u32 %v1129_v38, %v884_v39  ;;  %v1132_v46 = vld [vmem:[%s1634_s0 + $0x24] sm:$0xf]  ;;  %v892_v47 = vld [vmem:[%s1634_s0 + $0x30] sm:$0xf0]  ;;  %v898_v48 = vld [vmem:[%s1634_s0 + $0x28] sm:$0xf]  ;;  %v891_v52 = vor.u32 %v1134_v45, %v890_v44 }
  0x10   :  { %602 = vmatpush.bf16.msra.mxu2 %v1180_v14  ;;  %v1135_v49 = vld [vmem:[%s1634_s0 + $0x34] sm:$0xf0]  ;;  %v1133_v50 = vld [vmem:[%s1634_s0 + $0x2c] sm:$0xf]  ;;  %v900_v51 = vld [vmem:[%s1634_s0 + $0x38] sm:$0xf0]  ;;  %v895_v53 = vor.u32 %v1132_v46, %v892_v47 }
  0x11   :  { %651 = vmatpush.bf16.msra.mxu3 %v1188_v15  ;;  %v899_v54 = vor.u32 %v1135_v49, %v898_v48  ;;  %v903_v55 = vor.u32 %v1133_v50, %v900_v51  ;;  %v906_v56 = vld [vmem:[%s1634_s0 + $0x40] sm:$0xf]  ;;  %v1138_v57 = vld [vmem:[%s1634_s0 + $0x4c] sm:$0xf0]  ;;  %v1136_v58 = vld [vmem:[%s1634_s0 + $0x44] sm:$0xf] }
  0x12   :  { %505 = vmatpush.bf16.msra.mxu0 %v1163_v16  ;;  %v908_v59 = vld [vmem:[%s1634_s0 + $0x50] sm:$0xf0]  ;;  %v914_v60 = vld [vmem:[%s1634_s0 + $0x48] sm:$0xf]  ;;  %v1139_v61 = vld [vmem:[%s1634_s0 + $0x54] sm:$0xf0]  ;;  %v907_v0 = vor.u32 %v1138_v57, %v906_v56 }
  0x13   :  { %554 = vmatpush.bf16.msra.mxu1 %v1171_v17  ;;  %v1137_v62 = vld [vmem:[%s1634_s0 + $0x4c] sm:$0xf]  ;;  %v916_v63 = vld [vmem:[%s1634_s0 + $0x58] sm:$0xf0]  ;;  %v911_v1 = vor.u32 %v1136_v58, %v908_v59  ;;  %v915_v2 = vor.u32 %v1139_v61, %v914_v60  ;;  %v922_v4 = vld [vmem:[%s1634_s0 + $0x60] sm:$0xf] }
  0x14   :  { %603 = vmatpush.bf16.msra.mxu2 %v1179_v18  ;;  %v919_v3 = vor.u32 %v1137_v62, %v916_v63  ;;  %v1142_v5 = vld [vmem:[%s1634_s0 + $0x6c] sm:$0xf0]  ;;  %v1140_v6 = vld [vmem:[%s1634_s0 + $0x64] sm:$0xf]  ;;  %v924_v7 = vld [vmem:[%s1634_s0 + $0x70] sm:$0xf0] }
  0x15   :  { %652 = vmatpush.bf16.msra.mxu3 %v1187_v19  ;;  %v930_v8 = vld [vmem:[%s1634_s0 + $0x68] sm:$0xf]  ;;  %v1143_v9 = vld [vmem:[%s1634_s0 + $0x74] sm:$0xf0]  ;;  %v1141_v10 = vld [vmem:[%s1634_s0 + $0x6c] sm:$0xf]  ;;  %v923_v12 = vor.u32 %v1142_v5, %v922_v4  ;;  %v927_v13 = vor.u32 %v1140_v6, %v924_v7 }
  0x16   :  { %506 = vmatpush.bf16.msra.mxu0 %v1162_v20  ;;  %v932_v11 = vld [vmem:[%s1634_s0 + $0x78] sm:$0xf0]  ;;  %v931_v14 = vor.u32 %v1143_v9, %v930_v8  ;;  %v938_v16 = vld [vmem:[%s1634_s0 + $0x80] sm:$0xf]  ;;  %v1146_v17 = vld [vmem:[%s1634_s0 + $0x8c] sm:$0xf0] }
  0x17   :  { %555 = vmatpush.bf16.msra.mxu1 %v1170_v21  ;;  %v935_v15 = vor.u32 %v1141_v10, %v932_v11  ;;  %v1144_v18 = vld [vmem:[%s1634_s0 + $0x84] sm:$0xf]  ;;  %v940_v19 = vld [vmem:[%s1634_s0 + $0x90] sm:$0xf0]  ;;  %v946_v20 = vld [vmem:[%s1634_s0 + $0x88] sm:$0xf] }
  0x18   :  { %604 = vmatpush.bf16.msra.mxu2 %v1178_v22  ;;  %v1147_v21 = vld [vmem:[%s1634_s0 + $0x94] sm:$0xf0]  ;;  %v1145_v22 = vld [vmem:[%s1634_s0 + $0x8c] sm:$0xf]  ;;  %v962_v32 = vld [vmem:[%s1634_s0 + $0xa8] sm:$0xf] }
  0x19   :  { %653 = vmatpush.bf16.msra.mxu3 %v1186_v23  ;;  %v948_v23 = vld [vmem:[%s1634_s0 + $0x98] sm:$0xf0]  ;;  %v1151_v33 = vld [vmem:[%s1634_s0 + $0xb4] sm:$0xf0]  ;;  %v1149_v34 = vld [vmem:[%s1634_s0 + $0xac] sm:$0xf] }
  0x1a   :  { %507 = vmatpush.bf16.msra.mxu0 %v1161_v24  ;;  %v939_v24 = vor.u32 %v1146_v17, %v938_v16  ;;  %v964_v35 = vld [vmem:[%s1634_s0 + $0xb8] sm:$0xf0]  ;;  %v963_v38 = vor.u32 %v1151_v33, %v962_v32  ;;  %v978_v44 = vld [vmem:[%s1634_s0 + $0xc8] sm:$0xf]  ;;  %v1155_v45 = vld [vmem:[%s1634_s0 + $0xd4] sm:$0xf0] }
  0x1b   :  { %556 = vmatpush.bf16.msra.mxu1 %v1169_v25  ;;  %v943_v25 = vor.u32 %v1144_v18, %v940_v19  ;;  %v967_v39 = vor.u32 %v1149_v34, %v964_v35  ;;  %v1153_v46 = vld [vmem:[%s1634_s0 + $0xcc] sm:$0xf]  ;;  %v980_v47 = vld [vmem:[%s1634_s0 + $0xd8] sm:$0xf0]  ;;  %v979_v50 = vor.u32 %v1155_v45, %v978_v44  ;;  %v994_v56 = vld [vmem:[%s1634_s0 + $0xe8] sm:$0xf] }
  0x1c   :  { %605 = vmatpush.bf16.msra.mxu2 %v1177_v26  ;;  %v947_v26 = vor.u32 %v1147_v21, %v946_v20  ;;  %v983_v51 = vor.u32 %v1153_v46, %v980_v47  ;;  %v1159_v57 = vld [vmem:[%s1634_s0 + $0xf4] sm:$0xf0]  ;;  %v1157_v58 = vld [vmem:[%s1634_s0 + $0xec] sm:$0xf]  ;;  %v996_v59 = vld [vmem:[%s1634_s0 + $0xf8] sm:$0xf0] }
  0x1d   :  { %654 = vmatpush.bf16.msra.mxu3 %v1185_v27  ;;  %v951_v27 = vor.u32 %v1145_v22, %v948_v23  ;;  %v995_v62 = vor.u32 %v1159_v57, %v994_v56  ;;  %v999_v63 = vor.u32 %v1157_v58, %v996_v59  ;;  %v1561_v9 = vld [vmem:[%s1635_s2] ss:$0 sm:$0xff] }
  0x1e   :  { %508 = vmatpush.bf16.msra.mxu0 %v1160_v28  ;;  %v954_v28 = vld [vmem:[%s1634_s0 + $0xa0] sm:$0xf] }
  0x1f   :  { %557 = vmatpush.bf16.msra.mxu1 %v1168_v29  ;;  %v1150_v29 = vld [vmem:[%s1634_s0 + $0xac] sm:$0xf0] }
  0x20   :  { %606 = vmatpush.bf16.msra.mxu2 %v1176_v30  ;;  %v1148_v30 = vld [vmem:[%s1634_s0 + $0xa4] sm:$0xf]  ;;  %v955_v36 = vor.u32 %v1150_v29, %v954_v28 }
  0x21   :  { %655 = vmatpush.bf16.msra.mxu3 %v1184_v31  ;;  %509 = vmatmul.bf16.vlgmr.msra.gmra.mxu0 %v875_v40  ;;  %v956_v31 = vld [vmem:[%s1634_s0 + $0xb0] sm:$0xf0]  ;;  %v970_v40 = vld [vmem:[%s1634_s0 + $0xc0] sm:$0xf] }
  0x22   :  { %558 = vmatmul.bf16.vlgmr.msra.gmra.mxu1 %v879_v41  ;;  %v959_v37 = vor.u32 %v1148_v30, %v956_v31  ;;  %v1154_v41 = vld [vmem:[%s1634_s0 + $0xcc] sm:$0xf0] }
  0x23   :  { %607 = vmatmul.bf16.vlgmr.msra.gmra.mxu2 %v883_v42  ;;  %v1152_v42 = vld [vmem:[%s1634_s0 + $0xc4] sm:$0xf]  ;;  %v971_v48 = vor.u32 %v1154_v41, %v970_v40 }
  0x24   :  { %656 = vmatmul.bf16.vlgmr.msra.gmra.mxu3 %v887_v43  ;;  %v972_v43 = vld [vmem:[%s1634_s0 + $0xd0] sm:$0xf0] }
  0x25   :  { %v975_v49 = vor.u32 %v1152_v42, %v972_v43 }
  0x31   :  { %514 = vmatmul.bf16.gmra.mxu0 %v891_v52  ;;  %v986_v52 = vld [vmem:[%s1634_s0 + $0xe0] sm:$0xf] }
  0x32   :  { %563 = vmatmul.bf16.gmra.mxu1 %v895_v53  ;;  %v1158_v53 = vld [vmem:[%s1634_s0 + $0xec] sm:$0xf0] }
  0x33   :  { %612 = vmatmul.bf16.gmra.mxu2 %v899_v54  ;;  %v1156_v54 = vld [vmem:[%s1634_s0 + $0xe4] sm:$0xf]  ;;  %v987_v60 = vor.u32 %v1158_v53, %v986_v52 }
  0x34   :  { %661 = vmatmul.bf16.gmra.mxu3 %v903_v55  ;;  %v988_v55 = vld [vmem:[%s1634_s0 + $0xf0] sm:$0xf0] }
  0x35   :  { %v991_v61 = vor.u32 %v1156_v54, %v988_v55 }
  0x41   :  { %519 = vmatmul.bf16.gmra.mxu0 %v907_v0 }
  0x42   :  { %568 = vmatmul.bf16.gmra.mxu1 %v911_v1 }
  0x43   :  { %617 = vmatmul.bf16.gmra.mxu2 %v915_v2 }
  0x44   :  { %666 = vmatmul.bf16.gmra.mxu3 %v919_v3 }
  0x51   :  { %524 = vmatmul.bf16.gmra.mxu0 %v923_v12 }
  0x52   :  { %573 = vmatmul.bf16.gmra.mxu1 %v927_v13 }
  0x53   :  { %622 = vmatmul.bf16.gmra.mxu2 %v931_v14 }
  0x54   :  { %671 = vmatmul.bf16.gmra.mxu3 %v935_v15 }
  0x61   :  { %529 = vmatmul.bf16.gmra.mxu0 %v939_v24 }
  0x62   :  { %578 = vmatmul.bf16.gmra.mxu1 %v943_v25 }
  0x63   :  { %627 = vmatmul.bf16.gmra.mxu2 %v947_v26 }
  0x64   :  { %676 = vmatmul.bf16.gmra.mxu3 %v951_v27 }
  0x71   :  { %534 = vmatmul.bf16.gmra.mxu0 %v955_v36 }
  0x72   :  { %583 = vmatmul.bf16.gmra.mxu1 %v959_v37 }
  0x73   :  { %632 = vmatmul.bf16.gmra.mxu2 %v963_v38 }
  0x74   :  { %681 = vmatmul.bf16.gmra.mxu3 %v967_v39 }
  0x81   :  { %539 = vmatmul.bf16.gmra.mxu0 %v971_v48 }
  0x82   :  { %588 = vmatmul.bf16.gmra.mxu1 %v975_v49 }
  0x83   :  { %637 = vmatmul.bf16.gmra.mxu2 %v979_v50 }
  0x84   :  { %686 = vmatmul.bf16.gmra.mxu3 %v983_v51 }
  0x91   :  { %544 = vmatmul.bf16.gmra.mxu0 %v987_v60 }
  0x92   :  { %593 = vmatmul.bf16.gmra.mxu1 %v991_v61 }
  0x93   :  { %642 = vmatmul.bf16.gmra.mxu2 %v995_v62 }
  0x94   :  { %691 = vmatmul.bf16.gmra.mxu3 %v999_v63 }
  0x9e   :  { %v510_v0 = vpop.f32.mrf.mxu0 }
  0x9f   :  { %v559_v1 = vpop.f32.mrf.mxu1 }
  0xa0   :  { %v560_v2 = vadd.f32 %v559_v1, %v510_v0 }
  0xa6   :  { %v608_v3 = vpop.f32.mrf.mxu2  ;;  %v512_v5 = vpop.f32.mrf.mxu0 }
  0xa7   :  { %v657_v4 = vpop.f32.mrf.mxu3  ;;  %v561_v6 = vpop.f32.mrf.mxu1  ;;  %v609_v7 = vadd.f32 %v608_v3, %v560_v2 }
  0xa8   :  { %v562_v10 = vadd.f32 %v561_v6, %v512_v5 }
  0xa9   :  { %v658_v8 = vadd.f32 %v657_v4, %v609_v7 }
  0xab   :  { %v752_v16 = vadd.f32 %v1561_v9, %v658_v8 }
  0xad   :  { %v821_v20 = vmul.f32 %v752_v16, %v752_v16 }
  0xae   :  { %v610_v11 = vpop.f32.mrf.mxu2  ;;  %v515_v14 = vpop.f32.mrf.mxu0 }
  0xaf   :  { %v659_v12 = vpop.f32.mrf.mxu3  ;;  %v611_v13 = vadd.f32 %v610_v11, %v562_v10  ;;  %v564_v15 = vpop.f32.mrf.mxu1 }
  0xb0   :  { %v565_v19 = vadd.f32 %v564_v15, %v515_v14 }
  0xb1   :  { %v660_v17 = vadd.f32 %v659_v12, %v611_v13 }
  0xb3   :  { %v753_v18 = vadd.f32 %v1561_v9, %v660_v17 }
  0xb5   :  { %v1195_v21 = vpack.c.bf16 %v753_v18, %v752_v16  ;;  %v800_v22 = vadd.f32 %v753_v18, %v752_v16  ;;  %v822_v23 = vmul.f32 %v753_v18, %v753_v18 }
  0xb6   :  { %v613_v24 = vpop.f32.mrf.mxu2  ;;  %v517_v28 = vpop.f32.mrf.mxu0 }
  0xb7   :  { %v662_v25 = vpop.f32.mrf.mxu3  ;;  %1196 = vst [vmem:[%s1636_s3] sm:$0xff] %v1195_v21   ;;  %v837_v26 = vadd.f32 %v822_v23, %v821_v20  ;;  %v614_v27 = vadd.f32 %v613_v24, %v565_v19  ;;  %v566_v29 = vpop.f32.mrf.mxu1 }
  0xb8   :  { %v567_v34 = vadd.f32 %v566_v29, %v517_v28 }
  0xb9   :  { %v663_v30 = vadd.f32 %v662_v25, %v614_v27 }
  0xbb   :  { %v754_v31 = vadd.f32 %v1561_v9, %v663_v30 }
  0xbd   :  { %v801_v32 = vadd.f32 %v800_v22, %v754_v31  ;;  %v823_v33 = vmul.f32 %v754_v31, %v754_v31 }
  0xbe   :  { %v615_v35 = vpop.f32.mrf.mxu2  ;;  %v520_v39 = vpop.f32.mrf.mxu0 }
  0xbf   :  { %v664_v36 = vpop.f32.mrf.mxu3  ;;  %v838_v37 = vadd.f32 %v837_v26, %v823_v33  ;;  %v616_v38 = vadd.f32 %v615_v35, %v567_v34  ;;  %v569_v40 = vpop.f32.mrf.mxu1 }
  0xc0   :  { %v570_v49 = vadd.f32 %v569_v40, %v520_v39 }
  0xc1   :  { %v665_v41 = vadd.f32 %v664_v36, %v616_v38 }
  0xc3   :  { %v755_v42 = vadd.f32 %v1561_v9, %v665_v41 }
  0xc5   :  { %v1200_v43 = vpack.c.bf16 %v755_v42, %v754_v31  ;;  %v1570_v44 = vadd.f32 %v801_v32, %v755_v42  ;;  %v824_v45 = vmul.f32 %v755_v42, %v755_v42 }
  0xc6   :  { %v618_v46 = vpop.f32.mrf.mxu2  ;;  %v522_v50 = vpop.f32.mrf.mxu0 }
  0xc7   :  { %v667_v47 = vpop.f32.mrf.mxu3  ;;  %1232 = vst [vmem:[%s1636_s3 + $0x8] sm:$0xff] %v1200_v43   ;;  %v1575_v48 = vadd.f32 %v838_v37, %v824_v45  ;;  %v571_v51 = vpop.f32.mrf.mxu1  ;;  %v619_v52 = vadd.f32 %v618_v46, %v570_v49 }
  0xc8   :  { %v572_v53 = vadd.f32 %v571_v51, %v522_v50 }
  0xc9   :  { %v668_v56 = vadd.f32 %v667_v47, %v619_v52 }
  0xcb   :  { %v1578_v61 = vadd.f32 %v1561_v9, %v668_v56 }
  0xce   :  { %v620_v54 = vpop.f32.mrf.mxu2  ;;  %v525_v58 = vpop.f32.mrf.mxu0 }
  0xcf   :  { %v669_v55 = vpop.f32.mrf.mxu3  ;;  %v621_v57 = vadd.f32 %v620_v54, %v572_v53  ;;  %v574_v59 = vpop.f32.mrf.mxu1 }
  0xd0   :  { %v575_v2 = vadd.f32 %v574_v59, %v525_v58 }
  0xd1   :  { %v670_v60 = vadd.f32 %v669_v55, %v621_v57 }
  0xd3   :  { %v1581_v62 = vadd.f32 %v1561_v9, %v670_v60  ;;  %v825_v60 = vmul.f32 %v1578_v61, %v1578_v61 }
  0xd5   :  { %v1205_v63 = vpack.c.bf16 %v1581_v62, %v1578_v61 }
  0xd6   :  { %v623_v0 = vpop.f32.mrf.mxu2  ;;  %v527_v3 = vpop.f32.mrf.mxu0 }
  0xd7   :  { %v672_v1 = vpop.f32.mrf.mxu3  ;;  %1233 = vst [vmem:[%s1636_s3 + $0x10] sm:$0xff] %v1205_v63   ;;  %v576_v4 = vpop.f32.mrf.mxu1  ;;  %v624_v5 = vadd.f32 %v623_v0, %v575_v2  ;;  %v826_v0 = vmul.f32 %v1581_v62, %v1581_v62 }
  0xd8   :  { %v577_v6 = vadd.f32 %v576_v4, %v527_v3  ;;  %v803_v3 = vadd.f32 %v1570_v44, %v1578_v61 }
  0xd9   :  { %v673_v10 = vadd.f32 %v672_v1, %v624_v5 }
  0xdb   :  { %v758_v15 = vadd.f32 %v1561_v9, %v673_v10 }
  0xde   :  { %v625_v7 = vpop.f32.mrf.mxu2  ;;  %v530_v12 = vpop.f32.mrf.mxu0 }
  0xdf   :  { %v674_v8 = vpop.f32.mrf.mxu3  ;;  %v626_v11 = vadd.f32 %v625_v7, %v577_v6  ;;  %v579_v13 = vpop.f32.mrf.mxu1  ;;  %v840_v6 = vadd.f32 %v1575_v48, %v825_v60  ;;  %v827_v7 = vmul.f32 %v758_v15, %v758_v15 }
  0xe0   :  { %v580_v20 = vadd.f32 %v579_v13, %v530_v12 }
  0xe1   :  { %v675_v14 = vadd.f32 %v674_v8, %v626_v11  ;;  %v804_v11 = vadd.f32 %v803_v3, %v1581_v62  ;;  %v841_v13 = vadd.f32 %v840_v6, %v826_v0 }
  0xe3   :  { %v1590_v16 = vadd.f32 %v1561_v9, %v675_v14  ;;  %v842_v61 = vadd.f32 %v841_v13, %v827_v7 }
  0xe5   :  { %v1210_v17 = vpack.c.bf16 %v1590_v16, %v758_v15  ;;  %v828_v14 = vmul.f32 %v1590_v16, %v1590_v16 }
  0xe6   :  { %v628_v18 = vpop.f32.mrf.mxu2  ;;  %v532_v21 = vpop.f32.mrf.mxu0 }
  0xe7   :  { %v677_v19 = vpop.f32.mrf.mxu3  ;;  %1234 = vst [vmem:[%s1636_s3 + $0x18] sm:$0xff] %v1210_v17   ;;  %v581_v22 = vpop.f32.mrf.mxu1  ;;  %v629_v23 = vadd.f32 %v628_v18, %v580_v20  ;;  %v805_v17 = vadd.f32 %v804_v11, %v758_v15 }
  0xe8   :  { %v582_v24 = vadd.f32 %v581_v22, %v532_v21  ;;  %v843_v22 = vadd.f32 %v842_v61, %v828_v14 }
  0xe9   :  { %v678_v27 = vadd.f32 %v677_v19, %v629_v23  ;;  %v806_v48 = vadd.f32 %v805_v17, %v1590_v16 }
  0xeb   :  { %v760_v32 = vadd.f32 %v1561_v9, %v678_v27 }
  0xed   :  { %v829_v20 = vmul.f32 %v760_v32, %v760_v32 }
  0xee   :  { %v630_v25 = vpop.f32.mrf.mxu2  ;;  %v535_v29 = vpop.f32.mrf.mxu0 }
  0xef   :  { %v679_v26 = vpop.f32.mrf.mxu3  ;;  %v631_v28 = vadd.f32 %v630_v25, %v582_v24  ;;  %v584_v30 = vpop.f32.mrf.mxu1  ;;  %v807_v25 = vadd.f32 %v806_v48, %v760_v32 }
  0xf0   :  { %v585_v37 = vadd.f32 %v584_v30, %v535_v29 }
  0xf1   :  { %v680_v31 = vadd.f32 %v679_v26, %v631_v28  ;;  %v844_v26 = vadd.f32 %v843_v22, %v829_v20 }
  0xf3   :  { %v761_v33 = vadd.f32 %v1561_v9, %v680_v31 }
  0xf5   :  { %v1215_v34 = vpack.c.bf16 %v761_v33, %v760_v32  ;;  %v830_v23 = vmul.f32 %v761_v33, %v761_v33  ;;  %v808_v28 = vadd.f32 %v807_v25, %v761_v33 }
  0xf6   :  { %v633_v35 = vpop.f32.mrf.mxu2  ;;  %v537_v38 = vpop.f32.mrf.mxu0 }
  0xf7   :  { %v682_v36 = vpop.f32.mrf.mxu3  ;;  %1235 = vst [vmem:[%s1636_s3 + $0x20] sm:$0xff] %v1215_v34   ;;  %v586_v39 = vpop.f32.mrf.mxu1  ;;  %v634_v40 = vadd.f32 %v633_v35, %v585_v37  ;;  %v845_v30 = vadd.f32 %v844_v26, %v830_v23 }
  0xf8   :  { %v587_v41 = vadd.f32 %v586_v39, %v537_v38 }
  0xf9   :  { %v683_v45 = vadd.f32 %v682_v36, %v634_v40 }
  0xfb   :  { %v762_v51 = vadd.f32 %v1561_v9, %v683_v45 }
  0xfd   :  { %v831_v27 = vmul.f32 %v762_v51, %v762_v51  ;;  %v809_v35 = vadd.f32 %v808_v28, %v762_v51 }
  0xfe   :  { %v635_v42 = vpop.f32.mrf.mxu2  ;;  %v540_v47 = vpop.f32.mrf.mxu0 }
  0xff   :  { %v684_v43 = vpop.f32.mrf.mxu3  ;;  %v636_v46 = vadd.f32 %v635_v42, %v587_v41  ;;  %v589_v49 = vpop.f32.mrf.mxu1  ;;  %v846_v36 = vadd.f32 %v845_v30, %v831_v27 }
 0x100   :  { %v590_v56 = vadd.f32 %v589_v49, %v540_v47 }
 0x101   :  { %v685_v50 = vadd.f32 %v684_v43, %v636_v46 }
 0x103   :  { %v763_v52 = vadd.f32 %v1561_v9, %v685_v50 }
 0x105   :  { %v1220_v53 = vpack.c.bf16 %v763_v52, %v762_v51  ;;  %v832_v16 = vmul.f32 %v763_v52, %v763_v52  ;;  %v810_v37 = vadd.f32 %v809_v35, %v763_v52 }
 0x106   :  { %v638_v54 = vpop.f32.mrf.mxu2  ;;  %v542_v57 = vpop.f32.mrf.mxu0 }
 0x107   :  { %v687_v55 = vpop.f32.mrf.mxu3  ;;  %1236 = vst [vmem:[%s1636_s3 + $0x28] sm:$0xff] %v1220_v53   ;;  %v591_v58 = vpop.f32.mrf.mxu1  ;;  %v639_v59 = vadd.f32 %v638_v54, %v590_v56  ;;  %v847_v41 = vadd.f32 %v846_v36, %v832_v16 }
 0x108   :  { %v592_v63 = vadd.f32 %v591_v58, %v542_v57 }
 0x109   :  { %v688_v4 = vadd.f32 %v687_v55, %v639_v59 }
 0x10b   :  { %v764_v18 = vadd.f32 %v1561_v9, %v688_v4 }
 0x10d   :  { %v833_v38 = vmul.f32 %v764_v18, %v764_v18  ;;  %v811_v42 = vadd.f32 %v810_v37, %v764_v18 }
 0x10e   :  { %v640_v1 = vpop.f32.mrf.mxu2  ;;  %v545_v8 = vpop.f32.mrf.mxu0 }
 0x10f   :  { %v689_v2 = vpop.f32.mrf.mxu3  ;;  %v641_v5 = vadd.f32 %v640_v1, %v592_v63  ;;  %v594_v10 = vpop.f32.mrf.mxu1  ;;  %v848_v47 = vadd.f32 %v847_v41, %v833_v38 }
 0x110   :  { %v595_v44 = vadd.f32 %v594_v10, %v545_v8 }
 0x111   :  { %v690_v12 = vadd.f32 %v689_v2, %v641_v5 }
 0x113   :  { %v765_v19 = vadd.f32 %v1561_v9, %v690_v12 }
 0x115   :  { %v1225_v21 = vpack.c.bf16 %v765_v19, %v764_v18  ;;  %v834_v43 = vmul.f32 %v765_v19, %v765_v19  ;;  %v812_v33 = vadd.f32 %v811_v42, %v765_v19 }
 0x116   :  { %v643_v24 = vpop.f32.mrf.mxu2  ;;  %v547_v31 = vpop.f32.mrf.mxu0 }
 0x117   :  { %v692_v62 = vpop.f32.mrf.mxu3  ;;  %1237 = vst [vmem:[%s1636_s3 + $0x30] sm:$0xff] %v1225_v21   ;;  %v644_v15 = vadd.f32 %v643_v24, %v595_v44  ;;  %v596_v34 = vpop.f32.mrf.mxu1  ;;  %v849_v53 = vadd.f32 %v848_v47, %v834_v43 }
 0x118   :  { %v597_v32 = vadd.f32 %v596_v34, %v547_v31 }
 0x119   :  { %v693_v29 = vadd.f32 %v692_v62, %v644_v15 }
 0x11b   :  { %v766_v39 = vadd.f32 %v1561_v9, %v693_v29 }
 0x11d   :  { %v835_v49 = vmul.f32 %v766_v39, %v766_v39  ;;  %v813_v54 = vadd.f32 %v812_v33, %v766_v39 }
 0x11e   :  { %v645_v40 = vpop.f32.mrf.mxu2 }
 0x11f   :  { %v646_v45 = vadd.f32 %v645_v40, %v597_v32  ;;  %v694_v46 = vpop.f32.mrf.mxu3  ;;  %v850_v55 = vadd.f32 %v849_v53, %v835_v49 }
 0x121   :  { %v695_v50 = vadd.f32 %v694_v46, %v646_v45 }
 0x123   :  { %v767_v51 = vadd.f32 %v1561_v9, %v695_v50 }
 0x125   :  { %v1230_v52 = vpack.c.bf16 %v767_v51, %v766_v39  ;;  %v814_v56 = vadd.f32 %v813_v54, %v767_v51  ;;  %v836_v57 = vmul.f32 %v767_v51, %v767_v51 }
 0x127   :  { %1238 = vst [vmem:[%s1636_s3 + $0x38] sm:$0xff] %v1230_v52   ;;  %v815_v58 = vrot.slane %v814_v56, 4  ;;  %v851_v59 = vadd.f32 %v850_v55, %v836_v57 }
 0x129   :  { %v816_v60 = vadd.f32 %v815_v58, %v814_v56  ;;  %v852_v63 = vrot.slane %v851_v59, 4 }
 0x12b   :  { %v817_v0 = vrot.slane %v816_v60, 2  ;;  %v853_v1 = vadd.f32 %v852_v63, %v851_v59 }
 0x12d   :  { %v818_v2 = vadd.f32 %v817_v0, %v816_v60  ;;  %v854_v3 = vrot.slane %v853_v1, 2 }
 0x12f   :  { %v819_v4 = vrot.slane %v818_v2, 1  ;;  %v855_v5 = vadd.f32 %v854_v3, %v853_v1 }
 0x131   :  { %v820_v6 = vadd.f32 %v819_v4, %v818_v2  ;;  %v856_v9 = vrot.slane %v855_v5, 1 }
 0x133   :  { %v857_v7 = vadd.f32 %v856_v9, %v855_v5  ;;  %858 = vst [vmem:[%s1637_s4] sm:$0xff] %v820_v6 }
 0x135   :  { %859 = vst [vmem:[%s1638_s5] sm:$0xff] %v857_v7 }

// kernel: tile.183
= control target key start
LH: loop header
LB: loop body
LE: loop exit
PB: predicated region body
PF: predicated region fallthrough
CT: control target
= control target key end

     0   :  { %s22_s0 = inlined_call_operand.vmem [shape: f32[64], index: 0, kind: input, shape index: {}]   ;;  %s23_s1 = inlined_call_operand.vmem [shape: f32[2,64], index: 1, kind: output, shape index: {}]  }
   0x1   :  { %v4_v0 = vld [vmem:[%s22_s0] ss:$0 sm:$0xff] }
   0x2   :  { %5 = vst [vmem:[%s23_s1] sm:$0x3] %v4_v0 }

// kernel: local_enhancer_forward.47
= control target key start
LH: loop header
LB: loop body
LE: loop exit
PB: predicated region body
PF: predicated region fallthrough
CT: control target
= control target key end

     0   :  { %s83_s0 = inlined_call_operand.vmem [shape: bf16[16,128], index: 0, kind: input, shape index: {}]   ;;  %s84_s1 = inlined_call_operand.vmem [shape: f32[1,128], index: 1, kind: input, shape index: {}]   ;;  %s85_s2 = inlined_call_operand.vmem [shape: f32[1,128], index: 2, kind: input, shape index: {}]   ;;  %s86_s3 = inlined_call_operand.vmem [shape: bf16[16,128], index: 3, kind: output, shape index: {}]  }
   0x1   :  { %v41_v0 = vld [vmem:[%s83_s0] sm:$0xff]  }
   0x2   :  { %v49_v1 = vld [vmem:[%s84_s1] ss:$0 sm:$0xff]  ;;  %v42_v2 = vunpack.c.l.bf16 %v41_v0  ;;  %v43_v3 = vunpack.c.h.bf16 %v41_v0 }
   0x3   :  { %v50_v4 = vld [vmem:[%s85_s2] ss:$0 sm:$0xff] }
   0x4   :  { %v22_v5 = vmul.f32 %v49_v1, %v42_v2  ;;  %v23_v6 = vmul.f32 %v49_v1, %v43_v3 }
   0x6   :  { %v28_v7 = vadd.f32 %v50_v4, %v22_v5  ;;  %v29_v8 = vadd.f32 %v50_v4, %v23_v6 }
   0x8   :  { %v30_v9 = vmax.f32 %v28_v7, 0.0  ;;  %v31_v10 = vmax.f32 %v29_v8, 0.0 }
   0xa   :  { %v47_v11 = vpack.c.bf16 %v31_v10, %v30_v9 }
   0xc   :  { %48 = vst [vmem:[%s86_s3] sm:$0xff] %v47_v11  }

// kernel: local_enhancer_forward.46
= control target key start
LH: loop header
LB: loop body
LE: loop exit
PB: predicated region body
PF: predicated region fallthrough
CT: control target
= control target key end

     0   :  { %s1957_s18 = smov 0   ;;  %s1959_s19 = smov 0   ;;  %s2225_s0 = inlined_call_operand.vmem [shape: bf16[128,1024], index: 0, kind: input, shape index: {}]   ;;  %s2226_s1 = inlined_call_operand.vmem [shape: bf16[1024,128], index: 1, kind: input, shape index: {}]   ;;  %s2227_s2 = inlined_call_operand.vmem [shape: f32[1,128], index: 2, kind: input, shape index: {}]   ;;  %s2228_s3 = inlined_call_operand.vmem [shape: bf16[128,128], index: 3, kind: output, shape index: {0}]   ;;  %s2229_s4 = inlined_call_operand.vmem [shape: f32[8,128], index: 4, kind: output, shape index: {1}]   ;;  %s2230_s5 = inlined_call_operand.vmem [shape: f32[8,128], index: 5, kind: output, shape index: {2}]  }
   0x1   :  { %s1961_s20 = smov 0   ;;  %s1963_s21 = smov 0  }
   0x2   :  { %s1965_s22 = smov 0  }
   0x3 LB: > { %s28_s23 = sadd.s32 1, %s1920_s21  ;;  %p51_p1 = scmp.ne.s32.totalorder %s1912_s19, %s1908_s18  ;;  %s1924_s22 = sphi %s1965_s22, %s16_s22   ;;  %s1920_s21 = sphi %s1963_s21, %s2234_s21   ;;  %s1916_s20 = sphi %s1961_s20, %s2233_s20   ;;  %s1912_s19 = sphi %s1959_s19, %s2232_s19   ;;  %s1908_s18 = sphi %s1957_s18, %s2231_s18  }
   0x4   : > { %p29_p0 = scmp.ge.s32.totalorder %s28_s23, 2  ;;  %p52_p2 = scmp.eq.s32.totalorder %s1924_s22, 0 }
   0x5   : > { %s44_s25 = sadd.s32 1, %s1912_s19  ;;  %p1460_p5 = scmp.ge.s32.totalorder %s1924_s22, 2 }
   0x6   : > { %s2236_s23 = smov (%p29_p0, %s28_s23), 0  ;;  %p53_p3 = por %p52_p2, %p51_p1 }
   0x7   : > { %s40_s24 = ssub.s32 %s1920_s21, %s2236_s23  ;;  %221 = sbr.rel (%p1460_p5) target bundleno = 48 (0x30), region = 20 }
   0x8   : > { %p42_p4 = scmp.eq.s32.totalorder %s40_s24, 0 }
   0xa   : > { %s1992_s26 = scalar_select %p42_p4, %s1912_s19, %s44_s25  }
   0xc   : > { %224 = sbr.rel (!%p53_p3) target bundleno = 48 (0x30), region = 24  ;;  %s226_s27 = sand.u32 (%p53_p3), 1, %s1912_s19  }
   0xd   : > { %s1732_s28 = sshll.u32 (%p53_p3), %s1920_s21, 4  ;;  %s1461_s29 = sshll.u32 (%p53_p3), %s226_s27, 8 }
   0xe   : > { %s2000_s7 = scalar_lea.vmem (%p53_p3), %s2225_s0, %s1732_s28  ;;  %s2005_s8 = scalar_lea.vmem (%p53_p3), [#allocation3], %s1461_s29 }
   0xf   : > { %v247_v0 = vld [vmem:[%s2000_s7] sm:$0xff] (%p53_p3)  ;;  %v249_v1 = vld [vmem:[%s2000_s7 + $0x8] sm:$0xff] (%p53_p3) }
  0x10   : > { %v251_v2 = vld [vmem:[%s2000_s7 + $0x20] sm:$0xff] (%p53_p3)  ;;  %248 = vst [vmem:[%s2005_s8] sm:$0xff] (%p53_p3), %v247_v0  ;;  %v253_v3 = vld [vmem:[%s2000_s7 + $0x28] sm:$0xff] (%p53_p3) }
  0x11   : > { %250 = vst [vmem:[%s2005_s8 + $0x8] sm:$0xff] %v249_v1  ;;  %v255_v4 = vld [vmem:[%s2000_s7 + $0x40] sm:$0xff]  ;;  %v257_v5 = vld [vmem:[%s2000_s7 + $0x48] sm:$0xff] }
  0x12   : > { %252 = vst [vmem:[%s2005_s8 + $0x10] sm:$0xff] %v251_v2  ;;  %v259_v6 = vld [vmem:[%s2000_s7 + $0x60] sm:$0xff]  ;;  %v261_v7 = vld [vmem:[%s2000_s7 + $0x68] sm:$0xff] }
  0x13   : > { %254 = vst [vmem:[%s2005_s8 + $0x18] sm:$0xff] %v253_v3  ;;  %v263_v8 = vld [vmem:[%s2000_s7 + $0x80] sm:$0xff]  ;;  %v265_v9 = vld [vmem:[%s2000_s7 + $0x88] sm:$0xff] }
  0x14   : > { %256 = vst [vmem:[%s2005_s8 + $0x20] sm:$0xff] %v255_v4  ;;  %v267_v10 = vld [vmem:[%s2000_s7 + $0xa0] sm:$0xff]  ;;  %v269_v11 = vld [vmem:[%s2000_s7 + $0xa8] sm:$0xff] }
  0x15   : > { %258 = vst [vmem:[%s2005_s8 + $0x28] sm:$0xff] %v257_v5  ;;  %v271_v12 = vld [vmem:[%s2000_s7 + $0xc0] sm:$0xff]  ;;  %v273_v13 = vld [vmem:[%s2000_s7 + $0xc8] sm:$0xff] }
  0x16   : > { %260 = vst [vmem:[%s2005_s8 + $0x30] sm:$0xff] %v259_v6  ;;  %v275_v14 = vld [vmem:[%s2000_s7 + $0xe0] sm:$0xff]  ;;  %v277_v15 = vld [vmem:[%s2000_s7 + $0xe8] sm:$0xff] }
  0x17   : > { %262 = vst [vmem:[%s2005_s8 + $0x38] sm:$0xff] %v261_v7  ;;  %v279_v16 = vld [vmem:[%s2000_s7 + $0x100] sm:$0xff]  ;;  %v281_v17 = vld [vmem:[%s2000_s7 + $0x108] sm:$0xff] }
  0x18   : > { %264 = vst [vmem:[%s2005_s8 + $0x40] sm:$0xff] %v263_v8  ;;  %v283_v18 = vld [vmem:[%s2000_s7 + $0x120] sm:$0xff]  ;;  %v285_v19 = vld [vmem:[%s2000_s7 + $0x128] sm:$0xff] }
  0x19   : > { %266 = vst [vmem:[%s2005_s8 + $0x48] sm:$0xff] %v265_v9  ;;  %v287_v20 = vld [vmem:[%s2000_s7 + $0x140] sm:$0xff]  ;;  %v289_v21 = vld [vmem:[%s2000_s7 + $0x148] sm:$0xff] }
  0x1a   : > { %268 = vst [vmem:[%s2005_s8 + $0x50] sm:$0xff] %v267_v10  ;;  %v291_v22 = vld [vmem:[%s2000_s7 + $0x160] sm:$0xff]  ;;  %v293_v23 = vld [vmem:[%s2000_s7 + $0x168] sm:$0xff] }
  0x1b   : > { %270 = vst [vmem:[%s2005_s8 + $0x58] sm:$0xff] %v269_v11  ;;  %v295_v24 = vld [vmem:[%s2000_s7 + $0x180] sm:$0xff]  ;;  %v297_v25 = vld [vmem:[%s2000_s7 + $0x188] sm:$0xff] }
  0x1c   : > { %272 = vst [vmem:[%s2005_s8 + $0x60] sm:$0xff] %v271_v12  ;;  %v299_v26 = vld [vmem:[%s2000_s7 + $0x1a0] sm:$0xff]  ;;  %v301_v27 = vld [vmem:[%s2000_s7 + $0x1a8] sm:$0xff] }
  0x1d   : > { %274 = vst [vmem:[%s2005_s8 + $0x68] sm:$0xff] %v273_v13  ;;  %v303_v28 = vld [vmem:[%s2000_s7 + $0x1c0] sm:$0xff]  ;;  %v305_v29 = vld [vmem:[%s2000_s7 + $0x1c8] sm:$0xff] }
  0x1e   : > { %276 = vst [vmem:[%s2005_s8 + $0x70] sm:$0xff] %v275_v14  ;;  %v307_v30 = vld [vmem:[%s2000_s7 + $0x1e0] sm:$0xff]  ;;  %v309_v31 = vld [vmem:[%s2000_s7 + $0x1e8] sm:$0xff] }
  0x1f   : > { %278 = vst [vmem:[%s2005_s8 + $0x78] sm:$0xff] %v277_v15 }
  0x20   : > { %280 = vst [vmem:[%s2005_s8 + $0x80] sm:$0xff] %v279_v16 }
  0x21   : > { %282 = vst [vmem:[%s2005_s8 + $0x88] sm:$0xff] %v281_v17 }
  0x22   : > { %284 = vst [vmem:[%s2005_s8 + $0x90] sm:$0xff] %v283_v18 }
  0x23   : > { %286 = vst [vmem:[%s2005_s8 + $0x98] sm:$0xff] %v285_v19 }
  0x24   : > { %288 = vst [vmem:[%s2005_s8 + $0xa0] sm:$0xff] %v287_v20 }
  0x25   : > { %290 = vst [vmem:[%s2005_s8 + $0xa8] sm:$0xff] %v289_v21 }
  0x26   : > { %292 = vst [vmem:[%s2005_s8 + $0xb0] sm:$0xff] %v291_v22 }
  0x27   : > { %294 = vst [vmem:[%s2005_s8 + $0xb8] sm:$0xff] %v293_v23 }
  0x28   : > { %296 = vst [vmem:[%s2005_s8 + $0xc0] sm:$0xff] %v295_v24 }
  0x29   : > { %298 = vst [vmem:[%s2005_s8 + $0xc8] sm:$0xff] %v297_v25 }
  0x2a   : > { %300 = vst [vmem:[%s2005_s8 + $0xd0] sm:$0xff] %v299_v26 }
  0x2b   : > { %302 = vst [vmem:[%s2005_s8 + $0xd8] sm:$0xff] %v301_v27 }
  0x2c   : > { %304 = vst [vmem:[%s2005_s8 + $0xe0] sm:$0xff] %v303_v28 }
  0x2d   : > { %306 = vst [vmem:[%s2005_s8 + $0xe8] sm:$0xff] %v305_v29 }
  0x2e   : > { %308 = vst [vmem:[%s2005_s8 + $0xf0] sm:$0xff] %v307_v30 }
  0x2f   : > { %310 = vst [vmem:[%s2005_s8 + $0xf8] sm:$0xff] %v309_v31 }
  0x30 PF: > { %p1464_p6 = scmp.ge.s32.totalorder %s1924_s22, 1  ;;  %p327_p7 = scmp.lt.s32.totalorder %s1924_s22, 3 }
  0x32   : > { %p328_p8 = pnand %p1464_p6, %p327_p7 }
  0x33   : > { %s334_s9 = sand.u32 (!%p328_p8), 1, %s1908_s18   ;;  %s1466_s10 = sshll.u32 (!%p328_p8), %s1916_s20, 6 }
  0x34   : > { %331 = sbr.rel (%p328_p8) target bundleno = 422 (0x1a6), region = 51  ;;  %s1465_s11 = sshll.u32 (!%p328_p8), %s334_s9, 8 }
  0x35   : > { %p392_p9 = scmp.lt.s32.totalorder (!%p328_p8), %s1466_s10, 127  ;;  %s2077_s16 = scalar_lea.vmem (!%p328_p8), [#allocation3], %s1465_s11 }
  0x36   : > { %p1468_p10 = scmp.ne.s32.totalorder (!%p328_p8), %s1916_s20, 0 }
  0x39   : > { %s2238_s10 = smov (!%p392_p9, %s1466_s10), 127  ;;  %429 = sbr.rel (%p1468_p10) target bundleno = 79 (0x4f), region = 59 }
  0x3a   : > { %s1467_s12 = sshll.u32 %s2238_s10, 2 }
  0x3b   : > { %s2075_s15 = scalar_lea.vmem %s2226_s1, %s1467_s12 }
  0x3e   : > { %v1926_v32 = vmov 0.0  }
  0x3f   : > { %430 = vst [vmem:[#allocation2 + $0x30] sm:$0xff] %v1926_v32 }
  0x40   : > { %431 = vst [vmem:[#allocation2] sm:$0xff] %v1926_v32 }
  0x41   : > { %432 = vst [vmem:[#allocation2 + $0x58] sm:$0xff] %v1926_v32 }
  0x42   : > { %433 = vst [vmem:[#allocation2 + $0x18] sm:$0xff] %v1926_v32 }
  0x43   : > { %434 = vst [vmem:[#allocation2 + $0x50] sm:$0xff] %v1926_v32 }
  0x44   : > { %435 = vst [vmem:[#allocation2 + $0x68] sm:$0xff] %v1926_v32 }
  0x45   : > { %436 = vst [vmem:[#allocation2 + $0x8] sm:$0xff] %v1926_v32 }
  0x46   : > { %437 = vst [vmem:[#allocation2 + $0x48] sm:$0xff] %v1926_v32 }
  0x47   : > { %438 = vst [vmem:[#allocation2 + $0x40] sm:$0xff] %v1926_v32 }
  0x48   : > { %439 = vst [vmem:[#allocation2 + $0x20] sm:$0xff] %v1926_v32 }
  0x49   : > { %440 = vst [vmem:[#allocation2 + $0x10] sm:$0xff] %v1926_v32 }
  0x4a   : > { %441 = vst [vmem:[#allocation2 + $0x38] sm:$0xff] %v1926_v32 }
  0x4b   : > { %442 = vst [vmem:[#allocation2 + $0x60] sm:$0xff] %v1926_v32 }
  0x4c   : > { %443 = vst [vmem:[#allocation2 + $0x70] sm:$0xff] %v1926_v32 }
  0x4d   : > { %444 = vst [vmem:[#allocation2 + $0x78] sm:$0xff] %v1926_v32 }
  0x4e   : > { %445 = vst [vmem:[#allocation2 + $0x28] sm:$0xff] %v1926_v32 }
  0x4f PF: > { %v1772_v33 = vld [vmem:[%s2075_s15 + $0x38] sm:$0xff]  ;;  %v1771_v37 = vld [vmem:[%s2075_s15 + $0x30] sm:$0xff]  ;;  %v1770_v41 = vld [vmem:[%s2075_s15 + $0x28] sm:$0xff]  ;;  %p1725_p11 = scmp.ne.s32.totalorder %s1916_s20, 1 }
  0x50   : > { %v1780_v34 = vld [vmem:[%s2075_s15 + $0x78] sm:$0xff]  ;;  %910 = vmatpush.bf16.msra.mxu0 %v1772_v33  ;;  %v1779_v38 = vld [vmem:[%s2075_s15 + $0x70] sm:$0xff]  ;;  %v1778_v42 = vld [vmem:[%s2075_s15 + $0x68] sm:$0xff] }
  0x51   : > { %v1788_v35 = vld [vmem:[%s2075_s15 + $0xb8] sm:$0xff]  ;;  %959 = vmatpush.bf16.msra.mxu1 %v1780_v34  ;;  %v1787_v39 = vld [vmem:[%s2075_s15 + $0xb0] sm:$0xff]  ;;  %v1786_v43 = vld [vmem:[%s2075_s15 + $0xa8] sm:$0xff] }
  0x52   : > { %v1796_v36 = vld [vmem:[%s2075_s15 + $0xf8] sm:$0xff]  ;;  %1008 = vmatpush.bf16.msra.mxu2 %v1788_v35  ;;  %v1795_v40 = vld [vmem:[%s2075_s15 + $0xf0] sm:$0xff]  ;;  %v1794_v44 = vld [vmem:[%s2075_s15 + $0xe8] sm:$0xff] }
  0x53   : > { %1057 = vmatpush.bf16.msra.mxu3 %v1796_v36  ;;  %v1769_v45 = vld [vmem:[%s2075_s15 + $0x20] sm:$0xff]  ;;  %v1768_v49 = vld [vmem:[%s2075_s15 + $0x18] sm:$0xff]  ;;  %v1767_v53 = vld [vmem:[%s2075_s15 + $0x10] sm:$0xff] }
  0x54   : > { %911 = vmatpush.bf16.msra.mxu0 %v1771_v37  ;;  %v1777_v46 = vld [vmem:[%s2075_s15 + $0x60] sm:$0xff]  ;;  %v1776_v50 = vld [vmem:[%s2075_s15 + $0x58] sm:$0xff]  ;;  %v1775_v54 = vld [vmem:[%s2075_s15 + $0x50] sm:$0xff] }
  0x55   : > { %960 = vmatpush.bf16.msra.mxu1 %v1779_v38  ;;  %v1785_v47 = vld [vmem:[%s2075_s15 + $0xa0] sm:$0xff]  ;;  %v1784_v51 = vld [vmem:[%s2075_s15 + $0x98] sm:$0xff]  ;;  %v1783_v55 = vld [vmem:[%s2075_s15 + $0x90] sm:$0xff] }
  0x56   : > { %1009 = vmatpush.bf16.msra.mxu2 %v1787_v39  ;;  %v1793_v48 = vld [vmem:[%s2075_s15 + $0xe0] sm:$0xff]  ;;  %v1792_v52 = vld [vmem:[%s2075_s15 + $0xd8] sm:$0xff]  ;;  %v1791_v56 = vld [vmem:[%s2075_s15 + $0xd0] sm:$0xff] }
  0x57   : > { %1058 = vmatpush.bf16.msra.mxu3 %v1795_v40  ;;  %v1766_v57 = vld [vmem:[%s2075_s15 + $0x8] sm:$0xff]  ;;  %v1765_v61 = vld [vmem:[%s2075_s15] sm:$0xff]  ;;  %v1735_v2 = vld [vmem:[%s2077_s16 + $0xc] sm:$0xf0] }
  0x58   : > { %912 = vmatpush.bf16.msra.mxu0 %v1770_v41  ;;  %v1774_v58 = vld [vmem:[%s2075_s15 + $0x48] sm:$0xff]  ;;  %v1773_v62 = vld [vmem:[%s2075_s15 + $0x40] sm:$0xff]  ;;  %v1473_v4 = vld [vmem:[%s2077_s16 + $0x10] sm:$0xf0] }
  0x59   : > { %961 = vmatpush.bf16.msra.mxu1 %v1778_v42  ;;  %v1782_v59 = vld [vmem:[%s2075_s15 + $0x88] sm:$0xff]  ;;  %v1781_v63 = vld [vmem:[%s2075_s15 + $0x80] sm:$0xff]  ;;  %v1736_v6 = vld [vmem:[%s2077_s16 + $0x14] sm:$0xf0] }
  0x5a   : > { %1010 = vmatpush.bf16.msra.mxu2 %v1786_v43  ;;  %v1790_v60 = vld [vmem:[%s2075_s15 + $0xc8] sm:$0xff]  ;;  %v1789_v0 = vld [vmem:[%s2075_s15 + $0xc0] sm:$0xff]  ;;  %v1481_v8 = vld [vmem:[%s2077_s16 + $0x18] sm:$0xf0] }
  0x5b   : > { %1059 = vmatpush.bf16.msra.mxu3 %v1794_v44  ;;  %v1471_v1 = vld [vmem:[%s2077_s16] sm:$0xf]  ;;  %v1733_v3 = vld [vmem:[%s2077_s16 + $0x4] sm:$0xf]  ;;  %v1479_v5 = vld [vmem:[%s2077_s16 + $0x8] sm:$0xf] }
  0x5c   : > { %913 = vmatpush.bf16.msra.mxu0 %v1769_v45  ;;  %v1734_v7 = vld [vmem:[%s2077_s16 + $0xc] sm:$0xf]  ;;  %v1472_v9 = vor.u32 %v1735_v2, %v1471_v1  ;;  %v1476_v10 = vor.u32 %v1733_v3, %v1473_v4  ;;  %v1480_v11 = vor.u32 %v1736_v6, %v1479_v5  ;;  %v1487_v13 = vld [vmem:[%s2077_s16 + $0x20] sm:$0xf]  ;;  %v1739_v14 = vld [vmem:[%s2077_s16 + $0x2c] sm:$0xf0] }
  0x5d   : > { %962 = vmatpush.bf16.msra.mxu1 %v1777_v46  ;;  %v1484_v12 = vor.u32 %v1734_v7, %v1481_v8  ;;  %v1737_v15 = vld [vmem:[%s2077_s16 + $0x24] sm:$0xf]  ;;  %v1489_v16 = vld [vmem:[%s2077_s16 + $0x30] sm:$0xf0]  ;;  %v1495_v17 = vld [vmem:[%s2077_s16 + $0x28] sm:$0xf]  ;;  %v1488_v21 = vor.u32 %v1739_v14, %v1487_v13 }
  0x5e   : > { %1011 = vmatpush.bf16.msra.mxu2 %v1785_v47  ;;  %v1740_v18 = vld [vmem:[%s2077_s16 + $0x34] sm:$0xf0]  ;;  %v1738_v19 = vld [vmem:[%s2077_s16 + $0x2c] sm:$0xf]  ;;  %v1497_v20 = vld [vmem:[%s2077_s16 + $0x38] sm:$0xf0]  ;;  %v1492_v22 = vor.u32 %v1737_v15, %v1489_v16 }
  0x5f   : > { %1060 = vmatpush.bf16.msra.mxu3 %v1793_v48  ;;  %v1496_v23 = vor.u32 %v1740_v18, %v1495_v17  ;;  %v1500_v24 = vor.u32 %v1738_v19, %v1497_v20  ;;  %v1503_v25 = vld [vmem:[%s2077_s16 + $0x40] sm:$0xf]  ;;  %v1743_v26 = vld [vmem:[%s2077_s16 + $0x4c] sm:$0xf0]  ;;  %v1741_v27 = vld [vmem:[%s2077_s16 + $0x44] sm:$0xf] }
  0x60   : > { %914 = vmatpush.bf16.msra.mxu0 %v1768_v49  ;;  %v1505_v28 = vld [vmem:[%s2077_s16 + $0x50] sm:$0xf0]  ;;  %v1511_v29 = vld [vmem:[%s2077_s16 + $0x48] sm:$0xf]  ;;  %v1744_v30 = vld [vmem:[%s2077_s16 + $0x54] sm:$0xf0]  ;;  %v1504_v33 = vor.u32 %v1743_v26, %v1503_v25 }
  0x61   : > { %963 = vmatpush.bf16.msra.mxu1 %v1776_v50  ;;  %v1742_v31 = vld [vmem:[%s2077_s16 + $0x4c] sm:$0xf]  ;;  %v1513_v32 = vld [vmem:[%s2077_s16 + $0x58] sm:$0xf0]  ;;  %v1508_v34 = vor.u32 %v1741_v27, %v1505_v28  ;;  %v1512_v35 = vor.u32 %v1744_v30, %v1511_v29  ;;  %v1519_v37 = vld [vmem:[%s2077_s16 + $0x60] sm:$0xf] }
  0x62   : > { %1012 = vmatpush.bf16.msra.mxu2 %v1784_v51  ;;  %v1516_v36 = vor.u32 %v1742_v31, %v1513_v32  ;;  %v1747_v38 = vld [vmem:[%s2077_s16 + $0x6c] sm:$0xf0]  ;;  %v1745_v39 = vld [vmem:[%s2077_s16 + $0x64] sm:$0xf]  ;;  %v1521_v40 = vld [vmem:[%s2077_s16 + $0x70] sm:$0xf0] }
  0x63   : > { %1061 = vmatpush.bf16.msra.mxu3 %v1792_v52  ;;  %v1527_v41 = vld [vmem:[%s2077_s16 + $0x68] sm:$0xf]  ;;  %v1748_v42 = vld [vmem:[%s2077_s16 + $0x74] sm:$0xf0]  ;;  %v1746_v43 = vld [vmem:[%s2077_s16 + $0x6c] sm:$0xf]  ;;  %v1520_v45 = vor.u32 %v1747_v38, %v1519_v37  ;;  %v1524_v46 = vor.u32 %v1745_v39, %v1521_v40 }
  0x64   : > { %915 = vmatpush.bf16.msra.mxu0 %v1767_v53  ;;  %v1529_v44 = vld [vmem:[%s2077_s16 + $0x78] sm:$0xf0]  ;;  %v1528_v47 = vor.u32 %v1748_v42, %v1527_v41  ;;  %v1535_v49 = vld [vmem:[%s2077_s16 + $0x80] sm:$0xf]  ;;  %v1751_v50 = vld [vmem:[%s2077_s16 + $0x8c] sm:$0xf0] }
  0x65   : > { %964 = vmatpush.bf16.msra.mxu1 %v1775_v54  ;;  %v1532_v48 = vor.u32 %v1746_v43, %v1529_v44  ;;  %v1749_v51 = vld [vmem:[%s2077_s16 + $0x84] sm:$0xf]  ;;  %v1537_v52 = vld [vmem:[%s2077_s16 + $0x90] sm:$0xf0]  ;;  %v1543_v53 = vld [vmem:[%s2077_s16 + $0x88] sm:$0xf] }
  0x66   : > { %1013 = vmatpush.bf16.msra.mxu2 %v1783_v55  ;;  %v1752_v54 = vld [vmem:[%s2077_s16 + $0x94] sm:$0xf0]  ;;  %v1750_v55 = vld [vmem:[%s2077_s16 + $0x8c] sm:$0xf]  ;;  %v1559_v1 = vld [vmem:[%s2077_s16 + $0xa8] sm:$0xf] }
  0x67   : > { %1062 = vmatpush.bf16.msra.mxu3 %v1791_v56  ;;  %v1545_v56 = vld [vmem:[%s2077_s16 + $0x98] sm:$0xf0]  ;;  %v1756_v2 = vld [vmem:[%s2077_s16 + $0xb4] sm:$0xf0]  ;;  %v1754_v3 = vld [vmem:[%s2077_s16 + $0xac] sm:$0xf] }
  0x68   : > { %916 = vmatpush.bf16.msra.mxu0 %v1766_v57  ;;  %v1536_v57 = vor.u32 %v1751_v50, %v1535_v49  ;;  %v1561_v4 = vld [vmem:[%s2077_s16 + $0xb8] sm:$0xf0]  ;;  %v1560_v7 = vor.u32 %v1756_v2, %v1559_v1  ;;  %v1575_v13 = vld [vmem:[%s2077_s16 + $0xc8] sm:$0xf]  ;;  %v1760_v14 = vld [vmem:[%s2077_s16 + $0xd4] sm:$0xf0] }
  0x69   : > { %965 = vmatpush.bf16.msra.mxu1 %v1774_v58  ;;  %v1540_v58 = vor.u32 %v1749_v51, %v1537_v52  ;;  %v1564_v8 = vor.u32 %v1754_v3, %v1561_v4  ;;  %v1758_v15 = vld [vmem:[%s2077_s16 + $0xcc] sm:$0xf]  ;;  %v1577_v16 = vld [vmem:[%s2077_s16 + $0xd8] sm:$0xf0]  ;;  %v1576_v19 = vor.u32 %v1760_v14, %v1575_v13  ;;  %v1591_v25 = vld [vmem:[%s2077_s16 + $0xe8] sm:$0xf] }
  0x6a   : > { %1014 = vmatpush.bf16.msra.mxu2 %v1782_v59  ;;  %v1544_v59 = vor.u32 %v1752_v54, %v1543_v53  ;;  %v1580_v20 = vor.u32 %v1758_v15, %v1577_v16  ;;  %v1764_v26 = vld [vmem:[%s2077_s16 + $0xf4] sm:$0xf0]  ;;  %v1762_v27 = vld [vmem:[%s2077_s16 + $0xec] sm:$0xf]  ;;  %v1593_v28 = vld [vmem:[%s2077_s16 + $0xf8] sm:$0xf0] }
  0x6b   : > { %1063 = vmatpush.bf16.msra.mxu3 %v1790_v60  ;;  %v1548_v60 = vor.u32 %v1750_v55, %v1545_v56  ;;  %v1592_v31 = vor.u32 %v1764_v26, %v1591_v25  ;;  %v1596_v32 = vor.u32 %v1762_v27, %v1593_v28  ;;  %v446_v41 = vld [vmem:[#allocation2 + $0x30] sm:$0xff]  ;;  %v447_v50 = vld [vmem:[#allocation2] sm:$0xff]  ;;  %v449_v4 = vld [vmem:[#allocation2 + $0x18] sm:$0xff] }
  0x6c   : > { %917 = vmatpush.bf16.msra.mxu0 %v1765_v61  ;;  %v1551_v61 = vld [vmem:[%s2077_s16 + $0xa0] sm:$0xf]  ;;  %v450_v13 = vld [vmem:[#allocation2 + $0x50] sm:$0xff] }
  0x6d   : > { %966 = vmatpush.bf16.msra.mxu1 %v1773_v62  ;;  %v1755_v62 = vld [vmem:[%s2077_s16 + $0xac] sm:$0xf0] }
  0x6e   : > { %1015 = vmatpush.bf16.msra.mxu2 %v1781_v63  ;;  %v1753_v63 = vld [vmem:[%s2077_s16 + $0xa4] sm:$0xf]  ;;  %v1552_v5 = vor.u32 %v1755_v62, %v1551_v61 }
  0x6f   : > { %1064 = vmatpush.bf16.msra.mxu3 %v1789_v0  ;;  %918 = vmatmul.bf16.vlgmr.msra.gmra.mxu0 %v1472_v9  ;;  %v1553_v0 = vld [vmem:[%s2077_s16 + $0xb0] sm:$0xf0]  ;;  %v1567_v9 = vld [vmem:[%s2077_s16 + $0xc0] sm:$0xf] }
  0x70   : > { %967 = vmatmul.bf16.vlgmr.msra.gmra.mxu1 %v1476_v10  ;;  %v1556_v6 = vor.u32 %v1753_v63, %v1553_v0  ;;  %v1759_v10 = vld [vmem:[%s2077_s16 + $0xcc] sm:$0xf0] }
  0x71   : > { %1016 = vmatmul.bf16.vlgmr.msra.gmra.mxu2 %v1480_v11  ;;  %v1757_v11 = vld [vmem:[%s2077_s16 + $0xc4] sm:$0xf]  ;;  %v1568_v17 = vor.u32 %v1759_v10, %v1567_v9 }
  0x72   : > { %1065 = vmatmul.bf16.vlgmr.msra.gmra.mxu3 %v1484_v12  ;;  %v1569_v12 = vld [vmem:[%s2077_s16 + $0xd0] sm:$0xf0] }
  0x73   : > { %v1572_v18 = vor.u32 %v1757_v11, %v1569_v12 }
  0x7f   : > { %923 = vmatmul.bf16.gmra.mxu0 %v1488_v21  ;;  %v1583_v21 = vld [vmem:[%s2077_s16 + $0xe0] sm:$0xf] }
  0x80   : > { %972 = vmatmul.bf16.gmra.mxu1 %v1492_v22  ;;  %v1763_v22 = vld [vmem:[%s2077_s16 + $0xec] sm:$0xf0] }
  0x81   : > { %1021 = vmatmul.bf16.gmra.mxu2 %v1496_v23  ;;  %v1761_v23 = vld [vmem:[%s2077_s16 + $0xe4] sm:$0xf]  ;;  %v1584_v29 = vor.u32 %v1763_v22, %v1583_v21  ;;  %v451_v22 = vld [vmem:[#allocation2 + $0x68] sm:$0xff] }
  0x82   : > { %1070 = vmatmul.bf16.gmra.mxu3 %v1500_v24  ;;  %v1585_v24 = vld [vmem:[%s2077_s16 + $0xf0] sm:$0xf0] }
  0x83   : > { %v1588_v30 = vor.u32 %v1761_v23, %v1585_v24 }
  0x8f   : > { %928 = vmatmul.bf16.gmra.mxu0 %v1504_v33 }
  0x90   : > { %977 = vmatmul.bf16.gmra.mxu1 %v1508_v34 }
  0x91   : > { %1026 = vmatmul.bf16.gmra.mxu2 %v1512_v35 }
  0x92   : > { %1075 = vmatmul.bf16.gmra.mxu3 %v1516_v36 }
  0x9f   : > { %933 = vmatmul.bf16.gmra.mxu0 %v1520_v45 }
  0xa0   : > { %982 = vmatmul.bf16.gmra.mxu1 %v1524_v46 }
  0xa1   : > { %1031 = vmatmul.bf16.gmra.mxu2 %v1528_v47 }
  0xa2   : > { %1080 = vmatmul.bf16.gmra.mxu3 %v1532_v48 }
  0xaf   : > { %938 = vmatmul.bf16.gmra.mxu0 %v1536_v57 }
  0xb0   : > { %987 = vmatmul.bf16.gmra.mxu1 %v1540_v58 }
  0xb1   : > { %1036 = vmatmul.bf16.gmra.mxu2 %v1544_v59  ;;  %v448_v59 = vld [vmem:[#allocation2 + $0x58] sm:$0xff] }
  0xb2   : > { %1085 = vmatmul.bf16.gmra.mxu3 %v1548_v60 }
  0xbf   : > { %943 = vmatmul.bf16.gmra.mxu0 %v1552_v5 }
  0xc0   : > { %992 = vmatmul.bf16.gmra.mxu1 %v1556_v6 }
  0xc1   : > { %1041 = vmatmul.bf16.gmra.mxu2 %v1560_v7 }
  0xc2   : > { %1090 = vmatmul.bf16.gmra.mxu3 %v1564_v8 }
  0xcf   : > { %948 = vmatmul.bf16.gmra.mxu0 %v1568_v17 }
  0xd0   : > { %997 = vmatmul.bf16.gmra.mxu1 %v1572_v18 }
  0xd1   : > { %1046 = vmatmul.bf16.gmra.mxu2 %v1576_v19 }
  0xd2   : > { %1095 = vmatmul.bf16.gmra.mxu3 %v1580_v20 }
  0xdf   : > { %953 = vmatmul.bf16.gmra.mxu0 %v1584_v29 }
  0xe0   : > { %1002 = vmatmul.bf16.gmra.mxu1 %v1588_v30 }
  0xe1   : > { %1051 = vmatmul.bf16.gmra.mxu2 %v1592_v31  ;;  %v452_v31 = vld [vmem:[#allocation2 + $0x8] sm:$0xff] }
  0xe2   : > { %1100 = vmatmul.bf16.gmra.mxu3 %v1596_v32 }
  0xec   : > { %v919_v33 = vpop.f32.mrf.mxu0 }
  0xed   : > { %v968_v34 = vpop.f32.mrf.mxu1 }
  0xee   : > { %v969_v35 = vadd.f32 %v968_v34, %v919_v33 }
  0xf4   : > { %v1017_v36 = vpop.f32.mrf.mxu2  ;;  %v921_v39 = vpop.f32.mrf.mxu0 }
  0xf5   : > { %v1066_v37 = vpop.f32.mrf.mxu3  ;;  %v1018_v38 = vadd.f32 %v1017_v36, %v969_v35  ;;  %v970_v40 = vpop.f32.mrf.mxu1 }
  0xf6   : > { %v971_v44 = vadd.f32 %v970_v40, %v921_v39  ;;  %v453_v40 = vld [vmem:[#allocation2 + $0x48] sm:$0xff] }
  0xf7   : > { %v1067_v42 = vadd.f32 %v1066_v37, %v1018_v38 }
  0xf9   : > { %v1106_v43 = vadd.f32 %v1067_v42, %v446_v41 }
  0xfb   : > { %1122 = vst [vmem:[#allocation2 + $0x30] sm:$0xff] %v1106_v43 }
  0xfc   : > { %v1019_v45 = vpop.f32.mrf.mxu2  ;;  %v924_v48 = vpop.f32.mrf.mxu0 }
  0xfd   : > { %v1068_v46 = vpop.f32.mrf.mxu3  ;;  %v1020_v47 = vadd.f32 %v1019_v45, %v971_v44  ;;  %v973_v49 = vpop.f32.mrf.mxu1 }
  0xfe   : > { %v974_v53 = vadd.f32 %v973_v49, %v924_v48  ;;  %v454_v49 = vld [vmem:[#allocation2 + $0x40] sm:$0xff] }
  0xff   : > { %v1069_v51 = vadd.f32 %v1068_v46, %v1020_v47 }
 0x101   : > { %v1107_v52 = vadd.f32 %v1069_v51, %v447_v50 }
 0x103   : > { %1123 = vst [vmem:[#allocation2] sm:$0xff] %v1107_v52 }
 0x104   : > { %v1022_v54 = vpop.f32.mrf.mxu2  ;;  %v926_v57 = vpop.f32.mrf.mxu0 }
 0x105   : > { %v1071_v55 = vpop.f32.mrf.mxu3  ;;  %v1023_v56 = vadd.f32 %v1022_v54, %v974_v53  ;;  %v975_v58 = vpop.f32.mrf.mxu1 }
 0x106   : > { %v976_v62 = vadd.f32 %v975_v58, %v926_v57  ;;  %v455_v58 = vld [vmem:[#allocation2 + $0x20] sm:$0xff] }
 0x107   : > { %v1072_v60 = vadd.f32 %v1071_v55, %v1023_v56 }
 0x109   : > { %v1108_v61 = vadd.f32 %v1072_v60, %v448_v59 }
 0x10b   : > { %1124 = vst [vmem:[#allocation2 + $0x58] sm:$0xff] %v1108_v61 }
 0x10c   : > { %v1024_v63 = vpop.f32.mrf.mxu2  ;;  %v929_v2 = vpop.f32.mrf.mxu0 }
 0x10d   : > { %v1073_v0 = vpop.f32.mrf.mxu3  ;;  %v1025_v1 = vadd.f32 %v1024_v63, %v976_v62  ;;  %v978_v3 = vpop.f32.mrf.mxu1 }
 0x10e   : > { %v979_v7 = vadd.f32 %v978_v3, %v929_v2  ;;  %v456_v3 = vld [vmem:[#allocation2 + $0x10] sm:$0xff] }
 0x10f   : > { %v1074_v5 = vadd.f32 %v1073_v0, %v1025_v1 }
 0x111   : > { %v1109_v6 = vadd.f32 %v1074_v5, %v449_v4 }
 0x113   : > { %1125 = vst [vmem:[#allocation2 + $0x18] sm:$0xff] %v1109_v6 }
 0x114   : > { %v1027_v8 = vpop.f32.mrf.mxu2  ;;  %v931_v11 = vpop.f32.mrf.mxu0 }
 0x115   : > { %v1076_v9 = vpop.f32.mrf.mxu3  ;;  %v1028_v10 = vadd.f32 %v1027_v8, %v979_v7  ;;  %v980_v12 = vpop.f32.mrf.mxu1 }
 0x116   : > { %v981_v16 = vadd.f32 %v980_v12, %v931_v11  ;;  %v457_v12 = vld [vmem:[#allocation2 + $0x38] sm:$0xff] }
 0x117   : > { %v1077_v14 = vadd.f32 %v1076_v9, %v1028_v10 }
 0x119   : > { %v1110_v15 = vadd.f32 %v1077_v14, %v450_v13 }
 0x11b   : > { %1126 = vst [vmem:[#allocation2 + $0x50] sm:$0xff] %v1110_v15 }
 0x11c   : > { %v1029_v17 = vpop.f32.mrf.mxu2  ;;  %v934_v20 = vpop.f32.mrf.mxu0 }
 0x11d   : > { %v1078_v18 = vpop.f32.mrf.mxu3  ;;  %v1030_v19 = vadd.f32 %v1029_v17, %v981_v16  ;;  %v983_v21 = vpop.f32.mrf.mxu1 }
 0x11e   : > { %v984_v25 = vadd.f32 %v983_v21, %v934_v20  ;;  %v458_v21 = vld [vmem:[#allocation2 + $0x60] sm:$0xff] }
 0x11f   : > { %v1079_v23 = vadd.f32 %v1078_v18, %v1030_v19 }
 0x121   : > { %v1111_v24 = vadd.f32 %v1079_v23, %v451_v22 }
 0x123   : > { %1127 = vst [vmem:[#allocation2 + $0x68] sm:$0xff] %v1111_v24 }
 0x124   : > { %v1032_v26 = vpop.f32.mrf.mxu2  ;;  %v936_v29 = vpop.f32.mrf.mxu0 }
 0x125   : > { %v1081_v27 = vpop.f32.mrf.mxu3  ;;  %v1033_v28 = vadd.f32 %v1032_v26, %v984_v25  ;;  %v985_v30 = vpop.f32.mrf.mxu1 }
 0x126   : > { %v986_v34 = vadd.f32 %v985_v30, %v936_v29 }
 0x127   : > { %v1082_v32 = vadd.f32 %v1081_v27, %v1033_v28  ;;  %v459_v28 = vld [vmem:[#allocation2 + $0x70] sm:$0xff] }
 0x129   : > { %v1112_v33 = vadd.f32 %v1082_v32, %v452_v31 }
 0x12b   : > { %1128 = vst [vmem:[#allocation2 + $0x8] sm:$0xff] %v1112_v33 }
 0x12c   : > { %v1034_v35 = vpop.f32.mrf.mxu2  ;;  %v939_v38 = vpop.f32.mrf.mxu0 }
 0x12d   : > { %v1083_v36 = vpop.f32.mrf.mxu3  ;;  %v1035_v37 = vadd.f32 %v1034_v35, %v986_v34  ;;  %v988_v39 = vpop.f32.mrf.mxu1 }
 0x12e   : > { %v989_v43 = vadd.f32 %v988_v39, %v939_v38 }
 0x12f   : > { %v1084_v41 = vadd.f32 %v1083_v36, %v1035_v37  ;;  %v460_v37 = vld [vmem:[#allocation2 + $0x78] sm:$0xff] }
 0x131   : > { %v1113_v42 = vadd.f32 %v1084_v41, %v453_v40 }
 0x133   : > { %1129 = vst [vmem:[#allocation2 + $0x48] sm:$0xff] %v1113_v42 }
 0x134   : > { %v1037_v44 = vpop.f32.mrf.mxu2  ;;  %v941_v47 = vpop.f32.mrf.mxu0 }
 0x135   : > { %v1086_v45 = vpop.f32.mrf.mxu3  ;;  %v1038_v46 = vadd.f32 %v1037_v44, %v989_v43  ;;  %v990_v48 = vpop.f32.mrf.mxu1 }
 0x136   : > { %v991_v52 = vadd.f32 %v990_v48, %v941_v47 }
 0x137   : > { %v1087_v50 = vadd.f32 %v1086_v45, %v1038_v46  ;;  %v461_v45 = vld [vmem:[#allocation2 + $0x28] sm:$0xff] }
 0x139   : > { %v1114_v51 = vadd.f32 %v1087_v50, %v454_v49 }
 0x13b   : > { %1130 = vst [vmem:[#allocation2 + $0x40] sm:$0xff] %v1114_v51 }
 0x13c   : > { %v1039_v53 = vpop.f32.mrf.mxu2  ;;  %v944_v56 = vpop.f32.mrf.mxu0 }
 0x13d   : > { %v1088_v54 = vpop.f32.mrf.mxu3  ;;  %v1040_v55 = vadd.f32 %v1039_v53, %v991_v52  ;;  %v993_v57 = vpop.f32.mrf.mxu1 }
 0x13e   : > { %v994_v61 = vadd.f32 %v993_v57, %v944_v56 }
 0x13f   : > { %v1089_v59 = vadd.f32 %v1088_v54, %v1040_v55 }
 0x141   : > { %v1115_v60 = vadd.f32 %v1089_v59, %v455_v58 }
 0x143   : > { %1131 = vst [vmem:[#allocation2 + $0x20] sm:$0xff] %v1115_v60 }
 0x144   : > { %v1042_v62 = vpop.f32.mrf.mxu2  ;;  %v946_v1 = vpop.f32.mrf.mxu0 }
 0x145   : > { %v1091_v63 = vpop.f32.mrf.mxu3  ;;  %v1043_v0 = vadd.f32 %v1042_v62, %v994_v61  ;;  %v995_v2 = vpop.f32.mrf.mxu1 }
 0x146   : > { %v996_v6 = vadd.f32 %v995_v2, %v946_v1 }
 0x147   : > { %v1092_v4 = vadd.f32 %v1091_v63, %v1043_v0 }
 0x149   : > { %v1116_v5 = vadd.f32 %v1092_v4, %v456_v3 }
 0x14b   : > { %1132 = vst [vmem:[#allocation2 + $0x10] sm:$0xff] %v1116_v5 }
 0x14c   : > { %v1044_v7 = vpop.f32.mrf.mxu2  ;;  %v949_v10 = vpop.f32.mrf.mxu0 }
 0x14d   : > { %v1093_v8 = vpop.f32.mrf.mxu3  ;;  %v1045_v9 = vadd.f32 %v1044_v7, %v996_v6  ;;  %v998_v11 = vpop.f32.mrf.mxu1 }
 0x14e   : > { %v999_v15 = vadd.f32 %v998_v11, %v949_v10 }
 0x14f   : > { %v1094_v13 = vadd.f32 %v1093_v8, %v1045_v9 }
 0x151   : > { %v1117_v14 = vadd.f32 %v1094_v13, %v457_v12 }
 0x153   : > { %1133 = vst [vmem:[#allocation2 + $0x38] sm:$0xff] %v1117_v14 }
 0x154   : > { %v1047_v16 = vpop.f32.mrf.mxu2  ;;  %v951_v19 = vpop.f32.mrf.mxu0 }
 0x155   : > { %v1096_v17 = vpop.f32.mrf.mxu3  ;;  %v1048_v18 = vadd.f32 %v1047_v16, %v999_v15  ;;  %v1000_v20 = vpop.f32.mrf.mxu1 }
 0x156   : > { %v1001_v24 = vadd.f32 %v1000_v20, %v951_v19 }
 0x157   : > { %v1097_v22 = vadd.f32 %v1096_v17, %v1048_v18 }
 0x159   : > { %v1118_v23 = vadd.f32 %v1097_v22, %v458_v21 }
 0x15b   : > { %1134 = vst [vmem:[#allocation2 + $0x60] sm:$0xff] %v1118_v23 }
 0x15c   : > { %v1049_v25 = vpop.f32.mrf.mxu2  ;;  %v954_v29 = vpop.f32.mrf.mxu0 }
 0x15d   : > { %v1098_v26 = vpop.f32.mrf.mxu3  ;;  %v1050_v27 = vadd.f32 %v1049_v25, %v1001_v24  ;;  %v1003_v30 = vpop.f32.mrf.mxu1 }
 0x15e   : > { %v1004_v33 = vadd.f32 %v1003_v30, %v954_v29 }
 0x15f   : > { %v1099_v31 = vadd.f32 %v1098_v26, %v1050_v27 }
 0x161   : > { %v1119_v32 = vadd.f32 %v1099_v31, %v459_v28 }
 0x163   : > { %1135 = vst [vmem:[#allocation2 + $0x70] sm:$0xff] %v1119_v32 }
 0x164   : > { %v1052_v34 = vpop.f32.mrf.mxu2  ;;  %v956_v39 = vpop.f32.mrf.mxu0 }
 0x165   : > { %v1101_v35 = vpop.f32.mrf.mxu3  ;;  %v1053_v36 = vadd.f32 %v1052_v34, %v1004_v33  ;;  %v1005_v40 = vpop.f32.mrf.mxu1 }
 0x166   : > { %v1006_v42 = vadd.f32 %v1005_v40, %v956_v39 }
 0x167   : > { %v1102_v38 = vadd.f32 %v1101_v35, %v1053_v36 }
 0x169   : > { %v1120_v41 = vadd.f32 %v1102_v38, %v460_v37 }
 0x16b   : > { %1136 = vst [vmem:[#allocation2 + $0x78] sm:$0xff] %v1120_v41 }
 0x16c   : > { %v1054_v43 = vpop.f32.mrf.mxu2 }
 0x16d   : > { %v1055_v44 = vadd.f32 %v1054_v43, %v1006_v42  ;;  %v1103_v46 = vpop.f32.mrf.mxu3 }
 0x16f   : > { %v1104_v47 = vadd.f32 %v1103_v46, %v1055_v44  ;;  %1141 = sbr.rel (%p1725_p11) target bundleno = 422 (0x1a6), region = 63 }
 0x171   : > { %v1121_v48 = vadd.f32 %v1104_v47, %v461_v45 }
 0x173   : > { %1137 = vst [vmem:[#allocation2 + $0x28] sm:$0xff] %v1121_v48 }
 0x174   : > { %v1142_v49 = vld [vmem:[#allocation2 + $0x30] sm:$0xff]  ;;  %v1143_v50 = vld [vmem:[#allocation2] sm:$0xff]  ;;  %v1144_v52 = vld [vmem:[#allocation2 + $0x58] sm:$0xff] }
 0x175   : > { %v1885_v51 = vld [vmem:[%s2227_s2] ss:$0 sm:$0xff]  ;;  %v1145_v53 = vld [vmem:[#allocation2 + $0x18] sm:$0xff]  ;;  %v1146_v54 = vld [vmem:[#allocation2 + $0x50] sm:$0xff] }
 0x176   : > { %v1147_v55 = vld [vmem:[#allocation2 + $0x68] sm:$0xff]  ;;  %v1162_v57 = vadd.f32 %v1885_v51, %v1142_v49  ;;  %v1163_v58 = vadd.f32 %v1885_v51, %v1143_v50  ;;  %v1164_v59 = vadd.f32 %v1885_v51, %v1144_v52  ;;  %v1165_v60 = vadd.f32 %v1885_v51, %v1145_v53  ;;  %v1150_v9 = vld [vmem:[#allocation2 + $0x40] sm:$0xff]  ;;  %v1152_v11 = vld [vmem:[#allocation2 + $0x10] sm:$0xff] }
 0x177   : > { %v1148_v56 = vld [vmem:[#allocation2 + $0x8] sm:$0xff]  ;;  %v1166_v62 = vadd.f32 %v1885_v51, %v1146_v54  ;;  %v1167_v63 = vadd.f32 %v1885_v51, %v1147_v55  ;;  %v1151_v10 = vld [vmem:[#allocation2 + $0x20] sm:$0xff]  ;;  %v1153_v15 = vld [vmem:[#allocation2 + $0x38] sm:$0xff]  ;;  %v1170_v22 = vadd.f32 %v1885_v51, %v1150_v9  ;;  %v1172_v24 = vadd.f32 %v1885_v51, %v1152_v11 }
 0x178   : > { %v1149_v61 = vld [vmem:[#allocation2 + $0x48] sm:$0xff]  ;;  %v1168_v0 = vadd.f32 %v1885_v51, %v1148_v56  ;;  %v1800_v1 = vpack.c.bf16 %v1163_v58, %v1162_v57  ;;  %v1210_v2 = vadd.f32 %v1163_v58, %v1162_v57  ;;  %v1231_v3 = vmul.f32 %v1162_v57, %v1162_v57  ;;  %v1154_v16 = vld [vmem:[#allocation2 + $0x60] sm:$0xff]  ;;  %v1155_v17 = vld [vmem:[#allocation2 + $0x70] sm:$0xff] }
 0x179   : > { %v1232_v4 = vmul.f32 %v1163_v58, %v1163_v58  ;;  %v1805_v5 = vpack.c.bf16 %v1165_v60, %v1164_v59  ;;  %v1233_v6 = vmul.f32 %v1164_v59, %v1164_v59  ;;  %v1810_v7 = vpack.c.bf16 %v1167_v63, %v1166_v62  ;;  %v1156_v32 = vld [vmem:[#allocation2 + $0x78] sm:$0xff] }
 0x17a   : > { %v1169_v8 = vadd.f32 %v1885_v51, %v1149_v61  ;;  %1801 = vst [vmem:[%s2228_s3] sm:$0xff] %v1800_v1   ;;  %v1211_v13 = vadd.f32 %v1210_v2, %v1164_v59  ;;  %v1234_v14 = vmul.f32 %v1165_v60, %v1165_v60  ;;  %v1235_v18 = vmul.f32 %v1166_v62, %v1166_v62  ;;  %v1157_v33 = vld [vmem:[#allocation2 + $0x28] sm:$0xff] }
 0x17b   : > { %v1247_v12 = vadd.f32 %v1232_v4, %v1231_v3  ;;  %1837 = vst [vmem:[%s2228_s3 + $0x8] sm:$0xff] %v1805_v5   ;;  %v1171_v23 = vadd.f32 %v1885_v51, %v1151_v10  ;;  %v1173_v25 = vadd.f32 %v1885_v51, %v1153_v15  ;;  %v1174_v26 = vadd.f32 %v1885_v51, %v1154_v16 }
 0x17c   : > { %v1815_v19 = vpack.c.bf16 %v1169_v8, %v1168_v0  ;;  %v1212_v20 = vadd.f32 %v1211_v13, %v1165_v60  ;;  %1838 = vst [vmem:[%s2228_s3 + $0x10] sm:$0xff] %v1810_v7   ;;  %v1175_v27 = vadd.f32 %v1885_v51, %v1155_v17  ;;  %v1236_v30 = vmul.f32 %v1167_v63, %v1167_v63 }
 0x17d   : > { %v1248_v21 = vadd.f32 %v1247_v12, %v1233_v6  ;;  %v1820_v31 = vpack.c.bf16 %v1171_v23, %v1170_v22  ;;  %v1825_v34 = vpack.c.bf16 %v1173_v25, %v1172_v24  ;;  %v1237_v38 = vmul.f32 %v1168_v0, %v1168_v0 }
 0x17e   : > { %1839 = vst [vmem:[%s2228_s3 + $0x18] sm:$0xff] %v1815_v19   ;;  %v1213_v29 = vadd.f32 %v1212_v20, %v1166_v62  ;;  %v1830_v35 = vpack.c.bf16 %v1175_v27, %v1174_v26  ;;  %v1176_v39 = vadd.f32 %v1885_v51, %v1156_v32  ;;  %v1177_v40 = vadd.f32 %v1885_v51, %v1157_v33 }
 0x17f   : > { %v1249_v28 = vadd.f32 %v1248_v21, %v1234_v14  ;;  %1840 = vst [vmem:[%s2228_s3 + $0x20] sm:$0xff] %v1820_v31   ;;  %v1238_v43 = vmul.f32 %v1169_v8, %v1169_v8  ;;  %v1239_v47 = vmul.f32 %v1170_v22, %v1170_v22  ;;  %v1240_v50 = vmul.f32 %v1171_v23, %v1171_v23 }
 0x180   : > { %v1214_v36 = vadd.f32 %v1213_v29, %v1167_v63  ;;  %1841 = vst [vmem:[%s2228_s3 + $0x28] sm:$0xff] %v1825_v34   ;;  %v1835_v44 = vpack.c.bf16 %v1177_v40, %v1176_v39  ;;  %v1241_v53 = vmul.f32 %v1172_v24, %v1172_v24  ;;  %v1242_v56 = vmul.f32 %v1173_v25, %v1173_v25 }
 0x181   : > { %v1250_v37 = vadd.f32 %v1249_v28, %v1235_v18  ;;  %1842 = vst [vmem:[%s2228_s3 + $0x30] sm:$0xff] %v1830_v35   ;;  %v1243_v59 = vmul.f32 %v1174_v26, %v1174_v26  ;;  %v1244_v62 = vmul.f32 %v1175_v27, %v1175_v27  ;;  %v1245_v1 = vmul.f32 %v1176_v39, %v1176_v39 }
 0x182   : > { %v1215_v42 = vadd.f32 %v1214_v36, %v1168_v0  ;;  %1843 = vst [vmem:[%s2228_s3 + $0x38] sm:$0xff] %v1835_v44   ;;  %v1246_v3 = vmul.f32 %v1177_v40, %v1177_v40 }
 0x183   : > { %v1251_v41 = vadd.f32 %v1250_v37, %v1236_v30 }
 0x184   : > { %v1216_v45 = vadd.f32 %v1215_v42, %v1169_v8 }
 0x185   : > { %v1252_v46 = vadd.f32 %v1251_v41, %v1237_v38 }
 0x186   : > { %v1217_v49 = vadd.f32 %v1216_v45, %v1170_v22 }
 0x187   : > { %v1253_v48 = vadd.f32 %v1252_v46, %v1238_v43 }
 0x188   : > { %v1218_v52 = vadd.f32 %v1217_v49, %v1171_v23 }
 0x189   : > { %v1254_v51 = vadd.f32 %v1253_v48, %v1239_v47 }
 0x18a   : > { %v1219_v55 = vadd.f32 %v1218_v52, %v1172_v24 }
 0x18b   : > { %v1255_v54 = vadd.f32 %v1254_v51, %v1240_v50 }
 0x18c   : > { %v1220_v57 = vadd.f32 %v1219_v55, %v1173_v25 }
 0x18d   : > { %v1256_v58 = vadd.f32 %v1255_v54, %v1241_v53 }
 0x18e   : > { %v1221_v61 = vadd.f32 %v1220_v57, %v1174_v26 }
 0x18f   : > { %v1257_v60 = vadd.f32 %v1256_v58, %v1242_v56 }
 0x190   : > { %v1222_v63 = vadd.f32 %v1221_v61, %v1175_v27 }
 0x191   : > { %v1258_v0 = vadd.f32 %v1257_v60, %v1243_v59 }
 0x192   : > { %v1223_v2 = vadd.f32 %v1222_v63, %v1176_v39 }
 0x193   : > { %v1259_v4 = vadd.f32 %v1258_v0, %v1244_v62 }
 0x194   : > { %v1224_v5 = vadd.f32 %v1223_v2, %v1177_v40 }
 0x195   : > { %v1260_v6 = vadd.f32 %v1259_v4, %v1245_v1 }
 0x196   : > { %v1225_v7 = vrot.slane %v1224_v5, 4 }
 0x197   : > { %v1261_v8 = vadd.f32 %v1260_v6, %v1246_v3 }
 0x198   : > { %v1226_v9 = vadd.f32 %v1225_v7, %v1224_v5 }
 0x199   : > { %v1262_v10 = vrot.slane %v1261_v8, 4 }
 0x19a   : > { %v1227_v11 = vrot.slane %v1226_v9, 2 }
 0x19b   : > { %v1263_v12 = vadd.f32 %v1262_v10, %v1261_v8 }
 0x19c   : > { %v1228_v13 = vadd.f32 %v1227_v11, %v1226_v9 }
 0x19d   : > { %v1264_v14 = vrot.slane %v1263_v12, 2 }
 0x19e   : > { %v1229_v15 = vrot.slane %v1228_v13, 1 }
 0x19f   : > { %v1265_v16 = vadd.f32 %v1264_v14, %v1263_v12 }
 0x1a0   : > { %v1230_v17 = vadd.f32 %v1229_v15, %v1228_v13 }
 0x1a1   : > { %v1266_v18 = vrot.slane %v1265_v16, 1 }
 0x1a2   : > { %1268 = vst [vmem:[%s2229_s4] sm:$0xff] %v1230_v17 }
 0x1a3   : > { %v1267_v19 = vadd.f32 %v1266_v18, %v1265_v16 }
 0x1a5   : > { %1269 = vst [vmem:[%s2230_s5] sm:$0xff] %v1267_v19 }
 0x1a6 PF: > { %s16_s22 = sadd.s32 1, %s1924_s22   ;;  %s2231_s18 = smov %s1912_s19 }
 0x1a7   : > { %p13_p12 = scmp.ge.s32.totalorder %s16_s22, 4   ;;  %s2232_s19 = smov %s1992_s26 }
 0x1a8   : > { %s2233_s20 = smov %s1920_s21  ;;  %s2234_s21 = smov %s2236_s23 }
 0x1a9   :  { %15 = sbr.rel (!%p13_p12) target bundleno = 3 (0x3), region = 128 }

// kernel: local_enhancer_forward.51
= control target key start
LH: loop header
LB: loop body
LE: loop exit
PB: predicated region body
PF: predicated region fallthrough
CT: control target
= control target key end

     0   :  { %s102_s0 = inlined_call_operand.vmem [shape: bf16[16,128], index: 0, kind: input, shape index: {}]   ;;  %s103_s1 = inlined_call_operand.vmem [shape: f32[1,128], index: 1, kind: input, shape index: {}]   ;;  %s104_s2 = inlined_call_operand.vmem [shape: f32[1,128], index: 2, kind: input, shape index: {}]   ;;  %s105_s3 = inlined_call_operand.vmem [shape: bf16[16,128], index: 3, kind: input, shape index: {}]   ;;  %s106_s4 = inlined_call_operand.vmem [shape: bf16[16,128], index: 4, kind: output, shape index: {}]  }
   0x1   :  { %v48_v0 = vld [vmem:[%s102_s0] sm:$0xff]  }
   0x2   :  { %v60_v1 = vld [vmem:[%s103_s1] ss:$0 sm:$0xff]  ;;  %v49_v2 = vunpack.c.l.bf16 %v48_v0  ;;  %v50_v3 = vunpack.c.h.bf16 %v48_v0 }
   0x3   :  { %v61_v4 = vld [vmem:[%s104_s2] ss:$0 sm:$0xff] }
   0x4   :  { %v52_v5 = vld [vmem:[%s105_s3] sm:$0xff]   ;;  %v25_v6 = vmul.f32 %v60_v1, %v49_v2  ;;  %v26_v7 = vmul.f32 %v60_v1, %v50_v3 }
   0x5   :  { %v53_v8 = vunpack.c.l.bf16 %v52_v5  ;;  %v54_v9 = vunpack.c.h.bf16 %v52_v5 }
   0x6   :  { %v31_v10 = vadd.f32 %v61_v4, %v25_v6  ;;  %v32_v11 = vadd.f32 %v61_v4, %v26_v7 }
   0x8   :  { %v37_v12 = vadd.f32 %v53_v8, %v31_v10  ;;  %v38_v13 = vadd.f32 %v54_v9, %v32_v11 }
   0xa   :  { %v58_v14 = vpack.c.bf16 %v38_v13, %v37_v12 }
   0xc   :  { %59 = vst [vmem:[%s106_s4] sm:$0xff] %v58_v14  }

// kernel: local_enhancer_forward.48
= control target key start
LH: loop header
LB: loop body
LE: loop exit
PB: predicated region body
PF: predicated region fallthrough
CT: control target
= control target key end

     0   :  { %s1800_s18 = smov 0   ;;  %s1802_s19 = smov 0   ;;  %s2096_s0 = inlined_call_operand.vmem [shape: bf16[128,768], index: 0, kind: input, shape index: {}]   ;;  %s2097_s1 = inlined_call_operand.vmem [shape: bf16[768,128], index: 1, kind: input, shape index: {}]   ;;  %s2098_s2 = inlined_call_operand.vmem [shape: f32[1,128], index: 2, kind: input, shape index: {}]   ;;  %s2099_s3 = inlined_call_operand.vmem [shape: bf16[128,128], index: 3, kind: output, shape index: {0}]   ;;  %s2100_s4 = inlined_call_operand.vmem [shape: f32[8,128], index: 4, kind: output, shape index: {1}]   ;;  %s2101_s5 = inlined_call_operand.vmem [shape: f32[8,128], index: 5, kind: output, shape index: {2}]  }
   0x1   :  { %s1804_s20 = smov 0   ;;  %s1806_s21 = smov 0  }
   0x2   :  { %s1808_s22 = smov 0  }
   0x3 LB: > { %s28_s23 = sadd.s32 1, %s1763_s21  ;;  %p51_p1 = scmp.ne.s32.totalorder %s1755_s19, %s1751_s18  ;;  %s1767_s22 = sphi %s1808_s22, %s16_s22   ;;  %s1763_s21 = sphi %s1806_s21, %s2105_s21   ;;  %s1759_s20 = sphi %s1804_s20, %s2104_s20   ;;  %s1755_s19 = sphi %s1802_s19, %s2103_s19   ;;  %s1751_s18 = sphi %s1800_s18, %s2102_s18  }
   0x4   : > { %p29_p0 = scmp.ge.s32.totalorder %s28_s23, 2  ;;  %p52_p2 = scmp.eq.s32.totalorder %s1767_s22, 0 }
   0x5   : > { %s44_s25 = sadd.s32 1, %s1755_s19  ;;  %p1329_p5 = scmp.ge.s32.totalorder %s1767_s22, 2 }
   0x6   : > { %s2107_s23 = smov (%p29_p0, %s28_s23), 0  ;;  %p53_p3 = por %p52_p2, %p51_p1 }
   0x7   : > { %s40_s24 = ssub.s32 %s1763_s21, %s2107_s23  ;;  %221 = sbr.rel (%p1329_p5) target bundleno = 49 (0x31), region = 20 }
   0x8   : > { %p42_p4 = scmp.eq.s32.totalorder %s40_s24, 0 }
   0xa   : > { %s1835_s26 = scalar_select %p42_p4, %s1755_s19, %s44_s25  }
   0xc   : > { %224 = sbr.rel (!%p53_p3) target bundleno = 49 (0x31), region = 24  ;;  %s226_s27 = sand.u32 (%p53_p3), 1, %s1755_s19  }
   0xd   : > { %s1565_s28 = smul.u32 (%p53_p3), 12, %s1763_s21 }
   0xe   : > { %s1685_s29 = smul.u32 (%p53_p3), 192, %s226_s27 }
   0xf   : > { %s1843_s7 = scalar_lea.vmem (%p53_p3), %s2096_s0, %s1565_s28 }
  0x10   : > { %v249_v0 = vld [vmem:[%s1843_s7] sm:$0xff] (%p53_p3)  ;;  %v251_v1 = vld [vmem:[%s1843_s7 + $0x18] sm:$0xff] (%p53_p3)  ;;  %v253_v2 = vld [vmem:[%s1843_s7 + $0x30] sm:$0xff] (%p53_p3)  ;;  %s1848_s8 = scalar_lea.vmem (%p53_p3), [#allocation3], %s1685_s29 }
  0x11   : > { %250 = vst [vmem:[%s1848_s8] sm:$0xff] %v249_v0  ;;  %v255_v3 = vld [vmem:[%s1843_s7 + $0x48] sm:$0xff]  ;;  %v257_v4 = vld [vmem:[%s1843_s7 + $0x60] sm:$0xff]  ;;  %v259_v5 = vld [vmem:[%s1843_s7 + $0x78] sm:$0xff] }
  0x12   : > { %252 = vst [vmem:[%s1848_s8 + $0xc] sm:$0xff] %v251_v1  ;;  %v261_v6 = vld [vmem:[%s1843_s7 + $0x90] sm:$0xff]  ;;  %v263_v7 = vld [vmem:[%s1843_s7 + $0xa8] sm:$0xff]  ;;  %v265_v8 = vld [vmem:[%s1843_s7 + $0xc0] sm:$0xff] }
  0x13   : > { %254 = vst [vmem:[%s1848_s8 + $0x18] sm:$0xff] %v253_v2  ;;  %v267_v9 = vld [vmem:[%s1843_s7 + $0xd8] sm:$0xff]  ;;  %v269_v10 = vld [vmem:[%s1843_s7 + $0xf0] sm:$0xff]  ;;  %v271_v11 = vld [vmem:[%s1843_s7 + $0x108] sm:$0xff] }
  0x14   : > { %256 = vst [vmem:[%s1848_s8 + $0x24] sm:$0xff] %v255_v3  ;;  %v273_v12 = vld [vmem:[%s1843_s7 + $0x120] sm:$0xff]  ;;  %v275_v13 = vld [vmem:[%s1843_s7 + $0x138] sm:$0xff]  ;;  %v277_v14 = vld [vmem:[%s1843_s7 + $0x150] sm:$0xff] }
  0x15   : > { %258 = vst [vmem:[%s1848_s8 + $0x30] sm:$0xff] %v257_v4  ;;  %v279_v15 = vld [vmem:[%s1843_s7 + $0x168] sm:$0xff]  ;;  %v1333_v17 = vld [vmem:[%s1843_s7 + $0x20] sm:$0xf]  ;;  %v1335_v18 = vld [vmem:[%s1843_s7 + $0x38] sm:$0xf] }
  0x16   : > { %260 = vst [vmem:[%s1848_s8 + $0x3c] sm:$0xff] %v259_v5  ;;  %v1331_v16 = vld [vmem:[%s1843_s7 + $0x8] sm:$0xf]  ;;  %v1337_v19 = vld [vmem:[%s1843_s7 + $0x50] sm:$0xf] }
  0x17   : > { %262 = vst [vmem:[%s1848_s8 + $0x48] sm:$0xff] %v261_v6  ;;  %v1339_v20 = vld [vmem:[%s1843_s7 + $0x68] sm:$0xf]  ;;  %v1341_v21 = vld [vmem:[%s1843_s7 + $0x80] sm:$0xf] }
  0x18   : > { %264 = vst [vmem:[%s1848_s8 + $0x54] sm:$0xff] %v263_v7  ;;  %v1343_v22 = vld [vmem:[%s1843_s7 + $0x98] sm:$0xf]  ;;  %v1345_v23 = vld [vmem:[%s1843_s7 + $0xb0] sm:$0xf] }
  0x19   : > { %266 = vst [vmem:[%s1848_s8 + $0x60] sm:$0xff] %v265_v8  ;;  %v1347_v24 = vld [vmem:[%s1843_s7 + $0xc8] sm:$0xf]  ;;  %v1349_v25 = vld [vmem:[%s1843_s7 + $0xe0] sm:$0xf] }
  0x1a   : > { %268 = vst [vmem:[%s1848_s8 + $0x6c] sm:$0xff] %v267_v9  ;;  %v1351_v26 = vld [vmem:[%s1843_s7 + $0xf8] sm:$0xf]  ;;  %v1353_v27 = vld [vmem:[%s1843_s7 + $0x110] sm:$0xf] }
  0x1b   : > { %270 = vst [vmem:[%s1848_s8 + $0x78] sm:$0xff] %v269_v10  ;;  %v1355_v28 = vld [vmem:[%s1843_s7 + $0x128] sm:$0xf]  ;;  %v1357_v29 = vld [vmem:[%s1843_s7 + $0x140] sm:$0xf] }
  0x1c   : > { %272 = vst [vmem:[%s1848_s8 + $0x84] sm:$0xff] %v271_v11  ;;  %v1359_v30 = vld [vmem:[%s1843_s7 + $0x158] sm:$0xf]  ;;  %v1361_v31 = vld [vmem:[%s1843_s7 + $0x170] sm:$0xf] }
  0x1d   : > { %274 = vst [vmem:[%s1848_s8 + $0x90] sm:$0xff] %v273_v12 }
  0x1e   : > { %276 = vst [vmem:[%s1848_s8 + $0x9c] sm:$0xff] %v275_v13 }
  0x1f   : > { %278 = vst [vmem:[%s1848_s8 + $0xa8] sm:$0xff] %v277_v14 }
  0x20   : > { %280 = vst [vmem:[%s1848_s8 + $0xb4] sm:$0xff] %v279_v15 }
  0x21   : > { %1332 = vst [vmem:[%s1848_s8 + $0x8] sm:$0xf] %v1331_v16 }
  0x22   : > { %1334 = vst [vmem:[%s1848_s8 + $0x14] sm:$0xf] %v1333_v17 }
  0x23   : > { %1336 = vst [vmem:[%s1848_s8 + $0x20] sm:$0xf] %v1335_v18 }
  0x24   : > { %1338 = vst [vmem:[%s1848_s8 + $0x2c] sm:$0xf] %v1337_v19 }
  0x25   : > { %1340 = vst [vmem:[%s1848_s8 + $0x38] sm:$0xf] %v1339_v20 }
  0x26   : > { %1342 = vst [vmem:[%s1848_s8 + $0x44] sm:$0xf] %v1341_v21 }
  0x27   : > { %1344 = vst [vmem:[%s1848_s8 + $0x50] sm:$0xf] %v1343_v22 }
  0x28   : > { %1346 = vst [vmem:[%s1848_s8 + $0x5c] sm:$0xf] %v1345_v23 }
  0x29   : > { %1348 = vst [vmem:[%s1848_s8 + $0x68] sm:$0xf] %v1347_v24 }
  0x2a   : > { %1350 = vst [vmem:[%s1848_s8 + $0x74] sm:$0xf] %v1349_v25 }
  0x2b   : > { %1352 = vst [vmem:[%s1848_s8 + $0x80] sm:$0xf] %v1351_v26 }
  0x2c   : > { %1354 = vst [vmem:[%s1848_s8 + $0x8c] sm:$0xf] %v1353_v27 }
  0x2d   : > { %1356 = vst [vmem:[%s1848_s8 + $0x98] sm:$0xf] %v1355_v28 }
  0x2e   : > { %1358 = vst [vmem:[%s1848_s8 + $0xa4] sm:$0xf] %v1357_v29 }
  0x2f   : > { %1360 = vst [vmem:[%s1848_s8 + $0xb0] sm:$0xf] %v1359_v30 }
  0x30   : > { %1362 = vst [vmem:[%s1848_s8 + $0xbc] sm:$0xf] %v1361_v31 }
  0x31 PF: > { %p1363_p6 = scmp.ge.s32.totalorder %s1767_s22, 1  ;;  %p337_p7 = scmp.lt.s32.totalorder %s1767_s22, 3 }
  0x33   : > { %p338_p8 = pnand %p1363_p6, %p337_p7 }
  0x34   : > { %s344_s9 = sand.u32 (!%p338_p8), 1, %s1751_s18   ;;  %s401_s10 = smul.u32 (!%p338_p8), 48, %s1759_s20 }
  0x35   : > { %341 = sbr.rel (%p338_p8) target bundleno = 389 (0x185), region = 54  ;;  %p1365_p10 = scmp.ne.s32.totalorder (!%p338_p8), %s1759_s20, 0 }
  0x36   : > { %s1686_s11 = smul.u32 (!%p338_p8), 192, %s344_s9  ;;  %p402_p9 = scmp.lt.s32.totalorder (!%p338_p8), %s401_s10, 95 }
  0x38   : > { %s1920_s16 = scalar_lea.vmem (!%p338_p8), [#allocation3], %s1686_s11 }
  0x3a   : > { %s2109_s10 = smov (!%p402_p9, %s401_s10), 95  ;;  %439 = sbr.rel (%p1365_p10) target bundleno = 80 (0x50), region = 62 }
  0x3b   : > { %s1364_s12 = sshll.u32 %s2109_s10, 2 }
  0x3c   : > { %s1918_s15 = scalar_lea.vmem %s2097_s1, %s1364_s12 }
  0x3f   : > { %v1769_v32 = vmov 0.0  }
  0x40   : > { %440 = vst [vmem:[#allocation2 + $0x30] sm:$0xff] %v1769_v32 }
  0x41   : > { %441 = vst [vmem:[#allocation2] sm:$0xff] %v1769_v32 }
  0x42   : > { %442 = vst [vmem:[#allocation2 + $0x58] sm:$0xff] %v1769_v32 }
  0x43   : > { %443 = vst [vmem:[#allocation2 + $0x18] sm:$0xff] %v1769_v32 }
  0x44   : > { %444 = vst [vmem:[#allocation2 + $0x50] sm:$0xff] %v1769_v32 }
  0x45   : > { %445 = vst [vmem:[#allocation2 + $0x68] sm:$0xff] %v1769_v32 }
  0x46   : > { %446 = vst [vmem:[#allocation2 + $0x8] sm:$0xff] %v1769_v32 }
  0x47   : > { %447 = vst [vmem:[#allocation2 + $0x48] sm:$0xff] %v1769_v32 }
  0x48   : > { %448 = vst [vmem:[#allocation2 + $0x40] sm:$0xff] %v1769_v32 }
  0x49   : > { %449 = vst [vmem:[#allocation2 + $0x20] sm:$0xff] %v1769_v32 }
  0x4a   : > { %450 = vst [vmem:[#allocation2 + $0x10] sm:$0xff] %v1769_v32 }
  0x4b   : > { %451 = vst [vmem:[#allocation2 + $0x38] sm:$0xff] %v1769_v32 }
  0x4c   : > { %452 = vst [vmem:[#allocation2 + $0x60] sm:$0xff] %v1769_v32 }
  0x4d   : > { %453 = vst [vmem:[#allocation2 + $0x70] sm:$0xff] %v1769_v32 }
  0x4e   : > { %454 = vst [vmem:[#allocation2 + $0x78] sm:$0xff] %v1769_v32 }
  0x4f   : > { %455 = vst [vmem:[#allocation2 + $0x28] sm:$0xff] %v1769_v32 }
  0x50 PF: > { %v1597_v33 = vld [vmem:[%s1918_s15 + $0x38] sm:$0xff]  ;;  %v1596_v36 = vld [vmem:[%s1918_s15 + $0x30] sm:$0xff]  ;;  %v1595_v39 = vld [vmem:[%s1918_s15 + $0x28] sm:$0xff]  ;;  %p1558_p11 = scmp.ne.s32.totalorder %s1759_s20, 1 }
  0x51   : > { %v1925_v34 = vld [vmem:[%s1918_s15 + $0x78] sm:$0xff]  ;;  %824 = vmatpush.bf16.msra.mxu0 %v1597_v33  ;;  %1661 = vmatpush.bf16.msra.mxu3 %v1597_v33  ;;  %v1934_v37 = vld [vmem:[%s1918_s15 + $0x70] sm:$0xff]  ;;  %v1603_v40 = vld [vmem:[%s1918_s15 + $0x68] sm:$0xff] }
  0x52   : > { %v1928_v35 = vld [vmem:[%s1918_s15 + $0xb8] sm:$0xff]  ;;  %873 = vmatpush.bf16.msra.mxu1 %v1925_v34  ;;  %v1937_v38 = vld [vmem:[%s1918_s15 + $0xb0] sm:$0xff]  ;;  %v1944_v41 = vld [vmem:[%s1918_s15 + $0xa8] sm:$0xff] }
  0x53   : > { %922 = vmatpush.bf16.msra.mxu2 %v1928_v35  ;;  %v1594_v42 = vld [vmem:[%s1918_s15 + $0x20] sm:$0xff]  ;;  %v1593_v45 = vld [vmem:[%s1918_s15 + $0x18] sm:$0xff]  ;;  %v1592_v48 = vld [vmem:[%s1918_s15 + $0x10] sm:$0xff] }
  0x54   : > { %v1602_v43 = vld [vmem:[%s1918_s15 + $0x60] sm:$0xff]  ;;  %v1601_v46 = vld [vmem:[%s1918_s15 + $0x58] sm:$0xff]  ;;  %v1600_v49 = vld [vmem:[%s1918_s15 + $0x50] sm:$0xff] }
  0x55   : > { %825 = vmatpush.bf16.msra.mxu0 %v1596_v36  ;;  %1662 = vmatpush.bf16.msra.mxu3 %v1596_v36  ;;  %v1950_v44 = vld [vmem:[%s1918_s15 + $0xa0] sm:$0xff]  ;;  %v1956_v47 = vld [vmem:[%s1918_s15 + $0x98] sm:$0xff]  ;;  %v1962_v50 = vld [vmem:[%s1918_s15 + $0x90] sm:$0xff] }
  0x56   : > { %874 = vmatpush.bf16.msra.mxu1 %v1934_v37  ;;  %v1591_v51 = vld [vmem:[%s1918_s15 + $0x8] sm:$0xff]  ;;  %v1590_v54 = vld [vmem:[%s1918_s15] sm:$0xff]  ;;  %v1440_v59 = vld [vmem:[%s1920_s16 + $0x90] sm:$0xf] }
  0x57   : > { %923 = vmatpush.bf16.msra.mxu2 %v1937_v38  ;;  %v1599_v52 = vld [vmem:[%s1918_s15 + $0x48] sm:$0xff]  ;;  %v1598_v55 = vld [vmem:[%s1918_s15 + $0x40] sm:$0xff]  ;;  %v1585_v60 = vld [vmem:[%s1920_s16 + $0x98] sm:$0xf0] }
  0x58   : > { %v1968_v53 = vld [vmem:[%s1918_s15 + $0x88] sm:$0xff]  ;;  %v1973_v56 = vld [vmem:[%s1918_s15 + $0x80] sm:$0xff]  ;;  %v1370_v62 = vld [vmem:[%s1920_s16 + $0xc] sm:$0xf0]  ;;  %v1441_v2 = vor.u32 %v1585_v60, %v1440_v59 }
  0x59   : > { %826 = vmatpush.bf16.msra.mxu0 %v1595_v39  ;;  %1663 = vmatpush.bf16.msra.mxu3 %v1595_v39  ;;  %v1368_v57 = vld [vmem:[%s1920_s16] sm:$0xf]  ;;  %v1567_v58 = vld [vmem:[%s1920_s16 + $0x8] sm:$0xf0]  ;;  %v1566_v61 = vld [vmem:[%s1920_s16 + $0x4] sm:$0xf] }
  0x5a   : > { %875 = vmatpush.bf16.msra.mxu1 %v1603_v40  ;;  %v1376_v63 = vld [vmem:[%s1920_s16 + $0x8] sm:$0xf]  ;;  %v1568_v0 = vld [vmem:[%s1920_s16 + $0x10] sm:$0xf0]  ;;  %v1369_v1 = vor.u32 %v1567_v58, %v1368_v57  ;;  %v1373_v3 = vor.u32 %v1566_v61, %v1370_v62  ;;  %v1380_v5 = vld [vmem:[%s1920_s16 + $0x18] sm:$0xf] }
  0x5b   : > { %924 = vmatpush.bf16.msra.mxu2 %v1944_v41  ;;  %v1377_v4 = vor.u32 %v1568_v0, %v1376_v63  ;;  %v1570_v6 = vld [vmem:[%s1920_s16 + $0x20] sm:$0xf0]  ;;  %v1452_v7 = vld [vmem:[%s1920_s16 + $0xa8] sm:$0xf]  ;;  %v1588_v8 = vld [vmem:[%s1920_s16 + $0xb0] sm:$0xf0] }
  0x5c   : > { %v1569_v9 = vld [vmem:[%s1920_s16 + $0x1c] sm:$0xf]  ;;  %v1382_v10 = vld [vmem:[%s1920_s16 + $0x24] sm:$0xf0]  ;;  %v1388_v11 = vld [vmem:[%s1920_s16 + $0x20] sm:$0xf]  ;;  %v1381_v13 = vor.u32 %v1570_v6, %v1380_v5  ;;  %v1453_v14 = vor.u32 %v1588_v8, %v1452_v7 }
  0x5d   : > { %827 = vmatpush.bf16.msra.mxu0 %v1594_v42  ;;  %1664 = vmatpush.bf16.msra.mxu3 %v1594_v42  ;;  %v1571_v12 = vld [vmem:[%s1920_s16 + $0x28] sm:$0xf0]  ;;  %v1385_v15 = vor.u32 %v1569_v9, %v1382_v10  ;;  %v1392_v17 = vld [vmem:[%s1920_s16 + $0x30] sm:$0xf]  ;;  %v1573_v18 = vld [vmem:[%s1920_s16 + $0x38] sm:$0xf0] }
  0x5e   : > { %876 = vmatpush.bf16.msra.mxu1 %v1602_v43  ;;  %v1389_v16 = vor.u32 %v1571_v12, %v1388_v11  ;;  %v1572_v19 = vld [vmem:[%s1920_s16 + $0x34] sm:$0xf]  ;;  %v1442_v21 = vld [vmem:[%s1920_s16 + $0x9c] sm:$0xf0]  ;;  %v1400_v23 = vld [vmem:[%s1920_s16 + $0x38] sm:$0xf]  ;;  %v1393_v25 = vor.u32 %v1573_v18, %v1392_v17 }
  0x5f   : > { %925 = vmatpush.bf16.msra.mxu2 %v1950_v44  ;;  %v1584_v20 = vld [vmem:[%s1920_s16 + $0x94] sm:$0xf]  ;;  %v1394_v22 = vld [vmem:[%s1920_s16 + $0x3c] sm:$0xf0]  ;;  %v1574_v24 = vld [vmem:[%s1920_s16 + $0x40] sm:$0xf0] }
  0x60   : > { %v1445_v26 = vor.u32 %v1584_v20, %v1442_v21  ;;  %v1397_v27 = vor.u32 %v1572_v19, %v1394_v22  ;;  %v1401_v28 = vor.u32 %v1574_v24, %v1400_v23  ;;  %v1404_v29 = vld [vmem:[%s1920_s16 + $0x48] sm:$0xf]  ;;  %v1576_v30 = vld [vmem:[%s1920_s16 + $0x50] sm:$0xf0]  ;;  %v1575_v31 = vld [vmem:[%s1920_s16 + $0x4c] sm:$0xf] }
  0x61   : > { %828 = vmatpush.bf16.msra.mxu0 %v1593_v45  ;;  %1665 = vmatpush.bf16.msra.mxu3 %v1593_v45  ;;  %v1587_v32 = vld [vmem:[%s1920_s16 + $0xac] sm:$0xf]  ;;  %v1454_v33 = vld [vmem:[%s1920_s16 + $0xb4] sm:$0xf0]  ;;  %v1577_v36 = vld [vmem:[%s1920_s16 + $0x58] sm:$0xf0] }
  0x62   : > { %877 = vmatpush.bf16.msra.mxu1 %v1601_v46  ;;  %v1457_v39 = vor.u32 %v1587_v32, %v1454_v33  ;;  %v1579_v42 = vld [vmem:[%s1920_s16 + $0x68] sm:$0xf0]  ;;  %v1586_v45 = vld [vmem:[%s1920_s16 + $0xa0] sm:$0xf0]  ;;  %v1460_v57 = vld [vmem:[%s1920_s16 + $0xb0] sm:$0xf] }
  0x63   : > { %926 = vmatpush.bf16.msra.mxu2 %v1956_v47  ;;  %v1430_v58 = vld [vmem:[%s1920_s16 + $0x84] sm:$0xf0]  ;;  %v1436_v59 = vld [vmem:[%s1920_s16 + $0x80] sm:$0xf]  ;;  %v1583_v60 = vld [vmem:[%s1920_s16 + $0x88] sm:$0xf0] }
  0x64   : > { %v1437_v0 = vor.u32 %v1583_v60, %v1436_v59  ;;  %v456_v5 = vld [vmem:[#allocation2 + $0x30] sm:$0xff]  ;;  %v458_v21 = vld [vmem:[#allocation2 + $0x58] sm:$0xff] }
  0x65   : > { %829 = vmatpush.bf16.msra.mxu0 %v1592_v48  ;;  %1666 = vmatpush.bf16.msra.mxu3 %v1592_v48  ;;  %v1580_v48 = vld [vmem:[%s1920_s16 + $0x70] sm:$0xf0] }
  0x66   : > { %878 = vmatpush.bf16.msra.mxu1 %v1600_v49 }
  0x67   : > { %927 = vmatpush.bf16.msra.mxu2 %v1962_v50 }
  0x69   : > { %830 = vmatpush.bf16.msra.mxu0 %v1591_v51  ;;  %1667 = vmatpush.bf16.msra.mxu3 %v1591_v51 }
  0x6a   : > { %879 = vmatpush.bf16.msra.mxu1 %v1599_v52 }
  0x6b   : > { %928 = vmatpush.bf16.msra.mxu2 %v1968_v53 }
  0x6d   : > { %831 = vmatpush.bf16.msra.mxu0 %v1590_v54  ;;  %1668 = vmatpush.bf16.msra.mxu3 %v1590_v54  ;;  %v1582_v54 = vld [vmem:[%s1920_s16 + $0x80] sm:$0xf0] }
  0x6e   : > { %880 = vmatpush.bf16.msra.mxu1 %v1598_v55 }
  0x6f   : > { %929 = vmatpush.bf16.msra.mxu2 %v1973_v56 }
  0x70   : > { %832 = vmatmul.bf16.vlgmr.msra.gmra.mxu0 %v1369_v1  ;;  %862 = vmatmul.bf16.vlgmr.msra.gmra.mxu3 %v1441_v2 }
  0x71   : > { %1669 = vmatpush.bf16.msrb.mxu3 %v1925_v34  ;;  %881 = vmatmul.bf16.vlgmr.msra.gmra.mxu1 %v1373_v3  ;;  %v1406_v34 = vld [vmem:[%s1920_s16 + $0x54] sm:$0xf0] }
  0x72   : > { %930 = vmatmul.bf16.vlgmr.msra.gmra.mxu2 %v1377_v4 }
  0x75   : > { %1670 = vmatpush.bf16.msrb.mxu3 %v1934_v37  ;;  %v1405_v37 = vor.u32 %v1576_v30, %v1404_v29  ;;  %v459_v29 = vld [vmem:[#allocation2 + $0x18] sm:$0xff] }
  0x79   : > { %1671 = vmatpush.bf16.msrb.mxu3 %v1603_v40 }
  0x7d   : > { %1672 = vmatpush.bf16.msrb.mxu3 %v1602_v43  ;;  %v1578_v43 = vld [vmem:[%s1920_s16 + $0x64] sm:$0xf] }
  0x80   : > { %837 = vmatmul.bf16.gmra.mxu0 %v1381_v13  ;;  %867 = vmatmul.bf16.gmra.mxu3 %v1453_v14  ;;  %v457_v13 = vld [vmem:[#allocation2] sm:$0xff] }
  0x81   : > { %1673 = vmatpush.bf16.msrb.mxu3 %v1601_v46  ;;  %886 = vmatmul.bf16.gmra.mxu1 %v1385_v15  ;;  %v1418_v46 = vld [vmem:[%s1920_s16 + $0x6c] sm:$0xf0] }
  0x82   : > { %935 = vmatmul.bf16.gmra.mxu2 %v1389_v16  ;;  %v1421_v51 = vor.u32 %v1578_v43, %v1418_v46 }
  0x85   : > { %1674 = vmatpush.bf16.msrb.mxu3 %v1600_v49 }
  0x89   : > { %1675 = vmatpush.bf16.msrb.mxu3 %v1599_v52 }
  0x8d   : > { %1676 = vmatpush.bf16.msrb.mxu3 %v1598_v55  ;;  %v1581_v55 = vld [vmem:[%s1920_s16 + $0x7c] sm:$0xf] }
  0x8e   : > { %v1433_v63 = vor.u32 %v1581_v55, %v1430_v58 }
  0x90   : > { %842 = vmatmul.bf16.gmra.mxu0 %v1393_v25  ;;  %911 = vmatmul.bf16.vlgmr.msrb.gmra.mxu3 %v1445_v26 }
  0x91   : > { %1677 = vmatpush.bf16.msra.mxu3 %v1928_v35  ;;  %891 = vmatmul.bf16.gmra.mxu1 %v1397_v27  ;;  %v1412_v35 = vld [vmem:[%s1920_s16 + $0x50] sm:$0xf] }
  0x92   : > { %940 = vmatmul.bf16.gmra.mxu2 %v1401_v28  ;;  %v1413_v40 = vor.u32 %v1577_v36, %v1412_v35 }
  0x95   : > { %1678 = vmatpush.bf16.msra.mxu3 %v1937_v38  ;;  %v1409_v38 = vor.u32 %v1575_v31, %v1406_v34 }
  0x99   : > { %1679 = vmatpush.bf16.msra.mxu3 %v1944_v41  ;;  %v1416_v41 = vld [vmem:[%s1920_s16 + $0x60] sm:$0xf] }
  0x9a   : > { %v1417_v49 = vor.u32 %v1579_v42, %v1416_v41 }
  0x9d   : > { %1680 = vmatpush.bf16.msra.mxu3 %v1950_v44  ;;  %v1448_v44 = vld [vmem:[%s1920_s16 + $0x98] sm:$0xf] }
  0xa0   : > { %847 = vmatmul.bf16.gmra.mxu0 %v1405_v37  ;;  %916 = vmatmul.bf16.gmra.mxu3 %v1457_v39  ;;  %v460_v37 = vld [vmem:[#allocation2 + $0x50] sm:$0xff] }
  0xa1   : > { %1681 = vmatpush.bf16.msra.mxu3 %v1956_v47  ;;  %896 = vmatmul.bf16.gmra.mxu1 %v1409_v38  ;;  %v1424_v47 = vld [vmem:[%s1920_s16 + $0x68] sm:$0xf] }
  0xa2   : > { %945 = vmatmul.bf16.gmra.mxu2 %v1413_v40  ;;  %v1425_v52 = vor.u32 %v1580_v48, %v1424_v47 }
  0xa5   : > { %1682 = vmatpush.bf16.msra.mxu3 %v1962_v50  ;;  %v1449_v50 = vor.u32 %v1586_v45, %v1448_v44  ;;  %v461_v45 = vld [vmem:[#allocation2 + $0x68] sm:$0xff] }
  0xa9   : > { %1683 = vmatpush.bf16.msra.mxu3 %v1968_v53  ;;  %v1428_v53 = vld [vmem:[%s1920_s16 + $0x78] sm:$0xf] }
  0xaa   : > { %v1429_v61 = vor.u32 %v1582_v54, %v1428_v53  ;;  %v462_v53 = vld [vmem:[#allocation2 + $0x8] sm:$0xff] }
  0xad   : > { %1684 = vmatpush.bf16.msra.mxu3 %v1973_v56  ;;  %v1589_v56 = vld [vmem:[%s1920_s16 + $0xb8] sm:$0xf0] }
  0xae   : > { %v1461_v62 = vor.u32 %v1589_v56, %v1460_v57 }
  0xb0   : > { %852 = vmatmul.bf16.gmra.mxu0 %v1417_v49  ;;  %960 = vmatmul.bf16.vlgmr.msra.gmra.mxu3 %v1449_v50 }
  0xb1   : > { %901 = vmatmul.bf16.gmra.mxu1 %v1421_v51 }
  0xb2   : > { %950 = vmatmul.bf16.gmra.mxu2 %v1425_v52 }
  0xc0   : > { %857 = vmatmul.bf16.gmra.mxu0 %v1429_v61  ;;  %965 = vmatmul.bf16.gmra.mxu3 %v1461_v62  ;;  %v463_v61 = vld [vmem:[#allocation2 + $0x48] sm:$0xff] }
  0xc1   : > { %906 = vmatmul.bf16.gmra.mxu1 %v1433_v63 }
  0xc2   : > { %955 = vmatmul.bf16.gmra.mxu2 %v1437_v0 }
  0xed   : > { %v833_v1 = vpop.f32.mrf.mxu0 }
  0xee   : > { %v882_v2 = vpop.f32.mrf.mxu1 }
  0xef   : > { %v883_v3 = vadd.f32 %v882_v2, %v833_v1 }
  0xf3   : > { %v2035_v4 = vpop.f32.mrf.mxu3 }
  0xf5   : > { %v931_v6 = vpop.f32.mrf.mxu2  ;;  %v835_v8 = vpop.f32.mrf.mxu0 }
  0xf6   : > { %v932_v7 = vadd.f32 %v931_v6, %v883_v3  ;;  %v884_v9 = vpop.f32.mrf.mxu1  ;;  %v468_v6 = vld [vmem:[#allocation2 + $0x60] sm:$0xff] }
  0xf7   : > { %v885_v11 = vadd.f32 %v884_v9, %v835_v8  ;;  %v464_v8 = vld [vmem:[#allocation2 + $0x40] sm:$0xff] }
  0xf8   : > { %v971_v10 = vadd.f32 %v932_v7, %v456_v5 }
  0xfa   : > { %987 = vst [vmem:[#allocation2 + $0x30] sm:$0xff] %v971_v10 }
  0xfb   : > { %v2037_v12 = vpop.f32.mrf.mxu3 }
  0xfd   : > { %v933_v14 = vpop.f32.mrf.mxu2  ;;  %v838_v16 = vpop.f32.mrf.mxu0 }
  0xfe   : > { %v934_v15 = vadd.f32 %v933_v14, %v885_v11  ;;  %v887_v17 = vpop.f32.mrf.mxu1 }
  0xff   : > { %v888_v19 = vadd.f32 %v887_v17, %v838_v16 }
 0x100   : > { %v972_v18 = vadd.f32 %v934_v15, %v457_v13 }
 0x102   : > { %988 = vst [vmem:[#allocation2] sm:$0xff] %v972_v18 }
 0x103   : > { %v2039_v20 = vpop.f32.mrf.mxu3 }
 0x105   : > { %v936_v22 = vpop.f32.mrf.mxu2  ;;  %v840_v24 = vpop.f32.mrf.mxu0 }
 0x106   : > { %v937_v23 = vadd.f32 %v936_v22, %v888_v19  ;;  %v889_v25 = vpop.f32.mrf.mxu1  ;;  %v469_v19 = vld [vmem:[#allocation2 + $0x70] sm:$0xff]  ;;  %v465_v22 = vld [vmem:[#allocation2 + $0x20] sm:$0xff] }
 0x107   : > { %v890_v27 = vadd.f32 %v889_v25, %v840_v24 }
 0x108   : > { %v973_v26 = vadd.f32 %v937_v23, %v458_v21 }
 0x10a   : > { %989 = vst [vmem:[#allocation2 + $0x58] sm:$0xff] %v973_v26 }
 0x10b   : > { %v2041_v28 = vpop.f32.mrf.mxu3 }
 0x10d   : > { %v938_v30 = vpop.f32.mrf.mxu2  ;;  %v843_v32 = vpop.f32.mrf.mxu0 }
 0x10e   : > { %v939_v31 = vadd.f32 %v938_v30, %v890_v27  ;;  %v892_v33 = vpop.f32.mrf.mxu1 }
 0x10f   : > { %v893_v35 = vadd.f32 %v892_v33, %v843_v32  ;;  %v470_v32 = vld [vmem:[#allocation2 + $0x78] sm:$0xff] }
 0x110   : > { %v974_v34 = vadd.f32 %v939_v31, %v459_v29 }
 0x112   : > { %990 = vst [vmem:[#allocation2 + $0x18] sm:$0xff] %v974_v34  ;;  %v466_v34 = vld [vmem:[#allocation2 + $0x10] sm:$0xff] }
 0x113   : > { %v912_v36 = vpop.f32.mrf.mxu3 }
 0x114   : > { %v913_v5 = vadd.f32 %v912_v36, %v2035_v4 }
 0x115   : > { %v941_v39 = vpop.f32.mrf.mxu2  ;;  %v845_v40 = vpop.f32.mrf.mxu0 }
 0x116   : > { %v942_v38 = vadd.f32 %v941_v39, %v893_v35  ;;  %v894_v41 = vpop.f32.mrf.mxu1 }
 0x117   : > { %v895_v43 = vadd.f32 %v894_v41, %v845_v40 }
 0x118   : > { %v975_v42 = vadd.f32 %v942_v38, %v460_v37 }
 0x11a   : > { %991 = vst [vmem:[#allocation2 + $0x50] sm:$0xff] %v975_v42 }
 0x11b   : > { %v914_v44 = vpop.f32.mrf.mxu3 }
 0x11c   : > { %v915_v17 = vadd.f32 %v914_v44, %v2037_v12 }
 0x11d   : > { %v943_v46 = vpop.f32.mrf.mxu2  ;;  %v848_v48 = vpop.f32.mrf.mxu0 }
 0x11e   : > { %v944_v47 = vadd.f32 %v943_v46, %v895_v43  ;;  %v897_v49 = vpop.f32.mrf.mxu1  ;;  %v471_v43 = vld [vmem:[#allocation2 + $0x28] sm:$0xff] }
 0x11f   : > { %v898_v51 = vadd.f32 %v897_v49, %v848_v48 }
 0x120   : > { %v976_v50 = vadd.f32 %v944_v47, %v461_v45  ;;  %v467_v45 = vld [vmem:[#allocation2 + $0x38] sm:$0xff] }
 0x122   : > { %992 = vst [vmem:[#allocation2 + $0x68] sm:$0xff] %v976_v50 }
 0x123   : > { %v917_v52 = vpop.f32.mrf.mxu3 }
 0x124   : > { %v918_v31 = vadd.f32 %v917_v52, %v2039_v20 }
 0x125   : > { %v946_v54 = vpop.f32.mrf.mxu2  ;;  %v850_v57 = vpop.f32.mrf.mxu0 }
 0x126   : > { %v947_v55 = vadd.f32 %v946_v54, %v898_v51  ;;  %v899_v56 = vpop.f32.mrf.mxu1 }
 0x127   : > { %v900_v59 = vadd.f32 %v899_v56, %v850_v57 }
 0x128   : > { %v977_v58 = vadd.f32 %v947_v55, %v462_v53 }
 0x12a   : > { %993 = vst [vmem:[#allocation2 + $0x8] sm:$0xff] %v977_v58 }
 0x12b   : > { %v919_v60 = vpop.f32.mrf.mxu3 }
 0x12c   : > { %v920_v41 = vadd.f32 %v919_v60, %v2041_v28 }
 0x12d   : > { %v948_v62 = vpop.f32.mrf.mxu2  ;;  %v853_v0 = vpop.f32.mrf.mxu0 }
 0x12e   : > { %v949_v63 = vadd.f32 %v948_v62, %v900_v59  ;;  %v902_v1 = vpop.f32.mrf.mxu1 }
 0x12f   : > { %v903_v3 = vadd.f32 %v902_v1, %v853_v0 }
 0x130   : > { %v978_v2 = vadd.f32 %v949_v63, %v463_v61 }
 0x132   : > { %994 = vst [vmem:[#allocation2 + $0x48] sm:$0xff] %v978_v2 }
 0x133   : > { %v961_v7 = vpop.f32.mrf.mxu3 }
 0x134   : > { %v962_v10 = vadd.f32 %v961_v7, %v913_v5 }
 0x135   : > { %v951_v9 = vpop.f32.mrf.mxu2  ;;  %v855_v13 = vpop.f32.mrf.mxu0 }
 0x136   : > { %v952_v11 = vadd.f32 %v951_v9, %v903_v3  ;;  %v983_v14 = vadd.f32 %v962_v10, %v468_v6  ;;  %v904_v15 = vpop.f32.mrf.mxu1 }
 0x137   : > { %v905_v18 = vadd.f32 %v904_v15, %v855_v13 }
 0x138   : > { %v979_v16 = vadd.f32 %v952_v11, %v464_v8  ;;  %999 = vst [vmem:[#allocation2 + $0x60] sm:$0xff] %v983_v14 }
 0x13a   : > { %995 = vst [vmem:[#allocation2 + $0x40] sm:$0xff] %v979_v16 }
 0x13b   : > { %v963_v21 = vpop.f32.mrf.mxu3 }
 0x13c   : > { %v964_v4 = vadd.f32 %v963_v21, %v915_v17 }
 0x13d   : > { %v953_v23 = vpop.f32.mrf.mxu2  ;;  %v858_v26 = vpop.f32.mrf.mxu0 }
 0x13e   : > { %v954_v24 = vadd.f32 %v953_v23, %v905_v18  ;;  %v984_v25 = vadd.f32 %v964_v4, %v469_v19  ;;  %v907_v27 = vpop.f32.mrf.mxu1 }
 0x13f   : > { %v908_v30 = vadd.f32 %v907_v27, %v858_v26 }
 0x140   : > { %v980_v29 = vadd.f32 %v954_v24, %v465_v22  ;;  %1000 = vst [vmem:[#allocation2 + $0x70] sm:$0xff] %v984_v25 }
 0x142   : > { %996 = vst [vmem:[#allocation2 + $0x20] sm:$0xff] %v980_v29 }
 0x143   : > { %v966_v33 = vpop.f32.mrf.mxu3 }
 0x144   : > { %v967_v35 = vadd.f32 %v966_v33, %v918_v31 }
 0x145   : > { %v956_v12 = vpop.f32.mrf.mxu2  ;;  %v860_v38 = vpop.f32.mrf.mxu0 }
 0x146   : > { %v957_v36 = vadd.f32 %v956_v12, %v908_v30  ;;  %v985_v37 = vadd.f32 %v967_v35, %v470_v32  ;;  %v909_v40 = vpop.f32.mrf.mxu1 }
 0x147   : > { %v910_v42 = vadd.f32 %v909_v40, %v860_v38 }
 0x148   : > { %v981_v39 = vadd.f32 %v957_v36, %v466_v34  ;;  %1001 = vst [vmem:[#allocation2 + $0x78] sm:$0xff] %v985_v37 }
 0x14a   : > { %997 = vst [vmem:[#allocation2 + $0x10] sm:$0xff] %v981_v39 }
 0x14b   : > { %v968_v44 = vpop.f32.mrf.mxu3 }
 0x14c   : > { %v969_v20 = vadd.f32 %v968_v44, %v920_v41 }
 0x14d   : > { %v958_v46 = vpop.f32.mrf.mxu2 }
 0x14e   : > { %v959_v47 = vadd.f32 %v958_v46, %v910_v42  ;;  %v986_v48 = vadd.f32 %v969_v20, %v471_v43  ;;  %1006 = sbr.rel (%p1558_p11) target bundleno = 389 (0x185), region = 66 }
 0x150   : > { %v982_v49 = vadd.f32 %v959_v47, %v467_v45  ;;  %1002 = vst [vmem:[#allocation2 + $0x28] sm:$0xff] %v986_v48 }
 0x152   : > { %998 = vst [vmem:[#allocation2 + $0x38] sm:$0xff] %v982_v49 }
 0x153   : > { %v1007_v50 = vld [vmem:[#allocation2 + $0x30] sm:$0xff]  ;;  %v1008_v51 = vld [vmem:[#allocation2] sm:$0xff]  ;;  %v1009_v52 = vld [vmem:[#allocation2 + $0x58] sm:$0xff] }
 0x154   : > { %v1728_v28 = vld [vmem:[%s2098_s2] ss:$0 sm:$0xff]  ;;  %v1010_v53 = vld [vmem:[#allocation2 + $0x18] sm:$0xff]  ;;  %v1011_v54 = vld [vmem:[#allocation2 + $0x50] sm:$0xff] }
 0x155   : > { %v1012_v55 = vld [vmem:[#allocation2 + $0x68] sm:$0xff]  ;;  %v1027_v56 = vadd.f32 %v1728_v28, %v1007_v50  ;;  %v1028_v58 = vadd.f32 %v1728_v28, %v1008_v51  ;;  %v1029_v59 = vadd.f32 %v1728_v28, %v1009_v52  ;;  %v1030_v60 = vadd.f32 %v1728_v28, %v1010_v53  ;;  %v1015_v10 = vld [vmem:[#allocation2 + $0x40] sm:$0xff]  ;;  %v1017_v13 = vld [vmem:[#allocation2 + $0x10] sm:$0xff] }
 0x156   : > { %v1013_v57 = vld [vmem:[#allocation2 + $0x8] sm:$0xff]  ;;  %v1031_v62 = vadd.f32 %v1728_v28, %v1011_v54  ;;  %v1032_v63 = vadd.f32 %v1728_v28, %v1012_v55  ;;  %v1016_v11 = vld [vmem:[#allocation2 + $0x20] sm:$0xff]  ;;  %v1020_v19 = vld [vmem:[#allocation2 + $0x70] sm:$0xff]  ;;  %v1035_v24 = vadd.f32 %v1728_v28, %v1015_v10  ;;  %v1037_v26 = vadd.f32 %v1728_v28, %v1017_v13 }
 0x157   : > { %v1014_v61 = vld [vmem:[#allocation2 + $0x48] sm:$0xff]  ;;  %v1033_v0 = vadd.f32 %v1728_v28, %v1013_v57  ;;  %v1617_v1 = vpack.c.bf16 %v1028_v58, %v1027_v56  ;;  %v1075_v2 = vadd.f32 %v1028_v58, %v1027_v56  ;;  %v1096_v3 = vmul.f32 %v1027_v56, %v1027_v56  ;;  %v1019_v18 = vld [vmem:[#allocation2 + $0x60] sm:$0xff]  ;;  %v1021_v12 = vld [vmem:[#allocation2 + $0x78] sm:$0xff] }
 0x158   : > { %v1097_v5 = vmul.f32 %v1028_v58, %v1028_v58  ;;  %v1622_v6 = vpack.c.bf16 %v1030_v60, %v1029_v59  ;;  %v1098_v7 = vmul.f32 %v1029_v59, %v1029_v59  ;;  %v1627_v8 = vpack.c.bf16 %v1032_v63, %v1031_v62  ;;  %v1022_v35 = vld [vmem:[#allocation2 + $0x28] sm:$0xff] }
 0x159   : > { %v1034_v9 = vadd.f32 %v1728_v28, %v1014_v61  ;;  %1618 = vst [vmem:[%s2099_s3] sm:$0xff] %v1617_v1   ;;  %v1076_v15 = vadd.f32 %v1075_v2, %v1029_v59  ;;  %v1099_v16 = vmul.f32 %v1030_v60, %v1030_v60  ;;  %v1018_v17 = vld [vmem:[#allocation2 + $0x38] sm:$0xff]  ;;  %v1100_v21 = vmul.f32 %v1031_v62, %v1031_v62 }
 0x15a   : > { %v1112_v14 = vadd.f32 %v1097_v5, %v1096_v3  ;;  %1654 = vst [vmem:[%s2099_s3 + $0x8] sm:$0xff] %v1622_v6   ;;  %v1036_v25 = vadd.f32 %v1728_v28, %v1016_v11  ;;  %v1038_v27 = vadd.f32 %v1728_v28, %v1018_v17  ;;  %v1039_v29 = vadd.f32 %v1728_v28, %v1019_v18 }
 0x15b   : > { %v1632_v22 = vpack.c.bf16 %v1034_v9, %v1033_v0  ;;  %v1077_v23 = vadd.f32 %v1076_v15, %v1030_v60  ;;  %1655 = vst [vmem:[%s2099_s3 + $0x10] sm:$0xff] %v1627_v8   ;;  %v1040_v30 = vadd.f32 %v1728_v28, %v1020_v19  ;;  %v1101_v33 = vmul.f32 %v1032_v63, %v1032_v63 }
 0x15c   : > { %v1113_v4 = vadd.f32 %v1112_v14, %v1098_v7  ;;  %v1637_v34 = vpack.c.bf16 %v1036_v25, %v1035_v24  ;;  %v1642_v36 = vpack.c.bf16 %v1038_v27, %v1037_v26  ;;  %v1102_v40 = vmul.f32 %v1033_v0, %v1033_v0 }
 0x15d   : > { %1656 = vst [vmem:[%s2099_s3 + $0x18] sm:$0xff] %v1632_v22   ;;  %v1078_v32 = vadd.f32 %v1077_v23, %v1031_v62  ;;  %v1647_v37 = vpack.c.bf16 %v1040_v30, %v1039_v29  ;;  %v1041_v41 = vadd.f32 %v1728_v28, %v1021_v12  ;;  %v1042_v42 = vadd.f32 %v1728_v28, %v1022_v35 }
 0x15e   : > { %v1114_v31 = vadd.f32 %v1113_v4, %v1099_v16  ;;  %1657 = vst [vmem:[%s2099_s3 + $0x20] sm:$0xff] %v1637_v34   ;;  %v1103_v45 = vmul.f32 %v1034_v9, %v1034_v9  ;;  %v1104_v48 = vmul.f32 %v1035_v24, %v1035_v24  ;;  %v1105_v51 = vmul.f32 %v1036_v25, %v1036_v25 }
 0x15f   : > { %v1079_v39 = vadd.f32 %v1078_v32, %v1032_v63  ;;  %1658 = vst [vmem:[%s2099_s3 + $0x28] sm:$0xff] %v1642_v36   ;;  %v1652_v46 = vpack.c.bf16 %v1042_v42, %v1041_v41  ;;  %v1106_v53 = vmul.f32 %v1037_v26, %v1037_v26  ;;  %v1107_v57 = vmul.f32 %v1038_v27, %v1038_v27 }
 0x160   : > { %v1115_v38 = vadd.f32 %v1114_v31, %v1100_v21  ;;  %1659 = vst [vmem:[%s2099_s3 + $0x30] sm:$0xff] %v1647_v37   ;;  %v1108_v59 = vmul.f32 %v1039_v29, %v1039_v29  ;;  %v1109_v62 = vmul.f32 %v1040_v30, %v1040_v30  ;;  %v1110_v1 = vmul.f32 %v1041_v41, %v1041_v41 }
 0x161   : > { %v1080_v44 = vadd.f32 %v1079_v39, %v1033_v0  ;;  %1660 = vst [vmem:[%s2099_s3 + $0x38] sm:$0xff] %v1652_v46   ;;  %v1111_v3 = vmul.f32 %v1042_v42, %v1042_v42 }
 0x162   : > { %v1116_v43 = vadd.f32 %v1115_v38, %v1101_v33 }
 0x163   : > { %v1081_v20 = vadd.f32 %v1080_v44, %v1034_v9 }
 0x164   : > { %v1117_v47 = vadd.f32 %v1116_v43, %v1102_v40 }
 0x165   : > { %v1082_v50 = vadd.f32 %v1081_v20, %v1035_v24 }
 0x166   : > { %v1118_v49 = vadd.f32 %v1117_v47, %v1103_v45 }
 0x167   : > { %v1083_v52 = vadd.f32 %v1082_v50, %v1036_v25 }
 0x168   : > { %v1119_v28 = vadd.f32 %v1118_v49, %v1104_v48 }
 0x169   : > { %v1084_v55 = vadd.f32 %v1083_v52, %v1037_v26 }
 0x16a   : > { %v1120_v54 = vadd.f32 %v1119_v28, %v1105_v51 }
 0x16b   : > { %v1085_v56 = vadd.f32 %v1084_v55, %v1038_v27 }
 0x16c   : > { %v1121_v58 = vadd.f32 %v1120_v54, %v1106_v53 }
 0x16d   : > { %v1086_v61 = vadd.f32 %v1085_v56, %v1039_v29 }
 0x16e   : > { %v1122_v60 = vadd.f32 %v1121_v58, %v1107_v57 }
 0x16f   : > { %v1087_v63 = vadd.f32 %v1086_v61, %v1040_v30 }
 0x170   : > { %v1123_v0 = vadd.f32 %v1122_v60, %v1108_v59 }
 0x171   : > { %v1088_v2 = vadd.f32 %v1087_v63, %v1041_v41 }
 0x172   : > { %v1124_v5 = vadd.f32 %v1123_v0, %v1109_v62 }
 0x173   : > { %v1089_v6 = vadd.f32 %v1088_v2, %v1042_v42 }
 0x174   : > { %v1125_v7 = vadd.f32 %v1124_v5, %v1110_v1 }
 0x175   : > { %v1090_v8 = vrot.slane %v1089_v6, 4 }
 0x176   : > { %v1126_v9 = vadd.f32 %v1125_v7, %v1111_v3 }
 0x177   : > { %v1091_v10 = vadd.f32 %v1090_v8, %v1089_v6 }
 0x178   : > { %v1127_v11 = vrot.slane %v1126_v9, 4 }
 0x179   : > { %v1092_v13 = vrot.slane %v1091_v10, 2 }
 0x17a   : > { %v1128_v14 = vadd.f32 %v1127_v11, %v1126_v9 }
 0x17b   : > { %v1093_v15 = vadd.f32 %v1092_v13, %v1091_v10 }
 0x17c   : > { %v1129_v16 = vrot.slane %v1128_v14, 2 }
 0x17d   : > { %v1094_v17 = vrot.slane %v1093_v15, 1 }
 0x17e   : > { %v1130_v18 = vadd.f32 %v1129_v16, %v1128_v14 }
 0x17f   : > { %v1095_v19 = vadd.f32 %v1094_v17, %v1093_v15 }
 0x180   : > { %v1131_v21 = vrot.slane %v1130_v18, 1 }
 0x181   : > { %1133 = vst [vmem:[%s2100_s4] sm:$0xff] %v1095_v19 }
 0x182   : > { %v1132_v22 = vadd.f32 %v1131_v21, %v1130_v18 }
 0x184   : > { %1134 = vst [vmem:[%s2101_s5] sm:$0xff] %v1132_v22 }
 0x185 PF: > { %s16_s22 = sadd.s32 1, %s1767_s22   ;;  %s2102_s18 = smov %s1755_s19 }
 0x186   : > { %p13_p12 = scmp.ge.s32.totalorder %s16_s22, 4   ;;  %s2103_s19 = smov %s1835_s26 }
 0x187   : > { %s2104_s20 = smov %s1763_s21  ;;  %s2105_s21 = smov %s2107_s23 }
 0x188   :  { %15 = sbr.rel (!%p13_p12) target bundleno = 3 (0x3), region = 137 }

// kernel: local_enhancer_forward.57
= control target key start
LH: loop header
LB: loop body
LE: loop exit
PB: predicated region body
PF: predicated region fallthrough
CT: control target
= control target key end

     0   :  { %s1418_s1 = inlined_call_operand.vmem [shape: bf16[384,128], index: 1, kind: input, shape index: {}]   ;;  %s1419_s0 = inlined_call_operand.vmem [shape: bf16[128,384], index: 0, kind: input, shape index: {}]   ;;  %s1420_s2 = inlined_call_operand.vmem [shape: f32[1,128], index: 2, kind: input, shape index: {}]   ;;  %s1421_s3 = inlined_call_operand.vmem [shape: bf16[128,128], index: 3, kind: output, shape index: {0}]   ;;  %s1422_s4 = inlined_call_operand.vmem [shape: f32[8,128], index: 4, kind: output, shape index: {1}]   ;;  %s1423_s5 = inlined_call_operand.vmem [shape: f32[8,128], index: 5, kind: output, shape index: {2}]  }
   0x1   :  { %v950_v0 = vld [vmem:[%s1418_s1 + $0x38] sm:$0xff]  ;;  %v949_v3 = vld [vmem:[%s1418_s1 + $0x30] sm:$0xff]  ;;  %v948_v6 = vld [vmem:[%s1418_s1 + $0x28] sm:$0xff] }
   0x2   :  { %v1075_v1 = vld [vmem:[%s1418_s1 + $0x78] sm:$0xff]  ;;  %405 = vmatpush.bf16.msra.mxu0 %v950_v0  ;;  %1014 = vmatpush.bf16.msra.mxu3 %v950_v0  ;;  %v1090_v4 = vld [vmem:[%s1418_s1 + $0x70] sm:$0xff]  ;;  %v956_v7 = vld [vmem:[%s1418_s1 + $0x68] sm:$0xff] }
   0x3   :  { %v1080_v2 = vld [vmem:[%s1418_s1 + $0xb8] sm:$0xff]  ;;  %454 = vmatpush.bf16.msra.mxu1 %v1075_v1  ;;  %v1095_v5 = vld [vmem:[%s1418_s1 + $0xb0] sm:$0xff]  ;;  %v1108_v8 = vld [vmem:[%s1418_s1 + $0xa8] sm:$0xff] }
   0x4   :  { %503 = vmatpush.bf16.msra.mxu2 %v1080_v2  ;;  %v947_v9 = vld [vmem:[%s1418_s1 + $0x20] sm:$0xff]  ;;  %v946_v12 = vld [vmem:[%s1418_s1 + $0x18] sm:$0xff]  ;;  %v945_v15 = vld [vmem:[%s1418_s1 + $0x10] sm:$0xff] }
   0x5   :  { %v955_v10 = vld [vmem:[%s1418_s1 + $0x60] sm:$0xff]  ;;  %v954_v13 = vld [vmem:[%s1418_s1 + $0x58] sm:$0xff]  ;;  %v953_v16 = vld [vmem:[%s1418_s1 + $0x50] sm:$0xff] }
   0x6   :  { %406 = vmatpush.bf16.msra.mxu0 %v949_v3  ;;  %1015 = vmatpush.bf16.msra.mxu3 %v949_v3  ;;  %v1120_v11 = vld [vmem:[%s1418_s1 + $0xa0] sm:$0xff]  ;;  %v1132_v14 = vld [vmem:[%s1418_s1 + $0x98] sm:$0xff]  ;;  %v1144_v17 = vld [vmem:[%s1418_s1 + $0x90] sm:$0xff] }
   0x7   :  { %455 = vmatpush.bf16.msra.mxu1 %v1090_v4  ;;  %v944_v18 = vld [vmem:[%s1418_s1 + $0x8] sm:$0xff]  ;;  %v943_v21 = vld [vmem:[%s1418_s1] sm:$0xff]  ;;  %v801_v26 = vld [vmem:[%s1419_s0 + $0x90] sm:$0xf] }
   0x8   :  { %504 = vmatpush.bf16.msra.mxu2 %v1095_v5  ;;  %v952_v19 = vld [vmem:[%s1418_s1 + $0x48] sm:$0xff]  ;;  %v951_v22 = vld [vmem:[%s1418_s1 + $0x40] sm:$0xff]  ;;  %v938_v27 = vld [vmem:[%s1419_s0 + $0x98] sm:$0xf0] }
   0x9   :  { %v1156_v20 = vld [vmem:[%s1418_s1 + $0x88] sm:$0xff]  ;;  %v1167_v23 = vld [vmem:[%s1418_s1 + $0x80] sm:$0xff]  ;;  %v731_v29 = vld [vmem:[%s1419_s0 + $0xc] sm:$0xf0]  ;;  %v802_v33 = vor.u32 %v938_v27, %v801_v26 }
   0xa   :  { %407 = vmatpush.bf16.msra.mxu0 %v948_v6  ;;  %1016 = vmatpush.bf16.msra.mxu3 %v948_v6  ;;  %v729_v24 = vld [vmem:[%s1419_s0] sm:$0xf]  ;;  %v920_v25 = vld [vmem:[%s1419_s0 + $0x8] sm:$0xf0]  ;;  %v919_v28 = vld [vmem:[%s1419_s0 + $0x4] sm:$0xf] }
   0xb   :  { %456 = vmatpush.bf16.msra.mxu1 %v956_v7  ;;  %v737_v30 = vld [vmem:[%s1419_s0 + $0x8] sm:$0xf]  ;;  %v921_v31 = vld [vmem:[%s1419_s0 + $0x10] sm:$0xf0]  ;;  %v730_v32 = vor.u32 %v920_v25, %v729_v24  ;;  %v734_v34 = vor.u32 %v919_v28, %v731_v29  ;;  %v741_v36 = vld [vmem:[%s1419_s0 + $0x18] sm:$0xf] }
   0xc   :  { %505 = vmatpush.bf16.msra.mxu2 %v1108_v8  ;;  %v738_v35 = vor.u32 %v921_v31, %v737_v30  ;;  %v923_v37 = vld [vmem:[%s1419_s0 + $0x20] sm:$0xf0]  ;;  %v813_v38 = vld [vmem:[%s1419_s0 + $0xa8] sm:$0xf]  ;;  %v941_v39 = vld [vmem:[%s1419_s0 + $0xb0] sm:$0xf0] }
   0xd   :  { %v922_v40 = vld [vmem:[%s1419_s0 + $0x1c] sm:$0xf]  ;;  %v743_v41 = vld [vmem:[%s1419_s0 + $0x24] sm:$0xf0]  ;;  %v749_v42 = vld [vmem:[%s1419_s0 + $0x20] sm:$0xf]  ;;  %v742_v44 = vor.u32 %v923_v37, %v741_v36  ;;  %v814_v45 = vor.u32 %v941_v39, %v813_v38 }
   0xe   :  { %408 = vmatpush.bf16.msra.mxu0 %v947_v9  ;;  %1017 = vmatpush.bf16.msra.mxu3 %v947_v9  ;;  %v924_v43 = vld [vmem:[%s1419_s0 + $0x28] sm:$0xf0]  ;;  %v746_v46 = vor.u32 %v922_v40, %v743_v41  ;;  %v753_v48 = vld [vmem:[%s1419_s0 + $0x30] sm:$0xf]  ;;  %v926_v49 = vld [vmem:[%s1419_s0 + $0x38] sm:$0xf0] }
   0xf   :  { %457 = vmatpush.bf16.msra.mxu1 %v955_v10  ;;  %v750_v47 = vor.u32 %v924_v43, %v749_v42  ;;  %v925_v50 = vld [vmem:[%s1419_s0 + $0x34] sm:$0xf]  ;;  %v803_v52 = vld [vmem:[%s1419_s0 + $0x9c] sm:$0xf0]  ;;  %v761_v54 = vld [vmem:[%s1419_s0 + $0x38] sm:$0xf]  ;;  %v754_v56 = vor.u32 %v926_v49, %v753_v48 }
  0x10   :  { %506 = vmatpush.bf16.msra.mxu2 %v1120_v11  ;;  %v937_v51 = vld [vmem:[%s1419_s0 + $0x94] sm:$0xf]  ;;  %v755_v53 = vld [vmem:[%s1419_s0 + $0x3c] sm:$0xf0]  ;;  %v927_v55 = vld [vmem:[%s1419_s0 + $0x40] sm:$0xf0] }
  0x11   :  { %v806_v57 = vor.u32 %v937_v51, %v803_v52  ;;  %v758_v58 = vor.u32 %v925_v50, %v755_v53  ;;  %v762_v59 = vor.u32 %v927_v55, %v761_v54  ;;  %v765_v60 = vld [vmem:[%s1419_s0 + $0x48] sm:$0xf]  ;;  %v929_v61 = vld [vmem:[%s1419_s0 + $0x50] sm:$0xf0]  ;;  %v928_v62 = vld [vmem:[%s1419_s0 + $0x4c] sm:$0xf] }
  0x12   :  { %409 = vmatpush.bf16.msra.mxu0 %v946_v12  ;;  %1018 = vmatpush.bf16.msra.mxu3 %v946_v12  ;;  %v940_v63 = vld [vmem:[%s1419_s0 + $0xac] sm:$0xf]  ;;  %v815_v0 = vld [vmem:[%s1419_s0 + $0xb4] sm:$0xf0]  ;;  %v930_v3 = vld [vmem:[%s1419_s0 + $0x58] sm:$0xf0] }
  0x13   :  { %458 = vmatpush.bf16.msra.mxu1 %v954_v13  ;;  %v932_v9 = vld [vmem:[%s1419_s0 + $0x68] sm:$0xf0]  ;;  %v939_v12 = vld [vmem:[%s1419_s0 + $0xa0] sm:$0xf0]  ;;  %v942_v24 = vld [vmem:[%s1419_s0 + $0xb8] sm:$0xf0] }
  0x14   :  { %507 = vmatpush.bf16.msra.mxu2 %v1132_v14  ;;  %v791_v25 = vld [vmem:[%s1419_s0 + $0x84] sm:$0xf0]  ;;  %v797_v26 = vld [vmem:[%s1419_s0 + $0x80] sm:$0xf]  ;;  %v936_v27 = vld [vmem:[%s1419_s0 + $0x88] sm:$0xf0] }
  0x15   :  { %v798_v31 = vor.u32 %v936_v27, %v797_v26  ;;  %v1330_v40 = vld [vmem:[%s1420_s2] ss:$0 sm:$0xff] }
  0x16   :  { %410 = vmatpush.bf16.msra.mxu0 %v945_v15  ;;  %1019 = vmatpush.bf16.msra.mxu3 %v945_v15  ;;  %v933_v15 = vld [vmem:[%s1419_s0 + $0x70] sm:$0xf0] }
  0x17   :  { %459 = vmatpush.bf16.msra.mxu1 %v953_v16 }
  0x18   :  { %508 = vmatpush.bf16.msra.mxu2 %v1144_v17 }
  0x1a   :  { %411 = vmatpush.bf16.msra.mxu0 %v944_v18  ;;  %1020 = vmatpush.bf16.msra.mxu3 %v944_v18 }
  0x1b   :  { %460 = vmatpush.bf16.msra.mxu1 %v952_v19 }
  0x1c   :  { %509 = vmatpush.bf16.msra.mxu2 %v1156_v20 }
  0x1e   :  { %412 = vmatpush.bf16.msra.mxu0 %v943_v21  ;;  %1021 = vmatpush.bf16.msra.mxu3 %v943_v21  ;;  %v935_v21 = vld [vmem:[%s1419_s0 + $0x80] sm:$0xf0] }
  0x1f   :  { %461 = vmatpush.bf16.msra.mxu1 %v951_v22 }
  0x20   :  { %510 = vmatpush.bf16.msra.mxu2 %v1167_v23 }
  0x21   :  { %413 = vmatmul.bf16.vlgmr.msra.gmra.mxu0 %v730_v32  ;;  %443 = vmatmul.bf16.vlgmr.msra.gmra.mxu3 %v802_v33 }
  0x22   :  { %1022 = vmatpush.bf16.msrb.mxu3 %v1075_v1  ;;  %462 = vmatmul.bf16.vlgmr.msra.gmra.mxu1 %v734_v34  ;;  %v767_v1 = vld [vmem:[%s1419_s0 + $0x54] sm:$0xf0] }
  0x23   :  { %511 = vmatmul.bf16.vlgmr.msra.gmra.mxu2 %v738_v35  ;;  %v770_v6 = vor.u32 %v928_v62, %v767_v1 }
  0x26   :  { %1023 = vmatpush.bf16.msrb.mxu3 %v1090_v4  ;;  %v766_v4 = vor.u32 %v929_v61, %v765_v60 }
  0x2a   :  { %1024 = vmatpush.bf16.msrb.mxu3 %v956_v7 }
  0x2e   :  { %1025 = vmatpush.bf16.msrb.mxu3 %v955_v10  ;;  %v931_v10 = vld [vmem:[%s1419_s0 + $0x64] sm:$0xf] }
  0x31   :  { %418 = vmatmul.bf16.gmra.mxu0 %v742_v44  ;;  %448 = vmatmul.bf16.gmra.mxu3 %v814_v45 }
  0x32   :  { %1026 = vmatpush.bf16.msrb.mxu3 %v954_v13  ;;  %467 = vmatmul.bf16.gmra.mxu1 %v746_v46  ;;  %v779_v13 = vld [vmem:[%s1419_s0 + $0x6c] sm:$0xf0] }
  0x33   :  { %516 = vmatmul.bf16.gmra.mxu2 %v750_v47  ;;  %v782_v18 = vor.u32 %v931_v10, %v779_v13 }
  0x36   :  { %1027 = vmatpush.bf16.msrb.mxu3 %v953_v16 }
  0x3a   :  { %1028 = vmatpush.bf16.msrb.mxu3 %v952_v19 }
  0x3e   :  { %1029 = vmatpush.bf16.msrb.mxu3 %v951_v22  ;;  %v934_v22 = vld [vmem:[%s1419_s0 + $0x7c] sm:$0xf] }
  0x3f   :  { %v794_v30 = vor.u32 %v934_v22, %v791_v25 }
  0x41   :  { %423 = vmatmul.bf16.gmra.mxu0 %v754_v56  ;;  %492 = vmatmul.bf16.vlgmr.msrb.gmra.mxu3 %v806_v57 }
  0x42   :  { %1030 = vmatpush.bf16.msra.mxu3 %v1080_v2  ;;  %472 = vmatmul.bf16.gmra.mxu1 %v758_v58  ;;  %v773_v2 = vld [vmem:[%s1419_s0 + $0x50] sm:$0xf] }
  0x43   :  { %521 = vmatmul.bf16.gmra.mxu2 %v762_v59  ;;  %v774_v7 = vor.u32 %v930_v3, %v773_v2 }
  0x46   :  { %1031 = vmatpush.bf16.msra.mxu3 %v1095_v5  ;;  %v818_v5 = vor.u32 %v940_v63, %v815_v0 }
  0x4a   :  { %1032 = vmatpush.bf16.msra.mxu3 %v1108_v8  ;;  %v777_v8 = vld [vmem:[%s1419_s0 + $0x60] sm:$0xf] }
  0x4b   :  { %v778_v16 = vor.u32 %v932_v9, %v777_v8 }
  0x4e   :  { %1033 = vmatpush.bf16.msra.mxu3 %v1120_v11  ;;  %v809_v11 = vld [vmem:[%s1419_s0 + $0x98] sm:$0xf] }
  0x51   :  { %428 = vmatmul.bf16.gmra.mxu0 %v766_v4  ;;  %497 = vmatmul.bf16.gmra.mxu3 %v818_v5 }
  0x52   :  { %1034 = vmatpush.bf16.msra.mxu3 %v1132_v14  ;;  %477 = vmatmul.bf16.gmra.mxu1 %v770_v6  ;;  %v785_v14 = vld [vmem:[%s1419_s0 + $0x68] sm:$0xf] }
  0x53   :  { %526 = vmatmul.bf16.gmra.mxu2 %v774_v7  ;;  %v786_v19 = vor.u32 %v933_v15, %v785_v14 }
  0x56   :  { %1035 = vmatpush.bf16.msra.mxu3 %v1144_v17  ;;  %v810_v17 = vor.u32 %v939_v12, %v809_v11 }
  0x5a   :  { %1036 = vmatpush.bf16.msra.mxu3 %v1156_v20  ;;  %v789_v20 = vld [vmem:[%s1419_s0 + $0x78] sm:$0xf] }
  0x5b   :  { %v790_v28 = vor.u32 %v935_v21, %v789_v20 }
  0x5e   :  { %1037 = vmatpush.bf16.msra.mxu3 %v1167_v23  ;;  %v821_v23 = vld [vmem:[%s1419_s0 + $0xb0] sm:$0xf] }
  0x5f   :  { %v822_v29 = vor.u32 %v942_v24, %v821_v23 }
  0x61   :  { %433 = vmatmul.bf16.gmra.mxu0 %v778_v16  ;;  %541 = vmatmul.bf16.vlgmr.msra.gmra.mxu3 %v810_v17 }
  0x62   :  { %482 = vmatmul.bf16.gmra.mxu1 %v782_v18 }
  0x63   :  { %531 = vmatmul.bf16.gmra.mxu2 %v786_v19 }
  0x71   :  { %438 = vmatmul.bf16.gmra.mxu0 %v790_v28  ;;  %546 = vmatmul.bf16.gmra.mxu3 %v822_v29 }
  0x72   :  { %487 = vmatmul.bf16.gmra.mxu1 %v794_v30 }
  0x73   :  { %536 = vmatmul.bf16.gmra.mxu2 %v798_v31 }
  0x9e   :  { %v414_v32 = vpop.f32.mrf.mxu0 }
  0x9f   :  { %v463_v33 = vpop.f32.mrf.mxu1 }
  0xa0   :  { %v464_v38 = vadd.f32 %v463_v33, %v414_v32 }
  0xa4   :  { %v1325_v34 = vpop.f32.mrf.mxu3 }
  0xa6   :  { %v512_v35 = vpop.f32.mrf.mxu2  ;;  %v416_v36 = vpop.f32.mrf.mxu0 }
  0xa7   :  { %v465_v37 = vpop.f32.mrf.mxu1  ;;  %v513_v39 = vadd.f32 %v512_v35, %v464_v38 }
  0xa8   :  { %v466_v41 = vadd.f32 %v465_v37, %v416_v36 }
  0xa9   :  { %v1335_v47 = vadd.f32 %v1330_v40, %v513_v39 }
  0xac   :  { %v1332_v42 = vpop.f32.mrf.mxu3 }
  0xae   :  { %v514_v43 = vpop.f32.mrf.mxu2  ;;  %v419_v45 = vpop.f32.mrf.mxu0 }
  0xaf   :  { %v515_v44 = vadd.f32 %v514_v43, %v466_v41  ;;  %v468_v46 = vpop.f32.mrf.mxu1 }
  0xb0   :  { %v469_v54 = vadd.f32 %v468_v46, %v419_v45  ;;  %v676_v46 = vmul.f32 %v1335_v47, %v1335_v47 }
  0xb1   :  { %v1338_v48 = vadd.f32 %v1330_v40, %v515_v44 }
  0xb3   :  { %v970_v49 = vpack.c.bf16 %v1338_v48, %v1335_v47  ;;  %v677_v38 = vmul.f32 %v1338_v48, %v1338_v48 }
  0xb4   :  { %v1345_v50 = vpop.f32.mrf.mxu3 }
  0xb5   :  { %971 = vst [vmem:[%s1421_s3] sm:$0xff] %v970_v49  }
  0xb6   :  { %v517_v51 = vpop.f32.mrf.mxu2  ;;  %v421_v52 = vpop.f32.mrf.mxu0 }
  0xb7   :  { %v470_v53 = vpop.f32.mrf.mxu1  ;;  %v518_v55 = vadd.f32 %v517_v51, %v469_v54 }
  0xb8   :  { %v471_v56 = vadd.f32 %v470_v53, %v421_v52  ;;  %v655_v53 = vadd.f32 %v1338_v48, %v1335_v47 }
  0xb9   :  { %v609_v62 = vadd.f32 %v1330_v40, %v518_v55 }
  0xbb   :  { %v678_v49 = vmul.f32 %v609_v62, %v609_v62 }
  0xbc   :  { %v1347_v57 = vpop.f32.mrf.mxu3 }
  0xbe   :  { %v519_v58 = vpop.f32.mrf.mxu2  ;;  %v424_v60 = vpop.f32.mrf.mxu0 }
  0xbf   :  { %v520_v59 = vadd.f32 %v519_v58, %v471_v56  ;;  %v473_v61 = vpop.f32.mrf.mxu1 }
  0xc0   :  { %v474_v5 = vadd.f32 %v473_v61, %v424_v60 }
  0xc1   :  { %v1351_v63 = vadd.f32 %v1330_v40, %v520_v59  ;;  %v656_v59 = vadd.f32 %v655_v53, %v609_v62 }
  0xc3   :  { %v975_v0 = vpack.c.bf16 %v1351_v63, %v609_v62  ;;  %v679_v60 = vmul.f32 %v1351_v63, %v1351_v63  ;;  %v657_v48 = vadd.f32 %v656_v59, %v1351_v63 }
  0xc4   :  { %v493_v1 = vpop.f32.mrf.mxu3 }
  0xc5   :  { %1007 = vst [vmem:[%s1421_s3 + $0x8] sm:$0xff] %v975_v0   ;;  %v494_v37 = vadd.f32 %v493_v1, %v1325_v34  ;;  %v692_v34 = vadd.f32 %v677_v38, %v676_v46 }
  0xc6   :  { %v522_v2 = vpop.f32.mrf.mxu2  ;;  %v426_v3 = vpop.f32.mrf.mxu0 }
  0xc7   :  { %v475_v4 = vpop.f32.mrf.mxu1  ;;  %v523_v6 = vadd.f32 %v522_v2, %v474_v5  ;;  %v693_v1 = vadd.f32 %v692_v34, %v678_v49 }
  0xc8   :  { %v476_v7 = vadd.f32 %v475_v4, %v426_v3 }
  0xc9   :  { %v611_v13 = vadd.f32 %v1330_v40, %v523_v6  ;;  %v694_v62 = vadd.f32 %v693_v1, %v679_v60 }
  0xcb   :  { %v680_v2 = vmul.f32 %v611_v13, %v611_v13  ;;  %v658_v5 = vadd.f32 %v657_v48, %v611_v13 }
  0xcc   :  { %v495_v8 = vpop.f32.mrf.mxu3 }
  0xcd   :  { %v496_v39 = vadd.f32 %v495_v8, %v1332_v42 }
  0xce   :  { %v524_v9 = vpop.f32.mrf.mxu2  ;;  %v429_v11 = vpop.f32.mrf.mxu0 }
  0xcf   :  { %v525_v10 = vadd.f32 %v524_v9, %v476_v7  ;;  %v478_v12 = vpop.f32.mrf.mxu1  ;;  %v695_v9 = vadd.f32 %v694_v62, %v680_v2 }
  0xd0   :  { %v479_v20 = vadd.f32 %v478_v12, %v429_v11 }
  0xd1   :  { %v612_v14 = vadd.f32 %v1330_v40, %v525_v10 }
  0xd3   :  { %v980_v15 = vpack.c.bf16 %v612_v14, %v611_v13  ;;  %v681_v6 = vmul.f32 %v612_v14, %v612_v14  ;;  %v659_v10 = vadd.f32 %v658_v5, %v612_v14 }
  0xd4   :  { %v1362_v16 = vpop.f32.mrf.mxu3 }
  0xd5   :  { %1008 = vst [vmem:[%s1421_s3 + $0x10] sm:$0xff] %v980_v15   ;;  %v696_v12 = vadd.f32 %v695_v9, %v681_v6 }
  0xd6   :  { %v527_v17 = vpop.f32.mrf.mxu2  ;;  %v431_v18 = vpop.f32.mrf.mxu0 }
  0xd7   :  { %v480_v19 = vpop.f32.mrf.mxu1  ;;  %v528_v21 = vadd.f32 %v527_v17, %v479_v20 }
  0xd8   :  { %v481_v22 = vadd.f32 %v480_v19, %v431_v18  ;;  %v499_v18 = vadd.f32 %v1362_v16, %v1345_v50 }
  0xd9   :  { %v613_v28 = vadd.f32 %v1330_v40, %v528_v21 }
  0xdb   :  { %v682_v11 = vmul.f32 %v613_v28, %v613_v28  ;;  %v660_v15 = vadd.f32 %v659_v10, %v613_v28 }
  0xdc   :  { %v1364_v23 = vpop.f32.mrf.mxu3 }
  0xdd   :  { %v697_v13 = vadd.f32 %v696_v12, %v682_v11 }
  0xde   :  { %v529_v24 = vpop.f32.mrf.mxu2  ;;  %v434_v26 = vpop.f32.mrf.mxu0 }
  0xdf   :  { %v530_v25 = vadd.f32 %v529_v24, %v481_v22  ;;  %v483_v27 = vpop.f32.mrf.mxu1 }
  0xe0   :  { %v484_v36 = vadd.f32 %v483_v27, %v434_v26 }
  0xe1   :  { %v614_v29 = vadd.f32 %v1330_v40, %v530_v25  ;;  %v501_v25 = vadd.f32 %v1364_v23, %v1347_v57 }
  0xe3   :  { %v985_v30 = vpack.c.bf16 %v614_v29, %v613_v28  ;;  %v683_v17 = vmul.f32 %v614_v29, %v614_v29  ;;  %v661_v21 = vadd.f32 %v660_v15, %v614_v29 }
  0xe4   :  { %v542_v31 = vpop.f32.mrf.mxu3 }
  0xe5   :  { %1009 = vst [vmem:[%s1421_s3 + $0x18] sm:$0xff] %v985_v30   ;;  %v543_v41 = vadd.f32 %v542_v31, %v494_v37  ;;  %v698_v14 = vadd.f32 %v697_v13, %v683_v17 }
  0xe6   :  { %v532_v32 = vpop.f32.mrf.mxu2  ;;  %v436_v33 = vpop.f32.mrf.mxu0 }
  0xe7   :  { %v485_v35 = vpop.f32.mrf.mxu1  ;;  %v533_v43 = vadd.f32 %v532_v32, %v484_v36  ;;  %v619_v55 = vadd.f32 %v1330_v40, %v543_v41 }
  0xe8   :  { %v486_v44 = vadd.f32 %v485_v35, %v436_v33 }
  0xe9   :  { %v615_v61 = vadd.f32 %v1330_v40, %v533_v43  ;;  %v688_v46 = vmul.f32 %v619_v55, %v619_v55 }
  0xeb   :  { %v684_v22 = vmul.f32 %v615_v61, %v615_v61  ;;  %v662_v27 = vadd.f32 %v661_v21, %v615_v61 }
  0xec   :  { %v544_v45 = vpop.f32.mrf.mxu3 }
  0xed   :  { %v545_v52 = vadd.f32 %v544_v45, %v496_v39  ;;  %v699_v35 = vadd.f32 %v698_v14, %v684_v22 }
  0xee   :  { %v534_v51 = vpop.f32.mrf.mxu2  ;;  %v439_v42 = vpop.f32.mrf.mxu0 }
  0xef   :  { %v535_v54 = vadd.f32 %v534_v51, %v486_v44  ;;  %v1381_v56 = vadd.f32 %v1330_v40, %v545_v52  ;;  %v488_v58 = vpop.f32.mrf.mxu1 }
  0xf0   :  { %v489_v4 = vadd.f32 %v488_v58, %v439_v42 }
  0xf1   :  { %v616_v0 = vadd.f32 %v1330_v40, %v535_v54  ;;  %v1000_v47 = vpack.c.bf16 %v1381_v56, %v619_v55  ;;  %v689_v52 = vmul.f32 %v1381_v56, %v1381_v56 }
  0xf3   :  { %v990_v3 = vpack.c.bf16 %v616_v0, %v615_v61  ;;  %1012 = vst [vmem:[%s1421_s3 + $0x30] sm:$0xff] %v1000_v47   ;;  %v685_v30 = vmul.f32 %v616_v0, %v616_v0  ;;  %v663_v50 = vadd.f32 %v662_v27, %v616_v0 }
  0xf4   :  { %v547_v7 = vpop.f32.mrf.mxu3 }
  0xf5   :  { %1010 = vst [vmem:[%s1421_s3 + $0x20] sm:$0xff] %v990_v3   ;;  %v548_v26 = vadd.f32 %v547_v7, %v499_v18  ;;  %v700_v38 = vadd.f32 %v699_v35, %v685_v30 }
  0xf6   :  { %v537_v8 = vpop.f32.mrf.mxu2  ;;  %v441_v19 = vpop.f32.mrf.mxu0 }
  0xf7   :  { %v538_v63 = vadd.f32 %v537_v8, %v489_v4  ;;  %v490_v20 = vpop.f32.mrf.mxu1  ;;  %v621_v29 = vadd.f32 %v1330_v40, %v548_v26 }
  0xf8   :  { %v491_v31 = vadd.f32 %v490_v20, %v441_v19 }
  0xf9   :  { %v617_v24 = vadd.f32 %v1330_v40, %v538_v63  ;;  %v690_v54 = vmul.f32 %v621_v29, %v621_v29 }
  0xfb   :  { %v686_v16 = vmul.f32 %v617_v24, %v617_v24  ;;  %v664_v39 = vadd.f32 %v663_v50, %v617_v24 }
  0xfc   :  { %v549_v28 = vpop.f32.mrf.mxu3 }
  0xfd   :  { %v550_v33 = vadd.f32 %v549_v28, %v501_v25  ;;  %v701_v41 = vadd.f32 %v700_v38, %v686_v16 }
  0xfe   :  { %v539_v32 = vpop.f32.mrf.mxu2 }
  0xff   :  { %v540_v36 = vadd.f32 %v539_v32, %v491_v31  ;;  %v622_v37 = vadd.f32 %v1330_v40, %v550_v33 }
 0x101   :  { %v618_v57 = vadd.f32 %v1330_v40, %v540_v36  ;;  %v1005_v23 = vpack.c.bf16 %v622_v37, %v621_v29  ;;  %v691_v59 = vmul.f32 %v622_v37, %v622_v37 }
 0x103   :  { %v995_v43 = vpack.c.bf16 %v618_v57, %v617_v24  ;;  %v665_v44 = vadd.f32 %v664_v39, %v618_v57  ;;  %v687_v45 = vmul.f32 %v618_v57, %v618_v57  ;;  %1013 = vst [vmem:[%s1421_s3 + $0x38] sm:$0xff] %v1005_v23  }
 0x105   :  { %1011 = vst [vmem:[%s1421_s3 + $0x28] sm:$0xff] %v995_v43   ;;  %v666_v49 = vadd.f32 %v665_v44, %v619_v55  ;;  %v702_v51 = vadd.f32 %v701_v41, %v687_v45 }
 0x107   :  { %v703_v40 = vadd.f32 %v702_v51, %v688_v46  ;;  %v667_v53 = vadd.f32 %v666_v49, %v1381_v56 }
 0x109   :  { %v668_v34 = vadd.f32 %v667_v53, %v621_v29  ;;  %v704_v42 = vadd.f32 %v703_v40, %v689_v52 }
 0x10b   :  { %v669_v58 = vadd.f32 %v668_v34, %v622_v37  ;;  %v705_v60 = vadd.f32 %v704_v42, %v690_v54 }
 0x10d   :  { %v670_v61 = vrot.slane %v669_v58, 4  ;;  %v706_v0 = vadd.f32 %v705_v60, %v691_v59 }
 0x10f   :  { %v671_v1 = vadd.f32 %v670_v61, %v669_v58  ;;  %v707_v47 = vrot.slane %v706_v0, 4 }
 0x111   :  { %v672_v48 = vrot.slane %v671_v1, 2  ;;  %v708_v2 = vadd.f32 %v707_v47, %v706_v0 }
 0x113   :  { %v673_v55 = vadd.f32 %v672_v48, %v671_v1  ;;  %v709_v3 = vrot.slane %v708_v2, 2 }
 0x115   :  { %v674_v4 = vrot.slane %v673_v55, 1  ;;  %v710_v62 = vadd.f32 %v709_v3, %v708_v2 }
 0x117   :  { %v675_v5 = vadd.f32 %v674_v4, %v673_v55  ;;  %v711_v6 = vrot.slane %v710_v62, 1 }
 0x119   :  { %v712_v7 = vadd.f32 %v711_v6, %v710_v62  ;;  %713 = vst [vmem:[%s1422_s4] sm:$0xff] %v675_v5 }
 0x11b   :  { %714 = vst [vmem:[%s1423_s5] sm:$0xff] %v712_v7 }

// kernel: local_enhancer_forward.59
= control target key start
LH: loop header
LB: loop body
LE: loop exit
PB: predicated region body
PF: predicated region fallthrough
CT: control target
= control target key end

     0   :  { %s1023_s1 = inlined_call_operand.vmem [shape: bf16[256,128], index: 1, kind: input, shape index: {}]   ;;  %s1024_s0 = inlined_call_operand.vmem [shape: bf16[128,256], index: 0, kind: input, shape index: {}]   ;;  %s1025_s2 = inlined_call_operand.vmem [shape: f32[1,128], index: 2, kind: input, shape index: {}]   ;;  %s1026_s3 = inlined_call_operand.vmem [shape: bf16[128,128], index: 3, kind: output, shape index: {0}]   ;;  %s1027_s4 = inlined_call_operand.vmem [shape: f32[8,128], index: 4, kind: output, shape index: {1}]   ;;  %s1028_s5 = inlined_call_operand.vmem [shape: f32[8,128], index: 5, kind: output, shape index: {2}]  }
   0x1   :  { %v701_v0 = vld [vmem:[%s1023_s1 + $0x38] sm:$0xff]  ;;  %v700_v2 = vld [vmem:[%s1023_s1 + $0x30] sm:$0xff]  ;;  %v699_v4 = vld [vmem:[%s1023_s1 + $0x28] sm:$0xff] }
   0x2   :  { %v709_v1 = vld [vmem:[%s1023_s1 + $0x78] sm:$0xff]  ;;  %277 = vmatpush.bf16.msra.mxu0 %v701_v0  ;;  %v708_v3 = vld [vmem:[%s1023_s1 + $0x70] sm:$0xff]  ;;  %757 = vmatpush.bf16.msra.mxu2 %v701_v0  ;;  %v707_v5 = vld [vmem:[%s1023_s1 + $0x68] sm:$0xff] }
   0x3   :  { %326 = vmatpush.bf16.msra.mxu1 %v709_v1  ;;  %765 = vmatpush.bf16.msra.mxu3 %v709_v1  ;;  %v698_v6 = vld [vmem:[%s1023_s1 + $0x20] sm:$0xff]  ;;  %v697_v8 = vld [vmem:[%s1023_s1 + $0x18] sm:$0xff]  ;;  %v696_v10 = vld [vmem:[%s1023_s1 + $0x10] sm:$0xff] }
   0x4   :  { %v706_v7 = vld [vmem:[%s1023_s1 + $0x60] sm:$0xff]  ;;  %v705_v9 = vld [vmem:[%s1023_s1 + $0x58] sm:$0xff]  ;;  %v704_v11 = vld [vmem:[%s1023_s1 + $0x50] sm:$0xff] }
   0x5   :  { %v695_v12 = vld [vmem:[%s1023_s1 + $0x8] sm:$0xff]  ;;  %v694_v14 = vld [vmem:[%s1023_s1] sm:$0xff]  ;;  %v560_v28 = vld [vmem:[%s1024_s0 + $0x10] sm:$0xf] }
   0x6   :  { %278 = vmatpush.bf16.msra.mxu0 %v700_v2  ;;  %758 = vmatpush.bf16.msra.mxu2 %v700_v2  ;;  %v703_v13 = vld [vmem:[%s1023_s1 + $0x48] sm:$0xff]  ;;  %v702_v15 = vld [vmem:[%s1023_s1 + $0x40] sm:$0xff]  ;;  %v681_v29 = vld [vmem:[%s1024_s0 + $0x14] sm:$0xf0] }
   0x7   :  { %327 = vmatpush.bf16.msra.mxu1 %v708_v3  ;;  %766 = vmatpush.bf16.msra.mxu3 %v708_v3  ;;  %v552_v16 = vld [vmem:[%s1024_s0] sm:$0xf]  ;;  %v679_v17 = vld [vmem:[%s1024_s0 + $0x4] sm:$0xf0]  ;;  %v678_v18 = vld [vmem:[%s1024_s0 + $0x4] sm:$0xf]  ;;  %v561_v36 = vor.u32 %v681_v29, %v560_v28 }
   0x8   :  { %v554_v19 = vld [vmem:[%s1024_s0 + $0x8] sm:$0xf0]  ;;  %v584_v20 = vld [vmem:[%s1024_s0 + $0x40] sm:$0xf]  ;;  %v687_v21 = vld [vmem:[%s1024_s0 + $0x44] sm:$0xf0]  ;;  %v553_v24 = vor.u32 %v679_v17, %v552_v16 }
   0x9   :  { %v686_v22 = vld [vmem:[%s1024_s0 + $0x44] sm:$0xf]  ;;  %v586_v23 = vld [vmem:[%s1024_s0 + $0x48] sm:$0xf0]  ;;  %v557_v25 = vor.u32 %v678_v18, %v554_v19  ;;  %v585_v26 = vor.u32 %v687_v21, %v584_v20  ;;  %v680_v30 = vld [vmem:[%s1024_s0 + $0x14] sm:$0xf] }
   0xa   :  { %279 = vmatpush.bf16.msra.mxu0 %v699_v4  ;;  %759 = vmatpush.bf16.msra.mxu2 %v699_v4  ;;  %v589_v27 = vor.u32 %v686_v22, %v586_v23  ;;  %v562_v31 = vld [vmem:[%s1024_s0 + $0x18] sm:$0xf0]  ;;  %v592_v32 = vld [vmem:[%s1024_s0 + $0x50] sm:$0xf]  ;;  %v689_v33 = vld [vmem:[%s1024_s0 + $0x54] sm:$0xf0] }
   0xb   :  { %328 = vmatpush.bf16.msra.mxu1 %v707_v5  ;;  %767 = vmatpush.bf16.msra.mxu3 %v707_v5  ;;  %v688_v34 = vld [vmem:[%s1024_s0 + $0x54] sm:$0xf]  ;;  %v594_v35 = vld [vmem:[%s1024_s0 + $0x58] sm:$0xf0]  ;;  %v565_v37 = vor.u32 %v680_v30, %v562_v31  ;;  %v593_v38 = vor.u32 %v689_v33, %v592_v32  ;;  %v568_v40 = vld [vmem:[%s1024_s0 + $0x20] sm:$0xf] }
   0xc   :  { %v597_v39 = vor.u32 %v688_v34, %v594_v35  ;;  %v683_v41 = vld [vmem:[%s1024_s0 + $0x24] sm:$0xf0]  ;;  %v682_v42 = vld [vmem:[%s1024_s0 + $0x24] sm:$0xf]  ;;  %v570_v43 = vld [vmem:[%s1024_s0 + $0x28] sm:$0xf0] }
   0xd   :  { %v600_v44 = vld [vmem:[%s1024_s0 + $0x60] sm:$0xf]  ;;  %v691_v45 = vld [vmem:[%s1024_s0 + $0x64] sm:$0xf0]  ;;  %v690_v46 = vld [vmem:[%s1024_s0 + $0x64] sm:$0xf]  ;;  %v569_v48 = vor.u32 %v683_v41, %v568_v40  ;;  %v573_v49 = vor.u32 %v682_v42, %v570_v43 }
   0xe   :  { %280 = vmatpush.bf16.msra.mxu0 %v698_v6  ;;  %760 = vmatpush.bf16.msra.mxu2 %v698_v6  ;;  %v602_v47 = vld [vmem:[%s1024_s0 + $0x68] sm:$0xf0]  ;;  %v601_v50 = vor.u32 %v691_v45, %v600_v44  ;;  %v576_v52 = vld [vmem:[%s1024_s0 + $0x30] sm:$0xf]  ;;  %v685_v53 = vld [vmem:[%s1024_s0 + $0x34] sm:$0xf0] }
   0xf   :  { %329 = vmatpush.bf16.msra.mxu1 %v706_v7  ;;  %768 = vmatpush.bf16.msra.mxu3 %v706_v7  ;;  %v605_v51 = vor.u32 %v690_v46, %v602_v47  ;;  %v684_v54 = vld [vmem:[%s1024_s0 + $0x34] sm:$0xf]  ;;  %v578_v55 = vld [vmem:[%s1024_s0 + $0x38] sm:$0xf0]  ;;  %v608_v56 = vld [vmem:[%s1024_s0 + $0x70] sm:$0xf]  ;;  %v577_v60 = vor.u32 %v685_v53, %v576_v52 }
  0x10   :  { %v693_v57 = vld [vmem:[%s1024_s0 + $0x74] sm:$0xf0]  ;;  %v692_v58 = vld [vmem:[%s1024_s0 + $0x74] sm:$0xf]  ;;  %v610_v59 = vld [vmem:[%s1024_s0 + $0x78] sm:$0xf0]  ;;  %v581_v61 = vor.u32 %v684_v54, %v578_v55 }
  0x11   :  { %v609_v62 = vor.u32 %v693_v57, %v608_v56  ;;  %v613_v63 = vor.u32 %v692_v58, %v610_v59  ;;  %v951_v3 = vld [vmem:[%s1025_s2] ss:$0 sm:$0xff] }
  0x12   :  { %281 = vmatpush.bf16.msra.mxu0 %v697_v8  ;;  %761 = vmatpush.bf16.msra.mxu2 %v697_v8 }
  0x13   :  { %330 = vmatpush.bf16.msra.mxu1 %v705_v9  ;;  %769 = vmatpush.bf16.msra.mxu3 %v705_v9 }
  0x16   :  { %282 = vmatpush.bf16.msra.mxu0 %v696_v10  ;;  %762 = vmatpush.bf16.msra.mxu2 %v696_v10 }
  0x17   :  { %331 = vmatpush.bf16.msra.mxu1 %v704_v11  ;;  %770 = vmatpush.bf16.msra.mxu3 %v704_v11 }
  0x1a   :  { %283 = vmatpush.bf16.msra.mxu0 %v695_v12  ;;  %763 = vmatpush.bf16.msra.mxu2 %v695_v12 }
  0x1b   :  { %332 = vmatpush.bf16.msra.mxu1 %v703_v13  ;;  %771 = vmatpush.bf16.msra.mxu3 %v703_v13 }
  0x1e   :  { %284 = vmatpush.bf16.msra.mxu0 %v694_v14  ;;  %764 = vmatpush.bf16.msra.mxu2 %v694_v14 }
  0x1f   :  { %333 = vmatpush.bf16.msra.mxu1 %v702_v15  ;;  %772 = vmatpush.bf16.msra.mxu3 %v702_v15 }
  0x21   :  { %285 = vmatmul.bf16.vlgmr.msra.gmra.mxu0 %v553_v24  ;;  %305 = vmatmul.bf16.vlgmr.msra.gmra.mxu2 %v585_v26 }
  0x22   :  { %334 = vmatmul.bf16.vlgmr.msra.gmra.mxu1 %v557_v25  ;;  %354 = vmatmul.bf16.vlgmr.msra.gmra.mxu3 %v589_v27 }
  0x31   :  { %290 = vmatmul.bf16.gmra.mxu0 %v561_v36  ;;  %310 = vmatmul.bf16.gmra.mxu2 %v593_v38 }
  0x32   :  { %339 = vmatmul.bf16.gmra.mxu1 %v565_v37  ;;  %359 = vmatmul.bf16.gmra.mxu3 %v597_v39 }
  0x41   :  { %295 = vmatmul.bf16.gmra.mxu0 %v569_v48  ;;  %315 = vmatmul.bf16.gmra.mxu2 %v601_v50 }
  0x42   :  { %344 = vmatmul.bf16.gmra.mxu1 %v573_v49  ;;  %364 = vmatmul.bf16.gmra.mxu3 %v605_v51 }
  0x51   :  { %300 = vmatmul.bf16.gmra.mxu0 %v577_v60  ;;  %320 = vmatmul.bf16.gmra.mxu2 %v609_v62 }
  0x52   :  { %349 = vmatmul.bf16.gmra.mxu1 %v581_v61  ;;  %369 = vmatmul.bf16.gmra.mxu3 %v613_v63 }
  0x9e   :  { %v286_v0 = vpop.f32.mrf.mxu0 }
  0x9f   :  { %v335_v1 = vpop.f32.mrf.mxu1 }
  0xa0   :  { %v336_v2 = vadd.f32 %v335_v1, %v286_v0 }
  0xa2   :  { %v430_v9 = vadd.f32 %v951_v3, %v336_v2 }
  0xa4   :  { %v306_v4 = vpop.f32.mrf.mxu2  ;;  %v499_v56 = vmul.f32 %v430_v9, %v430_v9 }
  0xa5   :  { %v355_v5 = vpop.f32.mrf.mxu3 }
  0xa6   :  { %v288_v6 = vpop.f32.mrf.mxu0  ;;  %v356_v11 = vadd.f32 %v355_v5, %v306_v4 }
  0xa7   :  { %v337_v7 = vpop.f32.mrf.mxu1 }
  0xa8   :  { %v338_v8 = vadd.f32 %v337_v7, %v288_v6  ;;  %v959_v15 = vadd.f32 %v951_v3, %v356_v11 }
  0xaa   :  { %v431_v10 = vadd.f32 %v951_v3, %v338_v8 }
  0xac   :  { %v713_v12 = vpack.c.bf16 %v431_v10, %v430_v9  ;;  %v308_v13 = vpop.f32.mrf.mxu2  ;;  %v500_v49 = vmul.f32 %v431_v10, %v431_v10  ;;  %v478_v57 = vadd.f32 %v431_v10, %v430_v9 }
  0xad   :  { %v357_v14 = vpop.f32.mrf.mxu3 }
  0xae   :  { %714 = vst [vmem:[%s1026_s3] sm:$0xff] %v713_v12   ;;  %v291_v16 = vpop.f32.mrf.mxu0  ;;  %v358_v18 = vadd.f32 %v357_v14, %v308_v13  ;;  %v515_v61 = vadd.f32 %v500_v49, %v499_v56 }
  0xaf   :  { %v340_v17 = vpop.f32.mrf.mxu1 }
  0xb0   :  { %v962_v19 = vadd.f32 %v951_v3, %v358_v18  ;;  %v341_v21 = vadd.f32 %v340_v17, %v291_v16 }
  0xb2   :  { %v733_v20 = vpack.c.bf16 %v962_v19, %v959_v15  ;;  %v432_v27 = vadd.f32 %v951_v3, %v341_v21 }
  0xb4   :  { %753 = vst [vmem:[%s1026_s3 + $0x20] sm:$0xff] %v733_v20   ;;  %v311_v22 = vpop.f32.mrf.mxu2  ;;  %v501_v58 = vmul.f32 %v432_v27, %v432_v27  ;;  %v479_v62 = vadd.f32 %v478_v57, %v432_v27 }
  0xb5   :  { %v360_v23 = vpop.f32.mrf.mxu3 }
  0xb6   :  { %v293_v24 = vpop.f32.mrf.mxu0  ;;  %v361_v29 = vadd.f32 %v360_v23, %v311_v22  ;;  %v516_v1 = vadd.f32 %v515_v61, %v501_v58 }
  0xb7   :  { %v342_v25 = vpop.f32.mrf.mxu1 }
  0xb8   :  { %v343_v26 = vadd.f32 %v342_v25, %v293_v24  ;;  %v975_v33 = vadd.f32 %v951_v3, %v361_v29 }
  0xba   :  { %v433_v28 = vadd.f32 %v951_v3, %v343_v26 }
  0xbc   :  { %v718_v30 = vpack.c.bf16 %v433_v28, %v432_v27  ;;  %v313_v31 = vpop.f32.mrf.mxu2  ;;  %v502_v63 = vmul.f32 %v433_v28, %v433_v28  ;;  %v480_v2 = vadd.f32 %v479_v62, %v433_v28  ;;  %v507_v27 = vmul.f32 %v959_v15, %v959_v15 }
  0xbd   :  { %v362_v32 = vpop.f32.mrf.mxu3 }
  0xbe   :  { %750 = vst [vmem:[%s1026_s3 + $0x8] sm:$0xff] %v718_v30   ;;  %v296_v34 = vpop.f32.mrf.mxu0  ;;  %v363_v36 = vadd.f32 %v362_v32, %v313_v31  ;;  %v517_v6 = vadd.f32 %v516_v1, %v502_v63 }
  0xbf   :  { %v345_v35 = vpop.f32.mrf.mxu1 }
  0xc0   :  { %v978_v37 = vadd.f32 %v951_v3, %v363_v36  ;;  %v346_v39 = vadd.f32 %v345_v35, %v296_v34  ;;  %v508_v35 = vmul.f32 %v962_v19, %v962_v19 }
  0xc2   :  { %v738_v38 = vpack.c.bf16 %v978_v37, %v975_v33  ;;  %v434_v45 = vadd.f32 %v951_v3, %v346_v39 }
  0xc4   :  { %754 = vst [vmem:[%s1026_s3 + $0x28] sm:$0xff] %v738_v38   ;;  %v316_v40 = vpop.f32.mrf.mxu2  ;;  %v503_v4 = vmul.f32 %v434_v45, %v434_v45  ;;  %v481_v7 = vadd.f32 %v480_v2, %v434_v45 }
  0xc5   :  { %v365_v41 = vpop.f32.mrf.mxu3 }
  0xc6   :  { %v298_v42 = vpop.f32.mrf.mxu0  ;;  %v366_v47 = vadd.f32 %v365_v41, %v316_v40  ;;  %v518_v13 = vadd.f32 %v517_v6, %v503_v4  ;;  %v509_v40 = vmul.f32 %v975_v33, %v975_v33 }
  0xc7   :  { %v347_v43 = vpop.f32.mrf.mxu1 }
  0xc8   :  { %v348_v44 = vadd.f32 %v347_v43, %v298_v42  ;;  %v442_v52 = vadd.f32 %v951_v3, %v366_v47  ;;  %v510_v43 = vmul.f32 %v978_v37, %v978_v37 }
  0xca   :  { %v435_v46 = vadd.f32 %v951_v3, %v348_v44 }
  0xcc   :  { %v723_v48 = vpack.c.bf16 %v435_v46, %v434_v45  ;;  %v318_v50 = vpop.f32.mrf.mxu2  ;;  %v504_v8 = vmul.f32 %v435_v46, %v435_v46  ;;  %v482_v14 = vadd.f32 %v481_v7, %v435_v46 }
  0xcd   :  { %v367_v51 = vpop.f32.mrf.mxu3 }
  0xce   :  { %751 = vst [vmem:[%s1026_s3 + $0x10] sm:$0xff] %v723_v48   ;;  %v301_v53 = vpop.f32.mrf.mxu0  ;;  %v368_v55 = vadd.f32 %v367_v51, %v318_v50  ;;  %v519_v18 = vadd.f32 %v518_v13, %v504_v8 }
  0xcf   :  { %v350_v54 = vpop.f32.mrf.mxu1 }
  0xd0   :  { %v351_v59 = vadd.f32 %v350_v54, %v301_v53  ;;  %v443_v60 = vadd.f32 %v951_v3, %v368_v55 }
  0xd2   :  { %v743_v0 = vpack.c.bf16 %v443_v60, %v442_v52  ;;  %v436_v5 = vadd.f32 %v951_v3, %v351_v59  ;;  %v512_v47 = vmul.f32 %v443_v60, %v443_v60 }
  0xd4   :  { %755 = vst [vmem:[%s1026_s3 + $0x30] sm:$0xff] %v743_v0   ;;  %v321_v9 = vpop.f32.mrf.mxu2  ;;  %v505_v16 = vmul.f32 %v436_v5, %v436_v5  ;;  %v483_v20 = vadd.f32 %v482_v14, %v436_v5 }
  0xd5   :  { %v370_v10 = vpop.f32.mrf.mxu3 }
  0xd6   :  { %v303_v11 = vpop.f32.mrf.mxu0  ;;  %v371_v22 = vadd.f32 %v370_v10, %v321_v9  ;;  %v520_v23 = vadd.f32 %v519_v18, %v505_v16 }
  0xd7   :  { %v352_v12 = vpop.f32.mrf.mxu1 }
  0xd8   :  { %v353_v17 = vadd.f32 %v352_v12, %v303_v11  ;;  %v444_v32 = vadd.f32 %v951_v3, %v371_v22 }
  0xda   :  { %v437_v21 = vadd.f32 %v951_v3, %v353_v17 }
  0xdc   :  { %v728_v24 = vpack.c.bf16 %v437_v21, %v436_v5  ;;  %v484_v25 = vadd.f32 %v483_v20, %v437_v21  ;;  %v506_v26 = vmul.f32 %v437_v21, %v437_v21  ;;  %v323_v30 = vpop.f32.mrf.mxu2 }
  0xdd   :  { %v372_v31 = vpop.f32.mrf.mxu3 }
  0xde   :  { %752 = vst [vmem:[%s1026_s3 + $0x18] sm:$0xff] %v728_v24   ;;  %v485_v28 = vadd.f32 %v484_v25, %v959_v15  ;;  %v521_v29 = vadd.f32 %v520_v23, %v506_v26  ;;  %v373_v34 = vadd.f32 %v372_v31, %v323_v30 }
  0xe0   :  { %v486_v36 = vadd.f32 %v485_v28, %v962_v19  ;;  %v522_v38 = vadd.f32 %v521_v29, %v507_v27  ;;  %v445_v39 = vadd.f32 %v951_v3, %v373_v34  ;;  %v511_v19 = vmul.f32 %v442_v52, %v442_v52 }
  0xe2   :  { %v487_v41 = vadd.f32 %v486_v36, %v975_v33  ;;  %v523_v15 = vadd.f32 %v522_v38, %v508_v35  ;;  %v748_v42 = vpack.c.bf16 %v445_v39, %v444_v32  ;;  %v513_v33 = vmul.f32 %v444_v32, %v444_v32 }
  0xe3   :  { %v514_v55 = vmul.f32 %v445_v39, %v445_v39 }
  0xe4   :  { %v524_v44 = vadd.f32 %v523_v15, %v509_v40  ;;  %v488_v45 = vadd.f32 %v487_v41, %v978_v37  ;;  %756 = vst [vmem:[%s1026_s3 + $0x38] sm:$0xff] %v748_v42  }
  0xe6   :  { %v489_v46 = vadd.f32 %v488_v45, %v442_v52  ;;  %v525_v3 = vadd.f32 %v524_v44, %v510_v43 }
  0xe8   :  { %v490_v48 = vadd.f32 %v489_v46, %v443_v60  ;;  %v526_v49 = vadd.f32 %v525_v3, %v511_v19 }
  0xea   :  { %v491_v50 = vadd.f32 %v490_v48, %v444_v32  ;;  %v527_v51 = vadd.f32 %v526_v49, %v512_v47 }
  0xec   :  { %v528_v53 = vadd.f32 %v527_v51, %v513_v33  ;;  %v492_v54 = vadd.f32 %v491_v50, %v445_v39 }
  0xee   :  { %v493_v56 = vrot.slane %v492_v54, 4  ;;  %v529_v57 = vadd.f32 %v528_v53, %v514_v55 }
  0xf0   :  { %v494_v58 = vadd.f32 %v493_v56, %v492_v54  ;;  %v530_v37 = vrot.slane %v529_v57, 4 }
  0xf2   :  { %v495_v59 = vrot.slane %v494_v58, 2  ;;  %v531_v61 = vadd.f32 %v530_v37, %v529_v57 }
  0xf4   :  { %v496_v62 = vadd.f32 %v495_v59, %v494_v58  ;;  %v532_v63 = vrot.slane %v531_v61, 2 }
  0xf6   :  { %v497_v0 = vrot.slane %v496_v62, 1  ;;  %v533_v52 = vadd.f32 %v532_v63, %v531_v61 }
  0xf8   :  { %v498_v1 = vadd.f32 %v497_v0, %v496_v62  ;;  %v534_v2 = vrot.slane %v533_v52, 1 }
  0xfa   :  { %v535_v60 = vadd.f32 %v534_v2, %v533_v52  ;;  %536 = vst [vmem:[%s1027_s4] sm:$0xff] %v498_v1 }
  0xfc   :  { %537 = vst [vmem:[%s1028_s5] sm:$0xff] %v535_v60 }

// kernel: local_enhancer_forward.64
= control target key start
LH: loop header
LB: loop body
LE: loop exit
PB: predicated region body
PF: predicated region fallthrough
CT: control target
= control target key end

     0   :  { %s680_s1 = inlined_call_operand.vmem [shape: bf16[128,128], index: 1, kind: input, shape index: {}]   ;;  %s681_s2 = inlined_call_operand.vmem [shape: f32[1,128], index: 2, kind: input, shape index: {}]   ;;  %s682_s0 = inlined_call_operand.vmem [shape: bf16[128,128], index: 0, kind: input, shape index: {}]   ;;  %s683_s3 = inlined_call_operand.vmem [shape: bf16[128,128], index: 3, kind: output, shape index: {0}]   ;;  %s684_s4 = inlined_call_operand.vmem [shape: f32[8,128], index: 4, kind: output, shape index: {1}]   ;;  %s685_s5 = inlined_call_operand.vmem [shape: f32[8,128], index: 5, kind: output, shape index: {2}]  }
   0x1   :  { %v484_v0 = vld [vmem:[%s680_s1 + $0x38] sm:$0xff]  ;;  %v483_v1 = vld [vmem:[%s680_s1 + $0x30] sm:$0xff]  ;;  %v482_v2 = vld [vmem:[%s680_s1 + $0x28] sm:$0xff] }
   0x2   :  { %181 = vmatpush.bf16.msra.mxu0 %v484_v0  ;;  %532 = vmatpush.bf16.msra.mxu1 %v484_v0  ;;  %v481_v3 = vld [vmem:[%s680_s1 + $0x20] sm:$0xff]  ;;  %v480_v4 = vld [vmem:[%s680_s1 + $0x18] sm:$0xff]  ;;  %v479_v5 = vld [vmem:[%s680_s1 + $0x10] sm:$0xff] }
   0x3   :  { %533 = vmatpush.bf16.msra.mxu2 %v484_v0  ;;  %534 = vmatpush.bf16.msra.mxu3 %v484_v0  ;;  %v478_v6 = vld [vmem:[%s680_s1 + $0x8] sm:$0xff]  ;;  %v477_v7 = vld [vmem:[%s680_s1] sm:$0xff]  ;;  %v471_v9 = vld [vmem:[%s682_s0 + $0x10] sm:$0xff] }
   0x4   :  { %v469_v8 = vld [vmem:[%s682_s0] sm:$0xff]  ;;  %v475_v11 = vld [vmem:[%s682_s0 + $0x30] sm:$0xff]  ;;  %v470_v12 = vld [vmem:[%s682_s0 + $0x8] sm:$0xff] }
   0x5   :  { %v473_v10 = vld [vmem:[%s682_s0 + $0x20] sm:$0xff]  ;;  %v472_v13 = vld [vmem:[%s682_s0 + $0x18] sm:$0xff]  ;;  %v474_v14 = vld [vmem:[%s682_s0 + $0x28] sm:$0xff] }
   0x6   :  { %182 = vmatpush.bf16.msra.mxu0 %v483_v1  ;;  %535 = vmatpush.bf16.msra.mxu1 %v483_v1  ;;  %v476_v15 = vld [vmem:[%s682_s0 + $0x38] sm:$0xff]  ;;  %v556_v18 = vld [vmem:[%s681_s2] ss:$0 sm:$0xff] }
   0x7   :  { %536 = vmatpush.bf16.msra.mxu2 %v483_v1  ;;  %537 = vmatpush.bf16.msra.mxu3 %v483_v1 }
   0xa   :  { %183 = vmatpush.bf16.msra.mxu0 %v482_v2  ;;  %538 = vmatpush.bf16.msra.mxu1 %v482_v2 }
   0xb   :  { %539 = vmatpush.bf16.msra.mxu2 %v482_v2  ;;  %540 = vmatpush.bf16.msra.mxu3 %v482_v2 }
   0xe   :  { %184 = vmatpush.bf16.msra.mxu0 %v481_v3  ;;  %541 = vmatpush.bf16.msra.mxu1 %v481_v3 }
   0xf   :  { %542 = vmatpush.bf16.msra.mxu2 %v481_v3  ;;  %543 = vmatpush.bf16.msra.mxu3 %v481_v3 }
  0x12   :  { %185 = vmatpush.bf16.msra.mxu0 %v480_v4  ;;  %544 = vmatpush.bf16.msra.mxu1 %v480_v4 }
  0x13   :  { %545 = vmatpush.bf16.msra.mxu2 %v480_v4  ;;  %546 = vmatpush.bf16.msra.mxu3 %v480_v4 }
  0x16   :  { %186 = vmatpush.bf16.msra.mxu0 %v479_v5  ;;  %547 = vmatpush.bf16.msra.mxu1 %v479_v5 }
  0x17   :  { %548 = vmatpush.bf16.msra.mxu2 %v479_v5  ;;  %549 = vmatpush.bf16.msra.mxu3 %v479_v5 }
  0x1a   :  { %187 = vmatpush.bf16.msra.mxu0 %v478_v6  ;;  %550 = vmatpush.bf16.msra.mxu1 %v478_v6 }
  0x1b   :  { %551 = vmatpush.bf16.msra.mxu2 %v478_v6  ;;  %552 = vmatpush.bf16.msra.mxu3 %v478_v6 }
  0x1e   :  { %188 = vmatpush.bf16.msra.mxu0 %v477_v7  ;;  %553 = vmatpush.bf16.msra.mxu1 %v477_v7 }
  0x1f   :  { %554 = vmatpush.bf16.msra.mxu2 %v477_v7  ;;  %555 = vmatpush.bf16.msra.mxu3 %v477_v7 }
  0x21   :  { %189 = vmatmul.bf16.vlgmr.msra.gmra.mxu0 %v469_v8  ;;  %199 = vmatmul.bf16.vlgmr.msra.gmra.mxu1 %v471_v9 }
  0x22   :  { %209 = vmatmul.bf16.vlgmr.msra.gmra.mxu2 %v473_v10  ;;  %219 = vmatmul.bf16.vlgmr.msra.gmra.mxu3 %v475_v11 }
  0x31   :  { %194 = vmatmul.bf16.gmra.mxu0 %v470_v12  ;;  %204 = vmatmul.bf16.gmra.mxu1 %v472_v13 }
  0x32   :  { %214 = vmatmul.bf16.gmra.mxu2 %v474_v14  ;;  %224 = vmatmul.bf16.gmra.mxu3 %v476_v15 }
  0x9e   :  { %v190_v16 = vpop.f32.mrf.mxu0  ;;  %v200_v17 = vpop.f32.mrf.mxu1 }
  0x9f   :  { %v289_v19 = vadd.f32 %v556_v18, %v200_v17  ;;  %v285_v24 = vadd.f32 %v556_v18, %v190_v16 }
  0xa1   :  { %v354_v41 = vmul.f32 %v285_v24, %v285_v24  ;;  %v358_v58 = vmul.f32 %v289_v19, %v289_v19 }
  0xa5   :  { %v210_v20 = vpop.f32.mrf.mxu2  ;;  %v220_v21 = vpop.f32.mrf.mxu3 }
  0xa6   :  { %v192_v22 = vpop.f32.mrf.mxu0  ;;  %v202_v23 = vpop.f32.mrf.mxu1  ;;  %v293_v29 = vadd.f32 %v556_v18, %v210_v20  ;;  %v644_v30 = vadd.f32 %v556_v18, %v220_v21 }
  0xa7   :  { %v286_v25 = vadd.f32 %v556_v18, %v192_v22  ;;  %v290_v26 = vadd.f32 %v556_v18, %v202_v23 }
  0xa8   :  { %v362_v14 = vmul.f32 %v293_v29, %v293_v29 }
  0xa9   :  { %v488_v27 = vpack.c.bf16 %v286_v25, %v285_v24  ;;  %v498_v28 = vpack.c.bf16 %v290_v26, %v289_v19  ;;  %v355_v40 = vmul.f32 %v286_v25, %v286_v25  ;;  %v333_v43 = vadd.f32 %v286_v25, %v285_v24 }
  0xaa   :  { %v359_v63 = vmul.f32 %v290_v26, %v290_v26 }
  0xab   :  { %489 = vst [vmem:[%s683_s3] sm:$0xff] %v488_v27   ;;  %v370_v47 = vadd.f32 %v355_v40, %v354_v41 }
  0xac   :  { %526 = vst [vmem:[%s683_s3 + $0x10] sm:$0xff] %v498_v28  }
  0xad   :  { %v212_v31 = vpop.f32.mrf.mxu2  ;;  %v222_v32 = vpop.f32.mrf.mxu3 }
  0xae   :  { %v195_v33 = vpop.f32.mrf.mxu0  ;;  %v205_v34 = vpop.f32.mrf.mxu1  ;;  %v294_v35 = vadd.f32 %v556_v18, %v212_v31  ;;  %v646_v36 = vadd.f32 %v556_v18, %v222_v32 }
  0xaf   :  { %v287_v37 = vadd.f32 %v556_v18, %v195_v33  ;;  %v291_v44 = vadd.f32 %v556_v18, %v205_v34 }
  0xb0   :  { %v508_v38 = vpack.c.bf16 %v294_v35, %v293_v29  ;;  %v518_v39 = vpack.c.bf16 %v646_v36, %v644_v30  ;;  %v363_v17 = vmul.f32 %v294_v35, %v294_v35 }
  0xb1   :  { %v356_v42 = vmul.f32 %v287_v37, %v287_v37  ;;  %v334_v50 = vadd.f32 %v333_v43, %v287_v37  ;;  %v360_v6 = vmul.f32 %v291_v44, %v291_v44 }
  0xb2   :  { %528 = vst [vmem:[%s683_s3 + $0x20] sm:$0xff] %v508_v38  }
  0xb3   :  { %530 = vst [vmem:[%s683_s3 + $0x30] sm:$0xff] %v518_v39   ;;  %v371_v53 = vadd.f32 %v370_v47, %v356_v42 }
  0xb5   :  { %v215_v45 = vpop.f32.mrf.mxu2  ;;  %v225_v46 = vpop.f32.mrf.mxu3 }
  0xb6   :  { %v197_v48 = vpop.f32.mrf.mxu0  ;;  %v207_v49 = vpop.f32.mrf.mxu1  ;;  %v295_v61 = vadd.f32 %v556_v18, %v215_v45  ;;  %v299_v62 = vadd.f32 %v556_v18, %v225_v46 }
  0xb7   :  { %v288_v51 = vadd.f32 %v556_v18, %v197_v48  ;;  %v292_v52 = vadd.f32 %v556_v18, %v207_v49 }
  0xb8   :  { %v364_v21 = vmul.f32 %v295_v61, %v295_v61  ;;  %v368_v34 = vmul.f32 %v299_v62, %v299_v62 }
  0xb9   :  { %v493_v54 = vpack.c.bf16 %v288_v51, %v287_v37  ;;  %v335_v55 = vadd.f32 %v334_v50, %v288_v51  ;;  %v357_v56 = vmul.f32 %v288_v51, %v288_v51  ;;  %v503_v57 = vpack.c.bf16 %v292_v52, %v291_v44 }
  0xba   :  { %v361_v12 = vmul.f32 %v292_v52, %v292_v52 }
  0xbb   :  { %525 = vst [vmem:[%s683_s3 + $0x8] sm:$0xff] %v493_v54   ;;  %v336_v59 = vadd.f32 %v335_v55, %v289_v19  ;;  %v372_v60 = vadd.f32 %v371_v53, %v357_v56 }
  0xbc   :  { %527 = vst [vmem:[%s683_s3 + $0x18] sm:$0xff] %v503_v57  }
  0xbd   :  { %v373_v0 = vadd.f32 %v372_v60, %v358_v58  ;;  %v337_v1 = vadd.f32 %v336_v59, %v290_v26  ;;  %v217_v2 = vpop.f32.mrf.mxu2  ;;  %v227_v3 = vpop.f32.mrf.mxu3  ;;  %v366_v26 = vmul.f32 %v644_v30, %v644_v30 }
  0xbe   :  { %v296_v4 = vadd.f32 %v556_v18, %v217_v2  ;;  %v300_v5 = vadd.f32 %v556_v18, %v227_v3 }
  0xbf   :  { %v338_v7 = vadd.f32 %v337_v1, %v291_v44  ;;  %v374_v8 = vadd.f32 %v373_v0, %v359_v63 }
  0xc0   :  { %v513_v9 = vpack.c.bf16 %v296_v4, %v295_v61  ;;  %v523_v10 = vpack.c.bf16 %v300_v5, %v299_v62  ;;  %v365_v25 = vmul.f32 %v296_v4, %v296_v4  ;;  %v369_v39 = vmul.f32 %v300_v5, %v300_v5 }
  0xc1   :  { %v339_v11 = vadd.f32 %v338_v7, %v292_v52  ;;  %v375_v13 = vadd.f32 %v374_v8, %v360_v6 }
  0xc2   :  { %529 = vst [vmem:[%s683_s3 + $0x28] sm:$0xff] %v513_v9  }
  0xc3   :  { %v340_v15 = vadd.f32 %v339_v11, %v293_v29  ;;  %v376_v16 = vadd.f32 %v375_v13, %v361_v12  ;;  %531 = vst [vmem:[%s683_s3 + $0x38] sm:$0xff] %v523_v10   ;;  %v367_v29 = vmul.f32 %v646_v36, %v646_v36 }
  0xc5   :  { %v377_v18 = vadd.f32 %v376_v16, %v362_v14  ;;  %v341_v19 = vadd.f32 %v340_v15, %v294_v35 }
  0xc7   :  { %v342_v20 = vadd.f32 %v341_v19, %v295_v61  ;;  %v378_v22 = vadd.f32 %v377_v18, %v363_v17 }
  0xc9   :  { %v379_v23 = vadd.f32 %v378_v22, %v364_v21  ;;  %v343_v24 = vadd.f32 %v342_v20, %v296_v4 }
  0xcb   :  { %v344_v27 = vadd.f32 %v343_v24, %v644_v30  ;;  %v380_v28 = vadd.f32 %v379_v23, %v365_v25 }
  0xcd   :  { %v381_v31 = vadd.f32 %v380_v28, %v366_v26  ;;  %v345_v32 = vadd.f32 %v344_v27, %v646_v36 }
  0xcf   :  { %v346_v33 = vadd.f32 %v345_v32, %v299_v62  ;;  %v382_v35 = vadd.f32 %v381_v31, %v367_v29 }
  0xd1   :  { %v383_v37 = vadd.f32 %v382_v35, %v368_v34  ;;  %v347_v38 = vadd.f32 %v346_v33, %v300_v5 }
  0xd3   :  { %v348_v40 = vrot.slane %v347_v38, 4  ;;  %v384_v41 = vadd.f32 %v383_v37, %v369_v39 }
  0xd5   :  { %v349_v42 = vadd.f32 %v348_v40, %v347_v38  ;;  %v385_v43 = vrot.slane %v384_v41, 4 }
  0xd7   :  { %v350_v44 = vrot.slane %v349_v42, 2  ;;  %v386_v45 = vadd.f32 %v385_v43, %v384_v41 }
  0xd9   :  { %v351_v30 = vadd.f32 %v350_v44, %v349_v42  ;;  %v387_v46 = vrot.slane %v386_v45, 2 }
  0xdb   :  { %v352_v47 = vrot.slane %v351_v30, 1  ;;  %v388_v48 = vadd.f32 %v387_v46, %v386_v45 }
  0xdd   :  { %v353_v49 = vadd.f32 %v352_v47, %v351_v30  ;;  %v389_v50 = vrot.slane %v388_v48, 1 }
  0xdf   :  { %v390_v51 = vadd.f32 %v389_v50, %v388_v48  ;;  %391 = vst [vmem:[%s684_s4] sm:$0xff] %v353_v49 }
  0xe1   :  { %392 = vst [vmem:[%s685_s5] sm:$0xff] %v390_v51 }

// kernel: tile.253
= control target key start
LH: loop header
LB: loop body
LE: loop exit
PB: predicated region body
PF: predicated region fallthrough
CT: control target
= control target key end

     0   :  { %s28_s0 = inlined_call_operand.vmem [shape: f32[8], index: 0, kind: input, shape index: {}]   ;;  %s29_s1 = inlined_call_operand.vmem [shape: f32[16,8], index: 1, kind: output, shape index: {}]  }
   0x1   :  { %v4_v0 = vld [vmem:[%s28_s0] ss:$0 sm:$0xff] }
   0x2   :  { %5 = vst [vmem:[%s29_s1] sm:$0xff] %v4_v0 }
   0x3   :  { %8 = vst [vmem:[%s29_s1 + $0x8] sm:$0xff] %v4_v0 }

// kernel: local_enhancer_forward.67
= control target key start
LH: loop header
LB: loop body
LE: loop exit
PB: predicated region body
PF: predicated region fallthrough
CT: control target
= control target key end

     0   :  { %s336_s0 = inlined_call_operand.vmem [shape: bf16[128,128], index: 0, kind: input, shape index: {}]   ;;  %s337_s1 = inlined_call_operand.vmem [shape: f32[1,128], index: 1, kind: input, shape index: {}]   ;;  %s338_s2 = inlined_call_operand.vmem [shape: f32[1,128], index: 2, kind: input, shape index: {}]   ;;  %s339_s3 = inlined_call_operand.vmem [shape: bf16[128,128], index: 3, kind: output, shape index: {}]  }
   0x1   :  { %v139_v0 = vld [vmem:[%s336_s0] sm:$0xff]   ;;  %v210_v5 = vld [vmem:[%s336_s0 + $0x8] sm:$0xff]   ;;  %v211_v8 = vld [vmem:[%s336_s0 + $0x10] sm:$0xff]  }
   0x2   :  { %v252_v1 = vld [vmem:[%s337_s1] ss:$0 sm:$0xff]  ;;  %v140_v2 = vunpack.c.l.bf16 %v139_v0  ;;  %v141_v3 = vunpack.c.h.bf16 %v139_v0  ;;  %v144_v6 = vunpack.c.l.bf16 %v210_v5  ;;  %v145_v7 = vunpack.c.h.bf16 %v210_v5  ;;  %v212_v9 = vld [vmem:[%s336_s0 + $0x18] sm:$0xff]   ;;  %v214_v35 = vld [vmem:[%s336_s0 + $0x28] sm:$0xff]  }
   0x3   :  { %v257_v4 = vld [vmem:[%s338_s2] ss:$0 sm:$0xff]  ;;  %v148_v12 = vunpack.c.l.bf16 %v211_v8  ;;  %v149_v13 = vunpack.c.h.bf16 %v211_v8  ;;  %v152_v16 = vunpack.c.l.bf16 %v212_v9  ;;  %v153_v17 = vunpack.c.h.bf16 %v212_v9  ;;  %v215_v40 = vld [vmem:[%s336_s0 + $0x30] sm:$0xff]   ;;  %v216_v45 = vld [vmem:[%s336_s0 + $0x38] sm:$0xff]  }
   0x4   :  { %v50_v10 = vmul.f32 %v252_v1, %v140_v2  ;;  %v51_v11 = vmul.f32 %v252_v1, %v141_v3  ;;  %v52_v14 = vmul.f32 %v252_v1, %v144_v6  ;;  %v53_v15 = vmul.f32 %v252_v1, %v145_v7  ;;  %v213_v26 = vld [vmem:[%s336_s0 + $0x20] sm:$0xff]  }
   0x5   :  { %v54_v20 = vmul.f32 %v252_v1, %v148_v12  ;;  %v55_v21 = vmul.f32 %v252_v1, %v149_v13  ;;  %v56_v24 = vmul.f32 %v252_v1, %v152_v16  ;;  %v57_v25 = vmul.f32 %v252_v1, %v153_v17 }
   0x6   :  { %v70_v18 = vadd.f32 %v257_v4, %v50_v10  ;;  %v71_v19 = vadd.f32 %v257_v4, %v51_v11  ;;  %v72_v22 = vadd.f32 %v257_v4, %v52_v14  ;;  %v73_v23 = vadd.f32 %v257_v4, %v53_v15 }
   0x7   :  { %v74_v29 = vadd.f32 %v257_v4, %v54_v20  ;;  %v75_v30 = vadd.f32 %v257_v4, %v55_v21  ;;  %v76_v33 = vadd.f32 %v257_v4, %v56_v24  ;;  %v77_v34 = vadd.f32 %v257_v4, %v57_v25 }
   0x8   :  { %v86_v27 = vmax.f32 %v70_v18, 0.0  ;;  %v87_v28 = vmax.f32 %v71_v19, 0.0  ;;  %v88_v31 = vmax.f32 %v72_v22, 0.0  ;;  %v89_v32 = vmax.f32 %v73_v23, 0.0 }
   0x9   :  { %v90_v37 = vmax.f32 %v74_v29, 0.0  ;;  %v91_v38 = vmax.f32 %v75_v30, 0.0  ;;  %v156_v39 = vunpack.c.l.bf16 %v213_v26  ;;  %v92_v42 = vmax.f32 %v76_v33, 0.0 }
   0xa   :  { %v173_v36 = vpack.c.bf16 %v87_v28, %v86_v27  ;;  %v178_v41 = vpack.c.bf16 %v89_v32, %v88_v31  ;;  %v93_v43 = vmax.f32 %v77_v34, 0.0  ;;  %v157_v44 = vunpack.c.h.bf16 %v213_v26 }
   0xb   :  { %v183_v46 = vpack.c.bf16 %v91_v38, %v90_v37  ;;  %v58_v47 = vmul.f32 %v252_v1, %v156_v39  ;;  %v160_v48 = vunpack.c.l.bf16 %v214_v35  ;;  %v161_v49 = vunpack.c.h.bf16 %v214_v35 }
   0xc   :  { %174 = vst [vmem:[%s339_s3] sm:$0xff] %v173_v36   ;;  %v188_v50 = vpack.c.bf16 %v93_v43, %v92_v42  ;;  %v59_v51 = vmul.f32 %v252_v1, %v157_v44  ;;  %v164_v52 = vunpack.c.l.bf16 %v215_v40  ;;  %v165_v53 = vunpack.c.h.bf16 %v215_v40 }
   0xd   :  { %217 = vst [vmem:[%s339_s3 + $0x8] sm:$0xff] %v178_v41   ;;  %v78_v54 = vadd.f32 %v257_v4, %v58_v47  ;;  %v60_v55 = vmul.f32 %v252_v1, %v160_v48  ;;  %v61_v56 = vmul.f32 %v252_v1, %v161_v49  ;;  %v168_v57 = vunpack.c.l.bf16 %v216_v45 }
   0xe   :  { %218 = vst [vmem:[%s339_s3 + $0x10] sm:$0xff] %v183_v46   ;;  %v79_v58 = vadd.f32 %v257_v4, %v59_v51  ;;  %v62_v59 = vmul.f32 %v252_v1, %v164_v52  ;;  %v63_v60 = vmul.f32 %v252_v1, %v165_v53  ;;  %v169_v61 = vunpack.c.h.bf16 %v216_v45 }
   0xf   :  { %219 = vst [vmem:[%s339_s3 + $0x18] sm:$0xff] %v188_v50   ;;  %v94_v62 = vmax.f32 %v78_v54, 0.0  ;;  %v80_v63 = vadd.f32 %v257_v4, %v60_v55  ;;  %v81_v0 = vadd.f32 %v257_v4, %v61_v56  ;;  %v64_v2 = vmul.f32 %v252_v1, %v168_v57 }
  0x10   :  { %v95_v3 = vmax.f32 %v79_v58, 0.0  ;;  %v82_v5 = vadd.f32 %v257_v4, %v62_v59  ;;  %v83_v6 = vadd.f32 %v257_v4, %v63_v60  ;;  %v65_v7 = vmul.f32 %v252_v1, %v169_v61 }
  0x11   :  { %v96_v8 = vmax.f32 %v80_v63, 0.0  ;;  %v97_v9 = vmax.f32 %v81_v0, 0.0  ;;  %v84_v10 = vadd.f32 %v257_v4, %v64_v2 }
  0x12   :  { %v193_v11 = vpack.c.bf16 %v95_v3, %v94_v62  ;;  %v98_v12 = vmax.f32 %v82_v5, 0.0  ;;  %v99_v13 = vmax.f32 %v83_v6, 0.0  ;;  %v85_v14 = vadd.f32 %v257_v4, %v65_v7 }
  0x13   :  { %v198_v15 = vpack.c.bf16 %v97_v9, %v96_v8  ;;  %v100_v16 = vmax.f32 %v84_v10, 0.0 }
  0x14   :  { %220 = vst [vmem:[%s339_s3 + $0x20] sm:$0xff] %v193_v11   ;;  %v203_v17 = vpack.c.bf16 %v99_v13, %v98_v12  ;;  %v101_v18 = vmax.f32 %v85_v14, 0.0 }
  0x15   :  { %221 = vst [vmem:[%s339_s3 + $0x28] sm:$0xff] %v198_v15  }
  0x16   :  { %222 = vst [vmem:[%s339_s3 + $0x30] sm:$0xff] %v203_v17   ;;  %v208_v1 = vpack.c.bf16 %v101_v18, %v100_v16 }
  0x18   :  { %223 = vst [vmem:[%s339_s3 + $0x38] sm:$0xff] %v208_v1  }

// kernel: local_enhancer_forward.66
= control target key start
LH: loop header
LB: loop body
LE: loop exit
PB: predicated region body
PF: predicated region fallthrough
CT: control target
= control target key end

     0   :  { %s2835_s18 = smov 0   ;;  %s2837_s19 = smov 0   ;;  %s3379_s0 = inlined_call_operand.vmem [shape: bf16[2048,256], index: 0, kind: input, shape index: {}]   ;;  %s3380_s1 = inlined_call_operand.vmem [shape: bf16[256,128], index: 1, kind: input, shape index: {}]   ;;  %s3381_s2 = inlined_call_operand.vmem [shape: f32[1,128], index: 2, kind: input, shape index: {}]   ;;  %s3382_s3 = inlined_call_operand.vmem [shape: bf16[2048,128], index: 3, kind: output, shape index: {0}]   ;;  %s3383_s4 = inlined_call_operand.vmem [shape: f32[32,128], index: 4, kind: output, shape index: {1}]   ;;  %s3384_s5 = inlined_call_operand.vmem [shape: f32[32,128], index: 5, kind: output, shape index: {2}]  }
   0x1   :  { %s2839_s20 = smov 0  }
   0x2 LB: > { %s35_s21 = sadd.s32 1, %s2799_s19  ;;  %p2137_p0 = scmp.ge.s32.totalorder %s2803_s20, 1  ;;  %s2803_s20 = sphi %s2839_s20, %s16_s20   ;;  %s2799_s19 = sphi %s2837_s19, %s3386_s19   ;;  %s2795_s18 = sphi %s2835_s18, %s3385_s18  }
   0x3   : > { %p37_p1 = scmp.ge.s32.totalorder %s35_s21, 4  ;;  %p250_p2 = scmp.lt.s32.totalorder %s2803_s20, 5 }
   0x5   : > { %s3388_s21 = smov (%p37_p1, %s35_s21), 0  ;;  %p251_p3 = pnand %p2137_p0, %p250_p2 }
   0x6   : > { %s2138_s9 = sshll.u32 (!%p251_p3), %s2795_s18, 6  ;;  %p344_p5 = scmp.lt.s32.totalorder (!%p251_p3), %s2795_s18, 3 }
   0x7   : > { %254 = sbr.rel (%p251_p3) target bundleno = 504 (0x1f8), region = 32  ;;  %p313_p4 = scmp.lt.s32.totalorder (!%p251_p3), %s2138_s9, 255 }
   0xc   : > { %v2539_v0 = vld [vmem:[%s3380_s1 + $0x38] sm:$0xff]  ;;  %v2538_v2 = vld [vmem:[%s3380_s1 + $0x30] sm:$0xff]  ;;  %v2537_v4 = vld [vmem:[%s3380_s1 + $0x28] sm:$0xff]  ;;  %s3390_s9 = smov (!%p313_p4, %s2138_s9), 255  ;;  %s3392_s18 = smov (!%p344_p5, %s2795_s18), 3 }
   0xd   : > { %v2547_v1 = vld [vmem:[%s3380_s1 + $0x78] sm:$0xff]  ;;  %1002 = vmatpush.bf16.msra.mxu0 %v2539_v0  ;;  %v2546_v3 = vld [vmem:[%s3380_s1 + $0x70] sm:$0xff]  ;;  %2739 = vmatpush.bf16.msra.mxu2 %v2539_v0  ;;  %v2545_v5 = vld [vmem:[%s3380_s1 + $0x68] sm:$0xff]  ;;  %s2467_s26 = sshll.u32 %s3390_s9, 3  ;;  %s2142_s16 = sshll.u32 %s3390_s9, 2 }
   0xe   : > { %1171 = vmatpush.bf16.msra.mxu1 %v2547_v1  ;;  %2747 = vmatpush.bf16.msra.mxu3 %v2547_v1  ;;  %v2536_v6 = vld [vmem:[%s3380_s1 + $0x20] sm:$0xff]  ;;  %v2535_v8 = vld [vmem:[%s3380_s1 + $0x18] sm:$0xff]  ;;  %v2534_v10 = vld [vmem:[%s3380_s1 + $0x10] sm:$0xff]  ;;  %s2904_s8 = scalar_lea.vmem %s3379_s0, %s2467_s26  ;;  %s2992_s23 = scalar_lea.vmem %s3382_s3, %s2142_s16 }
   0xf   : > { %v2544_v7 = vld [vmem:[%s3380_s1 + $0x60] sm:$0xff]  ;;  %v2543_v9 = vld [vmem:[%s3380_s1 + $0x58] sm:$0xff]  ;;  %v2542_v11 = vld [vmem:[%s3380_s1 + $0x50] sm:$0xff]  ;;  %s2143_s25 = sshll.u32 %s3392_s18, 3 }
  0x10   : > { %v2533_v12 = vld [vmem:[%s3380_s1 + $0x8] sm:$0xff]  ;;  %v2532_v14 = vld [vmem:[%s3380_s1] sm:$0xff]  ;;  %v2155_v22 = vld [vmem:[%s2904_s8 + $0x10] sm:$0xf]  ;;  %s350_s28 = scalar_lea.vmem %s3383_s4, %s2143_s25  ;;  %s357_s6 = scalar_lea.vmem %s3384_s5, %s2143_s25 }
  0x11   : > { %1003 = vmatpush.bf16.msra.mxu0 %v2538_v2  ;;  %2740 = vmatpush.bf16.msra.mxu2 %v2538_v2  ;;  %v2541_v13 = vld [vmem:[%s3380_s1 + $0x48] sm:$0xff]  ;;  %v2540_v15 = vld [vmem:[%s3380_s1 + $0x40] sm:$0xff]  ;;  %v2471_v23 = vld [vmem:[%s2904_s8 + $0x14] sm:$0xf0] }
  0x12   : > { %1172 = vmatpush.bf16.msra.mxu1 %v2546_v3  ;;  %2748 = vmatpush.bf16.msra.mxu3 %v2546_v3  ;;  %v2147_v16 = vld [vmem:[%s2904_s8] sm:$0xf]  ;;  %v2469_v17 = vld [vmem:[%s2904_s8 + $0x4] sm:$0xf0]  ;;  %v2468_v18 = vld [vmem:[%s2904_s8 + $0x4] sm:$0xf]  ;;  %v2156_v26 = vor.u32 %v2471_v23, %v2155_v22 }
  0x13   : > { %v2149_v19 = vld [vmem:[%s2904_s8 + $0x8] sm:$0xf0]  ;;  %v2148_v20 = vor.u32 %v2469_v17, %v2147_v16  ;;  %v2470_v24 = vld [vmem:[%s2904_s8 + $0x14] sm:$0xf]  ;;  %v2157_v25 = vld [vmem:[%s2904_s8 + $0x18] sm:$0xf0] }
  0x14   : > { %v2152_v21 = vor.u32 %v2468_v18, %v2149_v19  ;;  %v2160_v27 = vor.u32 %v2470_v24, %v2157_v25  ;;  %v2275_v28 = vld [vmem:[%s2904_s8 + $0x100] sm:$0xf]  ;;  %v2501_v29 = vld [vmem:[%s2904_s8 + $0x104] sm:$0xf0]  ;;  %v2500_v30 = vld [vmem:[%s2904_s8 + $0x104] sm:$0xf] }
  0x15   : > { %1004 = vmatpush.bf16.msra.mxu0 %v2537_v4  ;;  %2741 = vmatpush.bf16.msra.mxu2 %v2537_v4  ;;  %v2276_v31 = vor.u32 %v2501_v29, %v2275_v28  ;;  %v2277_v32 = vld [vmem:[%s2904_s8 + $0x108] sm:$0xf0]  ;;  %v2163_v34 = vld [vmem:[%s2904_s8 + $0x20] sm:$0xf]  ;;  %v2473_v35 = vld [vmem:[%s2904_s8 + $0x24] sm:$0xf0] }
  0x16   : > { %1173 = vmatpush.bf16.msra.mxu1 %v2545_v5  ;;  %2749 = vmatpush.bf16.msra.mxu3 %v2545_v5  ;;  %v2280_v33 = vor.u32 %v2500_v30, %v2277_v32  ;;  %v2472_v36 = vld [vmem:[%s2904_s8 + $0x24] sm:$0xf]  ;;  %v2165_v37 = vld [vmem:[%s2904_s8 + $0x28] sm:$0xf0]  ;;  %v2164_v38 = vor.u32 %v2473_v35, %v2163_v34  ;;  %v2283_v40 = vld [vmem:[%s2904_s8 + $0x110] sm:$0xf] }
  0x17   : > { %v2168_v39 = vor.u32 %v2472_v36, %v2165_v37  ;;  %v2503_v41 = vld [vmem:[%s2904_s8 + $0x114] sm:$0xf0]  ;;  %v2502_v42 = vld [vmem:[%s2904_s8 + $0x114] sm:$0xf]  ;;  %v2285_v44 = vld [vmem:[%s2904_s8 + $0x118] sm:$0xf0] }
  0x18   : > { %v2284_v43 = vor.u32 %v2503_v41, %v2283_v40  ;;  %v2288_v45 = vor.u32 %v2502_v42, %v2285_v44  ;;  %v2171_v46 = vld [vmem:[%s2904_s8 + $0x30] sm:$0xf]  ;;  %v2475_v47 = vld [vmem:[%s2904_s8 + $0x34] sm:$0xf0]  ;;  %v2474_v48 = vld [vmem:[%s2904_s8 + $0x34] sm:$0xf] }
  0x19   : > { %1005 = vmatpush.bf16.msra.mxu0 %v2536_v6  ;;  %2742 = vmatpush.bf16.msra.mxu2 %v2536_v6  ;;  %v2173_v49 = vld [vmem:[%s2904_s8 + $0x38] sm:$0xf0]  ;;  %v2172_v50 = vor.u32 %v2475_v47, %v2171_v46  ;;  %v2291_v52 = vld [vmem:[%s2904_s8 + $0x120] sm:$0xf]  ;;  %v2505_v53 = vld [vmem:[%s2904_s8 + $0x124] sm:$0xf0] }
  0x1a   : > { %1174 = vmatpush.bf16.msra.mxu1 %v2544_v7  ;;  %2750 = vmatpush.bf16.msra.mxu3 %v2544_v7  ;;  %v2176_v51 = vor.u32 %v2474_v48, %v2173_v49  ;;  %v2504_v54 = vld [vmem:[%s2904_s8 + $0x124] sm:$0xf]  ;;  %v2292_v55 = vor.u32 %v2505_v53, %v2291_v52  ;;  %v2293_v56 = vld [vmem:[%s2904_s8 + $0x128] sm:$0xf0]  ;;  %v2179_v58 = vld [vmem:[%s2904_s8 + $0x40] sm:$0xf] }
  0x1b   : > { %v2296_v57 = vor.u32 %v2504_v54, %v2293_v56  ;;  %v2477_v59 = vld [vmem:[%s2904_s8 + $0x44] sm:$0xf0]  ;;  %v2476_v60 = vld [vmem:[%s2904_s8 + $0x44] sm:$0xf]  ;;  %v2181_v61 = vld [vmem:[%s2904_s8 + $0x48] sm:$0xf0] }
  0x1c   : > { %v2180_v62 = vor.u32 %v2477_v59, %v2179_v58  ;;  %v2184_v63 = vor.u32 %v2476_v60, %v2181_v61  ;;  %v2299_v0 = vld [vmem:[%s2904_s8 + $0x130] sm:$0xf]  ;;  %v2507_v1 = vld [vmem:[%s2904_s8 + $0x134] sm:$0xf0]  ;;  %v2506_v2 = vld [vmem:[%s2904_s8 + $0x134] sm:$0xf] }
  0x1d   : > { %1006 = vmatpush.bf16.msra.mxu0 %v2535_v8  ;;  %2743 = vmatpush.bf16.msra.mxu2 %v2535_v8  ;;  %v2300_v3 = vor.u32 %v2507_v1, %v2299_v0  ;;  %v2301_v4 = vld [vmem:[%s2904_s8 + $0x138] sm:$0xf0]  ;;  %v2187_v6 = vld [vmem:[%s2904_s8 + $0x50] sm:$0xf]  ;;  %v2479_v7 = vld [vmem:[%s2904_s8 + $0x54] sm:$0xf0] }
  0x1e   : > { %1175 = vmatpush.bf16.msra.mxu1 %v2543_v9  ;;  %2751 = vmatpush.bf16.msra.mxu3 %v2543_v9  ;;  %v2304_v5 = vor.u32 %v2506_v2, %v2301_v4  ;;  %v2478_v8 = vld [vmem:[%s2904_s8 + $0x54] sm:$0xf]  ;;  %v2189_v9 = vld [vmem:[%s2904_s8 + $0x58] sm:$0xf0]  ;;  %v2309_v16 = vld [vmem:[%s2904_s8 + $0x148] sm:$0xf0] }
  0x1f   : > { %v2195_v18 = vld [vmem:[%s2904_s8 + $0x60] sm:$0xf]  ;;  %v2481_v19 = vld [vmem:[%s2904_s8 + $0x64] sm:$0xf0]  ;;  %v2315_v24 = vld [vmem:[%s2904_s8 + $0x150] sm:$0xf] }
  0x20   : > { %v2196_v22 = vor.u32 %v2481_v19, %v2195_v18  ;;  %v2511_v25 = vld [vmem:[%s2904_s8 + $0x154] sm:$0xf0]  ;;  %v2317_v28 = vld [vmem:[%s2904_s8 + $0x158] sm:$0xf0]  ;;  %v2203_v30 = vld [vmem:[%s2904_s8 + $0x70] sm:$0xf] }
  0x21   : > { %1007 = vmatpush.bf16.msra.mxu0 %v2534_v10  ;;  %2744 = vmatpush.bf16.msra.mxu2 %v2534_v10  ;;  %v2188_v10 = vor.u32 %v2479_v7, %v2187_v6  ;;  %v2482_v32 = vld [vmem:[%s2904_s8 + $0x74] sm:$0xf]  ;;  %v2323_v36 = vld [vmem:[%s2904_s8 + $0x160] sm:$0xf]  ;;  %v2513_v37 = vld [vmem:[%s2904_s8 + $0x164] sm:$0xf0] }
  0x22   : > { %1176 = vmatpush.bf16.msra.mxu1 %v2542_v11  ;;  %2752 = vmatpush.bf16.msra.mxu3 %v2542_v11  ;;  %v2192_v11 = vor.u32 %v2478_v8, %v2189_v9  ;;  %v2325_v40 = vld [vmem:[%s2904_s8 + $0x168] sm:$0xf0]  ;;  %v2211_v42 = vld [vmem:[%s2904_s8 + $0x80] sm:$0xf]  ;;  %v2484_v44 = vld [vmem:[%s2904_s8 + $0x84] sm:$0xf] }
  0x23   : > { %v2514_v52 = vld [vmem:[%s2904_s8 + $0x174] sm:$0xf]  ;;  %v2333_v54 = vld [vmem:[%s2904_s8 + $0x178] sm:$0xf0]  ;;  %v2487_v0 = vld [vmem:[%s2904_s8 + $0x94] sm:$0xf0] }
  0x24   : > { %v2486_v1 = vld [vmem:[%s2904_s8 + $0x94] sm:$0xf]  ;;  %v2221_v2 = vld [vmem:[%s2904_s8 + $0x98] sm:$0xf0]  ;;  %v2341_v18 = vld [vmem:[%s2904_s8 + $0x188] sm:$0xf0] }
  0x25   : > { %1008 = vmatpush.bf16.msra.mxu0 %v2533_v12  ;;  %2745 = vmatpush.bf16.msra.mxu2 %v2533_v12  ;;  %v2307_v12 = vld [vmem:[%s2904_s8 + $0x140] sm:$0xf]  ;;  %v2224_v9 = vor.u32 %v2486_v1, %v2221_v2  ;;  %v2235_v2 = vld [vmem:[%s2904_s8 + $0xb0] sm:$0xf] }
  0x26   : > { %1177 = vmatpush.bf16.msra.mxu1 %v2541_v13  ;;  %2753 = vmatpush.bf16.msra.mxu3 %v2541_v13  ;;  %v2509_v13 = vld [vmem:[%s2904_s8 + $0x144] sm:$0xf0] }
  0x29   : > { %1009 = vmatpush.bf16.msra.mxu0 %v2532_v14  ;;  %2746 = vmatpush.bf16.msra.mxu2 %v2532_v14  ;;  %v2508_v14 = vld [vmem:[%s2904_s8 + $0x144] sm:$0xf] }
  0x2a   : > { %1178 = vmatpush.bf16.msra.mxu1 %v2540_v15  ;;  %2754 = vmatpush.bf16.msra.mxu3 %v2540_v15  ;;  %v2308_v15 = vor.u32 %v2509_v13, %v2307_v12  ;;  %v2312_v17 = vor.u32 %v2508_v14, %v2309_v16  ;;  %v2339_v13 = vld [vmem:[%s2904_s8 + $0x180] sm:$0xf]  ;;  %v2517_v14 = vld [vmem:[%s2904_s8 + $0x184] sm:$0xf0] }
  0x2c   : > { %1010 = vmatmul.bf16.vlgmr.msra.gmra.mxu0 %v2148_v20  ;;  %1090 = vmatmul.bf16.vlgmr.msra.gmra.mxu2 %v2276_v31  ;;  %v2480_v20 = vld [vmem:[%s2904_s8 + $0x64] sm:$0xf]  ;;  %v2483_v31 = vld [vmem:[%s2904_s8 + $0x74] sm:$0xf0] }
  0x2d   : > { %1179 = vmatmul.bf16.vlgmr.msra.gmra.mxu1 %v2152_v21  ;;  %1259 = vmatmul.bf16.vlgmr.msra.gmra.mxu3 %v2280_v33  ;;  %v2197_v21 = vld [vmem:[%s2904_s8 + $0x68] sm:$0xf0]  ;;  %v2205_v33 = vld [vmem:[%s2904_s8 + $0x78] sm:$0xf0]  ;;  %v2204_v34 = vor.u32 %v2483_v31, %v2203_v30  ;;  %v2489_v30 = vld [vmem:[%s2904_s8 + $0xa4] sm:$0xf0] }
  0x2e   : > { %v2200_v23 = vor.u32 %v2480_v20, %v2197_v21  ;;  %v2208_v35 = vor.u32 %v2482_v32, %v2205_v33  ;;  %v2488_v31 = vld [vmem:[%s2904_s8 + $0xa4] sm:$0xf]  ;;  %v2229_v32 = vld [vmem:[%s2904_s8 + $0xa8] sm:$0xf0] }
  0x3c   : > { %1015 = vmatmul.bf16.gmra.mxu0 %v2156_v26  ;;  %1095 = vmatmul.bf16.gmra.mxu2 %v2284_v43  ;;  %v2510_v26 = vld [vmem:[%s2904_s8 + $0x154] sm:$0xf]  ;;  %v2485_v43 = vld [vmem:[%s2904_s8 + $0x84] sm:$0xf0] }
  0x3d   : > { %1184 = vmatmul.bf16.gmra.mxu1 %v2160_v27  ;;  %1264 = vmatmul.bf16.gmra.mxu3 %v2288_v45  ;;  %v2316_v27 = vor.u32 %v2511_v25, %v2315_v24  ;;  %v2320_v29 = vor.u32 %v2510_v26, %v2317_v28  ;;  %v2213_v45 = vld [vmem:[%s2904_s8 + $0x88] sm:$0xf0]  ;;  %v2212_v46 = vor.u32 %v2485_v43, %v2211_v42 }
  0x3e   : > { %v2216_v47 = vor.u32 %v2484_v44, %v2213_v45 }
  0x4c   : > { %1020 = vmatmul.bf16.gmra.mxu0 %v2164_v38  ;;  %1100 = vmatmul.bf16.gmra.mxu2 %v2292_v55  ;;  %v2512_v38 = vld [vmem:[%s2904_s8 + $0x164] sm:$0xf]  ;;  %v2336_v55 = vor.u32 %v2514_v52, %v2333_v54  ;;  %v2349_v52 = vld [vmem:[%s2904_s8 + $0x198] sm:$0xf0] }
  0x4d   : > { %1189 = vmatmul.bf16.gmra.mxu1 %v2168_v39  ;;  %1269 = vmatmul.bf16.gmra.mxu3 %v2296_v57  ;;  %v2324_v39 = vor.u32 %v2513_v37, %v2323_v36  ;;  %v2328_v41 = vor.u32 %v2512_v38, %v2325_v40  ;;  %v2983_v57 = vld [vmem:[%s3381_s2] ss:$0 sm:$0xff]  ;;  %v2232_v38 = vor.u32 %v2488_v31, %v2229_v32 }
  0x5c   : > { %1025 = vmatmul.bf16.gmra.mxu0 %v2172_v50  ;;  %1105 = vmatmul.bf16.gmra.mxu2 %v2300_v3  ;;  %v2331_v50 = vld [vmem:[%s2904_s8 + $0x170] sm:$0xf] }
  0x5d   : > { %1194 = vmatmul.bf16.gmra.mxu1 %v2176_v51  ;;  %1274 = vmatmul.bf16.gmra.mxu3 %v2304_v5  ;;  %v2515_v51 = vld [vmem:[%s2904_s8 + $0x174] sm:$0xf0] }
  0x5e   : > { %v2332_v53 = vor.u32 %v2515_v51, %v2331_v50 }
  0x6c   : > { %1030 = vmatmul.bf16.gmra.mxu0 %v2180_v62  ;;  %1110 = vmatmul.bf16.gmra.mxu2 %v2308_v15  ;;  %v2516_v15 = vld [vmem:[%s2904_s8 + $0x184] sm:$0xf] }
  0x6d   : > { %1199 = vmatmul.bf16.gmra.mxu1 %v2184_v63  ;;  %1279 = vmatmul.bf16.gmra.mxu3 %v2312_v17  ;;  %v2219_v63 = vld [vmem:[%s2904_s8 + $0x90] sm:$0xf]  ;;  %v2340_v17 = vor.u32 %v2517_v14, %v2339_v13  ;;  %v2344_v19 = vor.u32 %v2516_v15, %v2341_v18 }
  0x6e   : > { %v2220_v8 = vor.u32 %v2487_v0, %v2219_v63 }
  0x7c   : > { %1035 = vmatmul.bf16.gmra.mxu0 %v2188_v10  ;;  %1115 = vmatmul.bf16.gmra.mxu2 %v2316_v27 }
  0x7d   : > { %1204 = vmatmul.bf16.gmra.mxu1 %v2192_v11  ;;  %1284 = vmatmul.bf16.gmra.mxu3 %v2320_v29  ;;  %v2227_v29 = vld [vmem:[%s2904_s8 + $0xa0] sm:$0xf] }
  0x7e   : > { %v2228_v37 = vor.u32 %v2489_v30, %v2227_v29 }
  0x8c   : > { %1040 = vmatmul.bf16.gmra.mxu0 %v2196_v22  ;;  %1120 = vmatmul.bf16.gmra.mxu2 %v2324_v39 }
  0x8d   : > { %1209 = vmatmul.bf16.gmra.mxu1 %v2200_v23  ;;  %1289 = vmatmul.bf16.gmra.mxu3 %v2328_v41 }
  0x9c   : > { %1045 = vmatmul.bf16.gmra.mxu0 %v2204_v34  ;;  %1125 = vmatmul.bf16.gmra.mxu2 %v2332_v53 }
  0x9d   : > { %1214 = vmatmul.bf16.gmra.mxu1 %v2208_v35  ;;  %1294 = vmatmul.bf16.gmra.mxu3 %v2336_v55 }
  0xa9   : > { %v1011_v48 = vpop.f32.mrf.mxu0 }
  0xaa   : > { %v1180_v49 = vpop.f32.mrf.mxu1 }
  0xab   : > { %v1181_v56 = vadd.f32 %v1180_v49, %v1011_v48  ;;  %v2519_v48 = vld [vmem:[%s2904_s8 + $0x194] sm:$0xf0]  ;;  %v2518_v49 = vld [vmem:[%s2904_s8 + $0x194] sm:$0xf] }
  0xac   : > { %1050 = vmatmul.bf16.gmra.mxu0 %v2212_v46  ;;  %1130 = vmatmul.bf16.gmra.mxu2 %v2340_v17  ;;  %v2352_v54 = vor.u32 %v2518_v49, %v2349_v52 }
  0xad   : > { %1219 = vmatmul.bf16.gmra.mxu1 %v2216_v47  ;;  %v1539_v60 = vadd.f32 %v2983_v57, %v1181_v56  ;;  %1299 = vmatmul.bf16.gmra.mxu3 %v2344_v19  ;;  %v2347_v47 = vld [vmem:[%s2904_s8 + $0x190] sm:$0xf] }
  0xae   : > { %v2348_v51 = vor.u32 %v2519_v48, %v2347_v47 }
  0xaf   : > { %v1800_v3 = vmul.f32 %v1539_v60, %v1539_v60  ;;  %v1091_v26 = vpop.f32.mrf.mxu2 }
  0xb0   : > { %v1260_v27 = vpop.f32.mrf.mxu3 }
  0xb1   : > { %v1013_v58 = vpop.f32.mrf.mxu0  ;;  %v1261_v39 = vadd.f32 %v1260_v27, %v1091_v26 }
  0xb2   : > { %v1182_v59 = vpop.f32.mrf.mxu1 }
  0xb3   : > { %v1183_v61 = vadd.f32 %v1182_v59, %v1013_v58  ;;  %v3010_v45 = vadd.f32 %v2983_v57, %v1261_v39  ;;  %v2493_v39 = vld [vmem:[%s2904_s8 + $0xc4] sm:$0xf0] }
  0xb5   : > { %v1540_v62 = vadd.f32 %v2983_v57, %v1183_v61 }
  0xb7   : > { %v2551_v4 = vpack.c.bf16 %v1540_v62, %v1539_v60  ;;  %v1731_v5 = vadd.f32 %v1540_v62, %v1539_v60  ;;  %v1801_v6 = vmul.f32 %v1540_v62, %v1540_v62  ;;  %v1093_v43 = vpop.f32.mrf.mxu2 }
  0xb8   : > { %v1262_v44 = vpop.f32.mrf.mxu3 }
  0xb9   : > { %2552 = vst [vmem:[%s2992_s23] sm:$0xff] %v2551_v4   ;;  %v1864_v7 = vadd.f32 %v1801_v6, %v1800_v3  ;;  %v1016_v10 = vpop.f32.mrf.mxu0  ;;  %v1263_v46 = vadd.f32 %v1262_v44, %v1093_v43  ;;  %v2491_v3 = vld [vmem:[%s2904_s8 + $0xb4] sm:$0xf0]  ;;  %v2490_v4 = vld [vmem:[%s2904_s8 + $0xb4] sm:$0xf] }
  0xba   : > { %v1185_v11 = vpop.f32.mrf.mxu1 }
  0xbb   : > { %v1186_v12 = vadd.f32 %v1185_v11, %v1016_v10  ;;  %v3018_v53 = vadd.f32 %v2983_v57, %v1263_v46  ;;  %v2236_v10 = vor.u32 %v2491_v3, %v2235_v2 }
  0xbc   : > { %1055 = vmatmul.bf16.gmra.mxu0 %v2220_v8  ;;  %1135 = vmatmul.bf16.gmra.mxu2 %v2348_v51 }
  0xbd   : > { %v1541_v16 = vadd.f32 %v2983_v57, %v1186_v12  ;;  %1224 = vmatmul.bf16.gmra.mxu1 %v2224_v9  ;;  %v2631_v58 = vpack.c.bf16 %v3018_v53, %v3010_v45  ;;  %1304 = vmatmul.bf16.gmra.mxu3 %v2352_v54 }
  0xbf   : > { %v1732_v20 = vadd.f32 %v1731_v5, %v1541_v16  ;;  %v1802_v21 = vmul.f32 %v1541_v16, %v1541_v16  ;;  %2723 = vst [vmem:[%s2992_s23 + $0x80] sm:$0xff] %v2631_v58   ;;  %v1096_v63 = vpop.f32.mrf.mxu2  ;;  %v2237_v5 = vld [vmem:[%s2904_s8 + $0xb8] sm:$0xf0] }
  0xc0   : > { %v1265_v0 = vpop.f32.mrf.mxu3  ;;  %v2240_v11 = vor.u32 %v2490_v4, %v2237_v5 }
  0xc1   : > { %v1865_v22 = vadd.f32 %v1864_v7, %v1802_v21  ;;  %v1018_v23 = vpop.f32.mrf.mxu0  ;;  %v1266_v12 = vadd.f32 %v1265_v0, %v1096_v63  ;;  %v2521_v21 = vld [vmem:[%s2904_s8 + $0x1a4] sm:$0xf0]  ;;  %v2365_v0 = vld [vmem:[%s2904_s8 + $0x1b8] sm:$0xf0] }
  0xc2   : > { %v1187_v24 = vpop.f32.mrf.mxu1 }
  0xc3   : > { %v1188_v25 = vadd.f32 %v1187_v24, %v1018_v23  ;;  %v3030_v18 = vadd.f32 %v2983_v57, %v1266_v12 }
  0xc5   : > { %v1542_v28 = vadd.f32 %v2983_v57, %v1188_v25  ;;  %v2357_v25 = vld [vmem:[%s2904_s8 + $0x1a8] sm:$0xf0] }
  0xc7   : > { %v2556_v33 = vpack.c.bf16 %v1542_v28, %v1541_v16  ;;  %v1733_v34 = vadd.f32 %v1732_v20, %v1542_v28  ;;  %v1803_v35 = vmul.f32 %v1542_v28, %v1542_v28  ;;  %v1098_v16 = vpop.f32.mrf.mxu2  ;;  %v2355_v20 = vld [vmem:[%s2904_s8 + $0x1a0] sm:$0xf] }
  0xc8   : > { %v1267_v17 = vpop.f32.mrf.mxu3  ;;  %v2356_v24 = vor.u32 %v2521_v21, %v2355_v20 }
  0xc9   : > { %2708 = vst [vmem:[%s2992_s23 + $0x8] sm:$0xff] %v2556_v33   ;;  %v1866_v36 = vadd.f32 %v1865_v22, %v1803_v35  ;;  %v1021_v40 = vpop.f32.mrf.mxu0  ;;  %v1268_v19 = vadd.f32 %v1267_v17, %v1098_v16  ;;  %v2520_v22 = vld [vmem:[%s2904_s8 + $0x1a4] sm:$0xf]  ;;  %v2253_v16 = vld [vmem:[%s2904_s8 + $0xd8] sm:$0xf0] }
  0xca   : > { %v1190_v41 = vpop.f32.mrf.mxu1  ;;  %v2360_v27 = vor.u32 %v2520_v22, %v2357_v25 }
  0xcb   : > { %v1191_v42 = vadd.f32 %v1190_v41, %v1021_v40  ;;  %v3038_v26 = vadd.f32 %v2983_v57, %v1268_v19  ;;  %v2492_v40 = vld [vmem:[%s2904_s8 + $0xc4] sm:$0xf]  ;;  %v2245_v41 = vld [vmem:[%s2904_s8 + $0xc8] sm:$0xf0] }
  0xcc   : > { %1060 = vmatmul.bf16.gmra.mxu0 %v2228_v37  ;;  %1140 = vmatmul.bf16.gmra.mxu2 %v2356_v24  ;;  %v2248_v48 = vor.u32 %v2492_v40, %v2245_v41 }
  0xcd   : > { %v1543_v50 = vadd.f32 %v2983_v57, %v1191_v42  ;;  %1229 = vmatmul.bf16.gmra.mxu1 %v2232_v38  ;;  %v2636_v30 = vpack.c.bf16 %v3038_v26, %v3030_v18  ;;  %1309 = vmatmul.bf16.gmra.mxu3 %v2360_v27  ;;  %v2243_v38 = vld [vmem:[%s2904_s8 + $0xc0] sm:$0xf] }
  0xce   : > { %v2244_v47 = vor.u32 %v2493_v39, %v2243_v38  ;;  %v2373_v38 = vld [vmem:[%s2904_s8 + $0x1c8] sm:$0xf0] }
  0xcf   : > { %v1734_v55 = vadd.f32 %v1733_v34, %v1543_v50  ;;  %v1804_v56 = vmul.f32 %v1543_v50, %v1543_v50  ;;  %2724 = vst [vmem:[%s2992_s23 + $0x88] sm:$0xff] %v2636_v30   ;;  %v1101_v35 = vpop.f32.mrf.mxu2 }
  0xd1   : > { %v1867_v59 = vadd.f32 %v1866_v36, %v1804_v56  ;;  %v1023_v60 = vpop.f32.mrf.mxu0  ;;  %v1270_v36 = vpop.f32.mrf.mxu3 }
  0xd2   : > { %v1192_v61 = vpop.f32.mrf.mxu1  ;;  %v1271_v49 = vadd.f32 %v1270_v36, %v1101_v35  ;;  %v2524_v35 = vld [vmem:[%s2904_s8 + $0x1c4] sm:$0xf] }
  0xd3   : > { %v1193_v62 = vadd.f32 %v1192_v61, %v1023_v60  ;;  %v2523_v60 = vld [vmem:[%s2904_s8 + $0x1b4] sm:$0xf0]  ;;  %v2522_v61 = vld [vmem:[%s2904_s8 + $0x1b4] sm:$0xf]  ;;  %v2376_v40 = vor.u32 %v2524_v35, %v2373_v38 }
  0xd4   : > { %v3050_v56 = vadd.f32 %v2983_v57, %v1271_v49  ;;  %v2368_v2 = vor.u32 %v2522_v61, %v2365_v0 }
  0xd5   : > { %v1544_v1 = vadd.f32 %v2983_v57, %v1193_v62 }
  0xd7   : > { %v2561_v6 = vpack.c.bf16 %v1544_v1, %v1543_v50  ;;  %v1735_v7 = vadd.f32 %v1734_v55, %v1544_v1  ;;  %v1805_v8 = vmul.f32 %v1544_v1, %v1544_v1  ;;  %v1103_v54 = vpop.f32.mrf.mxu2 }
  0xd9   : > { %2709 = vst [vmem:[%s2992_s23 + $0x10] sm:$0xff] %v2561_v6   ;;  %v1868_v9 = vadd.f32 %v1867_v59, %v1805_v8  ;;  %v1026_v13 = vpop.f32.mrf.mxu0  ;;  %v1272_v55 = vpop.f32.mrf.mxu3  ;;  %v2363_v59 = vld [vmem:[%s2904_s8 + $0x1b0] sm:$0xf] }
  0xda   : > { %v1195_v14 = vpop.f32.mrf.mxu1  ;;  %v1273_v58 = vadd.f32 %v1272_v55, %v1103_v54  ;;  %v2364_v63 = vor.u32 %v2523_v60, %v2363_v59  ;;  %v2497_v54 = vld [vmem:[%s2904_s8 + $0xe4] sm:$0xf0]  ;;  %v2496_v55 = vld [vmem:[%s2904_s8 + $0xe4] sm:$0xf] }
  0xdb   : > { %v1196_v15 = vadd.f32 %v1195_v14, %v1026_v13  ;;  %v2251_v13 = vld [vmem:[%s2904_s8 + $0xd0] sm:$0xf]  ;;  %v2495_v14 = vld [vmem:[%s2904_s8 + $0xd4] sm:$0xf0] }
  0xdc   : > { %1065 = vmatmul.bf16.gmra.mxu0 %v2236_v10  ;;  %v3058_v1 = vadd.f32 %v2983_v57, %v1273_v58  ;;  %1145 = vmatmul.bf16.gmra.mxu2 %v2364_v63  ;;  %v2252_v22 = vor.u32 %v2495_v14, %v2251_v13  ;;  %v2261_v58 = vld [vmem:[%s2904_s8 + $0xe8] sm:$0xf0] }
  0xdd   : > { %v1545_v23 = vadd.f32 %v2983_v57, %v1196_v15  ;;  %1234 = vmatmul.bf16.gmra.mxu1 %v2240_v11  ;;  %1314 = vmatmul.bf16.gmra.mxu3 %v2368_v2  ;;  %v2494_v15 = vld [vmem:[%s2904_s8 + $0xd4] sm:$0xf]  ;;  %v2264_v0 = vor.u32 %v2496_v55, %v2261_v58 }
  0xde   : > { %v2641_v5 = vpack.c.bf16 %v3058_v1, %v3050_v56 }
  0xdf   : > { %v1736_v28 = vadd.f32 %v1735_v7, %v1545_v23  ;;  %v1806_v29 = vmul.f32 %v1545_v23, %v1545_v23  ;;  %v1106_v10 = vpop.f32.mrf.mxu2 }
  0xe0   : > { %2725 = vst [vmem:[%s2992_s23 + $0x90] sm:$0xff] %v2641_v5  }
  0xe1   : > { %v1869_v31 = vadd.f32 %v1868_v9, %v1806_v29  ;;  %v1028_v32 = vpop.f32.mrf.mxu0  ;;  %v1275_v11 = vpop.f32.mrf.mxu3 }
  0xe2   : > { %v1197_v33 = vpop.f32.mrf.mxu1  ;;  %v1276_v24 = vadd.f32 %v1275_v11, %v1106_v10  ;;  %v2379_v10 = vld [vmem:[%s2904_s8 + $0x1d0] sm:$0xf]  ;;  %v2527_v11 = vld [vmem:[%s2904_s8 + $0x1d4] sm:$0xf0] }
  0xe3   : > { %v1198_v34 = vadd.f32 %v1197_v33, %v1028_v32  ;;  %v2371_v33 = vld [vmem:[%s2904_s8 + $0x1c0] sm:$0xf]  ;;  %v2380_v14 = vor.u32 %v2527_v11, %v2379_v10 }
  0xe5   : > { %v1546_v37 = vadd.f32 %v2983_v57, %v1198_v34  ;;  %v2525_v34 = vld [vmem:[%s2904_s8 + $0x1c4] sm:$0xf0] }
  0xe7   : > { %v2566_v42 = vpack.c.bf16 %v1546_v37, %v1545_v23  ;;  %v1737_v43 = vadd.f32 %v1736_v28, %v1546_v37  ;;  %v1807_v44 = vmul.f32 %v1546_v37, %v1546_v37  ;;  %v2256_v23 = vor.u32 %v2494_v15, %v2253_v16  ;;  %v1108_v29 = vpop.f32.mrf.mxu2  ;;  %v2381_v15 = vld [vmem:[%s2904_s8 + $0x1d8] sm:$0xf0] }
  0xe8   : > { %v2372_v37 = vor.u32 %v2525_v34, %v2371_v33  ;;  %v2498_v33 = vld [vmem:[%s2904_s8 + $0xf4] sm:$0xf]  ;;  %v2269_v34 = vld [vmem:[%s2904_s8 + $0xf8] sm:$0xf0] }
  0xe9   : > { %2710 = vst [vmem:[%s2992_s23 + $0x18] sm:$0xff] %v2566_v42   ;;  %v1870_v46 = vadd.f32 %v1869_v31, %v1807_v44  ;;  %v1031_v50 = vpop.f32.mrf.mxu0  ;;  %v1277_v30 = vpop.f32.mrf.mxu3  ;;  %v3070_v31 = vadd.f32 %v2983_v57, %v1276_v24 }
  0xea   : > { %v1200_v51 = vpop.f32.mrf.mxu1  ;;  %v1278_v32 = vadd.f32 %v1277_v30, %v1108_v29  ;;  %v2267_v30 = vld [vmem:[%s2904_s8 + $0xf0] sm:$0xf] }
  0xeb   : > { %v1201_v52 = vadd.f32 %v1200_v51, %v1031_v50 }
  0xec   : > { %1070 = vmatmul.bf16.gmra.mxu0 %v2244_v47  ;;  %v3078_v39 = vadd.f32 %v2983_v57, %v1278_v32  ;;  %1150 = vmatmul.bf16.gmra.mxu2 %v2372_v37  ;;  %v2499_v32 = vld [vmem:[%s2904_s8 + $0xf4] sm:$0xf0] }
  0xed   : > { %v1547_v62 = vadd.f32 %v2983_v57, %v1201_v52  ;;  %1239 = vmatmul.bf16.gmra.mxu1 %v2248_v48  ;;  %1319 = vmatmul.bf16.gmra.mxu3 %v2376_v40  ;;  %v2259_v52 = vld [vmem:[%s2904_s8 + $0xe0] sm:$0xf]  ;;  %v2268_v40 = vor.u32 %v2499_v32, %v2267_v30  ;;  %v2397_v30 = vld [vmem:[%s2904_s8 + $0x1f8] sm:$0xf0] }
  0xee   : > { %v2260_v63 = vor.u32 %v2497_v54, %v2259_v52  ;;  %v2529_v52 = vld [vmem:[%s2904_s8 + $0x1e4] sm:$0xf0]  ;;  %v2528_v54 = vld [vmem:[%s2904_s8 + $0x1e4] sm:$0xf] }
  0xef   : > { %v1738_v3 = vadd.f32 %v1737_v43, %v1547_v62  ;;  %v1808_v4 = vmul.f32 %v1547_v62, %v1547_v62  ;;  %v2646_v43 = vpack.c.bf16 %v3078_v39, %v3070_v31  ;;  %v1111_v49 = vpop.f32.mrf.mxu2 }
  0xf1   : > { %v1871_v6 = vadd.f32 %v1870_v46, %v1808_v4  ;;  %v1033_v7 = vpop.f32.mrf.mxu0  ;;  %2726 = vst [vmem:[%s2992_s23 + $0x98] sm:$0xff] %v2646_v43   ;;  %v1280_v50 = vpop.f32.mrf.mxu3 }
  0xf2   : > { %v1202_v8 = vpop.f32.mrf.mxu1  ;;  %v1281_v2 = vadd.f32 %v1280_v50, %v1111_v49 }
  0xf3   : > { %v1203_v9 = vadd.f32 %v1202_v8, %v1033_v7 }
  0xf4   : > { %v3090_v8 = vadd.f32 %v2983_v57, %v1281_v2 }
  0xf5   : > { %v1548_v12 = vadd.f32 %v2983_v57, %v1203_v9 }
  0xf7   : > { %v2571_v17 = vpack.c.bf16 %v1548_v12, %v1547_v62  ;;  %v1739_v19 = vadd.f32 %v1738_v3, %v1548_v12  ;;  %v1809_v20 = vmul.f32 %v1548_v12, %v1548_v12  ;;  %v2526_v12 = vld [vmem:[%s2904_s8 + $0x1d4] sm:$0xf] }
  0xf9   : > { %2711 = vst [vmem:[%s2992_s23 + $0x20] sm:$0xff] %v2571_v17   ;;  %v1872_v21 = vadd.f32 %v1871_v6, %v1809_v20  ;;  %v1036_v25 = vpop.f32.mrf.mxu0  ;;  %v1113_v6 = vpop.f32.mrf.mxu2  ;;  %v2384_v17 = vor.u32 %v2526_v12, %v2381_v15 }
  0xfa   : > { %v1205_v27 = vpop.f32.mrf.mxu1  ;;  %v1282_v7 = vpop.f32.mrf.mxu3 }
  0xfb   : > { %v1206_v28 = vadd.f32 %v1205_v27, %v1036_v25  ;;  %v1283_v9 = vadd.f32 %v1282_v7, %v1113_v6 }
  0xfc   : > { %1075 = vmatmul.bf16.gmra.mxu0 %v2252_v22  ;;  %1155 = vmatmul.bf16.gmra.mxu2 %v2380_v14 }
  0xfd   : > { %v1549_v36 = vadd.f32 %v2983_v57, %v1206_v28  ;;  %1244 = vmatmul.bf16.gmra.mxu1 %v2256_v23  ;;  %v3098_v16 = vadd.f32 %v2983_v57, %v1283_v9  ;;  %1324 = vmatmul.bf16.gmra.mxu3 %v2384_v17 }
  0xff   : > { %v1740_v41 = vadd.f32 %v1739_v19, %v1549_v36  ;;  %v1810_v42 = vmul.f32 %v1549_v36, %v1549_v36 }
 0x101   : > { %v1873_v44 = vadd.f32 %v1872_v21, %v1810_v42  ;;  %v1038_v46 = vpop.f32.mrf.mxu0  ;;  %v2651_v21 = vpack.c.bf16 %v3098_v16, %v3090_v8  ;;  %v1116_v27 = vpop.f32.mrf.mxu2 }
 0x102   : > { %v1207_v47 = vpop.f32.mrf.mxu1  ;;  %v1285_v28 = vpop.f32.mrf.mxu3 }
 0x103   : > { %v1208_v48 = vadd.f32 %v1207_v47, %v1038_v46  ;;  %2727 = vst [vmem:[%s2992_s23 + $0xa0] sm:$0xff] %v2651_v21   ;;  %v1286_v42 = vadd.f32 %v1285_v28, %v1116_v27  ;;  %v2530_v27 = vld [vmem:[%s2904_s8 + $0x1f4] sm:$0xf] }
 0x105   : > { %v1550_v51 = vadd.f32 %v2983_v57, %v1208_v48  ;;  %v3110_v49 = vadd.f32 %v2983_v57, %v1286_v42 }
 0x107   : > { %v2576_v59 = vpack.c.bf16 %v1550_v51, %v1549_v36  ;;  %v1741_v60 = vadd.f32 %v1740_v41, %v1550_v51  ;;  %v1811_v61 = vmul.f32 %v1550_v51, %v1550_v51  ;;  %v2272_v41 = vor.u32 %v2498_v33, %v2269_v34  ;;  %v2387_v51 = vld [vmem:[%s2904_s8 + $0x1e0] sm:$0xf] }
 0x108   : > { %v2388_v58 = vor.u32 %v2529_v52, %v2387_v51  ;;  %v2400_v33 = vor.u32 %v2530_v27, %v2397_v30 }
 0x109   : > { %2712 = vst [vmem:[%s2992_s23 + $0x28] sm:$0xff] %v2576_v59   ;;  %v1874_v62 = vadd.f32 %v1873_v44, %v1811_v61  ;;  %v1041_v3 = vpop.f32.mrf.mxu0  ;;  %v1118_v47 = vpop.f32.mrf.mxu2  ;;  %v2389_v59 = vld [vmem:[%s2904_s8 + $0x1e8] sm:$0xf0] }
 0x10a   : > { %v1210_v4 = vpop.f32.mrf.mxu1  ;;  %v1287_v48 = vpop.f32.mrf.mxu3  ;;  %v2392_v61 = vor.u32 %v2528_v54, %v2389_v59 }
 0x10b   : > { %v1211_v5 = vadd.f32 %v1210_v4, %v1041_v3  ;;  %v1288_v50 = vadd.f32 %v1287_v48, %v1118_v47 }
 0x10c   : > { %1080 = vmatmul.bf16.gmra.mxu0 %v2260_v63  ;;  %1160 = vmatmul.bf16.gmra.mxu2 %v2388_v58 }
 0x10d   : > { %v1551_v13 = vadd.f32 %v2983_v57, %v1211_v5  ;;  %1249 = vmatmul.bf16.gmra.mxu1 %v2264_v0  ;;  %1329 = vmatmul.bf16.gmra.mxu3 %v2392_v61 }
 0x10f   : > { %v1742_v19 = vadd.f32 %v1741_v60, %v1551_v13  ;;  %v1812_v20 = vmul.f32 %v1551_v13, %v1551_v13  ;;  %v3118_v60 = vadd.f32 %v2983_v57, %v1288_v50 }
 0x111   : > { %v1875_v22 = vadd.f32 %v1874_v62, %v1812_v20  ;;  %v1043_v23 = vpop.f32.mrf.mxu0  ;;  %v2656_v0 = vpack.c.bf16 %v3118_v60, %v3110_v49  ;;  %v1121_v6 = vpop.f32.mrf.mxu2 }
 0x112   : > { %v1212_v24 = vpop.f32.mrf.mxu1  ;;  %v1290_v7 = vpop.f32.mrf.mxu3 }
 0x113   : > { %v1213_v25 = vadd.f32 %v1212_v24, %v1043_v23  ;;  %2728 = vst [vmem:[%s2992_s23 + $0xa8] sm:$0xff] %v2656_v0   ;;  %v1291_v14 = vadd.f32 %v1290_v7, %v1121_v6  ;;  %v2395_v24 = vld [vmem:[%s2904_s8 + $0x1f0] sm:$0xf] }
 0x115   : > { %v1552_v29 = vadd.f32 %v2983_v57, %v1213_v25  ;;  %v2531_v25 = vld [vmem:[%s2904_s8 + $0x1f4] sm:$0xf0] }
 0x117   : > { %v2581_v35 = vpack.c.bf16 %v1552_v29, %v1551_v13  ;;  %v1743_v36 = vadd.f32 %v1742_v19, %v1552_v29  ;;  %v1813_v37 = vmul.f32 %v1552_v29, %v1552_v29  ;;  %v2396_v29 = vor.u32 %v2531_v25, %v2395_v24 }
 0x119   : > { %2713 = vst [vmem:[%s2992_s23 + $0x30] sm:$0xff] %v2581_v35   ;;  %v1876_v38 = vadd.f32 %v1875_v22, %v1813_v37  ;;  %v1046_v43 = vpop.f32.mrf.mxu0  ;;  %v1123_v20 = vpop.f32.mrf.mxu2  ;;  %v3126_v22 = vadd.f32 %v2983_v57, %v1291_v14 }
 0x11a   : > { %v1215_v44 = vpop.f32.mrf.mxu1  ;;  %v1292_v21 = vpop.f32.mrf.mxu3 }
 0x11b   : > { %v1216_v46 = vadd.f32 %v1215_v44, %v1046_v43  ;;  %v1293_v23 = vadd.f32 %v1292_v21, %v1123_v20 }
 0x11c   : > { %1085 = vmatmul.bf16.gmra.mxu0 %v2268_v40  ;;  %1165 = vmatmul.bf16.gmra.mxu2 %v2396_v29 }
 0x11d   : > { %v1553_v55 = vadd.f32 %v2983_v57, %v1216_v46  ;;  %1254 = vmatmul.bf16.gmra.mxu1 %v2272_v41  ;;  %v3134_v32 = vadd.f32 %v2983_v57, %v1293_v23  ;;  %1334 = vmatmul.bf16.gmra.mxu3 %v2400_v33 }
 0x11f   : > { %v1744_v62 = vadd.f32 %v1743_v36, %v1553_v55  ;;  %v1814_v63 = vmul.f32 %v1553_v55, %v1553_v55  ;;  %v2661_v36 = vpack.c.bf16 %v3134_v32, %v3126_v22 }
 0x121   : > { %v1877_v2 = vadd.f32 %v1876_v38, %v1814_v63  ;;  %v1048_v3 = vpop.f32.mrf.mxu0  ;;  %2729 = vst [vmem:[%s2992_s23 + $0xb0] sm:$0xff] %v2661_v36   ;;  %v1126_v42 = vpop.f32.mrf.mxu2 }
 0x122   : > { %v1217_v4 = vpop.f32.mrf.mxu1  ;;  %v1295_v43 = vpop.f32.mrf.mxu3 }
 0x123   : > { %v1218_v5 = vadd.f32 %v1217_v4, %v1048_v3  ;;  %v1296_v51 = vadd.f32 %v1295_v43, %v1126_v42 }
 0x125   : > { %v1554_v9 = vadd.f32 %v2983_v57, %v1218_v5  ;;  %v3142_v61 = vadd.f32 %v2983_v57, %v1296_v51 }
 0x127   : > { %v2586_v10 = vpack.c.bf16 %v1554_v9, %v1553_v55  ;;  %v1745_v11 = vadd.f32 %v1744_v62, %v1554_v9  ;;  %v1815_v12 = vmul.f32 %v1554_v9, %v1554_v9 }
 0x129   : > { %2714 = vst [vmem:[%s2992_s23 + $0x38] sm:$0xff] %v2586_v10   ;;  %v1878_v13 = vadd.f32 %v1877_v2, %v1815_v12  ;;  %v1051_v15 = vpop.f32.mrf.mxu0  ;;  %v1128_v58 = vpop.f32.mrf.mxu2 }
 0x12a   : > { %v1220_v17 = vpop.f32.mrf.mxu1  ;;  %v1297_v59 = vpop.f32.mrf.mxu3 }
 0x12b   : > { %v1221_v19 = vadd.f32 %v1220_v17, %v1051_v15  ;;  %v1298_v62 = vadd.f32 %v1297_v59, %v1128_v58 }
 0x12d   : > { %v1555_v28 = vadd.f32 %v2983_v57, %v1221_v19  ;;  %v3146_v0 = vadd.f32 %v2983_v57, %v1298_v62 }
 0x12f   : > { %v1746_v34 = vadd.f32 %v1745_v11, %v1555_v28  ;;  %v1816_v35 = vmul.f32 %v1555_v28, %v1555_v28  ;;  %v2666_v4 = vpack.c.bf16 %v3146_v0, %v3142_v61 }
 0x131   : > { %v1879_v37 = vadd.f32 %v1878_v13, %v1816_v35  ;;  %v1053_v38 = vpop.f32.mrf.mxu0  ;;  %2730 = vst [vmem:[%s2992_s23 + $0xb8] sm:$0xff] %v2666_v4   ;;  %v1131_v10 = vpop.f32.mrf.mxu2 }
 0x132   : > { %v1222_v40 = vpop.f32.mrf.mxu1  ;;  %v1300_v11 = vpop.f32.mrf.mxu3 }
 0x133   : > { %v1223_v41 = vadd.f32 %v1222_v40, %v1053_v38  ;;  %v1301_v19 = vadd.f32 %v1300_v11, %v1131_v10 }
 0x135   : > { %v1556_v44 = vadd.f32 %v2983_v57, %v1223_v41  ;;  %v3158_v25 = vadd.f32 %v2983_v57, %v1301_v19 }
 0x137   : > { %v2591_v46 = vpack.c.bf16 %v1556_v44, %v1555_v28  ;;  %v1747_v47 = vadd.f32 %v1746_v34, %v1556_v44  ;;  %v1817_v48 = vmul.f32 %v1556_v44, %v1556_v44 }
 0x139   : > { %2715 = vst [vmem:[%s2992_s23 + $0x40] sm:$0xff] %v2591_v46   ;;  %v1880_v50 = vadd.f32 %v1879_v37, %v1817_v48  ;;  %v1056_v52 = vpop.f32.mrf.mxu0  ;;  %v1133_v23 = vpop.f32.mrf.mxu2 }
 0x13a   : > { %v1225_v54 = vpop.f32.mrf.mxu1  ;;  %v1302_v24 = vpop.f32.mrf.mxu3 }
 0x13b   : > { %v1226_v55 = vadd.f32 %v1225_v54, %v1056_v52  ;;  %v1303_v27 = vadd.f32 %v1302_v24, %v1133_v23 }
 0x13d   : > { %v1557_v63 = vadd.f32 %v2983_v57, %v1226_v55  ;;  %v3161_v28 = vadd.f32 %v2983_v57, %v1303_v27 }
 0x13f   : > { %v1748_v2 = vadd.f32 %v1747_v47, %v1557_v63  ;;  %v1818_v3 = vmul.f32 %v1557_v63, %v1557_v63  ;;  %v2671_v29 = vpack.c.bf16 %v3161_v28, %v3158_v25 }
 0x141   : > { %v1881_v5 = vadd.f32 %v1880_v50, %v1818_v3  ;;  %v1058_v6 = vpop.f32.mrf.mxu0  ;;  %2731 = vst [vmem:[%s2992_s23 + $0xc0] sm:$0xff] %v2671_v29   ;;  %v1136_v36 = vpop.f32.mrf.mxu2 }
 0x142   : > { %v1227_v7 = vpop.f32.mrf.mxu1  ;;  %v1305_v37 = vpop.f32.mrf.mxu3 }
 0x143   : > { %v1228_v9 = vadd.f32 %v1227_v7, %v1058_v6  ;;  %v1306_v42 = vadd.f32 %v1305_v37, %v1136_v36 }
 0x145   : > { %v1558_v12 = vadd.f32 %v2983_v57, %v1228_v9  ;;  %v3176_v48 = vadd.f32 %v2983_v57, %v1306_v42 }
 0x147   : > { %v2596_v13 = vpack.c.bf16 %v1558_v12, %v1557_v63  ;;  %v3152_v14 = vadd.f32 %v1748_v2, %v1558_v12  ;;  %v1819_v15 = vmul.f32 %v1558_v12, %v1558_v12 }
 0x149   : > { %2716 = vst [vmem:[%s2992_s23 + $0x48] sm:$0xff] %v2596_v13   ;;  %v3155_v17 = vadd.f32 %v1881_v5, %v1819_v15  ;;  %v1061_v20 = vpop.f32.mrf.mxu0  ;;  %v1138_v46 = vpop.f32.mrf.mxu2 }
 0x14a   : > { %v1230_v21 = vpop.f32.mrf.mxu1  ;;  %v1307_v47 = vpop.f32.mrf.mxu3 }
 0x14b   : > { %v1231_v30 = vadd.f32 %v1230_v21, %v1061_v20  ;;  %v1308_v50 = vadd.f32 %v1307_v47, %v1138_v46 }
 0x14d   : > { %v3167_v38 = vadd.f32 %v2983_v57, %v1231_v30  ;;  %v3179_v51 = vadd.f32 %v2983_v57, %v1308_v50 }
 0x14f   : > { %v2676_v52 = vpack.c.bf16 %v3179_v51, %v3176_v48 }
 0x151   : > { %v1063_v33 = vpop.f32.mrf.mxu0  ;;  %2732 = vst [vmem:[%s2992_s23 + $0xc8] sm:$0xff] %v2676_v52   ;;  %v1141_v62 = vpop.f32.mrf.mxu2 }
 0x152   : > { %v1232_v34 = vpop.f32.mrf.mxu1  ;;  %v1310_v63 = vpop.f32.mrf.mxu3 }
 0x153   : > { %v1233_v35 = vadd.f32 %v1232_v34, %v1063_v33  ;;  %v1311_v5 = vadd.f32 %v1310_v63, %v1141_v62 }
 0x155   : > { %v3170_v40 = vadd.f32 %v2983_v57, %v1233_v35  ;;  %v3194_v11 = vadd.f32 %v2983_v57, %v1311_v5 }
 0x157   : > { %v2601_v41 = vpack.c.bf16 %v3170_v40, %v3167_v38 }
 0x159   : > { %2717 = vst [vmem:[%s2992_s23 + $0x50] sm:$0xff] %v2601_v41   ;;  %v1066_v43 = vpop.f32.mrf.mxu0  ;;  %v1143_v9 = vpop.f32.mrf.mxu2 }
 0x15a   : > { %v1235_v44 = vpop.f32.mrf.mxu1  ;;  %v1312_v10 = vpop.f32.mrf.mxu3 }
 0x15b   : > { %v1236_v54 = vadd.f32 %v1235_v44, %v1066_v43  ;;  %v1313_v12 = vadd.f32 %v1312_v10, %v1143_v9 }
 0x15d   : > { %v3185_v2 = vadd.f32 %v2983_v57, %v1236_v54  ;;  %v3197_v13 = vadd.f32 %v2983_v57, %v1313_v12 }
 0x15f   : > { %v2681_v15 = vpack.c.bf16 %v3197_v13, %v3194_v11 }
 0x161   : > { %v1068_v55 = vpop.f32.mrf.mxu0  ;;  %2733 = vst [vmem:[%s2992_s23 + $0xd0] sm:$0xff] %v2681_v15   ;;  %v1146_v24 = vpop.f32.mrf.mxu2  ;;  %v1820_v15 = vmul.f32 %v3167_v38, %v3167_v38 }
 0x162   : > { %v1237_v58 = vpop.f32.mrf.mxu1  ;;  %v1315_v27 = vpop.f32.mrf.mxu3 }
 0x163   : > { %v1238_v59 = vadd.f32 %v1237_v58, %v1068_v55  ;;  %v1316_v34 = vadd.f32 %v1315_v27, %v1146_v24  ;;  %v1883_v27 = vadd.f32 %v3155_v17, %v1820_v15 }
 0x165   : > { %v3188_v3 = vadd.f32 %v2983_v57, %v1238_v59  ;;  %v3206_v42 = vadd.f32 %v2983_v57, %v1316_v34 }
 0x167   : > { %v2606_v4 = vpack.c.bf16 %v3188_v3, %v3185_v2 }
 0x169   : > { %2718 = vst [vmem:[%s2992_s23 + $0x58] sm:$0xff] %v2606_v4   ;;  %v1071_v6 = vpop.f32.mrf.mxu0  ;;  %v1148_v37 = vpop.f32.mrf.mxu2 }
 0x16a   : > { %v1240_v7 = vpop.f32.mrf.mxu1  ;;  %v1317_v41 = vpop.f32.mrf.mxu3 }
 0x16b   : > { %v1241_v19 = vadd.f32 %v1240_v7, %v1071_v6  ;;  %v1318_v43 = vadd.f32 %v1317_v41, %v1148_v37 }
 0x16d   : > { %v1563_v29 = vadd.f32 %v2983_v57, %v1241_v19  ;;  %v3209_v44 = vadd.f32 %v2983_v57, %v1318_v43 }
 0x16f   : > { %v2686_v46 = vpack.c.bf16 %v3209_v44, %v3206_v42 }
 0x171   : > { %v1073_v20 = vpop.f32.mrf.mxu0  ;;  %2734 = vst [vmem:[%s2992_s23 + $0xd8] sm:$0xff] %v2686_v46   ;;  %v1151_v55 = vpop.f32.mrf.mxu2 }
 0x172   : > { %v1242_v21 = vpop.f32.mrf.mxu1  ;;  %v1320_v58 = vpop.f32.mrf.mxu3 }
 0x173   : > { %v1243_v23 = vadd.f32 %v1242_v21, %v1073_v20  ;;  %v1321_v6 = vadd.f32 %v1320_v58, %v1151_v55  ;;  %v1821_v20 = vmul.f32 %v3170_v40, %v3170_v40 }
 0x175   : > { %v1564_v30 = vadd.f32 %v2983_v57, %v1243_v23  ;;  %v3218_v12 = vadd.f32 %v2983_v57, %v1321_v6  ;;  %v1750_v23 = vadd.f32 %v3152_v14, %v3167_v38  ;;  %v1884_v46 = vadd.f32 %v1883_v27, %v1821_v20 }
 0x177   : > { %v2611_v33 = vpack.c.bf16 %v1564_v30, %v1563_v29 }
 0x179   : > { %2719 = vst [vmem:[%s2992_s23 + $0x60] sm:$0xff] %v2611_v33   ;;  %v1076_v35 = vpop.f32.mrf.mxu0  ;;  %v1153_v7 = vpop.f32.mrf.mxu2  ;;  %v1822_v33 = vmul.f32 %v3185_v2, %v3185_v2 }
 0x17a   : > { %v1245_v36 = vpop.f32.mrf.mxu1  ;;  %v1322_v9 = vpop.f32.mrf.mxu3 }
 0x17b   : > { %v1246_v47 = vadd.f32 %v1245_v36, %v1076_v35  ;;  %v1323_v10 = vadd.f32 %v1322_v9, %v1153_v7  ;;  %v1751_v36 = vadd.f32 %v1750_v23, %v3170_v40 }
 0x17d   : > { %v1565_v59 = vadd.f32 %v2983_v57, %v1246_v47  ;;  %v3223_v19 = vadd.f32 %v2983_v57, %v1323_v10  ;;  %v1823_v47 = vmul.f32 %v3188_v3, %v3188_v3  ;;  %v1752_v14 = vadd.f32 %v1751_v36, %v3185_v2 }
 0x17f   : > { %v2691_v21 = vpack.c.bf16 %v3223_v19, %v3218_v12  ;;  %v1826_v9 = vmul.f32 %v1565_v59, %v1565_v59 }
 0x181   : > { %v1078_v50 = vpop.f32.mrf.mxu0  ;;  %2735 = vst [vmem:[%s2992_s23 + $0xe0] sm:$0xff] %v2691_v21   ;;  %v1156_v41 = vpop.f32.mrf.mxu2 }
 0x182   : > { %v1247_v52 = vpop.f32.mrf.mxu1  ;;  %v1325_v43 = vpop.f32.mrf.mxu3 }
 0x183   : > { %v1248_v54 = vadd.f32 %v1247_v52, %v1078_v50  ;;  %v1885_v50 = vadd.f32 %v1884_v46, %v1822_v33  ;;  %v1824_v52 = vmul.f32 %v1563_v29, %v1563_v29  ;;  %v1326_v2 = vadd.f32 %v1325_v43, %v1156_v41 }
 0x185   : > { %v1566_v62 = vadd.f32 %v2983_v57, %v1248_v54  ;;  %v1753_v54 = vadd.f32 %v1752_v14, %v3188_v3  ;;  %v1886_v40 = vadd.f32 %v1885_v50, %v1823_v47  ;;  %v3244_v3 = vadd.f32 %v2983_v57, %v1326_v2 }
 0x187   : > { %v2616_v63 = vpack.c.bf16 %v1566_v62, %v1565_v59  ;;  %v1754_v58 = vadd.f32 %v1753_v54, %v1563_v29  ;;  %v1827_v27 = vmul.f32 %v1566_v62, %v1566_v62 }
 0x189   : > { %2720 = vst [vmem:[%s2992_s23 + $0x68] sm:$0xff] %v2616_v63   ;;  %v1081_v4 = vpop.f32.mrf.mxu0  ;;  %v1825_v63 = vmul.f32 %v1564_v30, %v1564_v30  ;;  %v1755_v7 = vadd.f32 %v1754_v58, %v1564_v30  ;;  %v1158_v15 = vpop.f32.mrf.mxu2 }
 0x18a   : > { %v1250_v5 = vpop.f32.mrf.mxu1  ;;  %v1327_v20 = vpop.f32.mrf.mxu3 }
 0x18b   : > { %v1251_v24 = vadd.f32 %v1250_v5, %v1081_v4  ;;  %v1887_v4 = vadd.f32 %v1886_v40, %v1824_v52  ;;  %v1328_v21 = vadd.f32 %v1327_v20, %v1158_v15 }
 0x18d   : > { %v1567_v17 = vadd.f32 %v2983_v57, %v1251_v24  ;;  %v1888_v23 = vadd.f32 %v1887_v4, %v1825_v63  ;;  %v1756_v24 = vadd.f32 %v1755_v7, %v1565_v59  ;;  %v3247_v29 = vadd.f32 %v2983_v57, %v1328_v21 }
 0x18f   : > { %v1889_v33 = vadd.f32 %v1888_v23, %v1826_v9  ;;  %v2696_v36 = vpack.c.bf16 %v3247_v29, %v3244_v3  ;;  %v1834_v23 = vmul.f32 %v3030_v18, %v3030_v18 }
 0x191   : > { %v1083_v34 = vpop.f32.mrf.mxu0  ;;  %2736 = vst [vmem:[%s2992_s23 + $0xe8] sm:$0xff] %v2696_v36   ;;  %v1161_v54 = vpop.f32.mrf.mxu2 }
 0x192   : > { %v1252_v35 = vpop.f32.mrf.mxu1 }
 0x193   : > { %v1253_v37 = vadd.f32 %v1252_v35, %v1083_v34  ;;  %v1757_v34 = vadd.f32 %v1756_v24, %v1566_v62  ;;  %v1828_v35 = vmul.f32 %v1567_v17, %v1567_v17 }
 0x195   : > { %v1568_v38 = vadd.f32 %v2983_v57, %v1253_v37  ;;  %v1890_v37 = vadd.f32 %v1889_v33, %v1827_v27  ;;  %v1758_v41 = vadd.f32 %v1757_v34, %v1567_v17 }
 0x197   : > { %v2621_v55 = vpack.c.bf16 %v1568_v38, %v1567_v17  ;;  %v1829_v43 = vmul.f32 %v1568_v38, %v1568_v38  ;;  %v1891_v47 = vadd.f32 %v1890_v37, %v1828_v35  ;;  %v1759_v14 = vadd.f32 %v1758_v41, %v1568_v38 }
 0x198   : > { %v1832_v17 = vmul.f32 %v3010_v45, %v3010_v45  ;;  %v1833_v38 = vmul.f32 %v3018_v53, %v3018_v53 }
 0x199   : > { %2721 = vst [vmem:[%s2992_s23 + $0x70] sm:$0xff] %v2621_v55   ;;  %v1086_v5 = vpop.f32.mrf.mxu0  ;;  %v1330_v55 = vpop.f32.mrf.mxu3  ;;  %v1892_v62 = vadd.f32 %v1891_v47, %v1829_v43  ;;  %v1837_v43 = vmul.f32 %v3058_v1, %v3058_v1 }
 0x19a   : > { %v1255_v6 = vpop.f32.mrf.mxu1  ;;  %v1331_v15 = vadd.f32 %v1330_v55, %v1161_v54  ;;  %v1163_v20 = vpop.f32.mrf.mxu2  ;;  %v1839_v54 = vmul.f32 %v3078_v39, %v3078_v39 }
 0x19b   : > { %v1256_v10 = vadd.f32 %v1255_v6, %v1086_v5 }
 0x19d   : > { %v1569_v30 = vadd.f32 %v2983_v57, %v1256_v10 }
 0x19f   : > { %v1830_v50 = vmul.f32 %v1569_v30, %v1569_v30  ;;  %v1760_v40 = vadd.f32 %v1759_v14, %v1569_v30 }
 0x1a1   : > { %v1088_v46 = vpop.f32.mrf.mxu0  ;;  %v1893_v63 = vadd.f32 %v1892_v62, %v1830_v50  ;;  %v1840_v62 = vmul.f32 %v3090_v8, %v3090_v8 }
 0x1a2   : > { %v1257_v59 = vpop.f32.mrf.mxu1  ;;  %v1166_v47 = vpop.f32.mrf.mxu2 }
 0x1a3   : > { %v1258_v52 = vadd.f32 %v1257_v59, %v1088_v46 }
 0x1a5   : > { %v1570_v58 = vadd.f32 %v2983_v57, %v1258_v52  ;;  %v1332_v57 = vpop.f32.mrf.mxu3 }
 0x1a6   : > { %v1333_v21 = vadd.f32 %v1332_v57, %v1163_v20  ;;  %v1844_v20 = vmul.f32 %v3126_v22, %v3126_v22 }
 0x1a7   : > { %v2626_v4 = vpack.c.bf16 %v1570_v58, %v1569_v30  ;;  %v1761_v5 = vadd.f32 %v1760_v40, %v1570_v58  ;;  %v1831_v6 = vmul.f32 %v1570_v58, %v1570_v58  ;;  %v1841_v58 = vmul.f32 %v3098_v16, %v3098_v16 }
 0x1a9   : > { %2722 = vst [vmem:[%s2992_s23 + $0x78] sm:$0xff] %v2626_v4   ;;  %v1762_v7 = vadd.f32 %v1761_v5, %v3010_v45  ;;  %v1894_v9 = vadd.f32 %v1893_v63, %v1831_v6  ;;  %v2780_v45 = vld [vmem:[%s3381_s2] ss:$0 sm:$0xff] }
 0x1aa   : > { %v3267_v33 = vadd.f32 %v2780_v45, %v1331_v15  ;;  %v3269_v34 = vadd.f32 %v2780_v45, %v1333_v21  ;;  %v1168_v5 = vpop.f32.mrf.mxu2 }
 0x1ab   : > { %v1763_v10 = vadd.f32 %v1762_v7, %v3018_v53  ;;  %v1895_v2 = vadd.f32 %v1894_v9, %v1832_v17  ;;  %v1835_v53 = vmul.f32 %v3038_v26, %v3038_v26 }
 0x1ac   : > { %v2701_v36 = vpack.c.bf16 %v3269_v34, %v3267_v33 }
 0x1ad   : > { %v1764_v24 = vadd.f32 %v1763_v10, %v3030_v18  ;;  %v1896_v27 = vadd.f32 %v1895_v2, %v1833_v38  ;;  %v1836_v18 = vmul.f32 %v3050_v56, %v3050_v56  ;;  %v1335_v14 = vpop.f32.mrf.mxu3  ;;  %v1843_v10 = vmul.f32 %v3118_v60, %v3118_v60 }
 0x1ae   : > { %2737 = vst [vmem:[%s2992_s23 + $0xf0] sm:$0xff] %v2701_v36  }
 0x1af   : > { %v1765_v35 = vadd.f32 %v1764_v24, %v3038_v26  ;;  %v1897_v30 = vadd.f32 %v1896_v27, %v1834_v23  ;;  %v1838_v26 = vmul.f32 %v3070_v31, %v3070_v31  ;;  %v1846_v27 = vmul.f32 %v3142_v61, %v3142_v61 }
 0x1b1   : > { %v1766_v37 = vadd.f32 %v1765_v35, %v3050_v56  ;;  %v1898_v41 = vadd.f32 %v1897_v30, %v1835_v53  ;;  %v1847_v53 = vmul.f32 %v3146_v0, %v3146_v0 }
 0x1b3   : > { %v1767_v46 = vadd.f32 %v1766_v37, %v3058_v1  ;;  %v1899_v59 = vadd.f32 %v1898_v41, %v1836_v18 }
 0x1b5   : > { %v1768_v50 = vadd.f32 %v1767_v46, %v3070_v31  ;;  %v1900_v52 = vadd.f32 %v1899_v59, %v1837_v43  ;;  %v1336_v31 = vadd.f32 %v1335_v14, %v1166_v47  ;;  %v1337_v6 = vpop.f32.mrf.mxu3 }
 0x1b6   : > { %v1338_v17 = vadd.f32 %v1337_v6, %v1168_v5 }
 0x1b7   : > { %v1769_v56 = vadd.f32 %v1768_v50, %v3078_v39  ;;  %v1901_v55 = vadd.f32 %v1900_v52, %v1838_v26  ;;  %v1842_v39 = vmul.f32 %v3110_v49, %v3110_v49  ;;  %v1601_v38 = vadd.f32 %v2780_v45, %v1336_v31 }
 0x1b9   : > { %v1770_v1 = vadd.f32 %v1769_v56, %v3090_v8  ;;  %v1902_v40 = vadd.f32 %v1901_v55, %v1839_v54  ;;  %v3298_v8 = vadd.f32 %v2780_v45, %v1338_v17 }
 0x1bb   : > { %v1771_v63 = vadd.f32 %v1770_v1, %v3098_v16  ;;  %v1903_v4 = vadd.f32 %v1902_v40, %v1840_v62  ;;  %v2706_v15 = vpack.c.bf16 %v3298_v8, %v1601_v38  ;;  %v1856_v1 = vmul.f32 %v3218_v12, %v3218_v12 }
 0x1bd   : > { %v1772_v7 = vadd.f32 %v1771_v63, %v3110_v49  ;;  %v1904_v9 = vadd.f32 %v1903_v4, %v1841_v58  ;;  %2738 = vst [vmem:[%s2992_s23 + $0xf8] sm:$0xff] %v2706_v15   ;;  %v1845_v49 = vmul.f32 %v3134_v32, %v3134_v32  ;;  %v1857_v63 = vmul.f32 %v3223_v19, %v3223_v19 }
 0x1be   : > { %v1863_v15 = vmul.f32 %v3298_v8, %v3298_v8 }
 0x1bf   : > { %v1773_v16 = vadd.f32 %v1772_v7, %v3118_v60  ;;  %v1905_v2 = vadd.f32 %v1904_v9, %v1842_v39  ;;  %v1861_v9 = vmul.f32 %v3269_v34, %v3269_v34 }
 0x1c1   : > { %v1906_v57 = vadd.f32 %v1905_v2, %v1843_v10  ;;  %v1774_v21 = vadd.f32 %v1773_v16, %v3126_v22  ;;  %v1848_v22 = vmul.f32 %v3158_v25, %v3158_v25  ;;  %v1862_v16 = vmul.f32 %v1601_v38, %v1601_v38 }
 0x1c3   : > { %v1775_v23 = vadd.f32 %v1774_v21, %v3134_v32  ;;  %v1907_v24 = vadd.f32 %v1906_v57, %v1844_v20  ;;  %v1849_v32 = vmul.f32 %v3161_v28, %v3161_v28 }
 0x1c5   : > { %v1776_v60 = vadd.f32 %v1775_v23, %v3142_v61  ;;  %v1908_v45 = vadd.f32 %v1907_v24, %v1845_v49  ;;  %v1850_v61 = vmul.f32 %v3176_v48, %v3176_v48 }
 0x1c7   : > { %v1777_v35 = vadd.f32 %v1776_v60, %v3146_v0  ;;  %v1909_v30 = vadd.f32 %v1908_v45, %v1846_v27  ;;  %v1851_v0 = vmul.f32 %v3179_v51, %v3179_v51 }
 0x1c9   : > { %v1778_v36 = vadd.f32 %v1777_v35, %v3158_v25  ;;  %v1910_v18 = vadd.f32 %v1909_v30, %v1847_v53  ;;  %v1852_v25 = vmul.f32 %v3194_v11, %v3194_v11 }
 0x1cb   : > { %v1779_v37 = vadd.f32 %v1778_v36, %v3161_v28  ;;  %v1911_v41 = vadd.f32 %v1910_v18, %v1848_v22  ;;  %v1853_v28 = vmul.f32 %v3197_v13, %v3197_v13 }
 0x1cd   : > { %v1780_v43 = vadd.f32 %v1779_v37, %v3176_v48  ;;  %v1912_v46 = vadd.f32 %v1911_v41, %v1849_v32  ;;  %v1854_v48 = vmul.f32 %v3206_v42, %v3206_v42 }
 0x1cf   : > { %v1781_v59 = vadd.f32 %v1780_v43, %v3179_v51  ;;  %v1913_v47 = vadd.f32 %v1912_v46, %v1850_v61  ;;  %v1855_v51 = vmul.f32 %v3209_v44, %v3209_v44 }
 0x1d1   : > { %v1782_v14 = vadd.f32 %v1781_v59, %v3194_v11  ;;  %v1914_v26 = vadd.f32 %v1913_v47, %v1851_v0 }
 0x1d3   : > { %v1783_v50 = vadd.f32 %v1782_v14, %v3197_v13  ;;  %v1915_v52 = vadd.f32 %v1914_v26, %v1852_v25 }
 0x1d5   : > { %v1784_v54 = vadd.f32 %v1783_v50, %v3206_v42  ;;  %v1916_v56 = vadd.f32 %v1915_v52, %v1853_v28 }
 0x1d7   : > { %v1785_v55 = vadd.f32 %v1784_v54, %v3209_v44  ;;  %v1917_v62 = vadd.f32 %v1916_v56, %v1854_v48  ;;  %v1858_v44 = vmul.f32 %v3244_v3, %v3244_v3 }
 0x1d9   : > { %v1786_v11 = vadd.f32 %v1785_v55, %v3218_v12  ;;  %v1918_v40 = vadd.f32 %v1917_v62, %v1855_v51  ;;  %v1859_v12 = vmul.f32 %v3247_v29, %v3247_v29 }
 0x1db   : > { %v1919_v13 = vadd.f32 %v1918_v40, %v1856_v1  ;;  %v1787_v58 = vadd.f32 %v1786_v11, %v3223_v19  ;;  %v1860_v19 = vmul.f32 %v3267_v33, %v3267_v33 }
 0x1dd   : > { %v1920_v42 = vadd.f32 %v1919_v13, %v1857_v63  ;;  %v1788_v4 = vadd.f32 %v1787_v58, %v3244_v3 }
 0x1df   : > { %v1921_v31 = vadd.f32 %v1920_v42, %v1858_v44  ;;  %v1789_v5 = vadd.f32 %v1788_v4, %v3247_v29 }
 0x1e1   : > { %v1922_v6 = vadd.f32 %v1921_v31, %v1859_v12  ;;  %v1790_v17 = vadd.f32 %v1789_v5, %v3267_v33 }
 0x1e3   : > { %v1923_v39 = vadd.f32 %v1922_v6, %v1860_v19  ;;  %v1791_v7 = vadd.f32 %v1790_v17, %v3269_v34 }
 0x1e5   : > { %v1924_v3 = vadd.f32 %v1923_v39, %v1861_v9  ;;  %v1792_v10 = vadd.f32 %v1791_v7, %v1601_v38 }
 0x1e7   : > { %v1925_v2 = vadd.f32 %v1924_v3, %v1862_v16  ;;  %v1793_v29 = vadd.f32 %v1792_v10, %v3298_v8 }
 0x1e9   : > { %v1794_v20 = vrot.slane %v1793_v29, 4  ;;  %v1926_v57 = vadd.f32 %v1925_v2, %v1863_v15 }
 0x1eb   : > { %v1795_v33 = vadd.f32 %v1794_v20, %v1793_v29  ;;  %v1927_v21 = vrot.slane %v1926_v57, 4 }
 0x1ed   : > { %v1796_v49 = vrot.slane %v1795_v33, 2  ;;  %v1928_v23 = vadd.f32 %v1927_v21, %v1926_v57 }
 0x1ef   : > { %v1797_v24 = vadd.f32 %v1796_v49, %v1795_v33  ;;  %v1929_v34 = vrot.slane %v1928_v23, 2 }
 0x1f1   : > { %v1798_v27 = vrot.slane %v1797_v24, 1  ;;  %v1930_v60 = vadd.f32 %v1929_v34, %v1928_v23 }
 0x1f3   : > { %v1799_v38 = vadd.f32 %v1798_v27, %v1797_v24  ;;  %v1931_v45 = vrot.slane %v1930_v60, 1 }
 0x1f5   : > { %v1932_v8 = vadd.f32 %v1931_v45, %v1930_v60  ;;  %1933 = vst [vmem:[%s350_s28] sm:$0xff] %v1799_v38 }
 0x1f7   : > { %1934 = vst [vmem:[%s357_s6] sm:$0xff] %v1932_v8 }
 0x1f8 PF: > { %s16_s20 = sadd.s32 1, %s2803_s20   ;;  %s3385_s18 = smov %s2799_s19 }
 0x1f9   : > { %p13_p6 = scmp.ge.s32.totalorder %s16_s20, 6   ;;  %s3386_s19 = smov %s3388_s21 }
 0x1fb   :  { %15 = sbr.rel (!%p13_p6) target bundleno = 2 (0x2), region = 100 }

// kernel: local_enhancer_forward.69
= control target key start
LH: loop header
LB: loop body
LE: loop exit
PB: predicated region body
PF: predicated region fallthrough
CT: control target
= control target key end

     0   :  { %s239_s0 = inlined_call_operand.vmem [shape: bf16[64,128], index: 0, kind: input, shape index: {}]   ;;  %s240_s1 = inlined_call_operand.vmem [shape: f32[1,128], index: 1, kind: input, shape index: {}]   ;;  %s241_s2 = inlined_call_operand.vmem [shape: f32[1,128], index: 2, kind: input, shape index: {}]   ;;  %s242_s3 = inlined_call_operand.vmem [shape: bf16[64,128], index: 3, kind: input, shape index: {}]   ;;  %s243_s4 = inlined_call_operand.vmem [shape: bf16[64,128], index: 4, kind: output, shape index: {}]  }
   0x1   :  { %v110_v0 = vld [vmem:[%s239_s0] sm:$0xff]   ;;  %v161_v8 = vld [vmem:[%s239_s0 + $0x8] sm:$0xff]   ;;  %v162_v10 = vld [vmem:[%s239_s0 + $0x10] sm:$0xff]  }
   0x2   :  { %v170_v1 = vld [vmem:[%s240_s1] ss:$0 sm:$0xff]  ;;  %v111_v2 = vunpack.c.l.bf16 %v110_v0  ;;  %v112_v3 = vunpack.c.h.bf16 %v110_v0  ;;  %v164_v9 = vld [vmem:[%s242_s3 + $0x8] sm:$0xff]   ;;  %v115_v13 = vunpack.c.l.bf16 %v161_v8  ;;  %v116_v14 = vunpack.c.h.bf16 %v161_v8  ;;  %v165_v15 = vld [vmem:[%s242_s3 + $0x10] sm:$0xff]  }
   0x3   :  { %v171_v4 = vld [vmem:[%s241_s2] ss:$0 sm:$0xff]  ;;  %v131_v16 = vunpack.c.l.bf16 %v164_v9  ;;  %v132_v17 = vunpack.c.h.bf16 %v164_v9  ;;  %v119_v18 = vunpack.c.l.bf16 %v162_v10  ;;  %v120_v19 = vunpack.c.h.bf16 %v162_v10  ;;  %v163_v24 = vld [vmem:[%s239_s0 + $0x18] sm:$0xff]  }
   0x4   :  { %v126_v5 = vld [vmem:[%s242_s3] sm:$0xff]   ;;  %v37_v11 = vmul.f32 %v170_v1, %v111_v2  ;;  %v38_v12 = vmul.f32 %v170_v1, %v112_v3  ;;  %v39_v22 = vmul.f32 %v170_v1, %v115_v13  ;;  %v40_v23 = vmul.f32 %v170_v1, %v116_v14  ;;  %v166_v37 = vld [vmem:[%s242_s3 + $0x18] sm:$0xff]  }
   0x5   :  { %v127_v6 = vunpack.c.l.bf16 %v126_v5  ;;  %v128_v7 = vunpack.c.h.bf16 %v126_v5  ;;  %v41_v25 = vmul.f32 %v170_v1, %v119_v18  ;;  %v42_v26 = vmul.f32 %v170_v1, %v120_v19 }
   0x6   :  { %v49_v20 = vadd.f32 %v171_v4, %v37_v11  ;;  %v50_v21 = vadd.f32 %v171_v4, %v38_v12  ;;  %v135_v27 = vunpack.c.l.bf16 %v165_v15  ;;  %v136_v28 = vunpack.c.h.bf16 %v165_v15 }
   0x7   :  { %v51_v31 = vadd.f32 %v171_v4, %v39_v22  ;;  %v52_v32 = vadd.f32 %v171_v4, %v40_v23  ;;  %v53_v33 = vadd.f32 %v171_v4, %v41_v25  ;;  %v54_v34 = vadd.f32 %v171_v4, %v42_v26 }
   0x8   :  { %v57_v29 = vmax.f32 %v49_v20, 0.0  ;;  %v58_v30 = vmax.f32 %v50_v21, 0.0  ;;  %v123_v35 = vunpack.c.l.bf16 %v163_v24  ;;  %v124_v36 = vunpack.c.h.bf16 %v163_v24 }
   0x9   :  { %v59_v40 = vmax.f32 %v51_v31, 0.0  ;;  %v60_v41 = vmax.f32 %v52_v32, 0.0  ;;  %v61_v42 = vmax.f32 %v53_v33, 0.0  ;;  %v62_v43 = vmax.f32 %v54_v34, 0.0 }
   0xa   :  { %v81_v38 = vadd.f32 %v127_v6, %v57_v29  ;;  %v82_v39 = vadd.f32 %v128_v7, %v58_v30  ;;  %v43_v44 = vmul.f32 %v170_v1, %v123_v35  ;;  %v44_v45 = vmul.f32 %v170_v1, %v124_v36 }
   0xb   :  { %v83_v47 = vadd.f32 %v131_v16, %v59_v40  ;;  %v84_v48 = vadd.f32 %v132_v17, %v60_v41  ;;  %v139_v49 = vunpack.c.l.bf16 %v166_v37  ;;  %v85_v50 = vadd.f32 %v135_v27, %v61_v42 }
   0xc   :  { %v144_v46 = vpack.c.bf16 %v82_v39, %v81_v38  ;;  %v86_v51 = vadd.f32 %v136_v28, %v62_v43  ;;  %v55_v52 = vadd.f32 %v171_v4, %v43_v44  ;;  %v56_v53 = vadd.f32 %v171_v4, %v44_v45 }
   0xd   :  { %v149_v54 = vpack.c.bf16 %v84_v48, %v83_v47  ;;  %v140_v55 = vunpack.c.h.bf16 %v166_v37 }
   0xe   :  { %145 = vst [vmem:[%s243_s4] sm:$0xff] %v144_v46   ;;  %v154_v56 = vpack.c.bf16 %v86_v51, %v85_v50  ;;  %v63_v57 = vmax.f32 %v55_v52, 0.0  ;;  %v64_v58 = vmax.f32 %v56_v53, 0.0 }
   0xf   :  { %167 = vst [vmem:[%s243_s4 + $0x8] sm:$0xff] %v149_v54  }
  0x10   :  { %168 = vst [vmem:[%s243_s4 + $0x10] sm:$0xff] %v154_v56   ;;  %v87_v59 = vadd.f32 %v139_v49, %v63_v57  ;;  %v88_v60 = vadd.f32 %v140_v55, %v64_v58 }
  0x12   :  { %v159_v61 = vpack.c.bf16 %v88_v60, %v87_v59 }
  0x14   :  { %169 = vst [vmem:[%s243_s4 + $0x18] sm:$0xff] %v159_v61  }

// kernel: local_enhancer_forward.73
= control target key start
LH: loop header
LB: loop body
LE: loop exit
PB: predicated region body
PF: predicated region fallthrough
CT: control target
= control target key end

     0   :  { %s231_s0 = inlined_call_operand.vmem [shape: bf16[64,128], index: 0, kind: input, shape index: {}]   ;;  %s232_s1 = inlined_call_operand.vmem [shape: f32[1,128], index: 1, kind: input, shape index: {}]   ;;  %s233_s2 = inlined_call_operand.vmem [shape: f32[1,128], index: 2, kind: input, shape index: {}]   ;;  %s234_s3 = inlined_call_operand.vmem [shape: bf16[64,128], index: 3, kind: input, shape index: {}]   ;;  %s235_s4 = inlined_call_operand.vmem [shape: bf16[64,128], index: 4, kind: output, shape index: {}]  }
   0x1   :  { %v102_v0 = vld [vmem:[%s231_s0] sm:$0xff]   ;;  %v153_v8 = vld [vmem:[%s231_s0 + $0x8] sm:$0xff]   ;;  %v154_v10 = vld [vmem:[%s231_s0 + $0x10] sm:$0xff]  }
   0x2   :  { %v162_v1 = vld [vmem:[%s232_s1] ss:$0 sm:$0xff]  ;;  %v103_v2 = vunpack.c.l.bf16 %v102_v0  ;;  %v104_v3 = vunpack.c.h.bf16 %v102_v0  ;;  %v156_v9 = vld [vmem:[%s234_s3 + $0x8] sm:$0xff]   ;;  %v107_v13 = vunpack.c.l.bf16 %v153_v8  ;;  %v108_v14 = vunpack.c.h.bf16 %v153_v8  ;;  %v157_v15 = vld [vmem:[%s234_s3 + $0x10] sm:$0xff]  }
   0x3   :  { %v163_v4 = vld [vmem:[%s233_s2] ss:$0 sm:$0xff]  ;;  %v123_v16 = vunpack.c.l.bf16 %v156_v9  ;;  %v124_v17 = vunpack.c.h.bf16 %v156_v9  ;;  %v111_v18 = vunpack.c.l.bf16 %v154_v10  ;;  %v112_v19 = vunpack.c.h.bf16 %v154_v10  ;;  %v155_v24 = vld [vmem:[%s231_s0 + $0x18] sm:$0xff]  }
   0x4   :  { %v118_v5 = vld [vmem:[%s234_s3] sm:$0xff]   ;;  %v37_v11 = vmul.f32 %v162_v1, %v103_v2  ;;  %v38_v12 = vmul.f32 %v162_v1, %v104_v3  ;;  %v39_v22 = vmul.f32 %v162_v1, %v107_v13  ;;  %v40_v23 = vmul.f32 %v162_v1, %v108_v14  ;;  %v158_v29 = vld [vmem:[%s234_s3 + $0x18] sm:$0xff]  }
   0x5   :  { %v119_v6 = vunpack.c.l.bf16 %v118_v5  ;;  %v120_v7 = vunpack.c.h.bf16 %v118_v5  ;;  %v41_v25 = vmul.f32 %v162_v1, %v111_v18  ;;  %v42_v26 = vmul.f32 %v162_v1, %v112_v19 }
   0x6   :  { %v49_v20 = vadd.f32 %v163_v4, %v37_v11  ;;  %v50_v21 = vadd.f32 %v163_v4, %v38_v12  ;;  %v127_v27 = vunpack.c.l.bf16 %v157_v15  ;;  %v128_v28 = vunpack.c.h.bf16 %v157_v15 }
   0x7   :  { %v51_v32 = vadd.f32 %v163_v4, %v39_v22  ;;  %v52_v33 = vadd.f32 %v163_v4, %v40_v23  ;;  %v53_v34 = vadd.f32 %v163_v4, %v41_v25  ;;  %v54_v35 = vadd.f32 %v163_v4, %v42_v26 }
   0x8   :  { %v73_v30 = vadd.f32 %v119_v6, %v49_v20  ;;  %v74_v31 = vadd.f32 %v120_v7, %v50_v21  ;;  %v115_v36 = vunpack.c.l.bf16 %v155_v24  ;;  %v116_v37 = vunpack.c.h.bf16 %v155_v24 }
   0x9   :  { %v75_v39 = vadd.f32 %v123_v16, %v51_v32  ;;  %v76_v40 = vadd.f32 %v124_v17, %v52_v33  ;;  %v131_v41 = vunpack.c.l.bf16 %v158_v29  ;;  %v77_v42 = vadd.f32 %v127_v27, %v53_v34 }
   0xa   :  { %v136_v38 = vpack.c.bf16 %v74_v31, %v73_v30  ;;  %v78_v43 = vadd.f32 %v128_v28, %v54_v35  ;;  %v43_v44 = vmul.f32 %v162_v1, %v115_v36  ;;  %v44_v45 = vmul.f32 %v162_v1, %v116_v37 }
   0xb   :  { %v141_v46 = vpack.c.bf16 %v76_v40, %v75_v39  ;;  %v132_v47 = vunpack.c.h.bf16 %v158_v29 }
   0xc   :  { %137 = vst [vmem:[%s235_s4] sm:$0xff] %v136_v38   ;;  %v146_v48 = vpack.c.bf16 %v78_v43, %v77_v42  ;;  %v55_v49 = vadd.f32 %v163_v4, %v43_v44  ;;  %v56_v50 = vadd.f32 %v163_v4, %v44_v45 }
   0xd   :  { %159 = vst [vmem:[%s235_s4 + $0x8] sm:$0xff] %v141_v46  }
   0xe   :  { %160 = vst [vmem:[%s235_s4 + $0x10] sm:$0xff] %v146_v48   ;;  %v79_v51 = vadd.f32 %v131_v41, %v55_v49  ;;  %v80_v52 = vadd.f32 %v132_v47, %v56_v50 }
  0x10   :  { %v151_v53 = vpack.c.bf16 %v80_v52, %v79_v51 }
  0x12   :  { %161 = vst [vmem:[%s235_s4 + $0x18] sm:$0xff] %v151_v53  }

// kernel: local_enhancer_forward.79
= control target key start
LH: loop header
LB: loop body
LE: loop exit
PB: predicated region body
PF: predicated region fallthrough
CT: control target
= control target key end

     0   :  { %s2318_s1 = inlined_call_operand.vmem [shape: bf16[128,128], index: 1, kind: input, shape index: {}]   ;;  %s2319_s2 = inlined_call_operand.vmem [shape: f32[1,128], index: 2, kind: input, shape index: {}]   ;;  %s2320_s0 = inlined_call_operand.vmem [shape: bf16[512,128], index: 0, kind: input, shape index: {}]   ;;  %s2321_s3 = inlined_call_operand.vmem [shape: bf16[512,128], index: 3, kind: output, shape index: {0}]   ;;  %s2322_s4 = inlined_call_operand.vmem [shape: f32[8,128], index: 4, kind: output, shape index: {1}]   ;;  %s2323_s5 = inlined_call_operand.vmem [shape: f32[8,128], index: 5, kind: output, shape index: {2}]  }
   0x1   :  { %v1444_v0 = vld [vmem:[%s2318_s1 + $0x38] sm:$0xff]  ;;  %v1443_v1 = vld [vmem:[%s2318_s1 + $0x30] sm:$0xff]  ;;  %v1442_v2 = vld [vmem:[%s2318_s1 + $0x28] sm:$0xff] }
   0x2   :  { %469 = vmatpush.bf16.msra.mxu0 %v1444_v0  ;;  %1636 = vmatpush.bf16.msra.mxu1 %v1444_v0  ;;  %v1441_v3 = vld [vmem:[%s2318_s1 + $0x20] sm:$0xff]  ;;  %v1440_v4 = vld [vmem:[%s2318_s1 + $0x18] sm:$0xff]  ;;  %v1439_v5 = vld [vmem:[%s2318_s1 + $0x10] sm:$0xff] }
   0x3   :  { %1637 = vmatpush.bf16.msra.mxu2 %v1444_v0  ;;  %1638 = vmatpush.bf16.msra.mxu3 %v1444_v0  ;;  %v1438_v6 = vld [vmem:[%s2318_s1 + $0x8] sm:$0xff]  ;;  %v1437_v7 = vld [vmem:[%s2318_s1] sm:$0xff]  ;;  %v1407_v13 = vld [vmem:[%s2320_s0 + $0x10] sm:$0xff] }
   0x4   :  { %v1405_v8 = vld [vmem:[%s2320_s0] sm:$0xff]  ;;  %v1406_v10 = vld [vmem:[%s2320_s0 + $0x8] sm:$0xff]  ;;  %v1415_v14 = vld [vmem:[%s2320_s0 + $0x50] sm:$0xff] }
   0x5   :  { %v1413_v9 = vld [vmem:[%s2320_s0 + $0x40] sm:$0xff]  ;;  %v1414_v11 = vld [vmem:[%s2320_s0 + $0x48] sm:$0xff]  ;;  %v1408_v16 = vld [vmem:[%s2320_s0 + $0x18] sm:$0xff] }
   0x6   :  { %470 = vmatpush.bf16.msra.mxu0 %v1443_v1  ;;  %1639 = vmatpush.bf16.msra.mxu1 %v1443_v1  ;;  %v1421_v12 = vld [vmem:[%s2320_s0 + $0x80] sm:$0xff]  ;;  %v1422_v15 = vld [vmem:[%s2320_s0 + $0x88] sm:$0xff]  ;;  %v1416_v17 = vld [vmem:[%s2320_s0 + $0x58] sm:$0xff] }
   0x7   :  { %1640 = vmatpush.bf16.msra.mxu2 %v1443_v1  ;;  %1641 = vmatpush.bf16.msra.mxu3 %v1443_v1  ;;  %v1423_v18 = vld [vmem:[%s2320_s0 + $0x90] sm:$0xff]  ;;  %v1429_v19 = vld [vmem:[%s2320_s0 + $0xc0] sm:$0xff]  ;;  %v1424_v22 = vld [vmem:[%s2320_s0 + $0x98] sm:$0xff] }
   0x8   :  { %v1409_v20 = vld [vmem:[%s2320_s0 + $0x20] sm:$0xff]  ;;  %v1430_v23 = vld [vmem:[%s2320_s0 + $0xc8] sm:$0xff]  ;;  %v1431_v27 = vld [vmem:[%s2320_s0 + $0xd0] sm:$0xff] }
   0x9   :  { %v1417_v21 = vld [vmem:[%s2320_s0 + $0x60] sm:$0xff]  ;;  %v1410_v24 = vld [vmem:[%s2320_s0 + $0x28] sm:$0xff]  ;;  %v1411_v28 = vld [vmem:[%s2320_s0 + $0x30] sm:$0xff] }
   0xa   :  { %471 = vmatpush.bf16.msra.mxu0 %v1442_v2  ;;  %1642 = vmatpush.bf16.msra.mxu1 %v1442_v2  ;;  %v1418_v25 = vld [vmem:[%s2320_s0 + $0x68] sm:$0xff]  ;;  %v1425_v26 = vld [vmem:[%s2320_s0 + $0xa0] sm:$0xff]  ;;  %v1419_v29 = vld [vmem:[%s2320_s0 + $0x70] sm:$0xff] }
   0xb   :  { %1643 = vmatpush.bf16.msra.mxu2 %v1442_v2  ;;  %1644 = vmatpush.bf16.msra.mxu3 %v1442_v2  ;;  %v1426_v30 = vld [vmem:[%s2320_s0 + $0xa8] sm:$0xff]  ;;  %v1432_v31 = vld [vmem:[%s2320_s0 + $0xd8] sm:$0xff]  ;;  %v1427_v34 = vld [vmem:[%s2320_s0 + $0xb0] sm:$0xff] }
   0xc   :  { %v1412_v32 = vld [vmem:[%s2320_s0 + $0x38] sm:$0xff]  ;;  %v1433_v35 = vld [vmem:[%s2320_s0 + $0xe0] sm:$0xff]  ;;  %v1434_v40 = vld [vmem:[%s2320_s0 + $0xe8] sm:$0xff] }
   0xd   :  { %v1420_v33 = vld [vmem:[%s2320_s0 + $0x78] sm:$0xff]  ;;  %v1802_v38 = vld [vmem:[%s2319_s2] ss:$0 sm:$0xff]  ;;  %v1435_v58 = vld [vmem:[%s2320_s0 + $0xf0] sm:$0xff] }
   0xe   :  { %472 = vmatpush.bf16.msra.mxu0 %v1441_v3  ;;  %1645 = vmatpush.bf16.msra.mxu1 %v1441_v3  ;;  %v1428_v39 = vld [vmem:[%s2320_s0 + $0xb8] sm:$0xff] }
   0xf   :  { %1646 = vmatpush.bf16.msra.mxu2 %v1441_v3  ;;  %1647 = vmatpush.bf16.msra.mxu3 %v1441_v3 }
  0x12   :  { %473 = vmatpush.bf16.msra.mxu0 %v1440_v4  ;;  %1648 = vmatpush.bf16.msra.mxu1 %v1440_v4 }
  0x13   :  { %1649 = vmatpush.bf16.msra.mxu2 %v1440_v4  ;;  %1650 = vmatpush.bf16.msra.mxu3 %v1440_v4 }
  0x16   :  { %474 = vmatpush.bf16.msra.mxu0 %v1439_v5  ;;  %1651 = vmatpush.bf16.msra.mxu1 %v1439_v5 }
  0x17   :  { %1652 = vmatpush.bf16.msra.mxu2 %v1439_v5  ;;  %1653 = vmatpush.bf16.msra.mxu3 %v1439_v5 }
  0x1a   :  { %475 = vmatpush.bf16.msra.mxu0 %v1438_v6  ;;  %1654 = vmatpush.bf16.msra.mxu1 %v1438_v6 }
  0x1b   :  { %1655 = vmatpush.bf16.msra.mxu2 %v1438_v6  ;;  %1656 = vmatpush.bf16.msra.mxu3 %v1438_v6 }
  0x1e   :  { %476 = vmatpush.bf16.msra.mxu0 %v1437_v7  ;;  %1657 = vmatpush.bf16.msra.mxu1 %v1437_v7 }
  0x1f   :  { %1658 = vmatpush.bf16.msra.mxu2 %v1437_v7  ;;  %1659 = vmatpush.bf16.msra.mxu3 %v1437_v7 }
  0x21   :  { %477 = vmatmul.bf16.vlgmr.msra.gmra.mxu0 %v1405_v8  ;;  %517 = vmatmul.bf16.vlgmr.msra.gmra.mxu1 %v1413_v9 }
  0x22   :  { %557 = vmatmul.bf16.vlgmr.msra.gmra.mxu2 %v1421_v12  ;;  %597 = vmatmul.bf16.vlgmr.msra.gmra.mxu3 %v1429_v19  ;;  %v1436_v12 = vld [vmem:[%s2320_s0 + $0xf8] sm:$0xff] }
  0x31   :  { %482 = vmatmul.bf16.gmra.mxu0 %v1406_v10  ;;  %522 = vmatmul.bf16.gmra.mxu1 %v1414_v11 }
  0x32   :  { %562 = vmatmul.bf16.gmra.mxu2 %v1422_v15  ;;  %602 = vmatmul.bf16.gmra.mxu3 %v1430_v23 }
  0x41   :  { %487 = vmatmul.bf16.gmra.mxu0 %v1407_v13  ;;  %527 = vmatmul.bf16.gmra.mxu1 %v1415_v14 }
  0x42   :  { %567 = vmatmul.bf16.gmra.mxu2 %v1423_v18  ;;  %607 = vmatmul.bf16.gmra.mxu3 %v1431_v27 }
  0x51   :  { %492 = vmatmul.bf16.gmra.mxu0 %v1408_v16  ;;  %532 = vmatmul.bf16.gmra.mxu1 %v1416_v17 }
  0x52   :  { %572 = vmatmul.bf16.gmra.mxu2 %v1424_v22  ;;  %612 = vmatmul.bf16.gmra.mxu3 %v1432_v31 }
  0x61   :  { %497 = vmatmul.bf16.gmra.mxu0 %v1409_v20  ;;  %537 = vmatmul.bf16.gmra.mxu1 %v1417_v21 }
  0x62   :  { %577 = vmatmul.bf16.gmra.mxu2 %v1425_v26  ;;  %617 = vmatmul.bf16.gmra.mxu3 %v1433_v35 }
  0x71   :  { %502 = vmatmul.bf16.gmra.mxu0 %v1410_v24  ;;  %542 = vmatmul.bf16.gmra.mxu1 %v1418_v25 }
  0x72   :  { %582 = vmatmul.bf16.gmra.mxu2 %v1426_v30  ;;  %622 = vmatmul.bf16.gmra.mxu3 %v1434_v40 }
  0x81   :  { %507 = vmatmul.bf16.gmra.mxu0 %v1411_v28  ;;  %547 = vmatmul.bf16.gmra.mxu1 %v1419_v29 }
  0x82   :  { %587 = vmatmul.bf16.gmra.mxu2 %v1427_v34  ;;  %627 = vmatmul.bf16.gmra.mxu3 %v1435_v58 }
  0x91   :  { %512 = vmatmul.bf16.gmra.mxu0 %v1412_v32  ;;  %552 = vmatmul.bf16.gmra.mxu1 %v1420_v33 }
  0x92   :  { %592 = vmatmul.bf16.gmra.mxu2 %v1428_v39  ;;  %632 = vmatmul.bf16.gmra.mxu3 %v1436_v12 }
  0x9e   :  { %v478_v36 = vpop.f32.mrf.mxu0  ;;  %v518_v37 = vpop.f32.mrf.mxu1 }
  0x9f   :  { %v837_v41 = vadd.f32 %v1802_v38, %v478_v36  ;;  %v1812_v42 = vadd.f32 %v1802_v38, %v518_v37 }
  0xa1   :  { %v1098_v47 = vmul.f32 %v837_v41, %v837_v41 }
  0xa5   :  { %v558_v1 = vpop.f32.mrf.mxu2  ;;  %v598_v36 = vpop.f32.mrf.mxu3 }
  0xa6   :  { %v480_v43 = vpop.f32.mrf.mxu0  ;;  %v520_v44 = vpop.f32.mrf.mxu1  ;;  %v1850_v9 = vadd.f32 %v1802_v38, %v558_v1 }
  0xa7   :  { %v838_v45 = vadd.f32 %v1802_v38, %v480_v43  ;;  %v1816_v46 = vadd.f32 %v1802_v38, %v520_v44  ;;  %v1922_v44 = vadd.f32 %v1802_v38, %v598_v36 }
  0xa9   :  { %v1448_v48 = vpack.c.bf16 %v838_v45, %v837_v41  ;;  %v1029_v49 = vadd.f32 %v838_v45, %v837_v41  ;;  %v1099_v50 = vmul.f32 %v838_v45, %v838_v45  ;;  %v1488_v51 = vpack.c.bf16 %v1816_v46, %v1812_v42 }
  0xab   :  { %1449 = vst [vmem:[%s2321_s3] sm:$0xff] %v1448_v48   ;;  %v1162_v52 = vadd.f32 %v1099_v50, %v1098_v47 }
  0xac   :  { %1612 = vst [vmem:[%s2321_s3 + $0x40] sm:$0xff] %v1488_v51  }
  0xad   :  { %v560_v10 = vpop.f32.mrf.mxu2  ;;  %v600_v47 = vpop.f32.mrf.mxu3 }
  0xae   :  { %v483_v53 = vpop.f32.mrf.mxu0  ;;  %v523_v54 = vpop.f32.mrf.mxu1  ;;  %v1853_v11 = vadd.f32 %v1802_v38, %v560_v10 }
  0xaf   :  { %v839_v55 = vadd.f32 %v1802_v38, %v483_v53  ;;  %v1831_v60 = vadd.f32 %v1802_v38, %v523_v54 }
  0xb0   :  { %v1528_v13 = vpack.c.bf16 %v1853_v11, %v1850_v9 }
  0xb1   :  { %v1030_v56 = vadd.f32 %v1029_v49, %v839_v55  ;;  %v1100_v57 = vmul.f32 %v839_v55, %v839_v55  ;;  %v1928_v49 = vadd.f32 %v1802_v38, %v600_v47 }
  0xb2   :  { %1620 = vst [vmem:[%s2321_s3 + $0x80] sm:$0xff] %v1528_v13  }
  0xb3   :  { %v1163_v59 = vadd.f32 %v1162_v52, %v1100_v57  ;;  %v1568_v51 = vpack.c.bf16 %v1928_v49, %v1922_v44 }
  0xb5   :  { %v563_v20 = vpop.f32.mrf.mxu2  ;;  %1628 = vst [vmem:[%s2321_s3 + $0xc0] sm:$0xff] %v1568_v51  }
  0xb6   :  { %v485_v61 = vpop.f32.mrf.mxu0  ;;  %v525_v62 = vpop.f32.mrf.mxu1  ;;  %v1886_v25 = vadd.f32 %v1802_v38, %v563_v20 }
  0xb7   :  { %v840_v63 = vadd.f32 %v1802_v38, %v485_v61  ;;  %v1835_v0 = vadd.f32 %v1802_v38, %v525_v62 }
  0xb9   :  { %v1453_v2 = vpack.c.bf16 %v840_v63, %v839_v55  ;;  %v1837_v3 = vadd.f32 %v1030_v56, %v840_v63  ;;  %v1101_v4 = vmul.f32 %v840_v63, %v840_v63  ;;  %v1493_v5 = vpack.c.bf16 %v1835_v0, %v1831_v60 }
  0xbb   :  { %1605 = vst [vmem:[%s2321_s3 + $0x8] sm:$0xff] %v1453_v2   ;;  %v1844_v6 = vadd.f32 %v1163_v59, %v1101_v4  ;;  %v603_v59 = vpop.f32.mrf.mxu3 }
  0xbc   :  { %1613 = vst [vmem:[%s2321_s3 + $0x48] sm:$0xff] %v1493_v5   ;;  %v1966_v4 = vadd.f32 %v1802_v38, %v603_v59 }
  0xbd   :  { %v565_v26 = vpop.f32.mrf.mxu2 }
  0xbe   :  { %v488_v7 = vpop.f32.mrf.mxu0  ;;  %v528_v8 = vpop.f32.mrf.mxu1  ;;  %v1889_v27 = vadd.f32 %v1802_v38, %v565_v26 }
  0xbf   :  { %v1864_v14 = vadd.f32 %v1802_v38, %v528_v8  ;;  %v1867_v17 = vadd.f32 %v1802_v38, %v488_v7 }
  0xc0   :  { %v1533_v28 = vpack.c.bf16 %v1889_v27, %v1886_v25 }
  0xc1   :  { %v1032_v51 = vadd.f32 %v1837_v3, %v1867_v17 }
  0xc2   :  { %1621 = vst [vmem:[%s2321_s3 + $0x88] sm:$0xff] %v1533_v28  }
  0xc3   :  { %v605_v7 = vpop.f32.mrf.mxu3 }
  0xc4   :  { %v1972_v10 = vadd.f32 %v1802_v38, %v605_v7 }
  0xc5   :  { %v568_v35 = vpop.f32.mrf.mxu2 }
  0xc6   :  { %v490_v15 = vpop.f32.mrf.mxu0  ;;  %v530_v16 = vpop.f32.mrf.mxu1  ;;  %v1919_v43 = vadd.f32 %v1802_v38, %v568_v35  ;;  %v1573_v13 = vpack.c.bf16 %v1972_v10, %v1966_v4 }
  0xc7   :  { %v1870_v18 = vadd.f32 %v1802_v38, %v490_v15  ;;  %v1873_v19 = vadd.f32 %v1802_v38, %v530_v16 }
  0xc8   :  { %1629 = vst [vmem:[%s2321_s3 + $0xc8] sm:$0xff] %v1573_v13  }
  0xc9   :  { %v1458_v21 = vpack.c.bf16 %v1870_v18, %v1867_v17  ;;  %v1498_v22 = vpack.c.bf16 %v1873_v19, %v1864_v14 }
  0xcb   :  { %1606 = vst [vmem:[%s2321_s3 + $0x10] sm:$0xff] %v1458_v21   ;;  %v608_v26 = vpop.f32.mrf.mxu3 }
  0xcc   :  { %1614 = vst [vmem:[%s2321_s3 + $0x50] sm:$0xff] %v1498_v22  }
  0xcd   :  { %v570_v45 = vpop.f32.mrf.mxu2 }
  0xce   :  { %v493_v23 = vpop.f32.mrf.mxu0  ;;  %v533_v24 = vpop.f32.mrf.mxu1  ;;  %v1925_v48 = vadd.f32 %v1802_v38, %v570_v45  ;;  %v1103_v45 = vmul.f32 %v1870_v18, %v1870_v18 }
  0xcf   :  { %v1897_v29 = vadd.f32 %v1802_v38, %v533_v24  ;;  %v1900_v32 = vadd.f32 %v1802_v38, %v493_v23 }
  0xd0   :  { %v1538_v50 = vpack.c.bf16 %v1925_v48, %v1919_v43 }
  0xd2   :  { %1622 = vst [vmem:[%s2321_s3 + $0x90] sm:$0xff] %v1538_v50  }
  0xd5   :  { %v573_v58 = vpop.f32.mrf.mxu2 }
  0xd6   :  { %v495_v30 = vpop.f32.mrf.mxu0  ;;  %v535_v31 = vpop.f32.mrf.mxu1  ;;  %v1963_v2 = vadd.f32 %v1802_v38, %v573_v58 }
  0xd7   :  { %v1903_v33 = vadd.f32 %v1802_v38, %v495_v30  ;;  %v1906_v34 = vadd.f32 %v1802_v38, %v535_v31  ;;  %v1102_v31 = vmul.f32 %v1867_v17, %v1867_v17 }
  0xd9   :  { %v1463_v37 = vpack.c.bf16 %v1903_v33, %v1900_v32  ;;  %v1503_v39 = vpack.c.bf16 %v1906_v34, %v1897_v29  ;;  %v1105_v3 = vmul.f32 %v1903_v33, %v1903_v33 }
  0xdb   :  { %1607 = vst [vmem:[%s2321_s3 + $0x18] sm:$0xff] %v1463_v37  }
  0xdc   :  { %1615 = vst [vmem:[%s2321_s3 + $0x58] sm:$0xff] %v1503_v39   ;;  %v2009_v39 = vadd.f32 %v1802_v38, %v608_v26 }
  0xdd   :  { %v575_v5 = vpop.f32.mrf.mxu2 }
  0xde   :  { %v498_v40 = vpop.f32.mrf.mxu0  ;;  %v538_v41 = vpop.f32.mrf.mxu1  ;;  %v1969_v8 = vadd.f32 %v1802_v38, %v575_v5 }
  0xdf   :  { %v1938_v52 = vadd.f32 %v1802_v38, %v538_v41  ;;  %v1944_v55 = vadd.f32 %v1802_v38, %v498_v40  ;;  %v610_v41 = vpop.f32.mrf.mxu3 }
  0xe0   :  { %v1543_v12 = vpack.c.bf16 %v1969_v8, %v1963_v2  ;;  %v2017_v50 = vadd.f32 %v1802_v38, %v610_v41 }
  0xe1   :  { %v1106_v5 = vmul.f32 %v1944_v55, %v1944_v55 }
  0xe2   :  { %1623 = vst [vmem:[%s2321_s3 + $0x98] sm:$0xff] %v1543_v12   ;;  %v1578_v59 = vpack.c.bf16 %v2017_v50, %v2009_v39 }
  0xe4   :  { %1630 = vst [vmem:[%s2321_s3 + $0xd0] sm:$0xff] %v1578_v59  }
  0xe5   :  { %v578_v24 = vpop.f32.mrf.mxu2 }
  0xe6   :  { %v500_v53 = vpop.f32.mrf.mxu0  ;;  %v540_v54 = vpop.f32.mrf.mxu1  ;;  %v2006_v37 = vadd.f32 %v1802_v38, %v578_v24 }
  0xe7   :  { %v1947_v56 = vadd.f32 %v1802_v38, %v500_v53  ;;  %v1950_v57 = vadd.f32 %v1802_v38, %v540_v54  ;;  %v1165_v53 = vadd.f32 %v1844_v6, %v1102_v31  ;;  %v1104_v54 = vmul.f32 %v1900_v32, %v1900_v32 }
  0xe9   :  { %v1468_v61 = vpack.c.bf16 %v1947_v56, %v1944_v55  ;;  %v1508_v62 = vpack.c.bf16 %v1950_v57, %v1938_v52 }
  0xeb   :  { %1608 = vst [vmem:[%s2321_s3 + $0x20] sm:$0xff] %v1468_v61   ;;  %v1033_v61 = vadd.f32 %v1032_v51, %v1870_v18 }
  0xec   :  { %1616 = vst [vmem:[%s2321_s3 + $0x60] sm:$0xff] %v1508_v62   ;;  %v1166_v62 = vadd.f32 %v1165_v53, %v1103_v45 }
  0xed   :  { %v580_v40 = vpop.f32.mrf.mxu2  ;;  %v1034_v17 = vadd.f32 %v1033_v61, %v1900_v32  ;;  %v1107_v32 = vmul.f32 %v1947_v56, %v1947_v56 }
  0xee   :  { %v503_v63 = vpop.f32.mrf.mxu0  ;;  %v543_v1 = vpop.f32.mrf.mxu1  ;;  %v2014_v47 = vadd.f32 %v1802_v38, %v580_v40 }
  0xef   :  { %v1982_v15 = vadd.f32 %v1802_v38, %v543_v1  ;;  %v847_v21 = vadd.f32 %v1802_v38, %v503_v63  ;;  %v1167_v63 = vadd.f32 %v1166_v62, %v1104_v54  ;;  %v1035_v24 = vadd.f32 %v1034_v17, %v1903_v33 }
  0xf0   :  { %v1548_v58 = vpack.c.bf16 %v2014_v47, %v2006_v37 }
  0xf1   :  { %v1168_v26 = vadd.f32 %v1167_v63, %v1105_v3  ;;  %v1036_v31 = vadd.f32 %v1035_v24, %v1944_v55 }
  0xf2   :  { %1624 = vst [vmem:[%s2321_s3 + $0xa0] sm:$0xff] %v1548_v58  }
  0xf3   :  { %v1037_v33 = vadd.f32 %v1036_v31, %v1947_v56 }
  0xf5   :  { %v1038_v53 = vadd.f32 %v1037_v33, %v847_v21 }
  0xf6   :  { %v505_v16 = vpop.f32.mrf.mxu0  ;;  %v545_v20 = vpop.f32.mrf.mxu1 }
  0xf7   :  { %v1989_v22 = vadd.f32 %v1802_v38, %v505_v16  ;;  %v1992_v23 = vadd.f32 %v1802_v38, %v545_v20  ;;  %v583_v16 = vpop.f32.mrf.mxu2  ;;  %v613_v20 = vpop.f32.mrf.mxu3 }
  0xf8   :  { %v2064_v54 = vadd.f32 %v1802_v38, %v583_v16  ;;  %v2067_v58 = vadd.f32 %v1802_v38, %v613_v20 }
  0xf9   :  { %v1473_v28 = vpack.c.bf16 %v1989_v22, %v847_v21  ;;  %v1513_v30 = vpack.c.bf16 %v1992_v23, %v1982_v15  ;;  %v1109_v41 = vmul.f32 %v1989_v22, %v1989_v22 }
  0xfb   :  { %1609 = vst [vmem:[%s2321_s3 + $0x28] sm:$0xff] %v1473_v28  }
  0xfc   :  { %1617 = vst [vmem:[%s2321_s3 + $0x68] sm:$0xff] %v1513_v30  }
  0xfe   :  { %v508_v35 = vpop.f32.mrf.mxu0  ;;  %v548_v36 = vpop.f32.mrf.mxu1 }
  0xff   :  { %v2035_v6 = vadd.f32 %v1802_v38, %v548_v36  ;;  %v849_v7 = vadd.f32 %v1802_v38, %v508_v35  ;;  %v1169_v35 = vadd.f32 %v1168_v26, %v1106_v5  ;;  %v1108_v36 = vmul.f32 %v847_v21, %v847_v21  ;;  %v585_v59 = vpop.f32.mrf.mxu2  ;;  %v615_v61 = vpop.f32.mrf.mxu3 }
 0x100   :  { %v2071_v56 = vadd.f32 %v1802_v38, %v585_v59  ;;  %v2074_v17 = vadd.f32 %v1802_v38, %v615_v61  ;;  %v1039_v21 = vadd.f32 %v1038_v53, %v1989_v22  ;;  %v1114_v53 = vmul.f32 %v1812_v42, %v1812_v42 }
 0x101   :  { %v1170_v40 = vadd.f32 %v1169_v35, %v1107_v32  ;;  %v1110_v62 = vmul.f32 %v849_v7, %v849_v7  ;;  %v1115_v61 = vmul.f32 %v1816_v46, %v1816_v46 }
 0x102   :  { %v1583_v5 = vpack.c.bf16 %v2074_v17, %v2067_v58  ;;  %v1040_v16 = vadd.f32 %v1039_v21, %v849_v7  ;;  %v1116_v21 = vmul.f32 %v1831_v60, %v1831_v60 }
 0x103   :  { %v1171_v55 = vadd.f32 %v1170_v40, %v1108_v36 }
 0x104   :  { %1631 = vst [vmem:[%s2321_s3 + $0xd8] sm:$0xff] %v1583_v5  }
 0x105   :  { %v1172_v63 = vadd.f32 %v1171_v55, %v1109_v41 }
 0x106   :  { %v510_v1 = vpop.f32.mrf.mxu0  ;;  %v550_v18 = vpop.f32.mrf.mxu1 }
 0x107   :  { %v850_v12 = vadd.f32 %v1802_v38, %v510_v1  ;;  %v2046_v13 = vadd.f32 %v1802_v38, %v550_v18  ;;  %v1553_v18 = vpack.c.bf16 %v2071_v56, %v2064_v54  ;;  %v1173_v20 = vadd.f32 %v1172_v63, %v1110_v62  ;;  %v588_v36 = vpop.f32.mrf.mxu2  ;;  %v618_v33 = vpop.f32.mrf.mxu3 }
 0x109   :  { %v1478_v28 = vpack.c.bf16 %v850_v12, %v849_v7  ;;  %v1518_v30 = vpack.c.bf16 %v2046_v13, %v2035_v6  ;;  %v1111_v1 = vmul.f32 %v850_v12, %v850_v12  ;;  %1625 = vst [vmem:[%s2321_s3 + $0xa8] sm:$0xff] %v1553_v18   ;;  %v1041_v26 = vadd.f32 %v1040_v16, %v850_v12 }
 0x10a   :  { %v2112_v18 = vadd.f32 %v1802_v38, %v588_v36 }
 0x10b   :  { %1610 = vst [vmem:[%s2321_s3 + $0x30] sm:$0xff] %v1478_v28   ;;  %v1174_v22 = vadd.f32 %v1173_v20, %v1111_v1 }
 0x10c   :  { %1618 = vst [vmem:[%s2321_s3 + $0x70] sm:$0xff] %v1518_v30  }
 0x10e   :  { %v513_v45 = vpop.f32.mrf.mxu0  ;;  %v553_v51 = vpop.f32.mrf.mxu1 }
 0x10f   :  { %v851_v3 = vadd.f32 %v1802_v38, %v513_v45  ;;  %v2085_v32 = vadd.f32 %v1802_v38, %v553_v51  ;;  %v590_v5 = vpop.f32.mrf.mxu2  ;;  %v620_v16 = vpop.f32.mrf.mxu3 }
 0x110   :  { %v2118_v20 = vadd.f32 %v1802_v38, %v590_v5 }
 0x111   :  { %v1112_v24 = vmul.f32 %v851_v3, %v851_v3  ;;  %v1042_v31 = vadd.f32 %v1041_v26, %v851_v3 }
 0x113   :  { %v1175_v40 = vadd.f32 %v1174_v22, %v1112_v24  ;;  %v1117_v24 = vmul.f32 %v1835_v0, %v1835_v0  ;;  %v1558_v22 = vpack.c.bf16 %v2118_v20, %v2112_v18 }
 0x115   :  { %1626 = vst [vmem:[%s2321_s3 + $0xb0] sm:$0xff] %v1558_v22  }
 0x116   :  { %v515_v28 = vpop.f32.mrf.mxu0  ;;  %v555_v30 = vpop.f32.mrf.mxu1 }
 0x117   :  { %v852_v7 = vadd.f32 %v1802_v38, %v515_v28  ;;  %v2092_v35 = vadd.f32 %v1802_v38, %v555_v30  ;;  %v1118_v30 = vmul.f32 %v1864_v14, %v1864_v14 }
 0x119   :  { %v1483_v12 = vpack.c.bf16 %v852_v7, %v851_v3  ;;  %v1043_v41 = vadd.f32 %v1042_v31, %v852_v7  ;;  %v1113_v45 = vmul.f32 %v852_v7, %v852_v7  ;;  %v1523_v51 = vpack.c.bf16 %v2092_v35, %v2085_v32 }
 0x11b   :  { %1611 = vst [vmem:[%s2321_s3 + $0x38] sm:$0xff] %v1483_v12   ;;  %v1044_v55 = vadd.f32 %v1043_v41, %v1812_v42  ;;  %v1176_v59 = vadd.f32 %v1175_v40, %v1113_v45  ;;  %v2115_v42 = vadd.f32 %v1802_v38, %v618_v33  ;;  %v1120_v40 = vmul.f32 %v1897_v29, %v1897_v29  ;;  %v593_v41 = vpop.f32.mrf.mxu2  ;;  %v623_v45 = vpop.f32.mrf.mxu3 }
 0x11c   :  { %1619 = vst [vmem:[%s2321_s3 + $0x78] sm:$0xff] %v1523_v51   ;;  %v1121_v51 = vmul.f32 %v1906_v34, %v1906_v34  ;;  %v2161_v5 = vadd.f32 %v1802_v38, %v623_v45  ;;  %v1129_v45 = vmul.f32 %v2092_v35, %v2092_v35 }
 0x11d   :  { %v1045_v62 = vadd.f32 %v1044_v55, %v1816_v46  ;;  %v1177_v3 = vadd.f32 %v1176_v59, %v1114_v53  ;;  %v2121_v46 = vadd.f32 %v1802_v38, %v620_v16 }
 0x11f   :  { %v1046_v63 = vadd.f32 %v1045_v62, %v1831_v60  ;;  %v1178_v1 = vadd.f32 %v1177_v3, %v1115_v61  ;;  %v1588_v28 = vpack.c.bf16 %v2121_v46, %v2115_v42  ;;  %v1123_v62 = vmul.f32 %v1950_v57, %v1950_v57 }
 0x121   :  { %v1047_v60 = vadd.f32 %v1046_v63, %v1835_v0  ;;  %v1179_v26 = vadd.f32 %v1178_v1, %v1116_v21  ;;  %v1119_v0 = vmul.f32 %v1873_v19, %v1873_v19  ;;  %1632 = vst [vmem:[%s2321_s3 + $0xe0] sm:$0xff] %v1588_v28   ;;  %v1124_v21 = vmul.f32 %v1982_v15, %v1982_v15 }
 0x123   :  { %v1048_v31 = vadd.f32 %v1047_v60, %v1864_v14  ;;  %v1180_v7 = vadd.f32 %v1179_v26, %v1117_v24  ;;  %v625_v16 = vpop.f32.mrf.mxu3  ;;  %v1125_v60 = vmul.f32 %v1992_v23, %v1992_v23 }
 0x125   :  { %v1049_v36 = vadd.f32 %v1048_v31, %v1873_v19  ;;  %v1181_v33 = vadd.f32 %v1180_v7, %v1118_v30  ;;  %v1122_v19 = vmul.f32 %v1938_v52, %v1938_v52  ;;  %v1126_v31 = vmul.f32 %v2035_v6, %v2035_v6 }
 0x127   :  { %v1182_v12 = vadd.f32 %v1181_v33, %v1119_v0  ;;  %v1050_v14 = vadd.f32 %v1049_v36, %v1897_v29  ;;  %v1127_v36 = vmul.f32 %v2046_v13, %v2046_v13 }
 0x129   :  { %v1051_v53 = vadd.f32 %v1050_v14, %v1906_v34  ;;  %v1183_v55 = vadd.f32 %v1182_v12, %v1120_v40  ;;  %v2158_v34 = vadd.f32 %v1802_v38, %v593_v41 }
 0x12b   :  { %v1052_v59 = vadd.f32 %v1051_v53, %v1938_v52  ;;  %v1184_v61 = vadd.f32 %v1183_v55, %v1121_v51  ;;  %v595_v52 = vpop.f32.mrf.mxu2  ;;  %v628_v12 = vpop.f32.mrf.mxu3  ;;  %v1131_v55 = vmul.f32 %v1853_v11, %v1853_v11 }
 0x12c   :  { %v2164_v24 = vadd.f32 %v1802_v38, %v595_v52 }
 0x12d   :  { %v1053_v3 = vadd.f32 %v1052_v59, %v1950_v57  ;;  %v1185_v29 = vadd.f32 %v1184_v61, %v1122_v19  ;;  %v2167_v57 = vadd.f32 %v1802_v38, %v625_v16  ;;  %v1135_v16 = vmul.f32 %v1925_v48, %v1925_v48 }
 0x12e   :  { %v1563_v22 = vpack.c.bf16 %v2164_v24, %v2158_v34 }
 0x12f   :  { %v1054_v63 = vadd.f32 %v1053_v3, %v1982_v15  ;;  %v1186_v1 = vadd.f32 %v1185_v29, %v1123_v62  ;;  %v1593_v28 = vpack.c.bf16 %v2167_v57, %v2161_v5 }
 0x130   :  { %1627 = vst [vmem:[%s2321_s3 + $0xb8] sm:$0xff] %v1563_v22  }
 0x131   :  { %v1055_v15 = vadd.f32 %v1054_v63, %v1992_v23  ;;  %v1187_v26 = vadd.f32 %v1186_v1, %v1124_v21  ;;  %1633 = vst [vmem:[%s2321_s3 + $0xe8] sm:$0xff] %v1593_v28  }
 0x133   :  { %v1056_v30 = vadd.f32 %v1055_v15, %v2035_v6  ;;  %v1188_v7 = vadd.f32 %v1187_v26, %v1125_v60  ;;  %v1128_v6 = vmul.f32 %v2085_v32, %v2085_v32  ;;  %v630_v3 = vpop.f32.mrf.mxu3  ;;  %v1136_v15 = vmul.f32 %v1963_v2, %v1963_v2 }
 0x134   :  { %v2207_v29 = vadd.f32 %v1802_v38, %v630_v3 }
 0x135   :  { %v1189_v0 = vadd.f32 %v1188_v7, %v1126_v31  ;;  %v1057_v23 = vadd.f32 %v1056_v30, %v2046_v13  ;;  %v1130_v13 = vmul.f32 %v1850_v9, %v1850_v9  ;;  %v1138_v7 = vmul.f32 %v2006_v37, %v2006_v37 }
 0x137   :  { %v1190_v33 = vadd.f32 %v1189_v0, %v1127_v36  ;;  %v1058_v40 = vadd.f32 %v1057_v23, %v2085_v32  ;;  %v1132_v32 = vmul.f32 %v1886_v25, %v1886_v25 }
 0x139   :  { %v1191_v14 = vadd.f32 %v1190_v33, %v1128_v6  ;;  %v1059_v41 = vadd.f32 %v1058_v40, %v2092_v35  ;;  %v2204_v35 = vadd.f32 %v1802_v38, %v628_v12  ;;  %v1140_v33 = vmul.f32 %v2064_v54, %v2064_v54 }
 0x13b   :  { %v1060_v51 = vadd.f32 %v1059_v41, %v1850_v9  ;;  %v1192_v53 = vadd.f32 %v1191_v14, %v1129_v45  ;;  %v1133_v9 = vmul.f32 %v1889_v27, %v1889_v27  ;;  %v1598_v63 = vpack.c.bf16 %v2207_v29, %v2204_v35  ;;  %v633_v28 = vpop.f32.mrf.mxu3 }
 0x13c   :  { %v1141_v41 = vmul.f32 %v2071_v56, %v2071_v56 }
 0x13d   :  { %v1061_v19 = vadd.f32 %v1060_v51, %v1853_v11  ;;  %v1193_v59 = vadd.f32 %v1192_v53, %v1130_v13  ;;  %1634 = vst [vmem:[%s2321_s3 + $0xf0] sm:$0xff] %v1598_v63   ;;  %v1142_v51 = vmul.f32 %v2112_v18, %v2112_v18 }
 0x13f   :  { %v1062_v61 = vadd.f32 %v1061_v19, %v1886_v25  ;;  %v1194_v62 = vadd.f32 %v1193_v59, %v1131_v55  ;;  %v1134_v25 = vmul.f32 %v1919_v43, %v1919_v43  ;;  %v1144_v59 = vmul.f32 %v2158_v34, %v2158_v34 }
 0x141   :  { %v1063_v21 = vadd.f32 %v1062_v61, %v1889_v27  ;;  %v1195_v11 = vadd.f32 %v1194_v62, %v1132_v32  ;;  %v1146_v62 = vmul.f32 %v1922_v44, %v1922_v44 }
 0x143   :  { %v1064_v1 = vadd.f32 %v1063_v21, %v1919_v43  ;;  %v1196_v52 = vadd.f32 %v1195_v11, %v1133_v9  ;;  %v1137_v43 = vmul.f32 %v1969_v8, %v1969_v8  ;;  %v635_v12 = vpop.f32.mrf.mxu3 }
 0x144   :  { %v2242_v14 = vadd.f32 %v1802_v38, %v635_v12  ;;  %v1159_v12 = vmul.f32 %v2207_v29, %v2207_v29 }
 0x145   :  { %v1197_v60 = vadd.f32 %v1196_v52, %v1134_v25  ;;  %v1065_v27 = vadd.f32 %v1064_v1, %v1925_v48  ;;  %v1139_v48 = vmul.f32 %v2014_v47, %v2014_v47 }
 0x147   :  { %v1066_v26 = vadd.f32 %v1065_v27, %v1963_v2  ;;  %v1198_v22 = vadd.f32 %v1197_v60, %v1135_v16 }
 0x149   :  { %v1067_v30 = vadd.f32 %v1066_v26, %v1969_v8  ;;  %v1199_v31 = vadd.f32 %v1198_v22, %v1136_v15  ;;  %v2239_v8 = vadd.f32 %v1802_v38, %v633_v28 }
 0x14b   :  { %v1068_v0 = vadd.f32 %v1067_v30, %v2006_v37  ;;  %v1200_v23 = vadd.f32 %v1199_v31, %v1137_v43  ;;  %v1603_v45 = vpack.c.bf16 %v2242_v14, %v2239_v8 }
 0x14d   :  { %v1069_v36 = vadd.f32 %v1068_v0, %v2014_v47  ;;  %v1201_v2 = vadd.f32 %v1200_v23, %v1138_v7  ;;  %1635 = vst [vmem:[%s2321_s3 + $0xf8] sm:$0xff] %v1603_v45   ;;  %v1161_v45 = vmul.f32 %v2242_v14, %v2242_v14 }
 0x14f   :  { %v1070_v40 = vadd.f32 %v1069_v36, %v2064_v54  ;;  %v1202_v6 = vadd.f32 %v1201_v2, %v1139_v48  ;;  %v1157_v36 = vmul.f32 %v2167_v57, %v2167_v57 }
 0x151   :  { %v1071_v37 = vadd.f32 %v1070_v40, %v2071_v56  ;;  %v1203_v47 = vadd.f32 %v1202_v6, %v1140_v33  ;;  %v1143_v56 = vmul.f32 %v2118_v20, %v2118_v20  ;;  %v1158_v40 = vmul.f32 %v2204_v35, %v2204_v35 }
 0x153   :  { %v1204_v13 = vadd.f32 %v1203_v47, %v1141_v41  ;;  %v1072_v54 = vadd.f32 %v1071_v37, %v2112_v18  ;;  %v1145_v18 = vmul.f32 %v2164_v24, %v2164_v24  ;;  %v1160_v41 = vmul.f32 %v2239_v8, %v2239_v8 }
 0x155   :  { %v1205_v38 = vadd.f32 %v1204_v13, %v1142_v51  ;;  %v1073_v53 = vadd.f32 %v1072_v54, %v2118_v20  ;;  %v1147_v20 = vmul.f32 %v1928_v49, %v1928_v49 }
 0x157   :  { %v1206_v55 = vadd.f32 %v1205_v38, %v1143_v56  ;;  %v1074_v19 = vadd.f32 %v1073_v53, %v2158_v34  ;;  %v1148_v34 = vmul.f32 %v1966_v4, %v1966_v4 }
 0x159   :  { %v1207_v32 = vadd.f32 %v1206_v55, %v1144_v59  ;;  %v1075_v61 = vadd.f32 %v1074_v19, %v2164_v24  ;;  %v1149_v24 = vmul.f32 %v1972_v10, %v1972_v10 }
 0x15b   :  { %v1076_v3 = vadd.f32 %v1075_v61, %v1922_v44  ;;  %v1208_v9 = vadd.f32 %v1207_v32, %v1145_v18  ;;  %v1150_v44 = vmul.f32 %v2009_v39, %v2009_v39 }
 0x15d   :  { %v1077_v21 = vadd.f32 %v1076_v3, %v1928_v49  ;;  %v1209_v11 = vadd.f32 %v1208_v9, %v1146_v62  ;;  %v1151_v49 = vmul.f32 %v2017_v50, %v2017_v50 }
 0x15f   :  { %v1078_v63 = vadd.f32 %v1077_v21, %v1966_v4  ;;  %v1210_v25 = vadd.f32 %v1209_v11, %v1147_v20  ;;  %v1152_v4 = vmul.f32 %v2067_v58, %v2067_v58 }
 0x161   :  { %v1079_v1 = vadd.f32 %v1078_v63, %v1972_v10  ;;  %v1211_v52 = vadd.f32 %v1210_v25, %v1148_v34  ;;  %v1153_v10 = vmul.f32 %v2074_v17, %v2074_v17 }
 0x163   :  { %v1080_v16 = vadd.f32 %v1079_v1, %v2009_v39  ;;  %v1212_v60 = vadd.f32 %v1211_v52, %v1149_v24  ;;  %v1154_v39 = vmul.f32 %v2115_v42, %v2115_v42 }
 0x165   :  { %v1213_v27 = vadd.f32 %v1212_v60, %v1150_v44  ;;  %v1081_v15 = vadd.f32 %v1080_v16, %v2017_v50  ;;  %v1155_v50 = vmul.f32 %v2121_v46, %v2121_v46 }
 0x167   :  { %v1082_v26 = vadd.f32 %v1081_v15, %v2067_v58  ;;  %v1214_v22 = vadd.f32 %v1213_v27, %v1151_v49  ;;  %v1156_v58 = vmul.f32 %v2161_v5, %v2161_v5 }
 0x169   :  { %v1083_v28 = vadd.f32 %v1082_v26, %v2074_v17  ;;  %v1215_v43 = vadd.f32 %v1214_v22, %v1152_v4 }
 0x16b   :  { %v1084_v30 = vadd.f32 %v1083_v28, %v2115_v42  ;;  %v1216_v31 = vadd.f32 %v1215_v43, %v1153_v10 }
 0x16d   :  { %v1085_v7 = vadd.f32 %v1084_v30, %v2121_v46  ;;  %v1217_v0 = vadd.f32 %v1216_v31, %v1154_v39 }
 0x16f   :  { %v1086_v23 = vadd.f32 %v1085_v7, %v2161_v5  ;;  %v1218_v48 = vadd.f32 %v1217_v0, %v1155_v50 }
 0x171   :  { %v1087_v17 = vadd.f32 %v1086_v23, %v2167_v57  ;;  %v1219_v2 = vadd.f32 %v1218_v48, %v1156_v58 }
 0x173   :  { %v1220_v42 = vadd.f32 %v1219_v2, %v1157_v36  ;;  %v1088_v33 = vadd.f32 %v1087_v17, %v2204_v35 }
 0x175   :  { %v1221_v46 = vadd.f32 %v1220_v42, %v1158_v40  ;;  %v1089_v6 = vadd.f32 %v1088_v33, %v2207_v29 }
 0x177   :  { %v1222_v5 = vadd.f32 %v1221_v46, %v1159_v12  ;;  %v1090_v37 = vadd.f32 %v1089_v6, %v2239_v8 }
 0x179   :  { %v1223_v57 = vadd.f32 %v1222_v5, %v1160_v41  ;;  %v1091_v47 = vadd.f32 %v1090_v37, %v2242_v14 }
 0x17b   :  { %v1092_v13 = vrot.slane %v1091_v47, 4  ;;  %v1224_v35 = vadd.f32 %v1223_v57, %v1161_v45 }
 0x17d   :  { %v1093_v54 = vadd.f32 %v1092_v13, %v1091_v47  ;;  %v1225_v51 = vrot.slane %v1224_v35, 4 }
 0x17f   :  { %v1094_v38 = vrot.slane %v1093_v54, 2  ;;  %v1226_v53 = vadd.f32 %v1225_v51, %v1224_v35 }
 0x181   :  { %v1095_v56 = vadd.f32 %v1094_v38, %v1093_v54  ;;  %v1227_v29 = vrot.slane %v1226_v53, 2 }
 0x183   :  { %v1096_v55 = vrot.slane %v1095_v56, 1  ;;  %v1228_v19 = vadd.f32 %v1227_v29, %v1226_v53 }
 0x185   :  { %v1097_v59 = vadd.f32 %v1096_v55, %v1095_v56  ;;  %v1229_v32 = vrot.slane %v1228_v19, 1 }
 0x187   :  { %v1230_v61 = vadd.f32 %v1229_v32, %v1228_v19  ;;  %1231 = vst [vmem:[%s2322_s4] sm:$0xff] %v1097_v59 }
 0x189   :  { %1232 = vst [vmem:[%s2323_s5] sm:$0xff] %v1230_v61 }

// kernel: local_enhancer_forward.83
= control target key start
LH: loop header
LB: loop body
LE: loop exit
PB: predicated region body
PF: predicated region fallthrough
CT: control target
= control target key end

     0   :  { %s3618_s12 = smov 0   ;;  %s3620_s13 = smov 0   ;;  %s4152_s0 = inlined_call_operand.vmem [shape: bf16[2048,512], index: 0, kind: input, shape index: {}]   ;;  %s4153_s1 = inlined_call_operand.vmem [shape: bf16[512,128], index: 1, kind: input, shape index: {}]   ;;  %s4154_s2 = inlined_call_operand.vmem [shape: f32[1,128], index: 2, kind: input, shape index: {}]   ;;  %s4155_s3 = inlined_call_operand.vmem [shape: f32[2048,128], index: 3, kind: output, shape index: {}]  }
   0x1   :  { %s3622_s14 = smov 0  }
   0x2 LB: > { %s32_s15 = sadd.s32 1, %s3592_s13  ;;  %p2610_p0 = scmp.ge.s32.totalorder %s3596_s14, 1  ;;  %s3596_s14 = sphi %s3622_s14, %s13_s14   ;;  %s3592_s13 = sphi %s3620_s13, %s4157_s13   ;;  %s3588_s12 = sphi %s3618_s12, %s4156_s12  }
   0x3   : > { %p34_p1 = scmp.ge.s32.totalorder %s32_s15, 4  ;;  %p191_p2 = scmp.lt.s32.totalorder %s3596_s14, 5 }
   0x5   : > { %s4159_s15 = smov (%p34_p1, %s32_s15), 0  ;;  %p192_p3 = pnand %p2610_p0, %p191_p2 }
   0x6   : > { %s2611_s17 = sshll.u32 (!%p192_p3), %s3588_s12, 6 }
   0x7   : > { %195 = sbr.rel (%p192_p3) target bundleno = 696 (0x2b8), region = 32  ;;  %p236_p4 = scmp.lt.s32.totalorder (!%p192_p3), %s2611_s17, 255 }
   0xc   : > { %v3394_v0 = vld [vmem:[%s4153_s1 + $0x38] sm:$0xff]  ;;  %v3393_v4 = vld [vmem:[%s4153_s1 + $0x30] sm:$0xff]  ;;  %v3392_v8 = vld [vmem:[%s4153_s1 + $0x28] sm:$0xff]  ;;  %s4161_s17 = smov (!%p236_p4, %s2611_s17), 255 }
   0xd   : > { %v3402_v1 = vld [vmem:[%s4153_s1 + $0x78] sm:$0xff]  ;;  %1423 = vmatpush.bf16.msra.mxu0 %v3394_v0  ;;  %v3401_v5 = vld [vmem:[%s4153_s1 + $0x70] sm:$0xff]  ;;  %v3400_v9 = vld [vmem:[%s4153_s1 + $0x68] sm:$0xff]  ;;  %s3258_s19 = sshll.u32 %s4161_s17, 4  ;;  %s2615_s18 = sshll.u32 %s4161_s17, 3 }
   0xe   : > { %v3410_v2 = vld [vmem:[%s4153_s1 + $0xb8] sm:$0xff]  ;;  %1592 = vmatpush.bf16.msra.mxu1 %v3402_v1  ;;  %v3409_v6 = vld [vmem:[%s4153_s1 + $0xb0] sm:$0xff]  ;;  %v3408_v10 = vld [vmem:[%s4153_s1 + $0xa8] sm:$0xff]  ;;  %s3723_s12 = scalar_lea.vmem %s4152_s0, %s3258_s19  ;;  %s3833_s21 = scalar_lea.vmem %s4155_s3, %s2615_s18 }
   0xf   : > { %v3418_v3 = vld [vmem:[%s4153_s1 + $0xf8] sm:$0xff]  ;;  %1761 = vmatpush.bf16.msra.mxu2 %v3410_v2  ;;  %v3417_v7 = vld [vmem:[%s4153_s1 + $0xf0] sm:$0xff]  ;;  %v3416_v11 = vld [vmem:[%s4153_s1 + $0xe8] sm:$0xff] }
  0x10   : > { %1930 = vmatpush.bf16.msra.mxu3 %v3418_v3  ;;  %v3391_v12 = vld [vmem:[%s4153_s1 + $0x20] sm:$0xff]  ;;  %v3390_v16 = vld [vmem:[%s4153_s1 + $0x18] sm:$0xff]  ;;  %v3389_v20 = vld [vmem:[%s4153_s1 + $0x10] sm:$0xff] }
  0x11   : > { %1424 = vmatpush.bf16.msra.mxu0 %v3393_v4  ;;  %v3399_v13 = vld [vmem:[%s4153_s1 + $0x60] sm:$0xff]  ;;  %v3398_v17 = vld [vmem:[%s4153_s1 + $0x58] sm:$0xff]  ;;  %v3397_v21 = vld [vmem:[%s4153_s1 + $0x50] sm:$0xff] }
  0x12   : > { %1593 = vmatpush.bf16.msra.mxu1 %v3401_v5  ;;  %v3407_v14 = vld [vmem:[%s4153_s1 + $0xa0] sm:$0xff]  ;;  %v3406_v18 = vld [vmem:[%s4153_s1 + $0x98] sm:$0xff]  ;;  %v3405_v22 = vld [vmem:[%s4153_s1 + $0x90] sm:$0xff] }
  0x13   : > { %1762 = vmatpush.bf16.msra.mxu2 %v3409_v6  ;;  %v3415_v15 = vld [vmem:[%s4153_s1 + $0xe0] sm:$0xff]  ;;  %v3414_v19 = vld [vmem:[%s4153_s1 + $0xd8] sm:$0xff]  ;;  %v3413_v23 = vld [vmem:[%s4153_s1 + $0xd0] sm:$0xff] }
  0x14   : > { %1931 = vmatpush.bf16.msra.mxu3 %v3417_v7  ;;  %v3388_v24 = vld [vmem:[%s4153_s1 + $0x8] sm:$0xff]  ;;  %v3387_v28 = vld [vmem:[%s4153_s1] sm:$0xff]  ;;  %v3261_v33 = vld [vmem:[%s3723_s12 + $0xc] sm:$0xf0] }
  0x15   : > { %1425 = vmatpush.bf16.msra.mxu0 %v3392_v8  ;;  %v3396_v25 = vld [vmem:[%s4153_s1 + $0x48] sm:$0xff]  ;;  %v3395_v29 = vld [vmem:[%s4153_s1 + $0x40] sm:$0xff]  ;;  %v2620_v35 = vld [vmem:[%s3723_s12 + $0x10] sm:$0xf0] }
  0x16   : > { %1594 = vmatpush.bf16.msra.mxu1 %v3400_v9  ;;  %v3404_v26 = vld [vmem:[%s4153_s1 + $0x88] sm:$0xff]  ;;  %v3403_v30 = vld [vmem:[%s4153_s1 + $0x80] sm:$0xff]  ;;  %v3262_v37 = vld [vmem:[%s3723_s12 + $0x14] sm:$0xf0] }
  0x17   : > { %1763 = vmatpush.bf16.msra.mxu2 %v3408_v10  ;;  %v3412_v27 = vld [vmem:[%s4153_s1 + $0xc8] sm:$0xff]  ;;  %v3411_v31 = vld [vmem:[%s4153_s1 + $0xc0] sm:$0xff]  ;;  %v2628_v39 = vld [vmem:[%s3723_s12 + $0x18] sm:$0xf0] }
  0x18   : > { %1932 = vmatpush.bf16.msra.mxu3 %v3416_v11  ;;  %v2618_v32 = vld [vmem:[%s3723_s12] sm:$0xf]  ;;  %v3259_v34 = vld [vmem:[%s3723_s12 + $0x4] sm:$0xf]  ;;  %v2626_v36 = vld [vmem:[%s3723_s12 + $0x8] sm:$0xf] }
  0x19   : > { %1426 = vmatpush.bf16.msra.mxu0 %v3391_v12  ;;  %v3260_v38 = vld [vmem:[%s3723_s12 + $0xc] sm:$0xf]  ;;  %v2619_v40 = vor.u32 %v3261_v33, %v2618_v32  ;;  %v2623_v41 = vor.u32 %v3259_v34, %v2620_v35  ;;  %v2627_v42 = vor.u32 %v3262_v37, %v2626_v36  ;;  %v2634_v44 = vld [vmem:[%s3723_s12 + $0x20] sm:$0xf]  ;;  %v3265_v45 = vld [vmem:[%s3723_s12 + $0x2c] sm:$0xf0] }
  0x1a   : > { %1595 = vmatpush.bf16.msra.mxu1 %v3399_v13  ;;  %v2631_v43 = vor.u32 %v3260_v38, %v2628_v39  ;;  %v3263_v46 = vld [vmem:[%s3723_s12 + $0x24] sm:$0xf]  ;;  %v2636_v47 = vld [vmem:[%s3723_s12 + $0x30] sm:$0xf0]  ;;  %v2642_v48 = vld [vmem:[%s3723_s12 + $0x28] sm:$0xf]  ;;  %v2635_v52 = vor.u32 %v3265_v45, %v2634_v44 }
  0x1b   : > { %1764 = vmatpush.bf16.msra.mxu2 %v3407_v14  ;;  %v3266_v49 = vld [vmem:[%s3723_s12 + $0x34] sm:$0xf0]  ;;  %v3264_v50 = vld [vmem:[%s3723_s12 + $0x2c] sm:$0xf]  ;;  %v2644_v51 = vld [vmem:[%s3723_s12 + $0x38] sm:$0xf0]  ;;  %v2639_v53 = vor.u32 %v3263_v46, %v2636_v47 }
  0x1c   : > { %1933 = vmatpush.bf16.msra.mxu3 %v3415_v15  ;;  %v2643_v54 = vor.u32 %v3266_v49, %v2642_v48  ;;  %v2647_v55 = vor.u32 %v3264_v50, %v2644_v51  ;;  %v2650_v56 = vld [vmem:[%s3723_s12 + $0x40] sm:$0xf]  ;;  %v3269_v57 = vld [vmem:[%s3723_s12 + $0x4c] sm:$0xf0]  ;;  %v3267_v58 = vld [vmem:[%s3723_s12 + $0x44] sm:$0xf] }
  0x1d   : > { %1427 = vmatpush.bf16.msra.mxu0 %v3390_v16  ;;  %v2652_v59 = vld [vmem:[%s3723_s12 + $0x50] sm:$0xf0]  ;;  %v2658_v60 = vld [vmem:[%s3723_s12 + $0x48] sm:$0xf]  ;;  %v3270_v61 = vld [vmem:[%s3723_s12 + $0x54] sm:$0xf0]  ;;  %v2651_v0 = vor.u32 %v3269_v57, %v2650_v56 }
  0x1e   : > { %1596 = vmatpush.bf16.msra.mxu1 %v3398_v17  ;;  %v3268_v62 = vld [vmem:[%s3723_s12 + $0x4c] sm:$0xf]  ;;  %v2660_v63 = vld [vmem:[%s3723_s12 + $0x58] sm:$0xf0]  ;;  %v2655_v1 = vor.u32 %v3267_v58, %v2652_v59  ;;  %v2659_v2 = vor.u32 %v3270_v61, %v2658_v60  ;;  %v2666_v4 = vld [vmem:[%s3723_s12 + $0x60] sm:$0xf] }
  0x1f   : > { %1765 = vmatpush.bf16.msra.mxu2 %v3406_v18  ;;  %v2663_v3 = vor.u32 %v3268_v62, %v2660_v63  ;;  %v3273_v5 = vld [vmem:[%s3723_s12 + $0x6c] sm:$0xf0]  ;;  %v3271_v6 = vld [vmem:[%s3723_s12 + $0x64] sm:$0xf]  ;;  %v2668_v7 = vld [vmem:[%s3723_s12 + $0x70] sm:$0xf0] }
  0x20   : > { %1934 = vmatpush.bf16.msra.mxu3 %v3414_v19  ;;  %v2674_v8 = vld [vmem:[%s3723_s12 + $0x68] sm:$0xf]  ;;  %v3274_v9 = vld [vmem:[%s3723_s12 + $0x74] sm:$0xf0]  ;;  %v3272_v10 = vld [vmem:[%s3723_s12 + $0x6c] sm:$0xf]  ;;  %v2667_v12 = vor.u32 %v3273_v5, %v2666_v4  ;;  %v2671_v13 = vor.u32 %v3271_v6, %v2668_v7 }
  0x21   : > { %1428 = vmatpush.bf16.msra.mxu0 %v3389_v20  ;;  %v2676_v11 = vld [vmem:[%s3723_s12 + $0x78] sm:$0xf0]  ;;  %v2675_v14 = vor.u32 %v3274_v9, %v2674_v8  ;;  %v2682_v16 = vld [vmem:[%s3723_s12 + $0x80] sm:$0xf]  ;;  %v3277_v17 = vld [vmem:[%s3723_s12 + $0x8c] sm:$0xf0] }
  0x22   : > { %1597 = vmatpush.bf16.msra.mxu1 %v3397_v21  ;;  %v2679_v15 = vor.u32 %v3272_v10, %v2676_v11  ;;  %v3275_v18 = vld [vmem:[%s3723_s12 + $0x84] sm:$0xf]  ;;  %v2684_v19 = vld [vmem:[%s3723_s12 + $0x90] sm:$0xf0]  ;;  %v2690_v20 = vld [vmem:[%s3723_s12 + $0x88] sm:$0xf] }
  0x23   : > { %1766 = vmatpush.bf16.msra.mxu2 %v3405_v22  ;;  %v3278_v21 = vld [vmem:[%s3723_s12 + $0x94] sm:$0xf0]  ;;  %v3276_v22 = vld [vmem:[%s3723_s12 + $0x8c] sm:$0xf]  ;;  %v2706_v32 = vld [vmem:[%s3723_s12 + $0xa8] sm:$0xf] }
  0x24   : > { %1935 = vmatpush.bf16.msra.mxu3 %v3413_v23  ;;  %v2692_v23 = vld [vmem:[%s3723_s12 + $0x98] sm:$0xf0]  ;;  %v3282_v33 = vld [vmem:[%s3723_s12 + $0xb4] sm:$0xf0]  ;;  %v3280_v34 = vld [vmem:[%s3723_s12 + $0xac] sm:$0xf] }
  0x25   : > { %1429 = vmatpush.bf16.msra.mxu0 %v3388_v24  ;;  %v2683_v24 = vor.u32 %v3277_v17, %v2682_v16  ;;  %v2708_v35 = vld [vmem:[%s3723_s12 + $0xb8] sm:$0xf0]  ;;  %v2707_v38 = vor.u32 %v3282_v33, %v2706_v32  ;;  %v2722_v44 = vld [vmem:[%s3723_s12 + $0xc8] sm:$0xf]  ;;  %v3286_v45 = vld [vmem:[%s3723_s12 + $0xd4] sm:$0xf0] }
  0x26   : > { %1598 = vmatpush.bf16.msra.mxu1 %v3396_v25  ;;  %v2687_v25 = vor.u32 %v3275_v18, %v2684_v19  ;;  %v2711_v39 = vor.u32 %v3280_v34, %v2708_v35  ;;  %v3284_v46 = vld [vmem:[%s3723_s12 + $0xcc] sm:$0xf]  ;;  %v2724_v47 = vld [vmem:[%s3723_s12 + $0xd8] sm:$0xf0]  ;;  %v2723_v50 = vor.u32 %v3286_v45, %v2722_v44  ;;  %v2738_v56 = vld [vmem:[%s3723_s12 + $0xe8] sm:$0xf] }
  0x27   : > { %1767 = vmatpush.bf16.msra.mxu2 %v3404_v26  ;;  %v2691_v26 = vor.u32 %v3278_v21, %v2690_v20  ;;  %v2727_v51 = vor.u32 %v3284_v46, %v2724_v47  ;;  %v3290_v57 = vld [vmem:[%s3723_s12 + $0xf4] sm:$0xf0]  ;;  %v3288_v58 = vld [vmem:[%s3723_s12 + $0xec] sm:$0xf]  ;;  %v2740_v59 = vld [vmem:[%s3723_s12 + $0xf8] sm:$0xf0] }
  0x28   : > { %1936 = vmatpush.bf16.msra.mxu3 %v3412_v27  ;;  %v2695_v27 = vor.u32 %v3276_v22, %v2692_v23  ;;  %v2739_v62 = vor.u32 %v3290_v57, %v2738_v56  ;;  %v2743_v63 = vor.u32 %v3288_v58, %v2740_v59  ;;  %v2754_v4 = vld [vmem:[%s3723_s12 + $0x108] sm:$0xf]  ;;  %v3294_v5 = vld [vmem:[%s3723_s12 + $0x114] sm:$0xf0]  ;;  %v3292_v6 = vld [vmem:[%s3723_s12 + $0x10c] sm:$0xf] }
  0x29   : > { %1430 = vmatpush.bf16.msra.mxu0 %v3387_v28  ;;  %v2698_v28 = vld [vmem:[%s3723_s12 + $0xa0] sm:$0xf]  ;;  %v2756_v7 = vld [vmem:[%s3723_s12 + $0x118] sm:$0xf0]  ;;  %v3297_v23 = vld [vmem:[%s3723_s12 + $0x12c] sm:$0xf0] }
  0x2a   : > { %1599 = vmatpush.bf16.msra.mxu1 %v3395_v29  ;;  %v3281_v29 = vld [vmem:[%s3723_s12 + $0xac] sm:$0xf0]  ;;  %v3818_v18 = vld [vmem:[%s4154_s2] ss:$0 sm:$0xff]  ;;  %v2780_v56 = vld [vmem:[%s3723_s12 + $0x150] sm:$0xf0] }
  0x2b   : > { %1768 = vmatpush.bf16.msra.mxu2 %v3403_v30  ;;  %v3279_v30 = vld [vmem:[%s3723_s12 + $0xa4] sm:$0xf]  ;;  %v2699_v36 = vor.u32 %v3281_v29, %v2698_v28  ;;  %v2762_v22 = vld [vmem:[%s3723_s12 + $0x120] sm:$0xf]  ;;  %v3298_v28 = vld [vmem:[%s3723_s12 + $0x134] sm:$0xf0] }
  0x2c   : > { %1937 = vmatpush.bf16.msra.mxu3 %v3411_v31  ;;  %1431 = vmatmul.bf16.vlgmr.msra.gmra.mxu0 %v2619_v40  ;;  %v2700_v31 = vld [vmem:[%s3723_s12 + $0xb0] sm:$0xf0]  ;;  %v2714_v40 = vld [vmem:[%s3723_s12 + $0xc0] sm:$0xf]  ;;  %v3296_v29 = vld [vmem:[%s3723_s12 + $0x12c] sm:$0xf]  ;;  %v2763_v34 = vor.u32 %v3297_v23, %v2762_v22 }
  0x2d   : > { %1600 = vmatmul.bf16.vlgmr.msra.gmra.mxu1 %v2623_v41  ;;  %v2703_v37 = vor.u32 %v3279_v30, %v2700_v31  ;;  %v3285_v41 = vld [vmem:[%s3723_s12 + $0xcc] sm:$0xf0]  ;;  %v2772_v30 = vld [vmem:[%s3723_s12 + $0x138] sm:$0xf0]  ;;  %v2786_v57 = vld [vmem:[%s3723_s12 + $0x148] sm:$0xf] }
  0x2e   : > { %1769 = vmatmul.bf16.vlgmr.msra.gmra.mxu2 %v2627_v42  ;;  %v3283_v42 = vld [vmem:[%s3723_s12 + $0xc4] sm:$0xf]  ;;  %v2715_v48 = vor.u32 %v3285_v41, %v2714_v40  ;;  %v2775_v40 = vor.u32 %v3296_v29, %v2772_v30  ;;  %v3302_v58 = vld [vmem:[%s3723_s12 + $0x154] sm:$0xf0]  ;;  %v3300_v59 = vld [vmem:[%s3723_s12 + $0x14c] sm:$0xf] }
  0x2f   : > { %1938 = vmatmul.bf16.vlgmr.msra.gmra.mxu3 %v2631_v43  ;;  %v2716_v43 = vld [vmem:[%s3723_s12 + $0xd0] sm:$0xf0] }
  0x30   : > { %v2719_v49 = vor.u32 %v3283_v42, %v2716_v43  ;;  %v2796_v23 = vld [vmem:[%s3723_s12 + $0x170] sm:$0xf0] }
  0x3c   : > { %1436 = vmatmul.bf16.gmra.mxu0 %v2635_v52  ;;  %v2730_v52 = vld [vmem:[%s3723_s12 + $0xe0] sm:$0xf] }
  0x3d   : > { %1605 = vmatmul.bf16.gmra.mxu1 %v2639_v53  ;;  %v3289_v53 = vld [vmem:[%s3723_s12 + $0xec] sm:$0xf0] }
  0x3e   : > { %1774 = vmatmul.bf16.gmra.mxu2 %v2643_v54  ;;  %v3287_v54 = vld [vmem:[%s3723_s12 + $0xe4] sm:$0xf]  ;;  %v2731_v60 = vor.u32 %v3289_v53, %v2730_v52  ;;  %v3301_v52 = vld [vmem:[%s3723_s12 + $0x14c] sm:$0xf0] }
  0x3f   : > { %1943 = vmatmul.bf16.gmra.mxu3 %v2647_v55  ;;  %v2732_v55 = vld [vmem:[%s3723_s12 + $0xf0] sm:$0xf0]  ;;  %v3299_v53 = vld [vmem:[%s3723_s12 + $0x144] sm:$0xf] }
  0x40   : > { %v2735_v61 = vor.u32 %v3287_v54, %v2732_v55 }
  0x4c   : > { %1441 = vmatmul.bf16.gmra.mxu0 %v2651_v0  ;;  %v2746_v0 = vld [vmem:[%s3723_s12 + $0x100] sm:$0xf] }
  0x4d   : > { %1610 = vmatmul.bf16.gmra.mxu1 %v2655_v1  ;;  %v3293_v1 = vld [vmem:[%s3723_s12 + $0x10c] sm:$0xf0] }
  0x4e   : > { %1779 = vmatmul.bf16.gmra.mxu2 %v2659_v2  ;;  %v3291_v2 = vld [vmem:[%s3723_s12 + $0x104] sm:$0xf]  ;;  %v2747_v8 = vor.u32 %v3293_v1, %v2746_v0  ;;  %v2783_v1 = vor.u32 %v3299_v53, %v2780_v56  ;;  %v2812_v53 = vld [vmem:[%s3723_s12 + $0x190] sm:$0xf0]  ;;  %v3308_v56 = vld [vmem:[%s3723_s12 + $0x18c] sm:$0xf] }
  0x4f   : > { %1948 = vmatmul.bf16.gmra.mxu3 %v2663_v3  ;;  %v2748_v3 = vld [vmem:[%s3723_s12 + $0x110] sm:$0xf0] }
  0x50   : > { %v2751_v9 = vor.u32 %v3291_v2, %v2748_v3 }
  0x5c   : > { %1446 = vmatmul.bf16.gmra.mxu0 %v2667_v12  ;;  %v2755_v12 = vor.u32 %v3294_v5, %v2754_v4  ;;  %v2787_v5 = vor.u32 %v3302_v58, %v2786_v57  ;;  %v2820_v57 = vld [vmem:[%s3723_s12 + $0x198] sm:$0xf0] }
  0x5d   : > { %1615 = vmatmul.bf16.gmra.mxu1 %v2671_v13  ;;  %v2759_v13 = vor.u32 %v3292_v6, %v2756_v7 }
  0x5e   : > { %1784 = vmatmul.bf16.gmra.mxu2 %v2675_v14 }
  0x5f   : > { %1953 = vmatmul.bf16.gmra.mxu3 %v2679_v15 }
  0x6c   : > { %1451 = vmatmul.bf16.gmra.mxu0 %v2683_v24 }
  0x6d   : > { %1620 = vmatmul.bf16.gmra.mxu1 %v2687_v25  ;;  %v3295_v25 = vld [vmem:[%s3723_s12 + $0x124] sm:$0xf] }
  0x6e   : > { %1789 = vmatmul.bf16.gmra.mxu2 %v2691_v26  ;;  %v2764_v26 = vld [vmem:[%s3723_s12 + $0x130] sm:$0xf0] }
  0x6f   : > { %1958 = vmatmul.bf16.gmra.mxu3 %v2695_v27  ;;  %v2770_v27 = vld [vmem:[%s3723_s12 + $0x128] sm:$0xf]  ;;  %v2767_v35 = vor.u32 %v3295_v25, %v2764_v26  ;;  %v3306_v25 = vld [vmem:[%s3723_s12 + $0x174] sm:$0xf0]  ;;  %v3304_v26 = vld [vmem:[%s3723_s12 + $0x16c] sm:$0xf] }
  0x7c   : > { %1456 = vmatmul.bf16.gmra.mxu0 %v2699_v36 }
  0x7d   : > { %1625 = vmatmul.bf16.gmra.mxu1 %v2703_v37 }
  0x7e   : > { %1794 = vmatmul.bf16.gmra.mxu2 %v2707_v38 }
  0x7f   : > { %1963 = vmatmul.bf16.gmra.mxu3 %v2711_v39  ;;  %v2771_v39 = vor.u32 %v3298_v28, %v2770_v27  ;;  %v2804_v27 = vld [vmem:[%s3723_s12 + $0x178] sm:$0xf0] }
  0x8c   : > { %1461 = vmatmul.bf16.gmra.mxu0 %v2715_v48 }
  0x8d   : > { %1630 = vmatmul.bf16.gmra.mxu1 %v2719_v49 }
  0x8e   : > { %1799 = vmatmul.bf16.gmra.mxu2 %v2723_v50 }
  0x8f   : > { %1968 = vmatmul.bf16.gmra.mxu3 %v2727_v51  ;;  %v2778_v51 = vld [vmem:[%s3723_s12 + $0x140] sm:$0xf] }
  0x90   : > { %v2779_v0 = vor.u32 %v3301_v52, %v2778_v51 }
  0x9c   : > { %1466 = vmatmul.bf16.gmra.mxu0 %v2731_v60  ;;  %v2788_v60 = vld [vmem:[%s3723_s12 + $0x158] sm:$0xf0] }
  0x9d   : > { %1635 = vmatmul.bf16.gmra.mxu1 %v2735_v61  ;;  %v2791_v6 = vor.u32 %v3300_v59, %v2788_v60 }
  0x9e   : > { %1804 = vmatmul.bf16.gmra.mxu2 %v2739_v62 }
  0x9f   : > { %1973 = vmatmul.bf16.gmra.mxu3 %v2743_v63 }
  0xa9   : > { %v1432_v10 = vpop.f32.mrf.mxu0 }
  0xaa   : > { %v1601_v11 = vpop.f32.mrf.mxu1 }
  0xab   : > { %v1602_v14 = vadd.f32 %v1601_v11, %v1432_v10 }
  0xac   : > { %1471 = vmatmul.bf16.gmra.mxu0 %v2747_v8 }
  0xad   : > { %1640 = vmatmul.bf16.gmra.mxu1 %v2751_v9 }
  0xae   : > { %1809 = vmatmul.bf16.gmra.mxu2 %v2755_v12 }
  0xaf   : > { %1978 = vmatmul.bf16.gmra.mxu3 %v2759_v13 }
  0xb1   : > { %v1770_v15 = vpop.f32.mrf.mxu2  ;;  %v1434_v19 = vpop.f32.mrf.mxu0 }
  0xb2   : > { %v1939_v16 = vpop.f32.mrf.mxu3  ;;  %v1771_v17 = vadd.f32 %v1770_v15, %v1602_v14  ;;  %v1603_v20 = vpop.f32.mrf.mxu1 }
  0xb3   : > { %v1604_v31 = vadd.f32 %v1603_v20, %v1434_v19  ;;  %v3305_v19 = vld [vmem:[%s3723_s12 + $0x16c] sm:$0xf0]  ;;  %v3303_v20 = vld [vmem:[%s3723_s12 + $0x164] sm:$0xf] }
  0xb4   : > { %v1940_v21 = vadd.f32 %v1939_v16, %v1771_v17  ;;  %v2794_v17 = vld [vmem:[%s3723_s12 + $0x160] sm:$0xf] }
  0xb6   : > { %v2298_v24 = vadd.f32 %v3818_v18, %v1940_v21 }
  0xb8   : > { %3444 = vtanh.f32 %v2298_v24  ;;  %v2802_v24 = vld [vmem:[%s3723_s12 + $0x168] sm:$0xf] }
  0xb9   : > { %v1772_v32 = vpop.f32.mrf.mxu2  ;;  %v1437_v37 = vpop.f32.mrf.mxu0 }
  0xba   : > { %v1941_v33 = vpop.f32.mrf.mxu3  ;;  %v1773_v36 = vadd.f32 %v1772_v32, %v1604_v31  ;;  %v1606_v38 = vpop.f32.mrf.mxu1  ;;  %v2795_v31 = vor.u32 %v3305_v19, %v2794_v17  ;;  %v2799_v32 = vor.u32 %v3303_v20, %v2796_v23  ;;  %v2828_v20 = vld [vmem:[%s3723_s12 + $0x1b0] sm:$0xf0]  ;;  %v3312_v23 = vld [vmem:[%s3723_s12 + $0x1ac] sm:$0xf] }
  0xbb   : > { %v1607_v44 = vadd.f32 %v1606_v38, %v1437_v37  ;;  %v2807_v37 = vor.u32 %v3304_v26, %v2804_v27 }
  0xbc   : > { %v1942_v41 = vadd.f32 %v1941_v33, %v1773_v36  ;;  %1476 = vmatmul.bf16.gmra.mxu0 %v2763_v34  ;;  %v2803_v36 = vor.u32 %v3306_v25, %v2802_v24  ;;  %v2836_v24 = vld [vmem:[%s3723_s12 + $0x1b8] sm:$0xf0] }
  0xbd   : > { %1645 = vmatmul.bf16.gmra.mxu1 %v2767_v35 }
  0xbe   : > { %v3445_v42 = vpop.eup %3444  ;;  %v2299_v43 = vadd.f32 %v3818_v18, %v1942_v41  ;;  %1814 = vmatmul.bf16.gmra.mxu2 %v2771_v39 }
  0xbf   : > { %1983 = vmatmul.bf16.gmra.mxu3 %v2775_v40  ;;  %2426 = vst [vmem:[%s3833_s21] sm:$0xff] %v3445_v42 }
  0xc0   : > { %3446 = vtanh.f32 %v2299_v43 }
  0xc1   : > { %v1775_v45 = vpop.f32.mrf.mxu2  ;;  %v1439_v48 = vpop.f32.mrf.mxu0 }
  0xc2   : > { %v1944_v46 = vpop.f32.mrf.mxu3  ;;  %v1776_v47 = vadd.f32 %v1775_v45, %v1607_v44  ;;  %v1608_v49 = vpop.f32.mrf.mxu1 }
  0xc3   : > { %v1609_v61 = vadd.f32 %v1608_v49, %v1439_v48  ;;  %v2810_v48 = vld [vmem:[%s3723_s12 + $0x180] sm:$0xf]  ;;  %v3309_v49 = vld [vmem:[%s3723_s12 + $0x18c] sm:$0xf0] }
  0xc4   : > { %v1945_v50 = vadd.f32 %v1944_v46, %v1776_v47 }
  0xc6   : > { %v3447_v54 = vpop.eup %3446  ;;  %v2300_v55 = vadd.f32 %v3818_v18, %v1945_v50  ;;  %v3307_v50 = vld [vmem:[%s3723_s12 + $0x184] sm:$0xf] }
  0xc7   : > { %2427 = vst [vmem:[%s3833_s21 + $0x8] sm:$0xff] %v3447_v54  ;;  %v2818_v54 = vld [vmem:[%s3723_s12 + $0x188] sm:$0xf] }
  0xc8   : > { %3448 = vtanh.f32 %v2300_v55  ;;  %v3310_v55 = vld [vmem:[%s3723_s12 + $0x194] sm:$0xf0] }
  0xc9   : > { %v1777_v62 = vpop.f32.mrf.mxu2  ;;  %v1442_v3 = vpop.f32.mrf.mxu0 }
  0xca   : > { %v1946_v63 = vpop.f32.mrf.mxu3  ;;  %v1778_v2 = vadd.f32 %v1777_v62, %v1609_v61  ;;  %v1611_v4 = vpop.f32.mrf.mxu1  ;;  %v2811_v61 = vor.u32 %v3309_v49, %v2810_v48  ;;  %v2815_v62 = vor.u32 %v3307_v50, %v2812_v53  ;;  %v2844_v50 = vld [vmem:[%s3723_s12 + $0x1d0] sm:$0xf0]  ;;  %v3316_v53 = vld [vmem:[%s3723_s12 + $0x1cc] sm:$0xf] }
  0xcb   : > { %v1612_v10 = vadd.f32 %v1611_v4, %v1442_v3  ;;  %v2823_v3 = vor.u32 %v3308_v56, %v2820_v57 }
  0xcc   : > { %v1947_v7 = vadd.f32 %v1946_v63, %v1778_v2  ;;  %1481 = vmatmul.bf16.gmra.mxu0 %v2779_v0  ;;  %v2819_v2 = vor.u32 %v3310_v55, %v2818_v54  ;;  %v2852_v54 = vld [vmem:[%s3723_s12 + $0x1d8] sm:$0xf0] }
  0xcd   : > { %1650 = vmatmul.bf16.gmra.mxu1 %v2783_v1 }
  0xce   : > { %v3449_v8 = vpop.eup %3448  ;;  %v2301_v9 = vadd.f32 %v3818_v18, %v1947_v7  ;;  %1819 = vmatmul.bf16.gmra.mxu2 %v2787_v5 }
  0xcf   : > { %1988 = vmatmul.bf16.gmra.mxu3 %v2791_v6  ;;  %2428 = vst [vmem:[%s3833_s21 + $0x10] sm:$0xff] %v3449_v8 }
  0xd0   : > { %3450 = vtanh.f32 %v2301_v9 }
  0xd1   : > { %v1780_v11 = vpop.f32.mrf.mxu2  ;;  %v1444_v14 = vpop.f32.mrf.mxu0 }
  0xd2   : > { %v1949_v12 = vpop.f32.mrf.mxu3  ;;  %v1781_v13 = vadd.f32 %v1780_v11, %v1612_v10  ;;  %v1613_v15 = vpop.f32.mrf.mxu1 }
  0xd3   : > { %v1614_v28 = vadd.f32 %v1613_v15, %v1444_v14  ;;  %v2826_v14 = vld [vmem:[%s3723_s12 + $0x1a0] sm:$0xf]  ;;  %v3313_v15 = vld [vmem:[%s3723_s12 + $0x1ac] sm:$0xf0] }
  0xd4   : > { %v1950_v16 = vadd.f32 %v1949_v12, %v1781_v13 }
  0xd6   : > { %v3451_v21 = vpop.eup %3450  ;;  %v2302_v22 = vadd.f32 %v3818_v18, %v1950_v16  ;;  %v3311_v16 = vld [vmem:[%s3723_s12 + $0x1a4] sm:$0xf] }
  0xd7   : > { %2429 = vst [vmem:[%s3833_s21 + $0x18] sm:$0xff] %v3451_v21  ;;  %v2834_v21 = vld [vmem:[%s3723_s12 + $0x1a8] sm:$0xf] }
  0xd8   : > { %3452 = vtanh.f32 %v2302_v22  ;;  %v3314_v22 = vld [vmem:[%s3723_s12 + $0x1b4] sm:$0xf0] }
  0xd9   : > { %v1782_v29 = vpop.f32.mrf.mxu2  ;;  %v1447_v34 = vpop.f32.mrf.mxu0 }
  0xda   : > { %v1951_v30 = vpop.f32.mrf.mxu3  ;;  %v1783_v33 = vadd.f32 %v1782_v29, %v1614_v28  ;;  %v1616_v35 = vpop.f32.mrf.mxu1  ;;  %v2827_v28 = vor.u32 %v3313_v15, %v2826_v14  ;;  %v2831_v29 = vor.u32 %v3311_v16, %v2828_v20  ;;  %v2860_v16 = vld [vmem:[%s3723_s12 + $0x1f0] sm:$0xf0]  ;;  %v3320_v20 = vld [vmem:[%s3723_s12 + $0x1ec] sm:$0xf] }
  0xdb   : > { %v1617_v41 = vadd.f32 %v1616_v35, %v1447_v34  ;;  %v2839_v34 = vor.u32 %v3312_v23, %v2836_v24 }
  0xdc   : > { %v1952_v38 = vadd.f32 %v1951_v30, %v1783_v33  ;;  %1486 = vmatmul.bf16.gmra.mxu0 %v2795_v31  ;;  %v2835_v33 = vor.u32 %v3314_v22, %v2834_v21  ;;  %v2868_v21 = vld [vmem:[%s3723_s12 + $0x1f8] sm:$0xf0] }
  0xdd   : > { %1655 = vmatmul.bf16.gmra.mxu1 %v2799_v32 }
  0xde   : > { %v3453_v39 = vpop.eup %3452  ;;  %v2303_v40 = vadd.f32 %v3818_v18, %v1952_v38  ;;  %1824 = vmatmul.bf16.gmra.mxu2 %v2803_v36 }
  0xdf   : > { %1993 = vmatmul.bf16.gmra.mxu3 %v2807_v37  ;;  %2430 = vst [vmem:[%s3833_s21 + $0x20] sm:$0xff] %v3453_v39 }
  0xe0   : > { %3454 = vtanh.f32 %v2303_v40 }
  0xe1   : > { %v1785_v42 = vpop.f32.mrf.mxu2  ;;  %v1449_v45 = vpop.f32.mrf.mxu0 }
  0xe2   : > { %v1954_v43 = vpop.f32.mrf.mxu3  ;;  %v1786_v44 = vadd.f32 %v1785_v42, %v1617_v41  ;;  %v1618_v46 = vpop.f32.mrf.mxu1 }
  0xe3   : > { %v1619_v58 = vadd.f32 %v1618_v46, %v1449_v45  ;;  %v2842_v45 = vld [vmem:[%s3723_s12 + $0x1c0] sm:$0xf]  ;;  %v3317_v46 = vld [vmem:[%s3723_s12 + $0x1cc] sm:$0xf0] }
  0xe4   : > { %v1955_v47 = vadd.f32 %v1954_v43, %v1786_v44 }
  0xe6   : > { %v3455_v51 = vpop.eup %3454  ;;  %v2304_v52 = vadd.f32 %v3818_v18, %v1955_v47  ;;  %v3315_v47 = vld [vmem:[%s3723_s12 + $0x1c4] sm:$0xf] }
  0xe7   : > { %2431 = vst [vmem:[%s3833_s21 + $0x28] sm:$0xff] %v3455_v51  ;;  %v2850_v51 = vld [vmem:[%s3723_s12 + $0x1c8] sm:$0xf] }
  0xe8   : > { %3456 = vtanh.f32 %v2304_v52  ;;  %v3318_v52 = vld [vmem:[%s3723_s12 + $0x1d4] sm:$0xf0] }
  0xe9   : > { %v1787_v59 = vpop.f32.mrf.mxu2  ;;  %v1452_v0 = vpop.f32.mrf.mxu0 }
  0xea   : > { %v1956_v60 = vpop.f32.mrf.mxu3  ;;  %v1788_v63 = vadd.f32 %v1787_v59, %v1619_v58  ;;  %v1621_v1 = vpop.f32.mrf.mxu1  ;;  %v2843_v58 = vor.u32 %v3317_v46, %v2842_v45  ;;  %v2847_v59 = vor.u32 %v3315_v47, %v2844_v50  ;;  %v2876_v47 = vld [vmem:[%s3723_s12 + $0x210] sm:$0xf0]  ;;  %v3324_v50 = vld [vmem:[%s3723_s12 + $0x20c] sm:$0xf] }
  0xeb   : > { %v1622_v7 = vadd.f32 %v1621_v1, %v1452_v0  ;;  %v2855_v0 = vor.u32 %v3316_v53, %v2852_v54 }
  0xec   : > { %v1957_v4 = vadd.f32 %v1956_v60, %v1788_v63  ;;  %1491 = vmatmul.bf16.gmra.mxu0 %v2811_v61  ;;  %v2851_v63 = vor.u32 %v3318_v52, %v2850_v51  ;;  %v2884_v51 = vld [vmem:[%s3723_s12 + $0x218] sm:$0xf0] }
  0xed   : > { %1660 = vmatmul.bf16.gmra.mxu1 %v2815_v62 }
  0xee   : > { %v3457_v5 = vpop.eup %3456  ;;  %v2305_v6 = vadd.f32 %v3818_v18, %v1957_v4  ;;  %1829 = vmatmul.bf16.gmra.mxu2 %v2819_v2 }
  0xef   : > { %1998 = vmatmul.bf16.gmra.mxu3 %v2823_v3  ;;  %2432 = vst [vmem:[%s3833_s21 + $0x30] sm:$0xff] %v3457_v5 }
  0xf0   : > { %3458 = vtanh.f32 %v2305_v6 }
  0xf1   : > { %v1790_v8 = vpop.f32.mrf.mxu2  ;;  %v1454_v11 = vpop.f32.mrf.mxu0 }
  0xf2   : > { %v1959_v9 = vpop.f32.mrf.mxu3  ;;  %v1791_v10 = vadd.f32 %v1790_v8, %v1622_v7  ;;  %v1623_v12 = vpop.f32.mrf.mxu1 }
  0xf3   : > { %v1624_v25 = vadd.f32 %v1623_v12, %v1454_v11  ;;  %v2858_v11 = vld [vmem:[%s3723_s12 + $0x1e0] sm:$0xf]  ;;  %v3321_v12 = vld [vmem:[%s3723_s12 + $0x1ec] sm:$0xf0] }
  0xf4   : > { %v1960_v13 = vadd.f32 %v1959_v9, %v1791_v10 }
  0xf6   : > { %v3459_v17 = vpop.eup %3458  ;;  %v2306_v19 = vadd.f32 %v3818_v18, %v1960_v13  ;;  %v3319_v13 = vld [vmem:[%s3723_s12 + $0x1e4] sm:$0xf] }
  0xf7   : > { %2433 = vst [vmem:[%s3833_s21 + $0x38] sm:$0xff] %v3459_v17  ;;  %v2866_v17 = vld [vmem:[%s3723_s12 + $0x1e8] sm:$0xf] }
  0xf8   : > { %3460 = vtanh.f32 %v2306_v19  ;;  %v3322_v19 = vld [vmem:[%s3723_s12 + $0x1f4] sm:$0xf0] }
  0xf9   : > { %v1792_v26 = vpop.f32.mrf.mxu2  ;;  %v1457_v31 = vpop.f32.mrf.mxu0 }
  0xfa   : > { %v1961_v27 = vpop.f32.mrf.mxu3  ;;  %v1793_v30 = vadd.f32 %v1792_v26, %v1624_v25  ;;  %v1626_v32 = vpop.f32.mrf.mxu1  ;;  %v2859_v25 = vor.u32 %v3321_v12, %v2858_v11  ;;  %v2863_v26 = vor.u32 %v3319_v13, %v2860_v16  ;;  %v2892_v13 = vld [vmem:[%s3723_s12 + $0x230] sm:$0xf0]  ;;  %v3328_v16 = vld [vmem:[%s3723_s12 + $0x22c] sm:$0xf] }
  0xfb   : > { %v1627_v38 = vadd.f32 %v1626_v32, %v1457_v31  ;;  %v2871_v31 = vor.u32 %v3320_v20, %v2868_v21 }
  0xfc   : > { %v1962_v35 = vadd.f32 %v1961_v27, %v1793_v30  ;;  %1496 = vmatmul.bf16.gmra.mxu0 %v2827_v28  ;;  %v2867_v30 = vor.u32 %v3322_v19, %v2866_v17  ;;  %v2900_v17 = vld [vmem:[%s3723_s12 + $0x238] sm:$0xf0] }
  0xfd   : > { %1665 = vmatmul.bf16.gmra.mxu1 %v2831_v29 }
  0xfe   : > { %v3461_v36 = vpop.eup %3460  ;;  %v2307_v37 = vadd.f32 %v3818_v18, %v1962_v35  ;;  %1834 = vmatmul.bf16.gmra.mxu2 %v2835_v33 }
  0xff   : > { %2003 = vmatmul.bf16.gmra.mxu3 %v2839_v34  ;;  %2434 = vst [vmem:[%s3833_s21 + $0x40] sm:$0xff] %v3461_v36 }
 0x100   : > { %3462 = vtanh.f32 %v2307_v37 }
 0x101   : > { %v1795_v39 = vpop.f32.mrf.mxu2  ;;  %v1459_v42 = vpop.f32.mrf.mxu0 }
 0x102   : > { %v1964_v40 = vpop.f32.mrf.mxu3  ;;  %v1796_v41 = vadd.f32 %v1795_v39, %v1627_v38  ;;  %v1628_v43 = vpop.f32.mrf.mxu1 }
 0x103   : > { %v1629_v55 = vadd.f32 %v1628_v43, %v1459_v42  ;;  %v2874_v42 = vld [vmem:[%s3723_s12 + $0x200] sm:$0xf]  ;;  %v3325_v43 = vld [vmem:[%s3723_s12 + $0x20c] sm:$0xf0] }
 0x104   : > { %v1965_v44 = vadd.f32 %v1964_v40, %v1796_v41 }
 0x106   : > { %v3463_v48 = vpop.eup %3462  ;;  %v2308_v49 = vadd.f32 %v3818_v18, %v1965_v44  ;;  %v3323_v44 = vld [vmem:[%s3723_s12 + $0x204] sm:$0xf] }
 0x107   : > { %2435 = vst [vmem:[%s3833_s21 + $0x48] sm:$0xff] %v3463_v48  ;;  %v2882_v48 = vld [vmem:[%s3723_s12 + $0x208] sm:$0xf] }
 0x108   : > { %3464 = vtanh.f32 %v2308_v49  ;;  %v3326_v49 = vld [vmem:[%s3723_s12 + $0x214] sm:$0xf0] }
 0x109   : > { %v1797_v56 = vpop.f32.mrf.mxu2  ;;  %v1462_v61 = vpop.f32.mrf.mxu0 }
 0x10a   : > { %v1966_v57 = vpop.f32.mrf.mxu3  ;;  %v1798_v60 = vadd.f32 %v1797_v56, %v1629_v55  ;;  %v1631_v62 = vpop.f32.mrf.mxu1  ;;  %v2875_v55 = vor.u32 %v3325_v43, %v2874_v42  ;;  %v2879_v56 = vor.u32 %v3323_v44, %v2876_v47  ;;  %v2908_v44 = vld [vmem:[%s3723_s12 + $0x250] sm:$0xf0]  ;;  %v3332_v47 = vld [vmem:[%s3723_s12 + $0x24c] sm:$0xf] }
 0x10b   : > { %v1632_v4 = vadd.f32 %v1631_v62, %v1462_v61  ;;  %v2887_v61 = vor.u32 %v3324_v50, %v2884_v51 }
 0x10c   : > { %v1967_v1 = vadd.f32 %v1966_v57, %v1798_v60  ;;  %1501 = vmatmul.bf16.gmra.mxu0 %v2843_v58  ;;  %v2883_v60 = vor.u32 %v3326_v49, %v2882_v48  ;;  %v2916_v48 = vld [vmem:[%s3723_s12 + $0x258] sm:$0xf0] }
 0x10d   : > { %1670 = vmatmul.bf16.gmra.mxu1 %v2847_v59 }
 0x10e   : > { %v3465_v2 = vpop.eup %3464  ;;  %v2309_v3 = vadd.f32 %v3818_v18, %v1967_v1  ;;  %1839 = vmatmul.bf16.gmra.mxu2 %v2851_v63 }
 0x10f   : > { %2008 = vmatmul.bf16.gmra.mxu3 %v2855_v0  ;;  %2436 = vst [vmem:[%s3833_s21 + $0x50] sm:$0xff] %v3465_v2 }
 0x110   : > { %3466 = vtanh.f32 %v2309_v3 }
 0x111   : > { %v1800_v5 = vpop.f32.mrf.mxu2  ;;  %v1464_v8 = vpop.f32.mrf.mxu0 }
 0x112   : > { %v1969_v6 = vpop.f32.mrf.mxu3  ;;  %v1801_v7 = vadd.f32 %v1800_v5, %v1632_v4  ;;  %v1633_v9 = vpop.f32.mrf.mxu1 }
 0x113   : > { %v1634_v22 = vadd.f32 %v1633_v9, %v1464_v8  ;;  %v2890_v8 = vld [vmem:[%s3723_s12 + $0x220] sm:$0xf]  ;;  %v3329_v9 = vld [vmem:[%s3723_s12 + $0x22c] sm:$0xf0] }
 0x114   : > { %v1970_v10 = vadd.f32 %v1969_v6, %v1801_v7 }
 0x116   : > { %v3467_v14 = vpop.eup %3466  ;;  %v2310_v15 = vadd.f32 %v3818_v18, %v1970_v10  ;;  %v3327_v10 = vld [vmem:[%s3723_s12 + $0x224] sm:$0xf] }
 0x117   : > { %2437 = vst [vmem:[%s3833_s21 + $0x58] sm:$0xff] %v3467_v14  ;;  %v2898_v14 = vld [vmem:[%s3723_s12 + $0x228] sm:$0xf] }
 0x118   : > { %3468 = vtanh.f32 %v2310_v15  ;;  %v3330_v15 = vld [vmem:[%s3723_s12 + $0x234] sm:$0xf0] }
 0x119   : > { %v1802_v23 = vpop.f32.mrf.mxu2  ;;  %v1467_v28 = vpop.f32.mrf.mxu0 }
 0x11a   : > { %v1971_v24 = vpop.f32.mrf.mxu3  ;;  %v1803_v27 = vadd.f32 %v1802_v23, %v1634_v22  ;;  %v1636_v29 = vpop.f32.mrf.mxu1  ;;  %v2891_v22 = vor.u32 %v3329_v9, %v2890_v8  ;;  %v2895_v23 = vor.u32 %v3327_v10, %v2892_v13  ;;  %v2924_v10 = vld [vmem:[%s3723_s12 + $0x270] sm:$0xf0]  ;;  %v3336_v13 = vld [vmem:[%s3723_s12 + $0x26c] sm:$0xf] }
 0x11b   : > { %v1637_v35 = vadd.f32 %v1636_v29, %v1467_v28  ;;  %v2903_v28 = vor.u32 %v3328_v16, %v2900_v17 }
 0x11c   : > { %v1972_v32 = vadd.f32 %v1971_v24, %v1803_v27  ;;  %1506 = vmatmul.bf16.gmra.mxu0 %v2859_v25  ;;  %v2899_v27 = vor.u32 %v3330_v15, %v2898_v14  ;;  %v2932_v14 = vld [vmem:[%s3723_s12 + $0x278] sm:$0xf0] }
 0x11d   : > { %1675 = vmatmul.bf16.gmra.mxu1 %v2863_v26 }
 0x11e   : > { %v3469_v33 = vpop.eup %3468  ;;  %v2311_v34 = vadd.f32 %v3818_v18, %v1972_v32  ;;  %1844 = vmatmul.bf16.gmra.mxu2 %v2867_v30 }
 0x11f   : > { %2013 = vmatmul.bf16.gmra.mxu3 %v2871_v31  ;;  %2438 = vst [vmem:[%s3833_s21 + $0x60] sm:$0xff] %v3469_v33 }
 0x120   : > { %3470 = vtanh.f32 %v2311_v34 }
 0x121   : > { %v1805_v36 = vpop.f32.mrf.mxu2  ;;  %v1469_v39 = vpop.f32.mrf.mxu0 }
 0x122   : > { %v1974_v37 = vpop.f32.mrf.mxu3  ;;  %v1806_v38 = vadd.f32 %v1805_v36, %v1637_v35  ;;  %v1638_v40 = vpop.f32.mrf.mxu1 }
 0x123   : > { %v1639_v52 = vadd.f32 %v1638_v40, %v1469_v39  ;;  %v2906_v39 = vld [vmem:[%s3723_s12 + $0x240] sm:$0xf]  ;;  %v3333_v40 = vld [vmem:[%s3723_s12 + $0x24c] sm:$0xf0] }
 0x124   : > { %v1975_v41 = vadd.f32 %v1974_v37, %v1806_v38 }
 0x126   : > { %v3471_v45 = vpop.eup %3470  ;;  %v2312_v46 = vadd.f32 %v3818_v18, %v1975_v41  ;;  %v3331_v41 = vld [vmem:[%s3723_s12 + $0x244] sm:$0xf] }
 0x127   : > { %2439 = vst [vmem:[%s3833_s21 + $0x68] sm:$0xff] %v3471_v45  ;;  %v2914_v45 = vld [vmem:[%s3723_s12 + $0x248] sm:$0xf] }
 0x128   : > { %3472 = vtanh.f32 %v2312_v46  ;;  %v3334_v46 = vld [vmem:[%s3723_s12 + $0x254] sm:$0xf0] }
 0x129   : > { %v1807_v53 = vpop.f32.mrf.mxu2  ;;  %v1472_v58 = vpop.f32.mrf.mxu0 }
 0x12a   : > { %v1976_v54 = vpop.f32.mrf.mxu3  ;;  %v1808_v57 = vadd.f32 %v1807_v53, %v1639_v52  ;;  %v1641_v59 = vpop.f32.mrf.mxu1  ;;  %v2907_v52 = vor.u32 %v3333_v40, %v2906_v39  ;;  %v2911_v53 = vor.u32 %v3331_v41, %v2908_v44  ;;  %v2940_v41 = vld [vmem:[%s3723_s12 + $0x290] sm:$0xf0]  ;;  %v3340_v44 = vld [vmem:[%s3723_s12 + $0x28c] sm:$0xf] }
 0x12b   : > { %v1642_v1 = vadd.f32 %v1641_v59, %v1472_v58  ;;  %v2919_v58 = vor.u32 %v3332_v47, %v2916_v48 }
 0x12c   : > { %v1977_v62 = vadd.f32 %v1976_v54, %v1808_v57  ;;  %1511 = vmatmul.bf16.gmra.mxu0 %v2875_v55  ;;  %v2915_v57 = vor.u32 %v3334_v46, %v2914_v45  ;;  %v2948_v45 = vld [vmem:[%s3723_s12 + $0x298] sm:$0xf0] }
 0x12d   : > { %1680 = vmatmul.bf16.gmra.mxu1 %v2879_v56 }
 0x12e   : > { %v3473_v63 = vpop.eup %3472  ;;  %v2313_v0 = vadd.f32 %v3818_v18, %v1977_v62  ;;  %1849 = vmatmul.bf16.gmra.mxu2 %v2883_v60 }
 0x12f   : > { %2018 = vmatmul.bf16.gmra.mxu3 %v2887_v61  ;;  %2440 = vst [vmem:[%s3833_s21 + $0x70] sm:$0xff] %v3473_v63 }
 0x130   : > { %3474 = vtanh.f32 %v2313_v0 }
 0x131   : > { %v1810_v2 = vpop.f32.mrf.mxu2  ;;  %v1474_v5 = vpop.f32.mrf.mxu0 }
 0x132   : > { %v1979_v3 = vpop.f32.mrf.mxu3  ;;  %v1811_v4 = vadd.f32 %v1810_v2, %v1642_v1  ;;  %v1643_v6 = vpop.f32.mrf.mxu1 }
 0x133   : > { %v1644_v19 = vadd.f32 %v1643_v6, %v1474_v5  ;;  %v2922_v5 = vld [vmem:[%s3723_s12 + $0x260] sm:$0xf]  ;;  %v3337_v6 = vld [vmem:[%s3723_s12 + $0x26c] sm:$0xf0] }
 0x134   : > { %v1980_v7 = vadd.f32 %v1979_v3, %v1811_v4 }
 0x136   : > { %v3475_v11 = vpop.eup %3474  ;;  %v2314_v12 = vadd.f32 %v3818_v18, %v1980_v7  ;;  %v3335_v7 = vld [vmem:[%s3723_s12 + $0x264] sm:$0xf] }
 0x137   : > { %2441 = vst [vmem:[%s3833_s21 + $0x78] sm:$0xff] %v3475_v11  ;;  %v2930_v11 = vld [vmem:[%s3723_s12 + $0x268] sm:$0xf] }
 0x138   : > { %3476 = vtanh.f32 %v2314_v12  ;;  %v3338_v12 = vld [vmem:[%s3723_s12 + $0x274] sm:$0xf0] }
 0x139   : > { %v1812_v20 = vpop.f32.mrf.mxu2  ;;  %v1477_v25 = vpop.f32.mrf.mxu0 }
 0x13a   : > { %v1981_v21 = vpop.f32.mrf.mxu3  ;;  %v1813_v24 = vadd.f32 %v1812_v20, %v1644_v19  ;;  %v1646_v26 = vpop.f32.mrf.mxu1  ;;  %v2923_v19 = vor.u32 %v3337_v6, %v2922_v5  ;;  %v2927_v20 = vor.u32 %v3335_v7, %v2924_v10  ;;  %v2956_v7 = vld [vmem:[%s3723_s12 + $0x2b0] sm:$0xf0]  ;;  %v3344_v10 = vld [vmem:[%s3723_s12 + $0x2ac] sm:$0xf] }
 0x13b   : > { %v1647_v32 = vadd.f32 %v1646_v26, %v1477_v25  ;;  %v2935_v25 = vor.u32 %v3336_v13, %v2932_v14 }
 0x13c   : > { %v1982_v29 = vadd.f32 %v1981_v21, %v1813_v24  ;;  %1516 = vmatmul.bf16.gmra.mxu0 %v2891_v22  ;;  %v2931_v24 = vor.u32 %v3338_v12, %v2930_v11  ;;  %v2964_v11 = vld [vmem:[%s3723_s12 + $0x2b8] sm:$0xf0] }
 0x13d   : > { %1685 = vmatmul.bf16.gmra.mxu1 %v2895_v23 }
 0x13e   : > { %v3477_v30 = vpop.eup %3476  ;;  %v2315_v31 = vadd.f32 %v3818_v18, %v1982_v29  ;;  %1854 = vmatmul.bf16.gmra.mxu2 %v2899_v27 }
 0x13f   : > { %2023 = vmatmul.bf16.gmra.mxu3 %v2903_v28  ;;  %2442 = vst [vmem:[%s3833_s21 + $0x80] sm:$0xff] %v3477_v30 }
 0x140   : > { %3478 = vtanh.f32 %v2315_v31 }
 0x141   : > { %v1815_v33 = vpop.f32.mrf.mxu2  ;;  %v1479_v36 = vpop.f32.mrf.mxu0 }
 0x142   : > { %v1984_v34 = vpop.f32.mrf.mxu3  ;;  %v1816_v35 = vadd.f32 %v1815_v33, %v1647_v32  ;;  %v1648_v37 = vpop.f32.mrf.mxu1 }
 0x143   : > { %v1649_v49 = vadd.f32 %v1648_v37, %v1479_v36  ;;  %v2938_v36 = vld [vmem:[%s3723_s12 + $0x280] sm:$0xf]  ;;  %v3341_v37 = vld [vmem:[%s3723_s12 + $0x28c] sm:$0xf0] }
 0x144   : > { %v1985_v38 = vadd.f32 %v1984_v34, %v1816_v35 }
 0x146   : > { %v3479_v42 = vpop.eup %3478  ;;  %v2316_v43 = vadd.f32 %v3818_v18, %v1985_v38  ;;  %v3339_v38 = vld [vmem:[%s3723_s12 + $0x284] sm:$0xf] }
 0x147   : > { %2443 = vst [vmem:[%s3833_s21 + $0x88] sm:$0xff] %v3479_v42  ;;  %v2946_v42 = vld [vmem:[%s3723_s12 + $0x288] sm:$0xf] }
 0x148   : > { %3480 = vtanh.f32 %v2316_v43  ;;  %v3342_v43 = vld [vmem:[%s3723_s12 + $0x294] sm:$0xf0] }
 0x149   : > { %v1817_v50 = vpop.f32.mrf.mxu2  ;;  %v1482_v55 = vpop.f32.mrf.mxu0 }
 0x14a   : > { %v1986_v51 = vpop.f32.mrf.mxu3  ;;  %v1818_v54 = vadd.f32 %v1817_v50, %v1649_v49  ;;  %v1651_v56 = vpop.f32.mrf.mxu1  ;;  %v2939_v49 = vor.u32 %v3341_v37, %v2938_v36  ;;  %v2943_v50 = vor.u32 %v3339_v38, %v2940_v41  ;;  %v2972_v38 = vld [vmem:[%s3723_s12 + $0x2d0] sm:$0xf0]  ;;  %v3348_v41 = vld [vmem:[%s3723_s12 + $0x2cc] sm:$0xf] }
 0x14b   : > { %v1652_v62 = vadd.f32 %v1651_v56, %v1482_v55  ;;  %v2951_v55 = vor.u32 %v3340_v44, %v2948_v45 }
 0x14c   : > { %v1987_v59 = vadd.f32 %v1986_v51, %v1818_v54  ;;  %1521 = vmatmul.bf16.gmra.mxu0 %v2907_v52  ;;  %v2947_v54 = vor.u32 %v3342_v43, %v2946_v42  ;;  %v2980_v42 = vld [vmem:[%s3723_s12 + $0x2d8] sm:$0xf0] }
 0x14d   : > { %1690 = vmatmul.bf16.gmra.mxu1 %v2911_v53 }
 0x14e   : > { %v3481_v60 = vpop.eup %3480  ;;  %v2317_v61 = vadd.f32 %v3818_v18, %v1987_v59  ;;  %1859 = vmatmul.bf16.gmra.mxu2 %v2915_v57 }
 0x14f   : > { %2028 = vmatmul.bf16.gmra.mxu3 %v2919_v58  ;;  %2444 = vst [vmem:[%s3833_s21 + $0x90] sm:$0xff] %v3481_v60 }
 0x150   : > { %3482 = vtanh.f32 %v2317_v61 }
 0x151   : > { %v1820_v63 = vpop.f32.mrf.mxu2  ;;  %v1484_v2 = vpop.f32.mrf.mxu0 }
 0x152   : > { %v1989_v0 = vpop.f32.mrf.mxu3  ;;  %v1821_v1 = vadd.f32 %v1820_v63, %v1652_v62  ;;  %v1653_v3 = vpop.f32.mrf.mxu1 }
 0x153   : > { %v1654_v15 = vadd.f32 %v1653_v3, %v1484_v2  ;;  %v2954_v2 = vld [vmem:[%s3723_s12 + $0x2a0] sm:$0xf]  ;;  %v3345_v3 = vld [vmem:[%s3723_s12 + $0x2ac] sm:$0xf0] }
 0x154   : > { %v1990_v4 = vadd.f32 %v1989_v0, %v1821_v1 }
 0x156   : > { %v3483_v8 = vpop.eup %3482  ;;  %v2318_v9 = vadd.f32 %v3818_v18, %v1990_v4  ;;  %v3343_v4 = vld [vmem:[%s3723_s12 + $0x2a4] sm:$0xf] }
 0x157   : > { %2445 = vst [vmem:[%s3833_s21 + $0x98] sm:$0xff] %v3483_v8  ;;  %v2962_v8 = vld [vmem:[%s3723_s12 + $0x2a8] sm:$0xf] }
 0x158   : > { %3484 = vtanh.f32 %v2318_v9  ;;  %v3346_v9 = vld [vmem:[%s3723_s12 + $0x2b4] sm:$0xf0] }
 0x159   : > { %v1822_v16 = vpop.f32.mrf.mxu2  ;;  %v1487_v22 = vpop.f32.mrf.mxu0 }
 0x15a   : > { %v1991_v17 = vpop.f32.mrf.mxu3  ;;  %v1823_v21 = vadd.f32 %v1822_v16, %v1654_v15  ;;  %v1656_v23 = vpop.f32.mrf.mxu1  ;;  %v2955_v15 = vor.u32 %v3345_v3, %v2954_v2  ;;  %v2959_v16 = vor.u32 %v3343_v4, %v2956_v7  ;;  %v2988_v4 = vld [vmem:[%s3723_s12 + $0x2f0] sm:$0xf0]  ;;  %v3352_v7 = vld [vmem:[%s3723_s12 + $0x2ec] sm:$0xf] }
 0x15b   : > { %v1657_v29 = vadd.f32 %v1656_v23, %v1487_v22  ;;  %v2967_v22 = vor.u32 %v3344_v10, %v2964_v11 }
 0x15c   : > { %v1992_v26 = vadd.f32 %v1991_v17, %v1823_v21  ;;  %1526 = vmatmul.bf16.gmra.mxu0 %v2923_v19  ;;  %v2963_v21 = vor.u32 %v3346_v9, %v2962_v8  ;;  %v2996_v8 = vld [vmem:[%s3723_s12 + $0x2f8] sm:$0xf0] }
 0x15d   : > { %1695 = vmatmul.bf16.gmra.mxu1 %v2927_v20 }
 0x15e   : > { %v3485_v27 = vpop.eup %3484  ;;  %v2319_v28 = vadd.f32 %v3818_v18, %v1992_v26  ;;  %1864 = vmatmul.bf16.gmra.mxu2 %v2931_v24 }
 0x15f   : > { %2033 = vmatmul.bf16.gmra.mxu3 %v2935_v25  ;;  %2446 = vst [vmem:[%s3833_s21 + $0xa0] sm:$0xff] %v3485_v27 }
 0x160   : > { %3486 = vtanh.f32 %v2319_v28 }
 0x161   : > { %v1825_v30 = vpop.f32.mrf.mxu2  ;;  %v1489_v33 = vpop.f32.mrf.mxu0 }
 0x162   : > { %v1994_v31 = vpop.f32.mrf.mxu3  ;;  %v1826_v32 = vadd.f32 %v1825_v30, %v1657_v29  ;;  %v1658_v34 = vpop.f32.mrf.mxu1 }
 0x163   : > { %v1659_v46 = vadd.f32 %v1658_v34, %v1489_v33  ;;  %v2970_v33 = vld [vmem:[%s3723_s12 + $0x2c0] sm:$0xf]  ;;  %v3349_v34 = vld [vmem:[%s3723_s12 + $0x2cc] sm:$0xf0] }
 0x164   : > { %v1995_v35 = vadd.f32 %v1994_v31, %v1826_v32 }
 0x166   : > { %v3487_v39 = vpop.eup %3486  ;;  %v2320_v40 = vadd.f32 %v3818_v18, %v1995_v35  ;;  %v3347_v35 = vld [vmem:[%s3723_s12 + $0x2c4] sm:$0xf] }
 0x167   : > { %2447 = vst [vmem:[%s3833_s21 + $0xa8] sm:$0xff] %v3487_v39  ;;  %v2978_v39 = vld [vmem:[%s3723_s12 + $0x2c8] sm:$0xf] }
 0x168   : > { %3488 = vtanh.f32 %v2320_v40  ;;  %v3350_v40 = vld [vmem:[%s3723_s12 + $0x2d4] sm:$0xf0] }
 0x169   : > { %v1827_v47 = vpop.f32.mrf.mxu2  ;;  %v1492_v52 = vpop.f32.mrf.mxu0 }
 0x16a   : > { %v1996_v48 = vpop.f32.mrf.mxu3  ;;  %v1828_v51 = vadd.f32 %v1827_v47, %v1659_v46  ;;  %v1661_v53 = vpop.f32.mrf.mxu1  ;;  %v2971_v46 = vor.u32 %v3349_v34, %v2970_v33  ;;  %v2975_v47 = vor.u32 %v3347_v35, %v2972_v38  ;;  %v3004_v35 = vld [vmem:[%s3723_s12 + $0x310] sm:$0xf0]  ;;  %v3356_v38 = vld [vmem:[%s3723_s12 + $0x30c] sm:$0xf] }
 0x16b   : > { %v1662_v59 = vadd.f32 %v1661_v53, %v1492_v52  ;;  %v2983_v52 = vor.u32 %v3348_v41, %v2980_v42 }
 0x16c   : > { %v1997_v56 = vadd.f32 %v1996_v48, %v1828_v51  ;;  %1531 = vmatmul.bf16.gmra.mxu0 %v2939_v49  ;;  %v2979_v51 = vor.u32 %v3350_v40, %v2978_v39  ;;  %v3012_v39 = vld [vmem:[%s3723_s12 + $0x318] sm:$0xf0] }
 0x16d   : > { %1700 = vmatmul.bf16.gmra.mxu1 %v2943_v50 }
 0x16e   : > { %v3489_v57 = vpop.eup %3488  ;;  %v2321_v58 = vadd.f32 %v3818_v18, %v1997_v56  ;;  %1869 = vmatmul.bf16.gmra.mxu2 %v2947_v54  ;;  %v3994_v54 = vld [vmem:[%s4154_s2] ss:$0 sm:$0xff] }
 0x16f   : > { %2038 = vmatmul.bf16.gmra.mxu3 %v2951_v55  ;;  %2448 = vst [vmem:[%s3833_s21 + $0xb0] sm:$0xff] %v3489_v57 }
 0x170   : > { %3490 = vtanh.f32 %v2321_v58 }
 0x171   : > { %v1830_v60 = vpop.f32.mrf.mxu2  ;;  %v1494_v63 = vpop.f32.mrf.mxu0 }
 0x172   : > { %v1999_v61 = vpop.f32.mrf.mxu3  ;;  %v1831_v62 = vadd.f32 %v1830_v60, %v1662_v59  ;;  %v1663_v0 = vpop.f32.mrf.mxu1 }
 0x173   : > { %v1664_v12 = vadd.f32 %v1663_v0, %v1494_v63  ;;  %v2986_v63 = vld [vmem:[%s3723_s12 + $0x2e0] sm:$0xf]  ;;  %v3353_v0 = vld [vmem:[%s3723_s12 + $0x2ec] sm:$0xf0] }
 0x174   : > { %v2000_v1 = vadd.f32 %v1999_v61, %v1831_v62 }
 0x176   : > { %v3491_v5 = vpop.eup %3490  ;;  %v2322_v6 = vadd.f32 %v3818_v18, %v2000_v1  ;;  %v3351_v1 = vld [vmem:[%s3723_s12 + $0x2e4] sm:$0xf] }
 0x177   : > { %2449 = vst [vmem:[%s3833_s21 + $0xb8] sm:$0xff] %v3491_v5  ;;  %v2994_v5 = vld [vmem:[%s3723_s12 + $0x2e8] sm:$0xf] }
 0x178   : > { %3492 = vtanh.f32 %v2322_v6  ;;  %v3354_v6 = vld [vmem:[%s3723_s12 + $0x2f4] sm:$0xf0] }
 0x179   : > { %v1832_v13 = vpop.f32.mrf.mxu2  ;;  %v1497_v19 = vpop.f32.mrf.mxu0 }
 0x17a   : > { %v2001_v14 = vpop.f32.mrf.mxu3  ;;  %v1833_v17 = vadd.f32 %v1832_v13, %v1664_v12  ;;  %v1666_v20 = vpop.f32.mrf.mxu1  ;;  %v2987_v12 = vor.u32 %v3353_v0, %v2986_v63  ;;  %v2991_v13 = vor.u32 %v3351_v1, %v2988_v4  ;;  %v3020_v1 = vld [vmem:[%s3723_s12 + $0x330] sm:$0xf0]  ;;  %v3360_v4 = vld [vmem:[%s3723_s12 + $0x32c] sm:$0xf] }
 0x17b   : > { %v1667_v26 = vadd.f32 %v1666_v20, %v1497_v19  ;;  %v2999_v19 = vor.u32 %v3352_v7, %v2996_v8 }
 0x17c   : > { %v2002_v23 = vadd.f32 %v2001_v14, %v1833_v17  ;;  %1536 = vmatmul.bf16.gmra.mxu0 %v2955_v15  ;;  %v2995_v17 = vor.u32 %v3354_v6, %v2994_v5  ;;  %v3028_v5 = vld [vmem:[%s3723_s12 + $0x338] sm:$0xf0] }
 0x17d   : > { %1705 = vmatmul.bf16.gmra.mxu1 %v2959_v16 }
 0x17e   : > { %v3493_v24 = vpop.eup %3492  ;;  %v2323_v25 = vadd.f32 %v3818_v18, %v2002_v23  ;;  %1874 = vmatmul.bf16.gmra.mxu2 %v2963_v21 }
 0x17f   : > { %2043 = vmatmul.bf16.gmra.mxu3 %v2967_v22  ;;  %2450 = vst [vmem:[%s3833_s21 + $0xc0] sm:$0xff] %v3493_v24 }
 0x180   : > { %3494 = vtanh.f32 %v2323_v25 }
 0x181   : > { %v1835_v27 = vpop.f32.mrf.mxu2  ;;  %v1499_v30 = vpop.f32.mrf.mxu0 }
 0x182   : > { %v2004_v28 = vpop.f32.mrf.mxu3  ;;  %v1836_v29 = vadd.f32 %v1835_v27, %v1667_v26  ;;  %v1668_v31 = vpop.f32.mrf.mxu1 }
 0x183   : > { %v1669_v43 = vadd.f32 %v1668_v31, %v1499_v30  ;;  %v3002_v30 = vld [vmem:[%s3723_s12 + $0x300] sm:$0xf]  ;;  %v3357_v31 = vld [vmem:[%s3723_s12 + $0x30c] sm:$0xf0] }
 0x184   : > { %v2005_v32 = vadd.f32 %v2004_v28, %v1836_v29 }
 0x186   : > { %v3495_v36 = vpop.eup %3494  ;;  %v2324_v37 = vadd.f32 %v3818_v18, %v2005_v32  ;;  %v3355_v32 = vld [vmem:[%s3723_s12 + $0x304] sm:$0xf] }
 0x187   : > { %2451 = vst [vmem:[%s3833_s21 + $0xc8] sm:$0xff] %v3495_v36  ;;  %v3010_v36 = vld [vmem:[%s3723_s12 + $0x308] sm:$0xf] }
 0x188   : > { %3496 = vtanh.f32 %v2324_v37  ;;  %v3358_v37 = vld [vmem:[%s3723_s12 + $0x314] sm:$0xf0] }
 0x189   : > { %v1837_v44 = vpop.f32.mrf.mxu2  ;;  %v1502_v49 = vpop.f32.mrf.mxu0 }
 0x18a   : > { %v2006_v45 = vpop.f32.mrf.mxu3  ;;  %v1838_v48 = vadd.f32 %v1837_v44, %v1669_v43  ;;  %v1671_v50 = vpop.f32.mrf.mxu1  ;;  %v3003_v43 = vor.u32 %v3357_v31, %v3002_v30  ;;  %v3007_v44 = vor.u32 %v3355_v32, %v3004_v35  ;;  %v3036_v32 = vld [vmem:[%s3723_s12 + $0x350] sm:$0xf0]  ;;  %v3364_v35 = vld [vmem:[%s3723_s12 + $0x34c] sm:$0xf] }
 0x18b   : > { %v1672_v56 = vadd.f32 %v1671_v50, %v1502_v49  ;;  %v3015_v49 = vor.u32 %v3356_v38, %v3012_v39 }
 0x18c   : > { %v2007_v53 = vadd.f32 %v2006_v45, %v1838_v48  ;;  %1541 = vmatmul.bf16.gmra.mxu0 %v2971_v46  ;;  %v3011_v48 = vor.u32 %v3358_v37, %v3010_v36  ;;  %v3044_v36 = vld [vmem:[%s3723_s12 + $0x358] sm:$0xf0] }
 0x18d   : > { %1710 = vmatmul.bf16.gmra.mxu1 %v2975_v47 }
 0x18e   : > { %v3497_v18 = vpop.eup %3496  ;;  %v2325_v55 = vadd.f32 %v3994_v54, %v2007_v53  ;;  %1879 = vmatmul.bf16.gmra.mxu2 %v2979_v51 }
 0x18f   : > { %2048 = vmatmul.bf16.gmra.mxu3 %v2983_v52  ;;  %2452 = vst [vmem:[%s3833_s21 + $0xd0] sm:$0xff] %v3497_v18 }
 0x190   : > { %3498 = vtanh.f32 %v2325_v55 }
 0x191   : > { %v1840_v57 = vpop.f32.mrf.mxu2  ;;  %v1504_v60 = vpop.f32.mrf.mxu0 }
 0x192   : > { %v2009_v58 = vpop.f32.mrf.mxu3  ;;  %v1841_v59 = vadd.f32 %v1840_v57, %v1672_v56  ;;  %v1673_v61 = vpop.f32.mrf.mxu1 }
 0x193   : > { %v1674_v9 = vadd.f32 %v1673_v61, %v1504_v60  ;;  %v3018_v60 = vld [vmem:[%s3723_s12 + $0x320] sm:$0xf]  ;;  %v3361_v61 = vld [vmem:[%s3723_s12 + $0x32c] sm:$0xf0] }
 0x194   : > { %v2010_v62 = vadd.f32 %v2009_v58, %v1841_v59 }
 0x196   : > { %v3499_v2 = vpop.eup %3498  ;;  %v2326_v3 = vadd.f32 %v3994_v54, %v2010_v62  ;;  %v3359_v62 = vld [vmem:[%s3723_s12 + $0x324] sm:$0xf] }
 0x197   : > { %2453 = vst [vmem:[%s3833_s21 + $0xd8] sm:$0xff] %v3499_v2  ;;  %v3026_v2 = vld [vmem:[%s3723_s12 + $0x328] sm:$0xf] }
 0x198   : > { %3500 = vtanh.f32 %v2326_v3  ;;  %v3362_v3 = vld [vmem:[%s3723_s12 + $0x334] sm:$0xf0] }
 0x199   : > { %v1842_v10 = vpop.f32.mrf.mxu2  ;;  %v1507_v15 = vpop.f32.mrf.mxu0 }
 0x19a   : > { %v2011_v11 = vpop.f32.mrf.mxu3  ;;  %v1843_v14 = vadd.f32 %v1842_v10, %v1674_v9  ;;  %v1676_v16 = vpop.f32.mrf.mxu1  ;;  %v3019_v9 = vor.u32 %v3361_v61, %v3018_v60  ;;  %v3023_v10 = vor.u32 %v3359_v62, %v3020_v1  ;;  %v3052_v62 = vld [vmem:[%s3723_s12 + $0x370] sm:$0xf0]  ;;  %v3368_v1 = vld [vmem:[%s3723_s12 + $0x36c] sm:$0xf] }
 0x19b   : > { %v1677_v23 = vadd.f32 %v1676_v16, %v1507_v15  ;;  %v3031_v15 = vor.u32 %v3360_v4, %v3028_v5 }
 0x19c   : > { %v2012_v20 = vadd.f32 %v2011_v11, %v1843_v14  ;;  %1546 = vmatmul.bf16.gmra.mxu0 %v2987_v12  ;;  %v3027_v14 = vor.u32 %v3362_v3, %v3026_v2  ;;  %v3060_v2 = vld [vmem:[%s3723_s12 + $0x378] sm:$0xf0] }
 0x19d   : > { %1715 = vmatmul.bf16.gmra.mxu1 %v2991_v13 }
 0x19e   : > { %v3501_v21 = vpop.eup %3500  ;;  %v2327_v22 = vadd.f32 %v3994_v54, %v2012_v20  ;;  %1884 = vmatmul.bf16.gmra.mxu2 %v2995_v17 }
 0x19f   : > { %2053 = vmatmul.bf16.gmra.mxu3 %v2999_v19  ;;  %2454 = vst [vmem:[%s3833_s21 + $0xe0] sm:$0xff] %v3501_v21 }
 0x1a0   : > { %3502 = vtanh.f32 %v2327_v22 }
 0x1a1   : > { %v1845_v24 = vpop.f32.mrf.mxu2  ;;  %v1509_v27 = vpop.f32.mrf.mxu0 }
 0x1a2   : > { %v2014_v25 = vpop.f32.mrf.mxu3  ;;  %v1846_v26 = vadd.f32 %v1845_v24, %v1677_v23  ;;  %v1678_v28 = vpop.f32.mrf.mxu1 }
 0x1a3   : > { %v1679_v40 = vadd.f32 %v1678_v28, %v1509_v27  ;;  %v3034_v27 = vld [vmem:[%s3723_s12 + $0x340] sm:$0xf]  ;;  %v3365_v28 = vld [vmem:[%s3723_s12 + $0x34c] sm:$0xf0] }
 0x1a4   : > { %v2015_v29 = vadd.f32 %v2014_v25, %v1846_v26 }
 0x1a6   : > { %v3503_v33 = vpop.eup %3502  ;;  %v2328_v34 = vadd.f32 %v3994_v54, %v2015_v29  ;;  %v3363_v29 = vld [vmem:[%s3723_s12 + $0x344] sm:$0xf] }
 0x1a7   : > { %2455 = vst [vmem:[%s3833_s21 + $0xe8] sm:$0xff] %v3503_v33  ;;  %v3042_v33 = vld [vmem:[%s3723_s12 + $0x348] sm:$0xf] }
 0x1a8   : > { %3504 = vtanh.f32 %v2328_v34  ;;  %v3366_v34 = vld [vmem:[%s3723_s12 + $0x354] sm:$0xf0] }
 0x1a9   : > { %v1847_v41 = vpop.f32.mrf.mxu2  ;;  %v1512_v46 = vpop.f32.mrf.mxu0 }
 0x1aa   : > { %v2016_v42 = vpop.f32.mrf.mxu3  ;;  %v1848_v45 = vadd.f32 %v1847_v41, %v1679_v40  ;;  %v1681_v47 = vpop.f32.mrf.mxu1  ;;  %v3035_v40 = vor.u32 %v3365_v28, %v3034_v27  ;;  %v3039_v41 = vor.u32 %v3363_v29, %v3036_v32  ;;  %v3068_v29 = vld [vmem:[%s3723_s12 + $0x390] sm:$0xf0]  ;;  %v3372_v32 = vld [vmem:[%s3723_s12 + $0x38c] sm:$0xf] }
 0x1ab   : > { %v1682_v53 = vadd.f32 %v1681_v47, %v1512_v46  ;;  %v3047_v46 = vor.u32 %v3364_v35, %v3044_v36 }
 0x1ac   : > { %v2017_v50 = vadd.f32 %v2016_v42, %v1848_v45  ;;  %1551 = vmatmul.bf16.gmra.mxu0 %v3003_v43  ;;  %v3043_v45 = vor.u32 %v3366_v34, %v3042_v33  ;;  %v3076_v33 = vld [vmem:[%s3723_s12 + $0x398] sm:$0xf0] }
 0x1ad   : > { %1720 = vmatmul.bf16.gmra.mxu1 %v3007_v44 }
 0x1ae   : > { %v3505_v51 = vpop.eup %3504  ;;  %v2329_v52 = vadd.f32 %v3994_v54, %v2017_v50  ;;  %1889 = vmatmul.bf16.gmra.mxu2 %v3011_v48 }
 0x1af   : > { %2058 = vmatmul.bf16.gmra.mxu3 %v3015_v49  ;;  %2456 = vst [vmem:[%s3833_s21 + $0xf0] sm:$0xff] %v3505_v51 }
 0x1b0   : > { %3506 = vtanh.f32 %v2329_v52 }
 0x1b1   : > { %v1850_v18 = vpop.f32.mrf.mxu2  ;;  %v1514_v57 = vpop.f32.mrf.mxu0 }
 0x1b2   : > { %v2019_v55 = vpop.f32.mrf.mxu3  ;;  %v1851_v56 = vadd.f32 %v1850_v18, %v1682_v53  ;;  %v1683_v58 = vpop.f32.mrf.mxu1 }
 0x1b3   : > { %v1684_v6 = vadd.f32 %v1683_v58, %v1514_v57  ;;  %v3050_v57 = vld [vmem:[%s3723_s12 + $0x360] sm:$0xf]  ;;  %v3369_v58 = vld [vmem:[%s3723_s12 + $0x36c] sm:$0xf0] }
 0x1b4   : > { %v2020_v59 = vadd.f32 %v2019_v55, %v1851_v56 }
 0x1b6   : > { %v3507_v63 = vpop.eup %3506  ;;  %v2330_v0 = vadd.f32 %v3994_v54, %v2020_v59  ;;  %v3367_v59 = vld [vmem:[%s3723_s12 + $0x364] sm:$0xf] }
 0x1b7   : > { %2457 = vst [vmem:[%s3833_s21 + $0xf8] sm:$0xff] %v3507_v63  ;;  %v3058_v63 = vld [vmem:[%s3723_s12 + $0x368] sm:$0xf] }
 0x1b8   : > { %3508 = vtanh.f32 %v2330_v0  ;;  %v3370_v0 = vld [vmem:[%s3723_s12 + $0x374] sm:$0xf0] }
 0x1b9   : > { %v1852_v7 = vpop.f32.mrf.mxu2  ;;  %v1517_v12 = vpop.f32.mrf.mxu0 }
 0x1ba   : > { %v2021_v8 = vpop.f32.mrf.mxu3  ;;  %v1853_v11 = vadd.f32 %v1852_v7, %v1684_v6  ;;  %v1686_v13 = vpop.f32.mrf.mxu1  ;;  %v3051_v6 = vor.u32 %v3369_v58, %v3050_v57  ;;  %v3055_v7 = vor.u32 %v3367_v59, %v3052_v62  ;;  %v3084_v59 = vld [vmem:[%s3723_s12 + $0x3b0] sm:$0xf0]  ;;  %v3376_v62 = vld [vmem:[%s3723_s12 + $0x3ac] sm:$0xf] }
 0x1bb   : > { %v1687_v20 = vadd.f32 %v1686_v13, %v1517_v12  ;;  %v3063_v12 = vor.u32 %v3368_v1, %v3060_v2 }
 0x1bc   : > { %v2022_v16 = vadd.f32 %v2021_v8, %v1853_v11  ;;  %1556 = vmatmul.bf16.gmra.mxu0 %v3019_v9  ;;  %v3059_v11 = vor.u32 %v3370_v0, %v3058_v63  ;;  %v3092_v63 = vld [vmem:[%s3723_s12 + $0x3b8] sm:$0xf0] }
 0x1bd   : > { %1725 = vmatmul.bf16.gmra.mxu1 %v3023_v10 }
 0x1be   : > { %v3509_v17 = vpop.eup %3508  ;;  %v2331_v19 = vadd.f32 %v3994_v54, %v2022_v16  ;;  %1894 = vmatmul.bf16.gmra.mxu2 %v3027_v14 }
 0x1bf   : > { %2063 = vmatmul.bf16.gmra.mxu3 %v3031_v15  ;;  %2458 = vst [vmem:[%s3833_s21 + $0x100] sm:$0xff] %v3509_v17 }
 0x1c0   : > { %3510 = vtanh.f32 %v2331_v19 }
 0x1c1   : > { %v1855_v21 = vpop.f32.mrf.mxu2  ;;  %v1519_v24 = vpop.f32.mrf.mxu0 }
 0x1c2   : > { %v2024_v22 = vpop.f32.mrf.mxu3  ;;  %v1856_v23 = vadd.f32 %v1855_v21, %v1687_v20  ;;  %v1688_v25 = vpop.f32.mrf.mxu1 }
 0x1c3   : > { %v1689_v37 = vadd.f32 %v1688_v25, %v1519_v24  ;;  %v3066_v24 = vld [vmem:[%s3723_s12 + $0x380] sm:$0xf]  ;;  %v3373_v25 = vld [vmem:[%s3723_s12 + $0x38c] sm:$0xf0] }
 0x1c4   : > { %v2025_v26 = vadd.f32 %v2024_v22, %v1856_v23 }
 0x1c6   : > { %v3511_v30 = vpop.eup %3510  ;;  %v2332_v31 = vadd.f32 %v3994_v54, %v2025_v26  ;;  %v3371_v26 = vld [vmem:[%s3723_s12 + $0x384] sm:$0xf] }
 0x1c7   : > { %2459 = vst [vmem:[%s3833_s21 + $0x108] sm:$0xff] %v3511_v30  ;;  %v3074_v30 = vld [vmem:[%s3723_s12 + $0x388] sm:$0xf] }
 0x1c8   : > { %3512 = vtanh.f32 %v2332_v31  ;;  %v3374_v31 = vld [vmem:[%s3723_s12 + $0x394] sm:$0xf0] }
 0x1c9   : > { %v1857_v38 = vpop.f32.mrf.mxu2  ;;  %v1522_v43 = vpop.f32.mrf.mxu0 }
 0x1ca   : > { %v2026_v39 = vpop.f32.mrf.mxu3  ;;  %v1858_v42 = vadd.f32 %v1857_v38, %v1689_v37  ;;  %v1691_v44 = vpop.f32.mrf.mxu1  ;;  %v3067_v37 = vor.u32 %v3373_v25, %v3066_v24  ;;  %v3071_v38 = vor.u32 %v3371_v26, %v3068_v29  ;;  %v3100_v26 = vld [vmem:[%s3723_s12 + $0x3d0] sm:$0xf0]  ;;  %v3380_v29 = vld [vmem:[%s3723_s12 + $0x3cc] sm:$0xf] }
 0x1cb   : > { %v1692_v50 = vadd.f32 %v1691_v44, %v1522_v43  ;;  %v3079_v43 = vor.u32 %v3372_v32, %v3076_v33 }
 0x1cc   : > { %v2027_v47 = vadd.f32 %v2026_v39, %v1858_v42  ;;  %1561 = vmatmul.bf16.gmra.mxu0 %v3035_v40  ;;  %v3075_v42 = vor.u32 %v3374_v31, %v3074_v30  ;;  %v3108_v30 = vld [vmem:[%s3723_s12 + $0x3d8] sm:$0xf0] }
 0x1cd   : > { %1730 = vmatmul.bf16.gmra.mxu1 %v3039_v41 }
 0x1ce   : > { %v3513_v48 = vpop.eup %3512  ;;  %v2333_v49 = vadd.f32 %v3994_v54, %v2027_v47  ;;  %1899 = vmatmul.bf16.gmra.mxu2 %v3043_v45 }
 0x1cf   : > { %2068 = vmatmul.bf16.gmra.mxu3 %v3047_v46  ;;  %2460 = vst [vmem:[%s3833_s21 + $0x110] sm:$0xff] %v3513_v48 }
 0x1d0   : > { %3514 = vtanh.f32 %v2333_v49 }
 0x1d1   : > { %v1860_v51 = vpop.f32.mrf.mxu2  ;;  %v1524_v18 = vpop.f32.mrf.mxu0 }
 0x1d2   : > { %v2029_v52 = vpop.f32.mrf.mxu3  ;;  %v1861_v53 = vadd.f32 %v1860_v51, %v1692_v50  ;;  %v1693_v55 = vpop.f32.mrf.mxu1 }
 0x1d3   : > { %v1694_v3 = vadd.f32 %v1693_v55, %v1524_v18  ;;  %v3082_v18 = vld [vmem:[%s3723_s12 + $0x3a0] sm:$0xf]  ;;  %v3377_v55 = vld [vmem:[%s3723_s12 + $0x3ac] sm:$0xf0] }
 0x1d4   : > { %v2030_v56 = vadd.f32 %v2029_v52, %v1861_v53 }
 0x1d6   : > { %v3515_v60 = vpop.eup %3514  ;;  %v2334_v61 = vadd.f32 %v3994_v54, %v2030_v56  ;;  %v3375_v56 = vld [vmem:[%s3723_s12 + $0x3a4] sm:$0xf] }
 0x1d7   : > { %2461 = vst [vmem:[%s3833_s21 + $0x118] sm:$0xff] %v3515_v60  ;;  %v3090_v60 = vld [vmem:[%s3723_s12 + $0x3a8] sm:$0xf] }
 0x1d8   : > { %3516 = vtanh.f32 %v2334_v61  ;;  %v3378_v61 = vld [vmem:[%s3723_s12 + $0x3b4] sm:$0xf0] }
 0x1d9   : > { %v1862_v4 = vpop.f32.mrf.mxu2  ;;  %v1527_v9 = vpop.f32.mrf.mxu0 }
 0x1da   : > { %v2031_v5 = vpop.f32.mrf.mxu3  ;;  %v1863_v8 = vadd.f32 %v1862_v4, %v1694_v3  ;;  %v1696_v10 = vpop.f32.mrf.mxu1  ;;  %v3083_v3 = vor.u32 %v3377_v55, %v3082_v18  ;;  %v3087_v4 = vor.u32 %v3375_v56, %v3084_v59  ;;  %v3116_v56 = vld [vmem:[%s3723_s12 + $0x3f0] sm:$0xf0]  ;;  %v3384_v59 = vld [vmem:[%s3723_s12 + $0x3ec] sm:$0xf] }
 0x1db   : > { %v1697_v16 = vadd.f32 %v1696_v10, %v1527_v9  ;;  %v3095_v9 = vor.u32 %v3376_v62, %v3092_v63 }
 0x1dc   : > { %v2032_v13 = vadd.f32 %v2031_v5, %v1863_v8  ;;  %1566 = vmatmul.bf16.gmra.mxu0 %v3051_v6  ;;  %v3091_v8 = vor.u32 %v3378_v61, %v3090_v60  ;;  %v3124_v60 = vld [vmem:[%s3723_s12 + $0x3f8] sm:$0xf0] }
 0x1dd   : > { %1735 = vmatmul.bf16.gmra.mxu1 %v3055_v7 }
 0x1de   : > { %v3517_v14 = vpop.eup %3516  ;;  %v2335_v15 = vadd.f32 %v3994_v54, %v2032_v13  ;;  %1904 = vmatmul.bf16.gmra.mxu2 %v3059_v11 }
 0x1df   : > { %2073 = vmatmul.bf16.gmra.mxu3 %v3063_v12  ;;  %2462 = vst [vmem:[%s3833_s21 + $0x120] sm:$0xff] %v3517_v14 }
 0x1e0   : > { %3518 = vtanh.f32 %v2335_v15 }
 0x1e1   : > { %v1865_v17 = vpop.f32.mrf.mxu2  ;;  %v1529_v21 = vpop.f32.mrf.mxu0 }
 0x1e2   : > { %v2034_v19 = vpop.f32.mrf.mxu3  ;;  %v1866_v20 = vadd.f32 %v1865_v17, %v1697_v16  ;;  %v1698_v22 = vpop.f32.mrf.mxu1 }
 0x1e3   : > { %v1699_v34 = vadd.f32 %v1698_v22, %v1529_v21  ;;  %v3098_v21 = vld [vmem:[%s3723_s12 + $0x3c0] sm:$0xf]  ;;  %v3381_v22 = vld [vmem:[%s3723_s12 + $0x3cc] sm:$0xf0] }
 0x1e4   : > { %v2035_v23 = vadd.f32 %v2034_v19, %v1866_v20 }
 0x1e6   : > { %v3519_v27 = vpop.eup %3518  ;;  %v2336_v28 = vadd.f32 %v3994_v54, %v2035_v23  ;;  %v3379_v23 = vld [vmem:[%s3723_s12 + $0x3c4] sm:$0xf] }
 0x1e7   : > { %2463 = vst [vmem:[%s3833_s21 + $0x128] sm:$0xff] %v3519_v27  ;;  %v3106_v27 = vld [vmem:[%s3723_s12 + $0x3c8] sm:$0xf] }
 0x1e8   : > { %3520 = vtanh.f32 %v2336_v28  ;;  %v3382_v28 = vld [vmem:[%s3723_s12 + $0x3d4] sm:$0xf0] }
 0x1e9   : > { %v1867_v35 = vpop.f32.mrf.mxu2  ;;  %v1532_v40 = vpop.f32.mrf.mxu0 }
 0x1ea   : > { %v2036_v36 = vpop.f32.mrf.mxu3  ;;  %v1868_v39 = vadd.f32 %v1867_v35, %v1699_v34  ;;  %v1701_v41 = vpop.f32.mrf.mxu1  ;;  %v3099_v34 = vor.u32 %v3381_v22, %v3098_v21  ;;  %v3103_v35 = vor.u32 %v3379_v23, %v3100_v26 }
 0x1eb   : > { %v1702_v47 = vadd.f32 %v1701_v41, %v1532_v40  ;;  %v3111_v40 = vor.u32 %v3380_v29, %v3108_v30 }
 0x1ec   : > { %v2037_v44 = vadd.f32 %v2036_v36, %v1868_v39  ;;  %1571 = vmatmul.bf16.gmra.mxu0 %v3067_v37  ;;  %v3107_v39 = vor.u32 %v3382_v28, %v3106_v27 }
 0x1ed   : > { %1740 = vmatmul.bf16.gmra.mxu1 %v3071_v38 }
 0x1ee   : > { %v3521_v45 = vpop.eup %3520  ;;  %v2337_v46 = vadd.f32 %v3994_v54, %v2037_v44  ;;  %1909 = vmatmul.bf16.gmra.mxu2 %v3075_v42 }
 0x1ef   : > { %2078 = vmatmul.bf16.gmra.mxu3 %v3079_v43  ;;  %2464 = vst [vmem:[%s3833_s21 + $0x130] sm:$0xff] %v3521_v45 }
 0x1f0   : > { %3522 = vtanh.f32 %v2337_v46 }
 0x1f1   : > { %v1870_v48 = vpop.f32.mrf.mxu2  ;;  %v1534_v51 = vpop.f32.mrf.mxu0 }
 0x1f2   : > { %v2039_v49 = vpop.f32.mrf.mxu3  ;;  %v1871_v50 = vadd.f32 %v1870_v48, %v1702_v47  ;;  %v1703_v52 = vpop.f32.mrf.mxu1 }
 0x1f3   : > { %v1704_v0 = vadd.f32 %v1703_v52, %v1534_v51  ;;  %v3114_v51 = vld [vmem:[%s3723_s12 + $0x3e0] sm:$0xf]  ;;  %v3385_v52 = vld [vmem:[%s3723_s12 + $0x3ec] sm:$0xf0] }
 0x1f4   : > { %v2040_v53 = vadd.f32 %v2039_v49, %v1871_v50 }
 0x1f6   : > { %v3523_v57 = vpop.eup %3522  ;;  %v2338_v58 = vadd.f32 %v3994_v54, %v2040_v53  ;;  %v3383_v53 = vld [vmem:[%s3723_s12 + $0x3e4] sm:$0xf] }
 0x1f7   : > { %2465 = vst [vmem:[%s3833_s21 + $0x138] sm:$0xff] %v3523_v57  ;;  %v3122_v57 = vld [vmem:[%s3723_s12 + $0x3e8] sm:$0xf] }
 0x1f8   : > { %3524 = vtanh.f32 %v2338_v58  ;;  %v3386_v58 = vld [vmem:[%s3723_s12 + $0x3f4] sm:$0xf0] }
 0x1f9   : > { %v1872_v1 = vpop.f32.mrf.mxu2  ;;  %v1537_v6 = vpop.f32.mrf.mxu0 }
 0x1fa   : > { %v2041_v2 = vpop.f32.mrf.mxu3  ;;  %v1873_v5 = vadd.f32 %v1872_v1, %v1704_v0  ;;  %v1706_v7 = vpop.f32.mrf.mxu1  ;;  %v3115_v0 = vor.u32 %v3385_v52, %v3114_v51  ;;  %v3119_v1 = vor.u32 %v3383_v53, %v3116_v56 }
 0x1fb   : > { %v1707_v13 = vadd.f32 %v1706_v7, %v1537_v6  ;;  %v3127_v6 = vor.u32 %v3384_v59, %v3124_v60 }
 0x1fc   : > { %v2042_v10 = vadd.f32 %v2041_v2, %v1873_v5  ;;  %1576 = vmatmul.bf16.gmra.mxu0 %v3083_v3  ;;  %v3123_v5 = vor.u32 %v3386_v58, %v3122_v57 }
 0x1fd   : > { %1745 = vmatmul.bf16.gmra.mxu1 %v3087_v4 }
 0x1fe   : > { %v3525_v11 = vpop.eup %3524  ;;  %v2339_v12 = vadd.f32 %v3994_v54, %v2042_v10  ;;  %1914 = vmatmul.bf16.gmra.mxu2 %v3091_v8 }
 0x1ff   : > { %2083 = vmatmul.bf16.gmra.mxu3 %v3095_v9  ;;  %2466 = vst [vmem:[%s3833_s21 + $0x140] sm:$0xff] %v3525_v11 }
 0x200   : > { %3526 = vtanh.f32 %v2339_v12 }
 0x201   : > { %v1875_v14 = vpop.f32.mrf.mxu2  ;;  %v1539_v17 = vpop.f32.mrf.mxu0 }
 0x202   : > { %v2044_v15 = vpop.f32.mrf.mxu3  ;;  %v1876_v16 = vadd.f32 %v1875_v14, %v1707_v13  ;;  %v1708_v19 = vpop.f32.mrf.mxu1 }
 0x203   : > { %v1709_v31 = vadd.f32 %v1708_v19, %v1539_v17 }
 0x204   : > { %v2045_v20 = vadd.f32 %v2044_v15, %v1876_v16 }
 0x206   : > { %v3527_v24 = vpop.eup %3526  ;;  %v2340_v25 = vadd.f32 %v3994_v54, %v2045_v20 }
 0x207   : > { %2467 = vst [vmem:[%s3833_s21 + $0x148] sm:$0xff] %v3527_v24 }
 0x208   : > { %3528 = vtanh.f32 %v2340_v25 }
 0x209   : > { %v1877_v32 = vpop.f32.mrf.mxu2  ;;  %v1542_v37 = vpop.f32.mrf.mxu0 }
 0x20a   : > { %v2046_v33 = vpop.f32.mrf.mxu3  ;;  %v1878_v36 = vadd.f32 %v1877_v32, %v1709_v31  ;;  %v1711_v38 = vpop.f32.mrf.mxu1 }
 0x20b   : > { %v1712_v44 = vadd.f32 %v1711_v38, %v1542_v37 }
 0x20c   : > { %v2047_v41 = vadd.f32 %v2046_v33, %v1878_v36  ;;  %1581 = vmatmul.bf16.gmra.mxu0 %v3099_v34 }
 0x20d   : > { %1750 = vmatmul.bf16.gmra.mxu1 %v3103_v35 }
 0x20e   : > { %v3529_v42 = vpop.eup %3528  ;;  %v2341_v43 = vadd.f32 %v3994_v54, %v2047_v41  ;;  %1919 = vmatmul.bf16.gmra.mxu2 %v3107_v39 }
 0x20f   : > { %2088 = vmatmul.bf16.gmra.mxu3 %v3111_v40  ;;  %2468 = vst [vmem:[%s3833_s21 + $0x150] sm:$0xff] %v3529_v42 }
 0x210   : > { %3530 = vtanh.f32 %v2341_v43 }
 0x211   : > { %v1880_v45 = vpop.f32.mrf.mxu2  ;;  %v1544_v48 = vpop.f32.mrf.mxu0 }
 0x212   : > { %v2049_v46 = vpop.f32.mrf.mxu3  ;;  %v1881_v47 = vadd.f32 %v1880_v45, %v1712_v44  ;;  %v1713_v49 = vpop.f32.mrf.mxu1 }
 0x213   : > { %v1714_v61 = vadd.f32 %v1713_v49, %v1544_v48 }
 0x214   : > { %v2050_v50 = vadd.f32 %v2049_v46, %v1881_v47 }
 0x216   : > { %v3531_v18 = vpop.eup %3530  ;;  %v2342_v55 = vadd.f32 %v3994_v54, %v2050_v50 }
 0x217   : > { %2469 = vst [vmem:[%s3833_s21 + $0x158] sm:$0xff] %v3531_v18 }
 0x218   : > { %3532 = vtanh.f32 %v2342_v55 }
 0x219   : > { %v1882_v62 = vpop.f32.mrf.mxu2  ;;  %v1547_v3 = vpop.f32.mrf.mxu0 }
 0x21a   : > { %v2051_v63 = vpop.f32.mrf.mxu3  ;;  %v1883_v2 = vadd.f32 %v1882_v62, %v1714_v61  ;;  %v1716_v4 = vpop.f32.mrf.mxu1 }
 0x21b   : > { %v1717_v10 = vadd.f32 %v1716_v4, %v1547_v3 }
 0x21c   : > { %v2052_v7 = vadd.f32 %v2051_v63, %v1883_v2  ;;  %1586 = vmatmul.bf16.gmra.mxu0 %v3115_v0 }
 0x21d   : > { %1755 = vmatmul.bf16.gmra.mxu1 %v3119_v1 }
 0x21e   : > { %v3533_v8 = vpop.eup %3532  ;;  %v2343_v9 = vadd.f32 %v3994_v54, %v2052_v7  ;;  %1924 = vmatmul.bf16.gmra.mxu2 %v3123_v5 }
 0x21f   : > { %2093 = vmatmul.bf16.gmra.mxu3 %v3127_v6  ;;  %2470 = vst [vmem:[%s3833_s21 + $0x160] sm:$0xff] %v3533_v8 }
 0x220   : > { %3534 = vtanh.f32 %v2343_v9 }
 0x221   : > { %v1885_v11 = vpop.f32.mrf.mxu2  ;;  %v1549_v14 = vpop.f32.mrf.mxu0 }
 0x222   : > { %v2054_v12 = vpop.f32.mrf.mxu3  ;;  %v1886_v13 = vadd.f32 %v1885_v11, %v1717_v10  ;;  %v1718_v15 = vpop.f32.mrf.mxu1 }
 0x223   : > { %v1719_v20 = vadd.f32 %v1718_v15, %v1549_v14 }
 0x224   : > { %v2055_v16 = vadd.f32 %v2054_v12, %v1886_v13 }
 0x226   : > { %v3535_v17 = vpop.eup %3534  ;;  %v2344_v19 = vadd.f32 %v3994_v54, %v2055_v16 }
 0x227   : > { %2471 = vst [vmem:[%s3833_s21 + $0x168] sm:$0xff] %v3535_v17 }
 0x228   : > { %3536 = vtanh.f32 %v2344_v19 }
 0x229   : > { %v1887_v21 = vpop.f32.mrf.mxu2  ;;  %v1552_v24 = vpop.f32.mrf.mxu0 }
 0x22a   : > { %v2056_v22 = vpop.f32.mrf.mxu3  ;;  %v1888_v23 = vadd.f32 %v1887_v21, %v1719_v20  ;;  %v1721_v25 = vpop.f32.mrf.mxu1 }
 0x22b   : > { %v1722_v29 = vadd.f32 %v1721_v25, %v1552_v24 }
 0x22c   : > { %v2057_v26 = vadd.f32 %v2056_v22, %v1888_v23 }
 0x22e   : > { %v3537_v27 = vpop.eup %3536  ;;  %v2345_v28 = vadd.f32 %v3994_v54, %v2057_v26 }
 0x22f   : > { %2472 = vst [vmem:[%s3833_s21 + $0x170] sm:$0xff] %v3537_v27 }
 0x230   : > { %3538 = vtanh.f32 %v2345_v28 }
 0x231   : > { %v1890_v30 = vpop.f32.mrf.mxu2  ;;  %v1554_v33 = vpop.f32.mrf.mxu0 }
 0x232   : > { %v2059_v31 = vpop.f32.mrf.mxu3  ;;  %v1891_v32 = vadd.f32 %v1890_v30, %v1722_v29  ;;  %v1723_v34 = vpop.f32.mrf.mxu1 }
 0x233   : > { %v1724_v38 = vadd.f32 %v1723_v34, %v1554_v33 }
 0x234   : > { %v2060_v35 = vadd.f32 %v2059_v31, %v1891_v32 }
 0x236   : > { %v3539_v36 = vpop.eup %3538  ;;  %v2346_v37 = vadd.f32 %v3994_v54, %v2060_v35 }
 0x237   : > { %2473 = vst [vmem:[%s3833_s21 + $0x178] sm:$0xff] %v3539_v36 }
 0x238   : > { %3540 = vtanh.f32 %v2346_v37 }
 0x239   : > { %v1892_v39 = vpop.f32.mrf.mxu2  ;;  %v1557_v42 = vpop.f32.mrf.mxu0 }
 0x23a   : > { %v2061_v40 = vpop.f32.mrf.mxu3  ;;  %v1893_v41 = vadd.f32 %v1892_v39, %v1724_v38  ;;  %v1726_v43 = vpop.f32.mrf.mxu1 }
 0x23b   : > { %v1727_v47 = vadd.f32 %v1726_v43, %v1557_v42 }
 0x23c   : > { %v2062_v44 = vadd.f32 %v2061_v40, %v1893_v41 }
 0x23e   : > { %v3541_v45 = vpop.eup %3540  ;;  %v2347_v46 = vadd.f32 %v3994_v54, %v2062_v44 }
 0x23f   : > { %2474 = vst [vmem:[%s3833_s21 + $0x180] sm:$0xff] %v3541_v45 }
 0x240   : > { %3542 = vtanh.f32 %v2347_v46 }
 0x241   : > { %v1895_v48 = vpop.f32.mrf.mxu2  ;;  %v1559_v51 = vpop.f32.mrf.mxu0 }
 0x242   : > { %v2064_v49 = vpop.f32.mrf.mxu3  ;;  %v1896_v50 = vadd.f32 %v1895_v48, %v1727_v47  ;;  %v1728_v52 = vpop.f32.mrf.mxu1 }
 0x243   : > { %v1729_v56 = vadd.f32 %v1728_v52, %v1559_v51 }
 0x244   : > { %v2065_v53 = vadd.f32 %v2064_v49, %v1896_v50 }
 0x246   : > { %v3543_v18 = vpop.eup %3542  ;;  %v2348_v55 = vadd.f32 %v3994_v54, %v2065_v53 }
 0x247   : > { %2475 = vst [vmem:[%s3833_s21 + $0x188] sm:$0xff] %v3543_v18 }
 0x248   : > { %3544 = vtanh.f32 %v2348_v55 }
 0x249   : > { %v1897_v57 = vpop.f32.mrf.mxu2  ;;  %v1562_v60 = vpop.f32.mrf.mxu0 }
 0x24a   : > { %v2066_v58 = vpop.f32.mrf.mxu3  ;;  %v1898_v59 = vadd.f32 %v1897_v57, %v1729_v56  ;;  %v1731_v61 = vpop.f32.mrf.mxu1 }
 0x24b   : > { %v1732_v1 = vadd.f32 %v1731_v61, %v1562_v60 }
 0x24c   : > { %v2067_v62 = vadd.f32 %v2066_v58, %v1898_v59 }
 0x24e   : > { %v3545_v63 = vpop.eup %3544  ;;  %v2349_v0 = vadd.f32 %v3994_v54, %v2067_v62 }
 0x24f   : > { %2476 = vst [vmem:[%s3833_s21 + $0x190] sm:$0xff] %v3545_v63 }
 0x250   : > { %3546 = vtanh.f32 %v2349_v0 }
 0x251   : > { %v1900_v2 = vpop.f32.mrf.mxu2  ;;  %v1564_v5 = vpop.f32.mrf.mxu0 }
 0x252   : > { %v2069_v3 = vpop.f32.mrf.mxu3  ;;  %v1901_v4 = vadd.f32 %v1900_v2, %v1732_v1  ;;  %v1733_v6 = vpop.f32.mrf.mxu1 }
 0x253   : > { %v1734_v10 = vadd.f32 %v1733_v6, %v1564_v5 }
 0x254   : > { %v2070_v7 = vadd.f32 %v2069_v3, %v1901_v4 }
 0x256   : > { %v3547_v8 = vpop.eup %3546  ;;  %v2350_v9 = vadd.f32 %v3994_v54, %v2070_v7 }
 0x257   : > { %2477 = vst [vmem:[%s3833_s21 + $0x198] sm:$0xff] %v3547_v8 }
 0x258   : > { %3548 = vtanh.f32 %v2350_v9 }
 0x259   : > { %v1902_v11 = vpop.f32.mrf.mxu2  ;;  %v1567_v14 = vpop.f32.mrf.mxu0 }
 0x25a   : > { %v2071_v12 = vpop.f32.mrf.mxu3  ;;  %v1903_v13 = vadd.f32 %v1902_v11, %v1734_v10  ;;  %v1736_v15 = vpop.f32.mrf.mxu1 }
 0x25b   : > { %v1737_v20 = vadd.f32 %v1736_v15, %v1567_v14 }
 0x25c   : > { %v2072_v16 = vadd.f32 %v2071_v12, %v1903_v13 }
 0x25e   : > { %v3549_v17 = vpop.eup %3548  ;;  %v2351_v19 = vadd.f32 %v3994_v54, %v2072_v16 }
 0x25f   : > { %2478 = vst [vmem:[%s3833_s21 + $0x1a0] sm:$0xff] %v3549_v17 }
 0x260   : > { %3550 = vtanh.f32 %v2351_v19 }
 0x261   : > { %v1905_v21 = vpop.f32.mrf.mxu2  ;;  %v1569_v24 = vpop.f32.mrf.mxu0 }
 0x262   : > { %v2074_v22 = vpop.f32.mrf.mxu3  ;;  %v1906_v23 = vadd.f32 %v1905_v21, %v1737_v20  ;;  %v1738_v25 = vpop.f32.mrf.mxu1 }
 0x263   : > { %v1739_v29 = vadd.f32 %v1738_v25, %v1569_v24 }
 0x264   : > { %v2075_v26 = vadd.f32 %v2074_v22, %v1906_v23 }
 0x266   : > { %v3551_v27 = vpop.eup %3550  ;;  %v2352_v28 = vadd.f32 %v3994_v54, %v2075_v26 }
 0x267   : > { %2479 = vst [vmem:[%s3833_s21 + $0x1a8] sm:$0xff] %v3551_v27 }
 0x268   : > { %3552 = vtanh.f32 %v2352_v28  ;;  %v3573_v28 = vld [vmem:[%s4154_s2] ss:$0 sm:$0xff] }
 0x269   : > { %v1907_v30 = vpop.f32.mrf.mxu2  ;;  %v1572_v33 = vpop.f32.mrf.mxu0 }
 0x26a   : > { %v2076_v31 = vpop.f32.mrf.mxu3  ;;  %v1908_v32 = vadd.f32 %v1907_v30, %v1739_v29  ;;  %v1741_v34 = vpop.f32.mrf.mxu1 }
 0x26b   : > { %v1742_v38 = vadd.f32 %v1741_v34, %v1572_v33 }
 0x26c   : > { %v2077_v35 = vadd.f32 %v2076_v31, %v1908_v32 }
 0x26e   : > { %v3553_v36 = vpop.eup %3552  ;;  %v2353_v37 = vadd.f32 %v3994_v54, %v2077_v35 }
 0x26f   : > { %2480 = vst [vmem:[%s3833_s21 + $0x1b0] sm:$0xff] %v3553_v36 }
 0x270   : > { %3554 = vtanh.f32 %v2353_v37 }
 0x271   : > { %v1910_v39 = vpop.f32.mrf.mxu2  ;;  %v1574_v42 = vpop.f32.mrf.mxu0 }
 0x272   : > { %v2079_v40 = vpop.f32.mrf.mxu3  ;;  %v1911_v41 = vadd.f32 %v1910_v39, %v1742_v38  ;;  %v1743_v43 = vpop.f32.mrf.mxu1 }
 0x273   : > { %v1744_v47 = vadd.f32 %v1743_v43, %v1574_v42 }
 0x274   : > { %v2080_v44 = vadd.f32 %v2079_v40, %v1911_v41 }
 0x276   : > { %v3555_v45 = vpop.eup %3554  ;;  %v2354_v46 = vadd.f32 %v3994_v54, %v2080_v44 }
 0x277   : > { %2481 = vst [vmem:[%s3833_s21 + $0x1b8] sm:$0xff] %v3555_v45 }
 0x278   : > { %3556 = vtanh.f32 %v2354_v46 }
 0x279   : > { %v1912_v48 = vpop.f32.mrf.mxu2  ;;  %v1577_v51 = vpop.f32.mrf.mxu0 }
 0x27a   : > { %v2081_v49 = vpop.f32.mrf.mxu3  ;;  %v1913_v50 = vadd.f32 %v1912_v48, %v1744_v47  ;;  %v1746_v52 = vpop.f32.mrf.mxu1 }
 0x27b   : > { %v1747_v56 = vadd.f32 %v1746_v52, %v1577_v51 }
 0x27c   : > { %v2082_v53 = vadd.f32 %v2081_v49, %v1913_v50 }
 0x27e   : > { %v3557_v18 = vpop.eup %3556  ;;  %v2355_v55 = vadd.f32 %v3994_v54, %v2082_v53 }
 0x27f   : > { %2482 = vst [vmem:[%s3833_s21 + $0x1c0] sm:$0xff] %v3557_v18 }
 0x280   : > { %3558 = vtanh.f32 %v2355_v55 }
 0x281   : > { %v1915_v57 = vpop.f32.mrf.mxu2  ;;  %v1579_v60 = vpop.f32.mrf.mxu0 }
 0x282   : > { %v2084_v58 = vpop.f32.mrf.mxu3  ;;  %v1916_v59 = vadd.f32 %v1915_v57, %v1747_v56  ;;  %v1748_v61 = vpop.f32.mrf.mxu1 }
 0x283   : > { %v1749_v1 = vadd.f32 %v1748_v61, %v1579_v60 }
 0x284   : > { %v2085_v62 = vadd.f32 %v2084_v58, %v1916_v59 }
 0x286   : > { %v3559_v63 = vpop.eup %3558  ;;  %v2356_v0 = vadd.f32 %v3994_v54, %v2085_v62 }
 0x287   : > { %2483 = vst [vmem:[%s3833_s21 + $0x1c8] sm:$0xff] %v3559_v63 }
 0x288   : > { %3560 = vtanh.f32 %v2356_v0 }
 0x289   : > { %v1917_v2 = vpop.f32.mrf.mxu2  ;;  %v1582_v5 = vpop.f32.mrf.mxu0 }
 0x28a   : > { %v2086_v3 = vpop.f32.mrf.mxu3  ;;  %v1918_v4 = vadd.f32 %v1917_v2, %v1749_v1  ;;  %v1751_v6 = vpop.f32.mrf.mxu1 }
 0x28b   : > { %v1752_v10 = vadd.f32 %v1751_v6, %v1582_v5 }
 0x28c   : > { %v2087_v7 = vadd.f32 %v2086_v3, %v1918_v4 }
 0x28e   : > { %v3561_v8 = vpop.eup %3560  ;;  %v2357_v9 = vadd.f32 %v3994_v54, %v2087_v7 }
 0x28f   : > { %2484 = vst [vmem:[%s3833_s21 + $0x1d0] sm:$0xff] %v3561_v8 }
 0x290   : > { %3562 = vtanh.f32 %v2357_v9 }
 0x291   : > { %v1920_v11 = vpop.f32.mrf.mxu2  ;;  %v1584_v14 = vpop.f32.mrf.mxu0 }
 0x292   : > { %v2089_v12 = vpop.f32.mrf.mxu3  ;;  %v1921_v13 = vadd.f32 %v1920_v11, %v1752_v10  ;;  %v1753_v15 = vpop.f32.mrf.mxu1 }
 0x293   : > { %v1754_v20 = vadd.f32 %v1753_v15, %v1584_v14 }
 0x294   : > { %v2090_v16 = vadd.f32 %v2089_v12, %v1921_v13 }
 0x296   : > { %v3563_v17 = vpop.eup %3562  ;;  %v2358_v19 = vadd.f32 %v3994_v54, %v2090_v16 }
 0x297   : > { %2485 = vst [vmem:[%s3833_s21 + $0x1d8] sm:$0xff] %v3563_v17 }
 0x298   : > { %3564 = vtanh.f32 %v2358_v19 }
 0x299   : > { %v1922_v21 = vpop.f32.mrf.mxu2  ;;  %v1587_v24 = vpop.f32.mrf.mxu0 }
 0x29a   : > { %v2091_v22 = vpop.f32.mrf.mxu3  ;;  %v1923_v23 = vadd.f32 %v1922_v21, %v1754_v20  ;;  %v1756_v25 = vpop.f32.mrf.mxu1 }
 0x29b   : > { %v1757_v30 = vadd.f32 %v1756_v25, %v1587_v24 }
 0x29c   : > { %v2092_v26 = vadd.f32 %v2091_v22, %v1923_v23 }
 0x29e   : > { %v3565_v27 = vpop.eup %3564  ;;  %v2359_v29 = vadd.f32 %v3573_v28, %v2092_v26 }
 0x29f   : > { %2486 = vst [vmem:[%s3833_s21 + $0x1e0] sm:$0xff] %v3565_v27 }
 0x2a0   : > { %3566 = vtanh.f32 %v2359_v29 }
 0x2a1   : > { %v1925_v54 = vpop.f32.mrf.mxu2  ;;  %v1589_v34 = vpop.f32.mrf.mxu0 }
 0x2a2   : > { %v2094_v31 = vpop.f32.mrf.mxu3  ;;  %v1926_v32 = vadd.f32 %v1925_v54, %v1757_v30  ;;  %v1758_v35 = vpop.f32.mrf.mxu1 }
 0x2a3   : > { %v1759_v38 = vadd.f32 %v1758_v35, %v1589_v34 }
 0x2a4   : > { %v2095_v33 = vadd.f32 %v2094_v31, %v1926_v32 }
 0x2a6   : > { %v3567_v36 = vpop.eup %3566  ;;  %v2360_v37 = vadd.f32 %v3573_v28, %v2095_v33 }
 0x2a7   : > { %2487 = vst [vmem:[%s3833_s21 + $0x1e8] sm:$0xff] %v3567_v36 }
 0x2a8   : > { %3568 = vtanh.f32 %v2360_v37 }
 0x2a9   : > { %v1927_v39 = vpop.f32.mrf.mxu2 }
 0x2aa   : > { %v1928_v40 = vadd.f32 %v1927_v39, %v1759_v38  ;;  %v2096_v41 = vpop.f32.mrf.mxu3 }
 0x2ac   : > { %v2097_v42 = vadd.f32 %v2096_v41, %v1928_v40 }
 0x2ae   : > { %v3569_v43 = vpop.eup %3568  ;;  %v2361_v44 = vadd.f32 %v3573_v28, %v2097_v42 }
 0x2af   : > { %2488 = vst [vmem:[%s3833_s21 + $0x1f0] sm:$0xff] %v3569_v43 }
 0x2b0   : > { %3570 = vtanh.f32 %v2361_v44 }
 0x2b6   : > { %v3571_v45 = vpop.eup %3570 }
 0x2b7   : > { %2489 = vst [vmem:[%s3833_s21 + $0x1f8] sm:$0xff] %v3571_v45 }
 0x2b8 PF: > { %s13_s14 = sadd.s32 1, %s3596_s14   ;;  %s4156_s12 = smov %s3592_s13 }
 0x2b9   : > { %p10_p5 = scmp.ge.s32.totalorder %s13_s14, 6   ;;  %s4157_s13 = smov %s4159_s15 }
 0x2bb   :  { %12 = sbr.rel (!%p10_p5) target bundleno = 2 (0x2), region = 76 }

</bundles_post_ra>
